<compile_context>
chip_gen: v6e
topology: v6e:2x2x1
jax: 0.10.0
libtpu: 0.0.40
codegen_flags: <defaults>
</compile_context>

<pallas_src>
import jax
import jax.numpy as jnp
from jax import lax
from jax.experimental import pallas as pl
from jax.experimental.pallas import tpu as pltpu

EPS = 1e-5


def _shift_h(t, dy):
    """s[:, h] = t[:, h + dy - 1], zero outside. Leading-dim concat (cheap)."""
    if dy == 1:
        return t
    zrow = jnp.zeros_like(t[:, :1])
    if dy == 0:
        return jnp.concatenate([zrow, t[:, :-1]], axis=1)
    return jnp.concatenate([t[:, 1:], zrow], axis=1)


def _shift_w(t, dx):
    """s[:, :, w] = t[:, :, w + dx - 1], zero outside (sublane-axis concat)."""
    if dx == 1:
        return t
    zcol = jnp.zeros_like(t[:, :, :1])
    if dx == 0:
        return jnp.concatenate([zcol, t[:, :, :-1]], axis=2)
    return jnp.concatenate([t[:, :, 1:], zcol], axis=2)


def basic_block_kernel(x_ref, w1_ref, w2_ref, g1_ref, b1_ref, g2_ref, b2_ref,
                       o_ref):
    # x_ref : (N, H, W, C) f32 unpadded input (also the residual identity)
    # w*_ref: (9*C, C)     bf16 conv weights, row order = (dy, dx, cin)
    # g*/b* : (1, C)       f32 BN affine params
    # o_ref : (N*H*W, C)   f32 output
    N, H, W, C = x_ref.shape
    M = N * H * W
    inv_m = 1.0 / M

    x = x_ref[...]  # f32

    def conv3x3(t4d, w_ref_):
        # im2col: columns ordered (dy, dx, cin); zero padding comes from the
        # zero rows/cols injected by the shift helpers (no padded scratch).
        wcat = jnp.concatenate(
            [_shift_w(t4d, 0), t4d, _shift_w(t4d, 2)], axis=3)          # (N,H,W,3C)
        col = jnp.concatenate(
            [_shift_h(wcat, 0), wcat, _shift_h(wcat, 2)], axis=3)       # (N,H,W,9C)
        col = col.reshape(M, 9 * C).astype(jnp.bfloat16)
        # Single MXU matmul per conv, K = 9*C, f32 accumulation.
        return jnp.dot(col, w_ref_[...], preferred_element_type=jnp.float32)

    def bn_train(acc, g_ref_, b_ref_):
        # One-pass batch statistics (sum & sum-of-squares), f32.
        mean = jnp.sum(acc, axis=0, keepdims=True) * inv_m
        ex2 = jnp.sum(acc * acc, axis=0, keepdims=True) * inv_m
        var = jnp.maximum(ex2 - mean * mean, 0.0)
        scale = g_ref_[...] * lax.rsqrt(var + EPS)
        shift = b_ref_[...] - mean * scale
        return acc * scale + shift

    # conv1 -> bn1 -> relu
    acc1 = conv3x3(x, w1_ref)
    out1 = jnp.maximum(bn_train(acc1, g1_ref, b1_ref), 0.0)

    # conv2 -> bn2
    acc2 = conv3x3(out1.reshape(N, H, W, C), w2_ref)
    out2 = bn_train(acc2, g2_ref, b2_ref)

    # residual add + relu (identity read straight from the unpadded input)
    identity = x.reshape(M, C)
    o_ref[...] = jnp.maximum(out2 + identity, 0.0)


@jax.jit
def basic_block_forward(x_nchw, w1, w2, g1, b1, g2, b2):
    """x_nchw: (N, C, H, W) f32 ; w1, w2: (C, C, 3, 3) PyTorch OIHW layout."""
    N, C, H, W = x_nchw.shape

    # NCHW -> NHWC (no spatial padding in the wrapper).
    x_nhwc = jnp.transpose(x_nchw, (0, 2, 3, 1)).astype(jnp.float32)

    def prep_w(w):
        # (Cout, Cin, kh, kw) -> (kh*kw*Cin, Cout), row index = dy*3C + dx*C + cin.
        return jnp.transpose(w, (2, 3, 1, 0)).reshape(9 * C, C).astype(jnp.bfloat16)

    w1p, w2p = prep_w(w1), prep_w(w2)
    g1r = g1.reshape(1, C).astype(jnp.float32)
    b1r = b1.reshape(1, C).astype(jnp.float32)
    g2r = g2.reshape(1, C).astype(jnp.float32)
    b2r = b2.reshape(1, C).astype(jnp.float32)

    full = lambda shape: pl.BlockSpec(shape, lambda i: (0,) * len(shape))

    out2d = pl.pallas_call(
        basic_block_kernel,
        out_shape=jax.ShapeDtypeStruct((N * H * W, C), jnp.float32),
        grid=(1,),
        in_specs=[
            full((N, H, W, C)),                  # input / residual
            full((9 * C, C)), full((9 * C, C)),  # conv1 / conv2 weights (bf16)
            full((1, C)), full((1, C)),          # bn1 gamma, beta
            full((1, C)), full((1, C)),          # bn2 gamma, beta
        ],
        out_specs=full((N * H * W, C)),
        compiler_params=pltpu.CompilerParams(
            dimension_semantics=("arbitrary",),
            # Resident I/O ~3 MiB, in-kernel im2col temporaries ~10 MiB peak;
            # 32 MiB is ample headroom and valid on v5e/v6e/v7x.
            vmem_limit_bytes=32 * 1024 * 1024,
        ),
    )(x_nhwc, w1p, w2p, g1r, b1r, g2r, b2r)

    # (N*H*W, C) -> NHWC -> NCHW
    return jnp.transpose(out2d.reshape(N, H, W, C), (0, 3, 1, 2))


def reference_forward(x_nchw, w1, w2, g1, b1, g2, b2):
    """Pure-JAX (f32) reference mirroring the PyTorch BasicBlock forward."""
    def conv3x3(x, w):
        return lax.conv_general_dilated(
            x, w, window_strides=(1, 1), padding=((1, 1), (1, 1)),
            dimension_numbers=("NCHW", "OIHW", "NCHW"))

    def bn_train(x, g, b):
        mean = jnp.mean(x, axis=(0, 2, 3), keepdims=True)
        var = jnp.mean((x - mean) ** 2, axis=(0, 2, 3), keepdims=True)
        xn = (x - mean) * lax.rsqrt(var + EPS)
        return xn * g.reshape(1, -1, 1, 1) + b.reshape(1, -1, 1, 1)

    out = jnp.maximum(bn_train(conv3x3(x_nchw, w1), g1, b1), 0.0)
    out = bn_train(conv3x3(out, w2), g2, b2)
    return jnp.maximum(out + x_nchw, 0.0)


if __name__ == "__main__":
    key = jax.random.PRNGKey(0)
    # inplanes == planes == 128, stride=1, downsample=None.  C=128 keeps every
    # activation / store lane-dense (last dim a multiple of 128) per review.
    N, C, H, W = 2, 128, 16, 16

    k_x, k_w1, k_w2, k_g1, k_b1, k_g2, k_b2 = jax.random.split(key, 7)
    x = jax.random.normal(k_x, (N, C, H, W), dtype=jnp.float32)
    scale = 1.0 / jnp.sqrt(9.0 * C)
    w1 = jax.random.normal(k_w1, (C, C, 3, 3), dtype=jnp.float32) * scale
    w2 = jax.random.normal(k_w2, (C, C, 3, 3), dtype=jnp.float32) * scale
    g1 = 1.0 + 0.1 * jax.random.normal(k_g1, (C,), dtype=jnp.float32)
    b1 = 0.1 * jax.random.normal(k_b1, (C,), dtype=jnp.float32)
    g2 = 1.0 + 0.1 * jax.random.normal(k_g2, (C,), dtype=jnp.float32)
    b2 = 0.1 * jax.random.normal(k_b2, (C,), dtype=jnp.float32)

    out = jax.block_until_ready(basic_block_forward(x, w1, w2, g1, b1, g2, b2))
    ref = reference_forward(x, w1, w2, g1, b1, g2, b2)

    assert out.shape == (N, C, H, W)
    err = float(jnp.max(jnp.abs(out - ref)))
    # bf16 MXU operands (f32 accumulation) -> loosened tolerance per review.
    assert err < 5e-2, f"mismatch vs reference: max abs err = {err}"

    print("KERNEL_OK")
</pallas_src>

<mosaic_0001>
module attributes {stable_mosaic.version = 11 : i64} {
  func.func @basic_block_kernel(%arg0: i32, %arg1: memref<2x16x16x128xf32, #tpu.memory_space<vmem>>, %arg2: memref<1152x128xbf16, #tpu.memory_space<vmem>>, %arg3: memref<1152x128xbf16, #tpu.memory_space<vmem>>, %arg4: memref<1x128xf32, #tpu.memory_space<vmem>>, %arg5: memref<1x128xf32, #tpu.memory_space<vmem>>, %arg6: memref<1x128xf32, #tpu.memory_space<vmem>>, %arg7: memref<1x128xf32, #tpu.memory_space<vmem>>, %arg8: memref<512x128xf32, #tpu.memory_space<vmem>>) attributes {dimension_semantics = [#tpu.dimension_semantics<arbitrary>], iteration_bounds = array<i64: 1>, scalar_prefetch = 0 : i64, scratch_operands = 0 : i64, tpu.core_type = #tpu.core_type<tc>, window_params = [{pipeline_mode = #tpu.pipeline_mode<synchronous>, transform_indices = @transform_0, window_bounds = array<i64: 2, 16, 16, 128>}, {pipeline_mode = #tpu.pipeline_mode<synchronous>, transform_indices = @transform_1, window_bounds = array<i64: 1152, 128>}, {pipeline_mode = #tpu.pipeline_mode<synchronous>, transform_indices = @transform_2, window_bounds = array<i64: 1152, 128>}, {pipeline_mode = #tpu.pipeline_mode<synchronous>, transform_indices = @transform_3, window_bounds = array<i64: 1, 128>}, {pipeline_mode = #tpu.pipeline_mode<synchronous>, transform_indices = @transform_4, window_bounds = array<i64: 1, 128>}, {pipeline_mode = #tpu.pipeline_mode<synchronous>, transform_indices = @transform_5, window_bounds = array<i64: 1, 128>}, {pipeline_mode = #tpu.pipeline_mode<synchronous>, transform_indices = @transform_6, window_bounds = array<i64: 1, 128>}, {pipeline_mode = #tpu.pipeline_mode<synchronous>, transform_indices = @transform_7, window_bounds = array<i64: 512, 128>}]} {
    %c0 = arith.constant 0 : index
    %c0_0 = arith.constant 0 : index
    %c0_1 = arith.constant 0 : index
    %c0_2 = arith.constant 0 : index
    %0 = vector.load %arg1[%c0, %c0_0, %c0_1, %c0_2] : memref<2x16x16x128xf32, #tpu.memory_space<vmem>>, vector<2x16x16x128xf32>
    %cst = arith.constant 0.000000e+00 : f32
    %1 = vector.broadcast %cst : f32 to vector<2x16x1x128xf32>
    %2 = vector.extract_strided_slice %0 {offsets = [0, 0, 0, 0], sizes = [2, 16, 15, 128], strides = [1, 1, 1, 1]} : vector<2x16x16x128xf32> to vector<2x16x15x128xf32>
    %3 = tpu.concatenate %1, %2 in 2 : vector<2x16x1x128xf32>, vector<2x16x15x128xf32> -> vector<2x16x16x128xf32>
    %cst_3 = arith.constant 0.000000e+00 : f32
    %4 = vector.broadcast %cst_3 : f32 to vector<2x16x1x128xf32>
    %5 = vector.extract_strided_slice %0 {offsets = [0, 0, 1, 0], sizes = [2, 16, 15, 128], strides = [1, 1, 1, 1]} : vector<2x16x16x128xf32> to vector<2x16x15x128xf32>
    %6 = tpu.concatenate %5, %4 in 2 : vector<2x16x15x128xf32>, vector<2x16x1x128xf32> -> vector<2x16x16x128xf32>
    %7 = tpu.concatenate %3, %0, %6 in 3 : vector<2x16x16x128xf32>, vector<2x16x16x128xf32>, vector<2x16x16x128xf32> -> vector<2x16x16x384xf32>
    %cst_4 = arith.constant 0.000000e+00 : f32
    %8 = vector.broadcast %cst_4 : f32 to vector<2x1x16x384xf32>
    %9 = vector.extract_strided_slice %7 {offsets = [0, 0, 0, 0], sizes = [2, 15, 16, 384], strides = [1, 1, 1, 1]} : vector<2x16x16x384xf32> to vector<2x15x16x384xf32>
    %10 = tpu.concatenate %8, %9 in 1 : vector<2x1x16x384xf32>, vector<2x15x16x384xf32> -> vector<2x16x16x384xf32>
    %cst_5 = arith.constant 0.000000e+00 : f32
    %11 = vector.broadcast %cst_5 : f32 to vector<2x1x16x384xf32>
    %12 = vector.extract_strided_slice %7 {offsets = [0, 1, 0, 0], sizes = [2, 15, 16, 384], strides = [1, 1, 1, 1]} : vector<2x16x16x384xf32> to vector<2x15x16x384xf32>
    %13 = tpu.concatenate %12, %11 in 1 : vector<2x15x16x384xf32>, vector<2x1x16x384xf32> -> vector<2x16x16x384xf32>
    %14 = tpu.concatenate %10, %7, %13 in 3 : vector<2x16x16x384xf32>, vector<2x16x16x384xf32>, vector<2x16x16x384xf32> -> vector<2x16x16x1152xf32>
    %15 = vector.shape_cast %14 : vector<2x16x16x1152xf32> to vector<512x1152xf32>
    %16 = arith.truncf %15 : vector<512x1152xf32> to vector<512x1152xbf16>
    %c0_6 = arith.constant 0 : index
    %c0_7 = arith.constant 0 : index
    %17 = vector.load %arg2[%c0_6, %c0_7] : memref<1152x128xbf16, #tpu.memory_space<vmem>>, vector<1152x128xbf16>
    %cst_8 = arith.constant dense<0.000000e+00> : vector<512x128xf32>
    %18 = tpu.matmul %16, %17, %cst_8 {dimension_numbers = #tpu.dot_dimension_numbers<[1], [0], [0], [1], [0, 0, 1, 1], [], []>} : vector<512x1152xbf16>, vector<1152x128xbf16>, vector<512x128xf32> -> vector<512x128xf32>
    %cst_9 = arith.constant dense<0.000000e+00> : vector<128xf32>
    %19 = vector.multi_reduction <add>, %18, %cst_9 [0] : vector<512x128xf32> to vector<128xf32>
    %20 = vector.shape_cast %19 : vector<128xf32> to vector<1x128xf32>
    %cst_10 = arith.constant 0.001953125 : f32
    %21 = vector.broadcast %cst_10 : f32 to vector<1x128xf32>
    %22 = arith.mulf %20, %21 : vector<1x128xf32>
    %23 = arith.mulf %18, %18 : vector<512x128xf32>
    %cst_11 = arith.constant dense<0.000000e+00> : vector<128xf32>
    %24 = vector.multi_reduction <add>, %23, %cst_11 [0] : vector<512x128xf32> to vector<128xf32>
    %25 = vector.shape_cast %24 : vector<128xf32> to vector<1x128xf32>
    %cst_12 = arith.constant 0.001953125 : f32
    %26 = vector.broadcast %cst_12 : f32 to vector<1x128xf32>
    %27 = arith.mulf %25, %26 : vector<1x128xf32>
    %28 = arith.mulf %22, %22 : vector<1x128xf32>
    %29 = arith.subf %27, %28 : vector<1x128xf32>
    %cst_13 = arith.constant 0.000000e+00 : f32
    %30 = vector.broadcast %cst_13 : f32 to vector<1x128xf32>
    %31 = arith.maximumf %29, %30 : vector<1x128xf32>
    %c0_14 = arith.constant 0 : index
    %c0_15 = arith.constant 0 : index
    %32 = vector.load %arg4[%c0_14, %c0_15] : memref<1x128xf32, #tpu.memory_space<vmem>>, vector<1x128xf32>
    %cst_16 = arith.constant 9.99999974E-6 : f32
    %33 = vector.broadcast %cst_16 : f32 to vector<1x128xf32>
    %34 = arith.addf %31, %33 : vector<1x128xf32>
    %35 = math.rsqrt %34 : vector<1x128xf32>
    %36 = arith.mulf %32, %35 : vector<1x128xf32>
    %c0_17 = arith.constant 0 : index
    %c0_18 = arith.constant 0 : index
    %37 = vector.load %arg5[%c0_17, %c0_18] : memref<1x128xf32, #tpu.memory_space<vmem>>, vector<1x128xf32>
    %38 = arith.mulf %22, %36 : vector<1x128xf32>
    %39 = arith.subf %37, %38 : vector<1x128xf32>
    %40 = vector.broadcast %36 : vector<1x128xf32> to vector<512x128xf32>
    %41 = arith.mulf %18, %40 : vector<512x128xf32>
    %42 = vector.broadcast %39 : vector<1x128xf32> to vector<512x128xf32>
    %43 = arith.addf %41, %42 : vector<512x128xf32>
    %cst_19 = arith.constant 0.000000e+00 : f32
    %44 = vector.broadcast %cst_19 : f32 to vector<512x128xf32>
    %45 = arith.maximumf %43, %44 : vector<512x128xf32>
    %46 = vector.shape_cast %45 : vector<512x128xf32> to vector<2x16x16x128xf32>
    %cst_20 = arith.constant 0.000000e+00 : f32
    %47 = vector.broadcast %cst_20 : f32 to vector<2x16x1x128xf32>
    %48 = vector.extract_strided_slice %46 {offsets = [0, 0, 0, 0], sizes = [2, 16, 15, 128], strides = [1, 1, 1, 1]} : vector<2x16x16x128xf32> to vector<2x16x15x128xf32>
    %49 = tpu.concatenate %47, %48 in 2 : vector<2x16x1x128xf32>, vector<2x16x15x128xf32> -> vector<2x16x16x128xf32>
    %cst_21 = arith.constant 0.000000e+00 : f32
    %50 = vector.broadcast %cst_21 : f32 to vector<2x16x1x128xf32>
    %51 = vector.extract_strided_slice %46 {offsets = [0, 0, 1, 0], sizes = [2, 16, 15, 128], strides = [1, 1, 1, 1]} : vector<2x16x16x128xf32> to vector<2x16x15x128xf32>
    %52 = tpu.concatenate %51, %50 in 2 : vector<2x16x15x128xf32>, vector<2x16x1x128xf32> -> vector<2x16x16x128xf32>
    %53 = tpu.concatenate %49, %46, %52 in 3 : vector<2x16x16x128xf32>, vector<2x16x16x128xf32>, vector<2x16x16x128xf32> -> vector<2x16x16x384xf32>
    %cst_22 = arith.constant 0.000000e+00 : f32
    %54 = vector.broadcast %cst_22 : f32 to vector<2x1x16x384xf32>
    %55 = vector.extract_strided_slice %53 {offsets = [0, 0, 0, 0], sizes = [2, 15, 16, 384], strides = [1, 1, 1, 1]} : vector<2x16x16x384xf32> to vector<2x15x16x384xf32>
    %56 = tpu.concatenate %54, %55 in 1 : vector<2x1x16x384xf32>, vector<2x15x16x384xf32> -> vector<2x16x16x384xf32>
    %cst_23 = arith.constant 0.000000e+00 : f32
    %57 = vector.broadcast %cst_23 : f32 to vector<2x1x16x384xf32>
    %58 = vector.extract_strided_slice %53 {offsets = [0, 1, 0, 0], sizes = [2, 15, 16, 384], strides = [1, 1, 1, 1]} : vector<2x16x16x384xf32> to vector<2x15x16x384xf32>
    %59 = tpu.concatenate %58, %57 in 1 : vector<2x15x16x384xf32>, vector<2x1x16x384xf32> -> vector<2x16x16x384xf32>
    %60 = tpu.concatenate %56, %53, %59 in 3 : vector<2x16x16x384xf32>, vector<2x16x16x384xf32>, vector<2x16x16x384xf32> -> vector<2x16x16x1152xf32>
    %61 = vector.shape_cast %60 : vector<2x16x16x1152xf32> to vector<512x1152xf32>
    %62 = arith.truncf %61 : vector<512x1152xf32> to vector<512x1152xbf16>
    %c0_24 = arith.constant 0 : index
    %c0_25 = arith.constant 0 : index
    %63 = vector.load %arg3[%c0_24, %c0_25] : memref<1152x128xbf16, #tpu.memory_space<vmem>>, vector<1152x128xbf16>
    %cst_26 = arith.constant dense<0.000000e+00> : vector<512x128xf32>
    %64 = tpu.matmul %62, %63, %cst_26 {dimension_numbers = #tpu.dot_dimension_numbers<[1], [0], [0], [1], [0, 0, 1, 1], [], []>} : vector<512x1152xbf16>, vector<1152x128xbf16>, vector<512x128xf32> -> vector<512x128xf32>
    %cst_27 = arith.constant dense<0.000000e+00> : vector<128xf32>
    %65 = vector.multi_reduction <add>, %64, %cst_27 [0] : vector<512x128xf32> to vector<128xf32>
    %66 = vector.shape_cast %65 : vector<128xf32> to vector<1x128xf32>
    %cst_28 = arith.constant 0.001953125 : f32
    %67 = vector.broadcast %cst_28 : f32 to vector<1x128xf32>
    %68 = arith.mulf %66, %67 : vector<1x128xf32>
    %69 = arith.mulf %64, %64 : vector<512x128xf32>
    %cst_29 = arith.constant dense<0.000000e+00> : vector<128xf32>
    %70 = vector.multi_reduction <add>, %69, %cst_29 [0] : vector<512x128xf32> to vector<128xf32>
    %71 = vector.shape_cast %70 : vector<128xf32> to vector<1x128xf32>
    %cst_30 = arith.constant 0.001953125 : f32
    %72 = vector.broadcast %cst_30 : f32 to vector<1x128xf32>
    %73 = arith.mulf %71, %72 : vector<1x128xf32>
    %74 = arith.mulf %68, %68 : vector<1x128xf32>
    %75 = arith.subf %73, %74 : vector<1x128xf32>
    %cst_31 = arith.constant 0.000000e+00 : f32
    %76 = vector.broadcast %cst_31 : f32 to vector<1x128xf32>
    %77 = arith.maximumf %75, %76 : vector<1x128xf32>
    %c0_32 = arith.constant 0 : index
    %c0_33 = arith.constant 0 : index
    %78 = vector.load %arg6[%c0_32, %c0_33] : memref<1x128xf32, #tpu.memory_space<vmem>>, vector<1x128xf32>
    %cst_34 = arith.constant 9.99999974E-6 : f32
    %79 = vector.broadcast %cst_34 : f32 to vector<1x128xf32>
    %80 = arith.addf %77, %79 : vector<1x128xf32>
    %81 = math.rsqrt %80 : vector<1x128xf32>
    %82 = arith.mulf %78, %81 : vector<1x128xf32>
    %c0_35 = arith.constant 0 : index
    %c0_36 = arith.constant 0 : index
    %83 = vector.load %arg7[%c0_35, %c0_36] : memref<1x128xf32, #tpu.memory_space<vmem>>, vector<1x128xf32>
    %84 = arith.mulf %68, %82 : vector<1x128xf32>
    %85 = arith.subf %83, %84 : vector<1x128xf32>
    %86 = vector.broadcast %82 : vector<1x128xf32> to vector<512x128xf32>
    %87 = arith.mulf %64, %86 : vector<512x128xf32>
    %88 = vector.broadcast %85 : vector<1x128xf32> to vector<512x128xf32>
    %89 = arith.addf %87, %88 : vector<512x128xf32>
    %90 = vector.shape_cast %0 : vector<2x16x16x128xf32> to vector<512x128xf32>
    %91 = arith.addf %89, %90 : vector<512x128xf32>
    %cst_37 = arith.constant 0.000000e+00 : f32
    %92 = vector.broadcast %cst_37 : f32 to vector<512x128xf32>
    %93 = arith.maximumf %91, %92 : vector<512x128xf32>
    %c0_38 = arith.constant 0 : index
    %c0_39 = arith.constant 0 : index
    %94 = vector.load %arg8[%c0_38, %c0_39] : memref<512x128xf32, #tpu.memory_space<vmem>>, vector<512x128xf32>
    tpu.vector_store %arg8[%c0_38, %c0_39], %93 {strides = array<i32>} : memref<512x128xf32, #tpu.memory_space<vmem>>, vector<512x128xf32>,
    return
  }
  func.func @transform_0(%arg0: i32) -> (i32, i32, i32, i32) {
    %c0_i32 = arith.constant 0 : i32
    %c0_i32_0 = arith.constant 0 : i32
    %c0_i32_1 = arith.constant 0 : i32
    %c0_i32_2 = arith.constant 0 : i32
    %c0_i32_3 = arith.constant 0 : i32
    return %c0_i32, %c0_i32_0, %c0_i32_1, %c0_i32_2 : i32, i32, i32, i32
  }
  func.func @transform_1(%arg0: i32) -> (i32, i32) {
    %c0_i32 = arith.constant 0 : i32
    %c0_i32_0 = arith.constant 0 : i32
    %c0_i32_1 = arith.constant 0 : i32
    return %c0_i32, %c0_i32_0 : i32, i32
  }
  func.func @transform_2(%arg0: i32) -> (i32, i32) {
    %c0_i32 = arith.constant 0 : i32
    %c0_i32_0 = arith.constant 0 : i32
    %c0_i32_1 = arith.constant 0 : i32
    return %c0_i32, %c0_i32_0 : i32, i32
  }
  func.func @transform_3(%arg0: i32) -> (i32, i32) {
    %c0_i32 = arith.constant 0 : i32
    %c0_i32_0 = arith.constant 0 : i32
    %c0_i32_1 = arith.constant 0 : i32
    return %c0_i32, %c0_i32_0 : i32, i32
  }
  func.func @transform_4(%arg0: i32) -> (i32, i32) {
    %c0_i32 = arith.constant 0 : i32
    %c0_i32_0 = arith.constant 0 : i32
    %c0_i32_1 = arith.constant 0 : i32
    return %c0_i32, %c0_i32_0 : i32, i32
  }
  func.func @transform_5(%arg0: i32) -> (i32, i32) {
    %c0_i32 = arith.constant 0 : i32
    %c0_i32_0 = arith.constant 0 : i32
    %c0_i32_1 = arith.constant 0 : i32
    return %c0_i32, %c0_i32_0 : i32, i32
  }
  func.func @transform_6(%arg0: i32) -> (i32, i32) {
    %c0_i32 = arith.constant 0 : i32
    %c0_i32_0 = arith.constant 0 : i32
    %c0_i32_1 = arith.constant 0 : i32
    return %c0_i32, %c0_i32_0 : i32, i32
  }
  func.func @transform_7(%arg0: i32) -> (i32, i32) {
    %c0_i32 = arith.constant 0 : i32
    %c0_i32_0 = arith.constant 0 : i32
    %c0_i32_1 = arith.constant 0 : i32
    return %c0_i32, %c0_i32_0 : i32, i32
  }
}

</mosaic_0001>

<bundles_post_ra>
// kernel: basic_block_forward.1
= control target key start
LH: loop header
LB: loop body
LE: loop exit
PB: predicated region body
PF: predicated region fallthrough
CT: control target
= control target key end

     0   :  { %v14172_v1 = vmov 0   ;;  %v14165_v4 = vmov 0.0|0.0   ;;  %vm156_vm0 = vcmask 1040384   ;;  %vm8121_vm2 = vmmov 1   ;;  %s14157_s0 = inlined_call_operand.vmem [shape: f32[2,16,16,128], index: 0, kind: input, shape index: {}]   ;;  %s14158_s1 = inlined_call_operand.vmem [shape: bf16[1152,128], index: 1, kind: input, shape index: {}]   ;;  %s14159_s2 = inlined_call_operand.vmem [shape: bf16[1152,128], index: 2, kind: input, shape index: {}]   ;;  %s14160_s3 = inlined_call_operand.vmem [shape: f32[1,128], index: 3, kind: input, shape index: {}]   ;;  %s14161_s4 = inlined_call_operand.vmem [shape: f32[1,128], index: 4, kind: input, shape index: {}]   ;;  %s14162_s5 = inlined_call_operand.vmem [shape: f32[1,128], index: 5, kind: input, shape index: {}]   ;;  %s14163_s6 = inlined_call_operand.vmem [shape: f32[1,128], index: 6, kind: input, shape index: {}]   ;;  %s14164_s7 = inlined_call_operand.hbm [shape: f32[512,128], index: 7, kind: output, shape index: {}]  }
   0x1   :  { %v7883_v0 = vld [vmem:[%s14158_s1 + $0x38] sm:$0xff]   ;;  %1215 = vmatprep.subr.bf16.mxu0 %v14172_v1  ;;  %1504 = vmatprep.subr.bf16.mxu1 %v14172_v1  ;;  %v7885_v3 = vld [vmem:[%s14158_s1 + $0x30] sm:$0xff]   ;;  %v7887_v6 = vld [vmem:[%s14158_s1 + $0x28] sm:$0xff]   ;;  %v14397_v27 = vmov 0  ;;  %vm349_vm4 = vcmask 1046528   ;;  %v14400_v62 = vmov 0 }
   0x2   :  { %v7884_v2 = vld [vmem:[%s14158_s1 + $0xb8] sm:$0xff]   ;;  %1216 = vmatpush1.bf16.msra.mxu0 %v7883_v0  ;;  %1247 = vmatprep.mubr.bf16.mxu0 %v14165_v4  ;;  %v7886_v5 = vld [vmem:[%s14158_s1 + $0xb0] sm:$0xff]   ;;  %v7888_v7 = vld [vmem:[%s14158_s1 + $0xa8] sm:$0xff]  }
   0x3   :  { %1505 = vmatpush1.bf16.msra.mxu1 %v7884_v2  ;;  %1217 = vmatprep.subr.bf16.mxu0 %v14172_v1  ;;  %v7889_v8 = vld [vmem:[%s14158_s1 + $0x20] sm:$0xff]   ;;  %v7891_v10 = vld [vmem:[%s14158_s1 + $0x18] sm:$0xff]   ;;  %v7893_v12 = vld [vmem:[%s14158_s1 + $0x10] sm:$0xff]  }
   0x4   :  { %1506 = vmatprep.subr.bf16.mxu1 %v14172_v1  ;;  %v7890_v9 = vld [vmem:[%s14158_s1 + $0xa0] sm:$0xff]   ;;  %v7892_v11 = vld [vmem:[%s14158_s1 + $0x98] sm:$0xff]   ;;  %v7894_v13 = vld [vmem:[%s14158_s1 + $0x90] sm:$0xff]  }
   0x5   :  { %v7895_v14 = vld [vmem:[%s14158_s1 + $0x8] sm:$0xff]   ;;  %v7897_v16 = vld [vmem:[%s14158_s1] sm:$0xff]   ;;  %v7899_v18 = vld [vmem:[%s14158_s1 + $0x78] sm:$0xff]  }
   0x6   :  { %1218 = vmatpush1.bf16.msra.mxu0 %v7885_v3  ;;  %v7896_v15 = vld [vmem:[%s14158_s1 + $0x88] sm:$0xff]   ;;  %v7898_v17 = vld [vmem:[%s14158_s1 + $0x80] sm:$0xff]   ;;  %v7900_v19 = vld [vmem:[%s14158_s1 + $0xf8] sm:$0xff]  }
   0x7   :  { %1507 = vmatpush1.bf16.msra.mxu1 %v7886_v5  ;;  %1219 = vmatprep.subr.bf16.mxu0 %v14172_v1  ;;  %v8241_v20 = vld [vmem:[%s14157_s0] sm:$0xff]  ;;  %v8246_v21 = vld [vmem:[%s14157_s0 + $0x8] sm:$0xff]  ;;  %vm6277_vm1 = vmneg %vm156_vm0 }
   0x8   :  { %1508 = vmatprep.subr.bf16.mxu1 %v14172_v1  ;;  %v157_v22 = vrot.slane %v8241_v20, 7  ;;  %v158_v23 = vrot.slane %v8246_v21, 7  ;;  %v7901_v24 = vld [vmem:[%s14158_s1 + $0x70] sm:$0xff]   ;;  %vm8260_vm3 = vmpackc.low %vm8121_vm2, %vm6277_vm1  ;;  %v7903_v29 = vld [vmem:[%s14158_s1 + $0x68] sm:$0xff]   ;;  %v350_v49 = vrot.slane %v8241_v20, 1  ;;  %v8348_v50 = vpack.c.bf16 %v8246_v21, %v8241_v20 }
   0x9   :  { %v7902_v25 = vld [vmem:[%s14158_s1 + $0xf0] sm:$0xff]   ;;  %v14398_v27 = vsel %vm8260_vm3, 4294967295, %v14397_v27  ;;  %v7904_v30 = vld [vmem:[%s14158_s1 + $0xe8] sm:$0xff]   ;;  %v7905_v31 = vld [vmem:[%s14158_s1 + $0x60] sm:$0xff]   ;;  %v351_v52 = vrot.slane %v8246_v21, 1 }
   0xa   :  { %1220 = vmatpush1.bf16.msra.mxu0 %v7887_v6  ;;  %v159_v26 = vsel %vm156_vm0, %v157_v22, %v158_v23  ;;  %14399 = vst [vmem:[#allocation5_spill] sm:$0xff] %v14398_v27  ;;  %v7906_v32 = vld [vmem:[%s14158_s1 + $0xe0] sm:$0xff]   ;;  %v7907_v33 = vld [vmem:[%s14158_s1 + $0x58] sm:$0xff]   ;;  %v7909_v35 = vld [vmem:[%s14158_s1 + $0x50] sm:$0xff]  }
   0xb   :  { %1509 = vmatpush1.bf16.msra.mxu1 %v7888_v7  ;;  %1221 = vmatprep.subr.bf16.mxu0 %v14172_v1  ;;  %v8265_v28 = vpack.c.bf16 %v159_v26, %v157_v22  ;;  %v7908_v34 = vld [vmem:[%s14158_s1 + $0xd8] sm:$0xff]   ;;  %v7910_v36 = vld [vmem:[%s14158_s1 + $0xd0] sm:$0xff]   ;;  %v7911_v39 = vld [vmem:[%s14158_s1 + $0x48] sm:$0xff]   ;;  %v352_v58 = vsel %vm349_vm4, %v350_v49, %v351_v52 }
   0xc   :  { %1510 = vmatprep.subr.bf16.mxu1 %v14172_v1  ;;  %v8305_v37 = vld [vmem:[%s14157_s0 + $0x10] sm:$0xff]  ;;  %v8310_v38 = vld [vmem:[%s14157_s0 + $0x18] sm:$0xff]  ;;  %v7912_v40 = vld [vmem:[%s14158_s1 + $0xc8] sm:$0xff]   ;;  %v8391_v2 = vpack.c.bf16 %v351_v52, %v352_v58 }
   0xd   :  { %6400 = vmatprep.mubr.msk.bf16.mxu1 %vm8260_vm3, %v8265_v28  ;;  %v160_v41 = vrot.slane %v8305_v37, 7  ;;  %v161_v42 = vrot.slane %v8310_v38, 7  ;;  %v7913_v43 = vld [vmem:[%s14158_s1 + $0x40] sm:$0xff]   ;;  %v8339_v47 = vld [vmem:[%s14157_s0 + $0x28] sm:$0xff]  ;;  %v7915_v48 = vld [vmem:[%s14158_s1 + $0x138] sm:$0xff]   ;;  %v353_v61 = vrot.slane %v8305_v37, 1  ;;  %v8395_v3 = vpack.c.bf16 %v8310_v38, %v8305_v37 }
   0xe   :  { %1222 = vmatpush1.bf16.msra.mxu0 %v7889_v8  ;;  %v7914_v44 = vld [vmem:[%s14158_s1 + $0xc0] sm:$0xff]   ;;  %v164_v54 = vrot.slane %v8339_v47, 7  ;;  %v7916_v55 = vld [vmem:[%s14158_s1 + $0x130] sm:$0xff]   ;;  %v7924_v57 = vld [vmem:[%s14158_s1 + $0x1b8] sm:$0xff]   ;;  %v354_v63 = vrot.slane %v8310_v38, 1 }
   0xf   :  { %1511 = vmatpush1.bf16.msra.mxu1 %v7890_v9  ;;  %1223 = vmatprep.subr.bf16.mxu0 %v14172_v1  ;;  %v162_v45 = vsel %vm156_vm0, %v160_v41, %v161_v42  ;;  %v8334_v46 = vld [vmem:[%s14157_s0 + $0x20] sm:$0xff]  ;;  %v8364_v56 = vld [vmem:[%s14157_s0 + $0x30] sm:$0xff]  ;;  %v8377_v59 = vld [vmem:[%s14157_s0 + $0x38] sm:$0xff] }
  0x10   :  { %1512 = vmatprep.subr.bf16.mxu1 %v14172_v1  ;;  %v8350_v51 = vpack.c.bf16 %v162_v45, %v160_v41  ;;  %v163_v53 = vrot.slane %v8334_v46, 7  ;;  %vm8384_vm5 = vmpackc.low %vm349_vm4, %vm8121_vm2  ;;  %v166_v0 = vrot.slane %v8364_v56, 7  ;;  %v167_v5 = vrot.slane %v8377_v59, 7  ;;  %v8401_v6 = vld [vmem:[%s14157_s0 + $0x40] sm:$0xff]  ;;  %v7917_v7 = vld [vmem:[%s14158_s1 + $0x128] sm:$0xff]  }
  0x11   :  { %v14401_v62 = vsel %vm8384_vm5, 4294967295, %v14400_v62  ;;  %v356_v9 = vrot.slane %v8334_v46, 1  ;;  %v8448_v21 = vld [vmem:[%s14157_s0 + $0x50] sm:$0xff]  ;;  %v8461_v22 = vld [vmem:[%s14157_s0 + $0x58] sm:$0xff]  ;;  %v362_v37 = vrot.slane %v8401_v6, 1  ;;  %v7922_v42 = vld [vmem:[%s14158_s1 + $0x100] sm:$0xff]  }
  0x12   :  { %1224 = vmatpush1.bf16.msra.mxu0 %v7891_v10  ;;  %v165_v60 = vsel %vm156_vm0, %v163_v53, %v164_v54  ;;  %14402 = vst [vmem:[#allocation6_spill] sm:$0xff] %v14401_v62  ;;  %v357_v10 = vrot.slane %v8339_v47, 1  ;;  %v7926_v23 = vld [vmem:[%s14158_s1 + $0x1b0] sm:$0xff]   ;;  %v7923_v45 = vld [vmem:[%s14158_s1 + $0x178] sm:$0xff]   ;;  %v366_v58 = vrot.slane %v8461_v22, 1 }
  0x13   :  { %1513 = vmatpush1.bf16.msra.mxu1 %v7892_v11  ;;  %1225 = vmatprep.subr.bf16.mxu0 %v14172_v1  ;;  %v8406_v8 = vpack.c.bf16 %v165_v60, %v163_v53  ;;  %v8421_v11 = vld [vmem:[%s14157_s0 + $0x48] sm:$0xff]  ;;  %v7920_v26 = vld [vmem:[%s14158_s1 + $0x110] sm:$0xff]   ;;  %v8549_v52 = vld [vmem:[%s14157_s0 + $0x78] sm:$0xff] }
  0x14   :  { %1514 = vmatprep.subr.bf16.mxu1 %v14172_v1  ;;  %v363_v38 = vrot.slane %v8421_v11, 1  ;;  %v8536_v49 = vld [vmem:[%s14157_s0 + $0x70] sm:$0xff]  ;;  %v7928_v53 = vld [vmem:[%s14158_s1 + $0x1a8] sm:$0xff]   ;;  %v179_v60 = vrot.slane %v8549_v52, 7 }
  0x16   :  { %1226 = vmatpush1.bf16.msra.mxu0 %v7893_v12  ;;  %v355_v12 = vsel %vm349_vm4, %v353_v61, %v354_v63  ;;  %v364_v54 = vsel %vm349_vm4, %v362_v37, %v363_v38  ;;  %v7927_v61 = vld [vmem:[%s14158_s1 + $0x168] sm:$0xff]  }
  0x17   :  { %1515 = vmatpush1.bf16.msra.mxu1 %v7894_v13  ;;  %1227 = vmatprep.subr.bf16.mxu0 %v14172_v1  ;;  %v169_v13 = vrot.slane %v8401_v6, 7 }
  0x18   :  { %1516 = vmatprep.subr.bf16.mxu1 %v14172_v1 }
  0x1a   :  { %1228 = vmatpush1.bf16.msra.mxu0 %v7895_v14  ;;  %v7918_v14 = vld [vmem:[%s14158_s1 + $0x120] sm:$0xff]  }
  0x1b   :  { %1517 = vmatpush1.bf16.msra.mxu1 %v7896_v15  ;;  %1229 = vmatprep.subr.bf16.mxu0 %v14172_v1  ;;  %v168_v15 = vsel %vm156_vm0, %v166_v0, %v167_v5 }
  0x1c   :  { %1518 = vmatprep.subr.bf16.mxu1 %v14172_v1  ;;  %v8443_v20 = vpack.c.bf16 %v168_v15, %v166_v0  ;;  %v8575_v0 = vpack.c.bf16 %v8461_v22, %v8448_v21 }
  0x1e   :  { %1230 = vmatpush1.bf16.msra.mxu0 %v7897_v16  ;;  %v170_v16 = vrot.slane %v8421_v11, 7 }
  0x1f   :  { %1519 = vmatpush1.bf16.msra.mxu1 %v7898_v17  ;;  %1231 = vmatprep.subr.bf16.mxu0 %v14172_v1  ;;  %v7919_v17 = vld [vmem:[%s14158_s1 + $0x118] sm:$0xff]  }
  0x20   :  { %1520 = vmatprep.subr.bf16.mxu1 %v14172_v1 }
  0x22   :  { %1232 = vmatpush2.bf16.msra.mxu0 %v7899_v18  ;;  %v8437_v18 = vpack.c.bf16 %v354_v63, %v355_v12  ;;  %v8571_v63 = vpack.c.bf16 %v363_v38, %v364_v54  ;;  %v48_v38 = vld [vmem:[%s14157_s0 + $0xa0] sm:$0xff]  ;;  %v8680_v54 = vld [vmem:[%s14157_s0 + $0xb0] sm:$0xff] }
  0x23   :  { %1521 = vmatpush2.bf16.msra.mxu1 %v7900_v19  ;;  %1233 = vmatprep.subr.bf16.mxu0 %v14172_v1  ;;  %v8441_v19 = vpack.c.bf16 %v8339_v47, %v8334_v46  ;;  %v8529_v47 = vpack.c.bf16 %v8421_v11, %v8401_v6  ;;  %v44_v6 = vld [vmem:[%s14157_s0 + $0x80] sm:$0xff] }
  0x24   :  { %1522 = vmatprep.subr.bf16.mxu1 %v14172_v1 }
  0x26   :  { %1234 = vmatpush2.bf16.msra.mxu0 %v7901_v24  ;;  %v358_v24 = vsel %vm349_vm4, %v356_v9, %v357_v10 }
  0x27   :  { %1523 = vmatpush2.bf16.msra.mxu1 %v7902_v25  ;;  %1235 = vmatprep.subr.bf16.mxu0 %v14172_v1  ;;  %v359_v25 = vrot.slane %v8364_v56, 1 }
  0x28   :  { %1524 = vmatprep.subr.bf16.mxu1 %v14172_v1 }
  0x2a   :  { %1236 = vmatpush2.bf16.msra.mxu0 %v7903_v29  ;;  %v360_v29 = vrot.slane %v8377_v59, 1 }
  0x2b   :  { %1525 = vmatpush2.bf16.msra.mxu1 %v7904_v30  ;;  %1237 = vmatprep.subr.bf16.mxu0 %v14172_v1  ;;  %v172_v30 = vrot.slane %v8448_v21, 7 }
  0x2c   :  { %1526 = vmatprep.subr.bf16.mxu1 %v14172_v1 }
  0x2e   :  { %1238 = vmatpush2.bf16.msra.mxu0 %v7905_v31  ;;  %v173_v31 = vrot.slane %v8461_v22, 7  ;;  %v8625_v22 = vld [vmem:[%s14157_s0 + $0x98] sm:$0xff] }
  0x2f   :  { %1527 = vmatpush2.bf16.msra.mxu1 %v7906_v32  ;;  %1239 = vmatprep.subr.bf16.mxu0 %v14172_v1  ;;  %v7921_v32 = vld [vmem:[%s14158_s1 + $0x108] sm:$0xff]  }
  0x30   :  { %1528 = vmatprep.subr.bf16.mxu1 %v14172_v1 }
  0x32   :  { %1240 = vmatpush2.bf16.msra.mxu0 %v7907_v33  ;;  %v8483_v33 = vpack.c.bf16 %v357_v10, %v358_v24  ;;  %v7930_v24 = vld [vmem:[%s14158_s1 + $0x1a0] sm:$0xff]  }
  0x33   :  { %1529 = vmatpush2.bf16.msra.mxu1 %v7908_v34  ;;  %1241 = vmatprep.subr.bf16.mxu0 %v14172_v1  ;;  %v8487_v34 = vpack.c.bf16 %v8377_v59, %v8364_v56  ;;  %v7925_v56 = vld [vmem:[%s14158_s1 + $0x170] sm:$0xff]   ;;  %v178_v59 = vrot.slane %v8536_v49, 7 }
  0x34   :  { %1530 = vmatprep.subr.bf16.mxu1 %v14172_v1 }
  0x35   :  { %v180_v12 = vsel %vm156_vm0, %v178_v59, %v179_v60  ;;  %v378_v60 = vrot.slane %v8625_v22, 1 }
  0x36   :  { %1242 = vmatpush2.bf16.msra.mxu0 %v7909_v35  ;;  %v8492_v35 = vld [vmem:[%s14157_s0 + $0x60] sm:$0xff] }
  0x37   :  { %1531 = vmatpush2.bf16.msra.mxu1 %v7910_v36  ;;  %1243 = vmatprep.subr.bf16.mxu0 %v14172_v1  ;;  %v175_v41 = vrot.slane %v8492_v35, 7  ;;  %v368_v10 = vrot.slane %v8492_v35, 1 }
  0x38   :  { %1532 = vmatprep.subr.bf16.mxu1 %v14172_v1 }
  0x3a   :  { %1244 = vmatpush2.bf16.msra.mxu0 %v7911_v39  ;;  %v8509_v39 = vld [vmem:[%s14157_s0 + $0x68] sm:$0xff] }
  0x3b   :  { %1533 = vmatpush2.bf16.msra.mxu1 %v7912_v40  ;;  %1245 = vmatprep.subr.bf16.mxu0 %v14172_v1  ;;  %v361_v40 = vsel %vm349_vm4, %v359_v25, %v360_v29  ;;  %v369_v11 = vrot.slane %v8509_v39, 1 }
  0x3c   :  { %1534 = vmatprep.subr.bf16.mxu1 %v14172_v1  ;;  %v8525_v46 = vpack.c.bf16 %v360_v29, %v361_v40  ;;  %v372_v29 = vrot.slane %v8549_v52, 1 }
  0x3d   :  { %v370_v25 = vsel %vm349_vm4, %v368_v10, %v369_v11 }
  0x3e   :  { %1246 = vmatpush2.bf16.msra.mxu0 %v7913_v43  ;;  %v174_v43 = vsel %vm156_vm0, %v172_v30, %v173_v31  ;;  %v185_v31 = vrot.slane %v8625_v22, 7 }
  0x3f   :  { %1535 = vmatpush2.bf16.msra.mxu1 %v7914_v44  ;;  %1793 = vmatprep.subr.bf16.mxu0 %v14172_v1  ;;  %v176_v44 = vrot.slane %v8509_v39, 7 }
  0x40   :  { %2082 = vmatprep.subr.bf16.mxu1 %v14172_v1 }
  0x41   :  { %1248 = vmatmul.mubr.bf16.vlgmr.msra.gmra.mxu0 %v14165_v4 }
  0x42   :  { %1537 = vmatmul.mubr.bf16.vlgmr.msra.gmra.mxu1 %v14165_v4  ;;  %1794 = vmatpush1.bf16.msra.mxu0 %v7915_v48  ;;  %v8531_v48 = vpack.c.bf16 %v174_v43, %v172_v30 }
  0x43   :  { %1255 = vmatprep.mubr.bf16.mxu0 %v8348_v50  ;;  %6404 = vmatprep.mubr.msk.bf16.mxu1 %vm8260_vm3, %v8350_v51 }
  0x44   :  { %1795 = vmatprep.subr.bf16.mxu0 %v14172_v1  ;;  %2083 = vmatpush1.bf16.msra.mxu1 %v7924_v57  ;;  %v177_v57 = vsel %vm156_vm0, %v175_v41, %v176_v44  ;;  %v187_v44 = vrot.slane %v48_v38, 7 }
  0x45   :  { %2084 = vmatprep.subr.bf16.mxu1 %v14172_v1  ;;  %v8577_v5 = vpack.c.bf16 %v177_v57, %v175_v41  ;;  %v374_v41 = vrot.slane %v44_v6, 1 }
  0x46   :  { %1796 = vmatpush1.bf16.msra.mxu0 %v7916_v55  ;;  %v365_v55 = vrot.slane %v8448_v21, 1  ;;  %v46_v21 = vld [vmem:[%s14157_s0 + $0x90] sm:$0xff] }
  0x47   :  { %1797 = vmatprep.subr.bf16.mxu0 %v14172_v1  ;;  %v184_v30 = vrot.slane %v46_v21, 7 }
  0x48   :  { %2085 = vmatpush1.bf16.msra.mxu1 %v7926_v23  ;;  %v367_v9 = vsel %vm349_vm4, %v365_v55, %v366_v58  ;;  %v7929_v23 = vld [vmem:[%s14158_s1 + $0x160] sm:$0xff]  }
  0x49   :  { %6280 = vmatmul.mubr.msk.bf16.gmra.mxu0 %vm8260_vm3, %v8265_v28  ;;  %v171_v28 = vsel %vm156_vm0, %v169_v13, %v170_v16  ;;  %2086 = vmatprep.subr.bf16.mxu1 %v14172_v1  ;;  %v8604_v15 = vpack.c.bf16 %v366_v58, %v367_v9  ;;  %v8608_v16 = vpack.c.bf16 %v8509_v39, %v8492_v35  ;;  %v49_v39 = vld [vmem:[%s14157_s0 + $0xa8] sm:$0xff]  ;;  %v377_v58 = vrot.slane %v46_v21, 1 }
  0x4a   :  { %6407 = vmatmul.mubr.msk.bf16.gmra.mxu1 %vm8384_vm5, %v8391_v2  ;;  %1263 = vmatprep.mubr.bf16.mxu0 %v8395_v3  ;;  %v8494_v36 = vpack.c.bf16 %v171_v28, %v169_v13  ;;  %v181_v13 = vrot.slane %v44_v6, 7  ;;  %v371_v28 = vrot.slane %v8536_v49, 1  ;;  %v8647_v35 = vpack.c.bf16 %v8549_v52, %v8536_v49 }
  0x4b   :  { %6411 = vmatprep.mubr.msk.bf16.mxu1 %vm8260_vm3, %v8406_v8  ;;  %1798 = vmatpush1.bf16.msra.mxu0 %v7917_v7  ;;  %v8593_v7 = vld [vmem:[%s14157_s0 + $0x88] sm:$0xff]  ;;  %v186_v43 = vsel %vm156_vm0, %v184_v30, %v185_v31 }
  0x4c   :  { %1799 = vmatprep.subr.bf16.mxu0 %v14172_v1  ;;  %2087 = vmatpush1.bf16.msra.mxu1 %v7928_v53  ;;  %v373_v40 = vsel %vm349_vm4, %v371_v28, %v372_v29  ;;  %v8673_v52 = vpack.c.bf16 %v8593_v7, %v44_v6  ;;  %v8675_v53 = vpack.c.bf16 %v186_v43, %v184_v30 }
  0x4d   :  { %2088 = vmatprep.subr.bf16.mxu1 %v14172_v1  ;;  %v8670_v49 = vpack.c.bf16 %v372_v29, %v373_v40 }
  0x4f   :  { %1800 = vmatpush1.bf16.msra.mxu0 %v7918_v14  ;;  %v182_v14 = vrot.slane %v8593_v7, 7 }
  0x50   :  { %1801 = vmatprep.subr.bf16.mxu0 %v14172_v1  ;;  %2089 = vmatpush1.bf16.msra.mxu1 %v7930_v24 }
  0x51   :  { %6284 = vmatmul.mubr.msk.bf16.gmra.mxu0 %vm8260_vm3, %v8350_v51  ;;  %2090 = vmatprep.subr.bf16.mxu1 %v14172_v1 }
  0x52   :  { %6414 = vmatmul.mubr.msk.bf16.gmra.mxu1 %vm8384_vm5, %v8437_v18  ;;  %1271 = vmatprep.mubr.bf16.mxu0 %v8441_v19 }
  0x53   :  { %6418 = vmatprep.mubr.msk.bf16.mxu1 %vm8260_vm3, %v8443_v20  ;;  %1802 = vmatpush1.bf16.msra.mxu0 %v7919_v17  ;;  %v8610_v17 = vpack.c.bf16 %v180_v12, %v178_v59  ;;  %v51_v59 = vld [vmem:[%s14157_s0 + $0xb8] sm:$0xff]  ;;  %v379_v12 = vsel %vm349_vm4, %v377_v58, %v378_v60 }
  0x54   :  { %1803 = vmatprep.subr.bf16.mxu0 %v14172_v1  ;;  %v191_v10 = vrot.slane %v51_v59, 7  ;;  %v8734_v24 = vpack.c.bf16 %v378_v60, %v379_v12 }
  0x57   :  { %1804 = vmatpush1.bf16.msra.mxu0 %v7920_v26  ;;  %v183_v26 = vsel %vm156_vm0, %v181_v13, %v182_v14 }
  0x58   :  { %1805 = vmatprep.subr.bf16.mxu0 %v14172_v1  ;;  %v8649_v37 = vpack.c.bf16 %v183_v26, %v181_v13  ;;  %v52_v13 = vld [vmem:[%s14157_s0 + $0xc0] sm:$0xff] }
  0x59   :  { %6288 = vmatmul.mubr.msk.bf16.gmra.mxu0 %vm8260_vm3, %v8406_v8  ;;  %v193_v28 = vrot.slane %v52_v13, 7 }
  0x5a   :  { %6421 = vmatmul.mubr.msk.bf16.gmra.mxu1 %vm8384_vm5, %v8483_v33  ;;  %1279 = vmatprep.mubr.bf16.mxu0 %v8487_v34 }
  0x5b   :  { %6425 = vmatprep.mubr.msk.bf16.mxu1 %vm8260_vm3, %v8494_v36  ;;  %1806 = vmatpush1.bf16.msra.mxu0 %v7921_v32  ;;  %v8643_v32 = vpack.c.bf16 %v369_v11, %v370_v25  ;;  %v7932_v11 = vld [vmem:[%s14158_s1 + $0x198] sm:$0xff]   ;;  %v8736_v25 = vpack.c.bf16 %v49_v39, %v48_v38 }
  0x5c   :  { %1807 = vmatprep.subr.bf16.mxu0 %v14172_v1  ;;  %2091 = vmatpush1.bf16.msra.mxu1 %v7932_v11 }
  0x5d   :  { %2092 = vmatprep.subr.bf16.mxu1 %v14172_v1 }
  0x5f   :  { %1808 = vmatpush1.bf16.msra.mxu0 %v7922_v42  ;;  %v375_v42 = vrot.slane %v8593_v7, 1  ;;  %v8705_v7 = vpack.c.bf16 %v8625_v22, %v46_v21  ;;  %v8732_v21 = vld [vmem:[%s14157_s0 + $0xc8] sm:$0xff]  ;;  %v380_v22 = vrot.slane %v48_v38, 1 }
  0x60   :  { %1809 = vmatprep.subr.bf16.mxu0 %v14172_v1  ;;  %v194_v29 = vrot.slane %v8732_v21, 7 }
  0x61   :  { %6292 = vmatmul.mubr.msk.bf16.gmra.mxu0 %vm8260_vm3, %v8443_v20  ;;  %v376_v55 = vsel %vm349_vm4, %v374_v41, %v375_v42 }
  0x62   :  { %6428 = vmatmul.mubr.msk.bf16.gmra.mxu1 %vm8384_vm5, %v8525_v46  ;;  %1287 = vmatprep.mubr.bf16.mxu0 %v8529_v47  ;;  %v8702_v6 = vpack.c.bf16 %v375_v42, %v376_v55 }
  0x63   :  { %6432 = vmatprep.mubr.msk.bf16.mxu1 %vm8260_vm3, %v8531_v48  ;;  %1810 = vmatpush2.bf16.msra.mxu0 %v7923_v45  ;;  %v188_v45 = vrot.slane %v49_v39, 7 }
  0x64   :  { %1811 = vmatprep.subr.bf16.mxu0 %v14172_v1 }
  0x65   :  { %v189_v57 = vsel %vm156_vm0, %v187_v44, %v188_v45 }
  0x66   :  { %v8708_v9 = vpack.c.bf16 %v189_v57, %v187_v44 }
  0x67   :  { %1812 = vmatpush2.bf16.msra.mxu0 %v7925_v56  ;;  %v7931_v56 = vld [vmem:[%s14158_s1 + $0x158] sm:$0xff]  }
  0x68   :  { %1813 = vmatprep.subr.bf16.mxu0 %v14172_v1 }
  0x69   :  { %6296 = vmatmul.mubr.msk.bf16.gmra.mxu0 %vm8260_vm3, %v8494_v36 }
  0x6a   :  { %6435 = vmatmul.mubr.msk.bf16.gmra.mxu1 %vm8384_vm5, %v8571_v63  ;;  %1295 = vmatprep.mubr.bf16.mxu0 %v8575_v0 }
  0x6b   :  { %6439 = vmatprep.mubr.msk.bf16.mxu1 %vm8260_vm3, %v8577_v5  ;;  %1814 = vmatpush2.bf16.msra.mxu0 %v7927_v61  ;;  %v190_v61 = vrot.slane %v8680_v54, 7 }
  0x6c   :  { %1815 = vmatprep.subr.bf16.mxu0 %v14172_v1 }
  0x6d   :  { %v192_v14 = vsel %vm156_vm0, %v190_v61, %v191_v10 }
  0x6e   :  { %v8738_v26 = vpack.c.bf16 %v192_v14, %v190_v61 }
  0x6f   :  { %1816 = vmatpush2.bf16.msra.mxu0 %v7929_v23  ;;  %v381_v23 = vrot.slane %v49_v39, 1 }
  0x70   :  { %1817 = vmatprep.subr.bf16.mxu0 %v14172_v1 }
  0x71   :  { %6300 = vmatmul.mubr.msk.bf16.gmra.mxu0 %vm8260_vm3, %v8531_v48 }
  0x72   :  { %6442 = vmatmul.mubr.msk.bf16.gmra.mxu1 %vm8384_vm5, %v8604_v15  ;;  %1303 = vmatprep.mubr.bf16.mxu0 %v8608_v16 }
  0x73   :  { %6446 = vmatprep.mubr.msk.bf16.mxu1 %vm8260_vm3, %v8610_v17  ;;  %1818 = vmatpush2.bf16.msra.mxu0 %v7931_v56 }
  0x74   :  { %1819 = vmatprep.subr.bf16.mxu0 %v14172_v1 }
  0x79   :  { %6304 = vmatmul.mubr.msk.bf16.gmra.mxu0 %vm8260_vm3, %v8577_v5 }
  0x7a   :  { %6449 = vmatmul.mubr.msk.bf16.gmra.mxu1 %vm8384_vm5, %v8643_v32  ;;  %1311 = vmatprep.mubr.bf16.mxu0 %v8647_v35 }
  0x7b   :  { %6453 = vmatprep.mubr.msk.bf16.mxu1 %vm8260_vm3, %v8649_v37 }
  0x81   :  { %6308 = vmatmul.mubr.msk.bf16.gmra.mxu0 %vm8260_vm3, %v8610_v17 }
  0x82   :  { %6456 = vmatmul.mubr.msk.bf16.gmra.mxu1 %vm8384_vm5, %v8670_v49  ;;  %1319 = vmatprep.mubr.bf16.mxu0 %v8673_v52 }
  0x83   :  { %6460 = vmatprep.mubr.msk.bf16.mxu1 %vm8260_vm3, %v8675_v53 }
  0x89   :  { %6312 = vmatmul.mubr.msk.bf16.gmra.mxu0 %vm8260_vm3, %v8649_v37 }
  0x8a   :  { %6463 = vmatmul.mubr.msk.bf16.gmra.mxu1 %vm8384_vm5, %v8702_v6  ;;  %1327 = vmatprep.mubr.bf16.mxu0 %v8705_v7 }
  0x8b   :  { %6467 = vmatprep.mubr.msk.bf16.mxu1 %vm8260_vm3, %v8708_v9 }
  0x8c   :  { %12 = vsyncpa [#allocation3], 0  ;;  %v382_v30 = vsel %vm349_vm4, %v380_v22, %v381_v23  ;;  %v7933_v31 = vld [vmem:[%s14158_s1 + $0x150] sm:$0xff]   ;;  %v195_v38 = vsel %vm156_vm0, %v193_v28, %v194_v29  ;;  %v8764_v40 = vld [vmem:[%s14157_s0 + $0xd8] sm:$0xff]  ;;  %v8769_v42 = vpack.c.bf16 %v51_v59, %v8680_v54  ;;  %v383_v44 = vrot.slane %v8680_v54, 1 }
  0x8d   :  { %v8759_v39 = vld [vmem:[%s14157_s0 + $0xd0] sm:$0xff]  ;;  %1820 = vmatpush2.bf16.msra.mxu0 %v7933_v31  ;;  %v8766_v41 = vpack.c.bf16 %v381_v23, %v382_v30  ;;  %v8772_v43 = vpack.c.bf16 %v195_v38, %v193_v28  ;;  %v384_v45 = vrot.slane %v51_v59, 1  ;;  %v197_v57 = vrot.slane %v8764_v40, 7  ;;  %v7935_v58 = vld [vmem:[%s14158_s1 + $0x188] sm:$0xff]   ;;  %v8799_v60 = vld [vmem:[%s14157_s0 + $0xe0] sm:$0xff] }
  0x8e   :  { %1821 = vmatprep.subr.bf16.mxu0 %v14172_v1  ;;  %v7934_v55 = vld [vmem:[%s14158_s1 + $0x190] sm:$0xff]   ;;  %v196_v56 = vrot.slane %v8759_v39, 7  ;;  %v8804_v61 = vld [vmem:[%s14157_s0 + $0xe8] sm:$0xff]  ;;  %v8809_v11 = vpack.c.bf16 %v8732_v21, %v52_v13  ;;  %v386_v14 = vrot.slane %v52_v13, 1  ;;  %v387_v22 = vrot.slane %v8732_v21, 1  ;;  %v7936_v23 = vld [vmem:[%s14158_s1 + $0x180] sm:$0xff]  }
  0x8f   :  { %14403 = vst [vmem:[#allocation7_spill] sm:$0xff] %v8772_v43  ;;  %2093 = vmatpush1.bf16.msra.mxu1 %v7934_v55  ;;  %v385_v54 = vsel %vm349_vm4, %v383_v44, %v384_v45  ;;  %v199_v28 = vrot.slane %v8799_v60, 7  ;;  %v200_v29 = vrot.slane %v8804_v61, 7  ;;  %v7937_v21 = vld [vmem:[%s14158_s1 + $0x148] sm:$0xff]   ;;  %v7938_v30 = vld [vmem:[%s14158_s1 + $0x1f8] sm:$0xff]   ;;  %v58_v38 = vld [vmem:[%s14157_s0 + $0xf0] sm:$0xff]  ;;  %v8849_v55 = vpack.c.bf16 %v8764_v40, %v8759_v39 }
  0x90   :  { %2094 = vmatprep.subr.bf16.mxu1 %v14172_v1  ;;  %v198_v59 = vsel %vm156_vm0, %v196_v56, %v197_v57  ;;  %v8806_v10 = vpack.c.bf16 %v384_v45, %v385_v54  ;;  %v388_v13 = vsel %vm349_vm4, %v386_v14, %v387_v22  ;;  %v59_v44 = vld [vmem:[%s14157_s0 + $0xf8] sm:$0xff]  ;;  %v389_v57 = vrot.slane %v8759_v39, 1 }
  0x91   :  { %6316 = vmatmul.mubr.msk.bf16.gmra.mxu0 %vm8260_vm3, %v8675_v53  ;;  %v8812_v12 = vpack.c.bf16 %v198_v59, %v196_v56  ;;  %v201_v31 = vsel %vm156_vm0, %v199_v28, %v200_v29  ;;  %v8845_v45 = vpack.c.bf16 %v387_v22, %v388_v13  ;;  %14406 = vst [vmem:[#allocation10_spill] sm:$0xff] %v8849_v55  ;;  %v390_v54 = vrot.slane %v8764_v40, 1  ;;  %v7940_v40 = vld [vmem:[%s14158_s1 + $0x1e8] sm:$0xff]  }
  0x92   :  { %6470 = vmatmul.mubr.msk.bf16.gmra.mxu1 %vm8384_vm5, %v8734_v24  ;;  %1335 = vmatprep.mubr.bf16.mxu0 %v8736_v25  ;;  %v8853_v56 = vpack.c.bf16 %v201_v31, %v199_v28  ;;  %v202_v59 = vrot.slane %v58_v38, 7  ;;  %v203_v14 = vrot.slane %v59_v44, 7  ;;  %v8882_v28 = vld [vmem:[%s14157_s0 + $0x108] sm:$0xff]  ;;  %v8888_v13 = vpack.c.bf16 %v8804_v61, %v8799_v60  ;;  %v7941_v38 = vld [vmem:[%s14158_s1 + $0x1e0] sm:$0xff]  }
  0x93   :  { %6474 = vmatprep.mubr.msk.bf16.mxu1 %vm8260_vm3, %v8738_v26  ;;  %2095 = vmatpush1.bf16.msra.mxu1 %v7935_v58  ;;  %14404 = vst [vmem:[#allocation8_spill] sm:$0xff] %v8812_v12  ;;  %14405 = vst [vmem:[#allocation9_spill] sm:$0xff] %v8845_v45  ;;  %v7939_v58 = vld [vmem:[%s14158_s1 + $0x1f0] sm:$0xff]   ;;  %v391_v39 = vsel %vm349_vm4, %v389_v57, %v390_v54  ;;  %v393_v31 = vrot.slane %v8804_v61, 1  ;;  %v206_v57 = vrot.slane %v8882_v28, 7  ;;  %v7942_v61 = vld [vmem:[%s14158_s1 + $0x140] sm:$0xff]  }
  0x94   :  { %2096 = vmatprep.subr.bf16.mxu1 %v14172_v1  ;;  %1822 = vmatpush2.bf16.msra.mxu0 %v7937_v21  ;;  %14407 = vst [vmem:[#allocation11_spill] sm:$0xff] %v8853_v56  ;;  %v204_v22 = vsel %vm156_vm0, %v202_v59, %v203_v14  ;;  %v8884_v29 = vpack.c.bf16 %v390_v54, %v391_v39  ;;  %14409 = vst [vmem:[#allocation13_spill] sm:$0xff] %v8888_v13  ;;  %v7943_v54 = vld [vmem:[%s14158_s1 + $0x1d8] sm:$0xff]  }
  0x95   :  { %1823 = vmatprep.subr.bf16.mxu0 %v14172_v1  ;;  %v8891_v21 = vpack.c.bf16 %v204_v22, %v202_v59  ;;  %v62_v59 = vld [vmem:[%s14157_s0 + $0x110] sm:$0xff]  ;;  %v63_v14 = vld [vmem:[%s14157_s0 + $0x118] sm:$0xff] }
  0x96   :  { %14408 = vst [vmem:[#allocation12_spill] sm:$0xff] %v8884_v29  ;;  %v7944_v22 = vld [vmem:[%s14158_s1 + $0x1d0] sm:$0xff]  }
  0x97   :  { %2097 = vmatpush1.bf16.msra.mxu1 %v7936_v23  ;;  %v60_v23 = vld [vmem:[%s14157_s0 + $0x100] sm:$0xff]  ;;  %14410 = vst [vmem:[#allocation14_spill] sm:$0xff] %v8891_v21 }
  0x98   :  { %2098 = vmatprep.subr.bf16.mxu1 %v14172_v1  ;;  %v205_v44 = vrot.slane %v60_v23, 7  ;;  %1824 = vmatpush2.bf16.msra.mxu0 %v7942_v61  ;;  %v8951_v61 = vpack.c.bf16 %v8882_v28, %v60_v23 }
  0x99   :  { %6320 = vmatmul.mubr.msk.bf16.gmra.mxu0 %vm8260_vm3, %v8708_v9 }
  0x9a   :  { %6477 = vmatmul.mubr.msk.bf16.gmra.mxu1 %vm8384_vm5, %v8766_v41  ;;  %1343 = vmatprep.mubr.bf16.mxu0 %v8769_v42  ;;  %14412 = vst [vmem:[#allocation16_spill] sm:$0xff] %v8951_v61 }
  0x9b   :  { %6481 = vmatprep.mubr.msk.bf16.mxu1 %vm8260_vm3, %v8772_v43  ;;  %2099 = vmatpush2.bf16.msra.mxu1 %v7938_v30  ;;  %v392_v30 = vrot.slane %v8799_v60, 1 }
  0x9c   :  { %2100 = vmatprep.subr.bf16.mxu1 %v14172_v1 }
  0x9d   :  { %v394_v60 = vsel %vm349_vm4, %v392_v30, %v393_v31  ;;  %v208_v30 = vrot.slane %v62_v59, 7 }
  0x9e   :  { %v8924_v39 = vpack.c.bf16 %v393_v31, %v394_v60  ;;  %v7945_v31 = vld [vmem:[%s14158_s1 + $0x1c8] sm:$0xff]  }
  0x9f   :  { %2101 = vmatpush2.bf16.msra.mxu1 %v7939_v58  ;;  %v207_v58 = vsel %vm156_vm0, %v205_v44, %v206_v57  ;;  %v64_v57 = vld [vmem:[%s14157_s0 + $0x120] sm:$0xff]  ;;  %v65_v60 = vld [vmem:[%s14157_s0 + $0x128] sm:$0xff] }
  0xa0   :  { %2102 = vmatprep.subr.bf16.mxu1 %v14172_v1  ;;  %14411 = vst [vmem:[#allocation15_spill] sm:$0xff] %v8924_v39 }
  0xa1   :  { %6324 = vmatmul.mubr.msk.bf16.gmra.mxu0 %vm8260_vm3, %v8738_v26 }
  0xa2   :  { %6484 = vmatmul.mubr.msk.bf16.gmra.mxu1 %vm8384_vm5, %v8806_v10  ;;  %1351 = vmatprep.mubr.bf16.mxu0 %v8809_v11 }
  0xa3   :  { %6488 = vmatprep.mubr.msk.bf16.mxu1 %vm8260_vm3, %v8812_v12  ;;  %2103 = vmatpush2.bf16.msra.mxu1 %v7940_v40  ;;  %v6339_v40 = vpack.c.bf16 %v207_v58, %v205_v44  ;;  %v398_v58 = vrot.slane %v60_v23, 1 }
  0xa4   :  { %2104 = vmatprep.subr.bf16.mxu1 %v14172_v1 }
  0xa7   :  { %2105 = vmatpush2.bf16.msra.mxu1 %v7941_v38  ;;  %v209_v38 = vrot.slane %v63_v14, 7 }
  0xa8   :  { %2106 = vmatprep.subr.bf16.mxu1 %v14172_v1 }
  0xa9   :  { %6328 = vmatmul.mubr.msk.bf16.gmra.mxu0 %vm8260_vm3, %v8772_v43  ;;  %v210_v44 = vsel %vm156_vm0, %v208_v30, %v209_v38  ;;  %v7946_v38 = vld [vmem:[%s14158_s1 + $0x1c0] sm:$0xff]  }
  0xaa   :  { %6491 = vmatmul.mubr.msk.bf16.gmra.mxu1 %vm8384_vm5, %v8845_v45  ;;  %1359 = vmatprep.mubr.bf16.mxu0 %v8849_v55 }
  0xab   :  { %6495 = vmatprep.mubr.msk.bf16.mxu1 %vm8260_vm3, %v8853_v56  ;;  %2107 = vmatpush2.bf16.msra.mxu1 %v7943_v54  ;;  %v8954_v54 = vpack.c.bf16 %v210_v44, %v208_v30  ;;  %v67_v44 = vld [vmem:[%s14157_s0 + $0x138] sm:$0xff] }
  0xac   :  { %2108 = vmatprep.subr.bf16.mxu1 %v14172_v1 }
  0xad   :  { %14413 = vst [vmem:[#allocation17_spill] sm:$0xff] %v8954_v54 }
  0xaf   :  { %2109 = vmatpush2.bf16.msra.mxu1 %v7944_v22  ;;  %v399_v22 = vrot.slane %v8882_v28, 1  ;;  %v8970_v28 = vld [vmem:[%s14158_s1 + $0x238] sm:$0xff]  }
  0xb0   :  { %2110 = vmatprep.subr.bf16.mxu1 %v14172_v1  ;;  %7717 = vmatprep.subr.bf16.mxu0 %v8970_v28 }
  0xb1   :  { %6332 = vmatmul.mubr.msk.bf16.gmra.mxu0 %vm8260_vm3, %v8812_v12  ;;  %v400_v23 = vsel %vm349_vm4, %v398_v58, %v399_v22 }
  0xb2   :  { %6498 = vmatmul.mubr.msk.bf16.gmra.mxu1 %vm8384_vm5, %v8884_v29  ;;  %1367 = vmatprep.mubr.bf16.mxu0 %v8888_v13  ;;  %v8981_v58 = vpack.c.bf16 %v399_v22, %v400_v23  ;;  %v9006_v23 = vpack.c.bf16 %v65_v60, %v64_v57 }
  0xb3   :  { %6502 = vmatprep.mubr.msk.bf16.mxu1 %vm8260_vm3, %v8891_v21  ;;  %2111 = vmatpush2.bf16.msra.mxu1 %v7945_v31  ;;  %v212_v21 = vrot.slane %v65_v60, 7  ;;  %v66_v31 = vld [vmem:[%s14157_s0 + $0x130] sm:$0xff] }
  0xb4   :  { %2112 = vmatprep.subr.bf16.mxu1 %v14172_v1  ;;  %14415 = vst [vmem:[#allocation18_spill] sm:$0xff] %v8981_v58  ;;  %14419 = vst [vmem:[#allocation22_spill] sm:$0xff] %v9006_v23 }
  0xb7   :  { %2113 = vmatpush2.bf16.msra.mxu1 %v7946_v38  ;;  %v8983_v38 = vpack.c.bf16 %v63_v14, %v62_v59 }
  0xb8   :  { %4198 = vmatprep.subr.bf16.mxu1 %v14172_v1  ;;  %v402_v1 = vrot.slane %v63_v14, 1  ;;  %v68_v14 = vld [vmem:[%s14157_s0 + $0x140] sm:$0xff] }
  0xb9   :  { %6336 = vmatmul.mubr.msk.bf16.gmra.mxu0 %vm8260_vm3, %v8853_v56  ;;  %14416 = vst [vmem:[#allocation19_spill] sm:$0xff] %v8983_v38  ;;  %v214_v56 = vrot.slane %v66_v31, 7  ;;  %v217_v13 = vrot.slane %v68_v14, 7 }
  0xba   :  { %6505 = vmatmul.mubr.msk.bf16.gmra.mxu1 %vm8384_vm5, %v8924_v39  ;;  %1375 = vmatprep.mubr.bf16.mxu0 %v14165_v4  ;;  %v211_v4 = vrot.slane %v64_v57, 7  ;;  %v14414_v39 = vmov 0.0|0.0  }
  0xbb   :  { %6509 = vmatprep.mubr.msk.bf16.mxu1 %vm8260_vm3, %v6339_v40 }
  0xbc   :  { %v213_v30 = vsel %vm156_vm0, %v211_v4, %v212_v21  ;;  %v215_v21 = vrot.slane %v67_v44, 7 }
  0xc1   :  { %1376 = vmatmul.mubr.bf16.gmra.mxu0 %v14414_v39 }
  0xc2   :  { %1665 = vmatmul.mubr.bf16.gmra.mxu1 %v14414_v39  ;;  %1383 = vmatprep.mubr.bf16.mxu0 %v8951_v61  ;;  %v8985_v61 = vpack.c.bf16 %v213_v30, %v211_v4  ;;  %v401_v39 = vrot.slane %v62_v59, 1  ;;  %v216_v59 = vsel %vm156_vm0, %v214_v56, %v215_v21 }
  0xc3   :  { %6513 = vmatprep.mubr.msk.bf16.mxu1 %vm8260_vm3, %v8954_v54  ;;  %v9008_v30 = vpack.c.bf16 %v216_v59, %v214_v56 }
  0xc4   :  { %14417 = vst [vmem:[#allocation20_spill] sm:$0xff] %v8985_v61  ;;  %v403_v4 = vsel %vm349_vm4, %v401_v39, %v402_v1 }
  0xc5   :  { %v9004_v22 = vpack.c.bf16 %v402_v1, %v403_v4  ;;  %14420 = vst [vmem:[#allocation23_spill] sm:$0xff] %v9008_v30  ;;  %v9030_v4 = vpack.c.bf16 %v67_v44, %v66_v31 }
  0xc7   :  { %14418 = vst [vmem:[#allocation21_spill] sm:$0xff] %v9004_v22  ;;  %14422 = vst [vmem:[#allocation25_spill] sm:$0xff] %v9030_v4 }
  0xc9   :  { %6340 = vmatmul.mubr.msk.bf16.gmra.mxu0 %vm8260_vm3, %v6339_v40  ;;  %v69_v40 = vld [vmem:[%s14157_s0 + $0x148] sm:$0xff] }
  0xca   :  { %6516 = vmatmul.mubr.msk.bf16.gmra.mxu1 %vm8384_vm5, %v8981_v58  ;;  %1391 = vmatprep.mubr.bf16.mxu0 %v8983_v38  ;;  %v404_v38 = vrot.slane %v64_v57, 1  ;;  %v405_v58 = vrot.slane %v65_v60, 1  ;;  %v218_v39 = vrot.slane %v69_v40, 7  ;;  %v70_v57 = vld [vmem:[%s14157_s0 + $0x150] sm:$0xff]  ;;  %v71_v60 = vld [vmem:[%s14157_s0 + $0x158] sm:$0xff] }
  0xcb   :  { %6520 = vmatprep.mubr.msk.bf16.mxu1 %vm8260_vm3, %v8985_v61 }
  0xcc   :  { %v406_v1 = vsel %vm349_vm4, %v404_v38, %v405_v58  ;;  %v219_v56 = vsel %vm156_vm0, %v217_v13, %v218_v39  ;;  %v221_v38 = vrot.slane %v71_v60, 7 }
  0xcd   :  { %v9028_v21 = vpack.c.bf16 %v405_v58, %v406_v1  ;;  %v9032_v59 = vpack.c.bf16 %v219_v56, %v217_v13  ;;  %v73_v58 = vld [vmem:[%s14157_s0 + $0x168] sm:$0xff]  ;;  %v9054_v1 = vpack.c.bf16 %v69_v40, %v68_v14 }
  0xcf   :  { %14421 = vst [vmem:[#allocation24_spill] sm:$0xff] %v9028_v21  ;;  %14423 = vst [vmem:[#allocation26_spill] sm:$0xff] %v9032_v59 }
  0xd0   :  { %14425 = vst [vmem:[#allocation28_spill] sm:$0xff] %v9054_v1 }
  0xd1   :  { %6344 = vmatmul.mubr.msk.bf16.gmra.mxu0 %vm8260_vm3, %v8954_v54  ;;  %v220_v54 = vrot.slane %v70_v57, 7 }
  0xd2   :  { %6523 = vmatmul.mubr.msk.bf16.gmra.mxu1 %vm8384_vm5, %v9004_v22  ;;  %1399 = vmatprep.mubr.bf16.mxu0 %v9006_v23  ;;  %v407_v23 = vrot.slane %v66_v31, 1  ;;  %v408_v22 = vrot.slane %v67_v44, 1  ;;  %v72_v44 = vld [vmem:[%s14157_s0 + $0x160] sm:$0xff] }
  0xd3   :  { %6527 = vmatprep.mubr.msk.bf16.mxu1 %vm8260_vm3, %v9008_v30  ;;  %v222_v31 = vsel %vm156_vm0, %v220_v54, %v221_v38 }
  0xd4   :  { %v409_v13 = vsel %vm349_vm4, %v407_v23, %v408_v22  ;;  %v9056_v56 = vpack.c.bf16 %v222_v31, %v220_v54  ;;  %v224_v23 = vrot.slane %v73_v58, 7 }
  0xd5   :  { %v9052_v39 = vpack.c.bf16 %v408_v22, %v409_v13  ;;  %v75_v22 = vld [vmem:[%s14157_s0 + $0x178] sm:$0xff]  ;;  %v9078_v13 = vpack.c.bf16 %v71_v60, %v70_v57 }
  0xd6   :  { %14426 = vst [vmem:[#allocation29_spill] sm:$0xff] %v9056_v56 }
  0xd7   :  { %14424 = vst [vmem:[#allocation27_spill] sm:$0xff] %v9052_v39  ;;  %14428 = vst [vmem:[#allocation31_spill] sm:$0xff] %v9078_v13 }
  0xd9   :  { %6348 = vmatmul.mubr.msk.bf16.gmra.mxu0 %vm8260_vm3, %v8985_v61  ;;  %v223_v61 = vrot.slane %v72_v44, 7 }
  0xda   :  { %6530 = vmatmul.mubr.msk.bf16.gmra.mxu1 %vm8384_vm5, %v9028_v21  ;;  %1407 = vmatprep.mubr.bf16.mxu0 %v9030_v4  ;;  %v410_v4 = vrot.slane %v68_v14, 1  ;;  %v411_v21 = vrot.slane %v69_v40, 1  ;;  %v74_v40 = vld [vmem:[%s14157_s0 + $0x170] sm:$0xff] }
  0xdb   :  { %6534 = vmatprep.mubr.msk.bf16.mxu1 %vm8260_vm3, %v9032_v59  ;;  %v225_v14 = vsel %vm156_vm0, %v223_v61, %v224_v23 }
  0xdc   :  { %v412_v54 = vsel %vm349_vm4, %v410_v4, %v411_v21  ;;  %v9080_v31 = vpack.c.bf16 %v225_v14, %v223_v61  ;;  %v227_v4 = vrot.slane %v75_v22, 7 }
  0xdd   :  { %v9076_v38 = vpack.c.bf16 %v411_v21, %v412_v54  ;;  %v77_v21 = vld [vmem:[%s14157_s0 + $0x188] sm:$0xff]  ;;  %v9102_v54 = vpack.c.bf16 %v73_v58, %v72_v44 }
  0xde   :  { %14429 = vst [vmem:[#allocation32_spill] sm:$0xff] %v9080_v31 }
  0xdf   :  { %14427 = vst [vmem:[#allocation30_spill] sm:$0xff] %v9076_v38  ;;  %14431 = vst [vmem:[#allocation34_spill] sm:$0xff] %v9102_v54 }
  0xe1   :  { %6352 = vmatmul.mubr.msk.bf16.gmra.mxu0 %vm8260_vm3, %v9008_v30  ;;  %v226_v30 = vrot.slane %v74_v40, 7 }
  0xe2   :  { %6537 = vmatmul.mubr.msk.bf16.gmra.mxu1 %vm8384_vm5, %v9052_v39  ;;  %1415 = vmatprep.mubr.bf16.mxu0 %v9054_v1  ;;  %v413_v1 = vrot.slane %v70_v57, 1  ;;  %v414_v39 = vrot.slane %v71_v60, 1  ;;  %v76_v60 = vld [vmem:[%s14157_s0 + $0x180] sm:$0xff] }
  0xe3   :  { %6541 = vmatprep.mubr.msk.bf16.mxu1 %vm8260_vm3, %v9056_v56  ;;  %v228_v57 = vsel %vm156_vm0, %v226_v30, %v227_v4 }
  0xe4   :  { %v415_v61 = vsel %vm349_vm4, %v413_v1, %v414_v39  ;;  %v9104_v14 = vpack.c.bf16 %v228_v57, %v226_v30  ;;  %v230_v1 = vrot.slane %v77_v21, 7 }
  0xe5   :  { %v9100_v23 = vpack.c.bf16 %v414_v39, %v415_v61  ;;  %v9124_v39 = vld [vmem:[%s14157_s0 + $0x198] sm:$0xff]  ;;  %v9128_v61 = vpack.c.bf16 %v75_v22, %v74_v40 }
  0xe6   :  { %14432 = vst [vmem:[#allocation35_spill] sm:$0xff] %v9104_v14 }
  0xe7   :  { %14430 = vst [vmem:[#allocation33_spill] sm:$0xff] %v9100_v23  ;;  %14434 = vst [vmem:[#allocation37_spill] sm:$0xff] %v9128_v61 }
  0xe9   :  { %6356 = vmatmul.mubr.msk.bf16.gmra.mxu0 %vm8260_vm3, %v9032_v59  ;;  %v229_v59 = vrot.slane %v76_v60, 7 }
  0xea   :  { %6544 = vmatmul.mubr.msk.bf16.gmra.mxu1 %vm8384_vm5, %v9076_v38  ;;  %1423 = vmatprep.mubr.bf16.mxu0 %v9078_v13  ;;  %v416_v13 = vrot.slane %v72_v44, 1  ;;  %v417_v38 = vrot.slane %v73_v58, 1  ;;  %v78_v58 = vld [vmem:[%s14157_s0 + $0x190] sm:$0xff] }
  0xeb   :  { %6548 = vmatprep.mubr.msk.bf16.mxu1 %vm8260_vm3, %v9080_v31  ;;  %v231_v44 = vsel %vm156_vm0, %v229_v59, %v230_v1  ;;  %v233_v1 = vrot.slane %v9124_v39, 7 }
  0xec   :  { %v418_v30 = vsel %vm349_vm4, %v416_v13, %v417_v38  ;;  %v9130_v57 = vpack.c.bf16 %v231_v44, %v229_v59  ;;  %v232_v13 = vrot.slane %v78_v58, 7  ;;  %v9157_v44 = vpack.c.bf16 %v77_v21, %v76_v60 }
  0xed   :  { %v9126_v4 = vpack.c.bf16 %v417_v38, %v418_v30  ;;  %v9153_v38 = vld [vmem:[%s14157_s0 + $0x1a8] sm:$0xff] }
  0xee   :  { %14436 = vst [vmem:[#allocation39_spill] sm:$0xff] %v9157_v44 }
  0xef   :  { %14433 = vst [vmem:[#allocation36_spill] sm:$0xff] %v9126_v4 }
  0xf1   :  { %6360 = vmatmul.mubr.msk.bf16.gmra.mxu0 %vm8260_vm3, %v9056_v56 }
  0xf2   :  { %6551 = vmatmul.mubr.msk.bf16.gmra.mxu1 %vm8384_vm5, %v9100_v23  ;;  %1431 = vmatprep.mubr.bf16.mxu0 %v9102_v54  ;;  %v419_v54 = vrot.slane %v74_v40, 1  ;;  %v420_v23 = vrot.slane %v75_v22, 1  ;;  %v234_v40 = vsel %vm156_vm0, %v232_v13, %v233_v1  ;;  %v9148_v22 = vld [vmem:[%s14157_s0 + $0x1a0] sm:$0xff] }
  0xf3   :  { %6555 = vmatprep.mubr.msk.bf16.mxu1 %vm8260_vm3, %v9104_v14  ;;  %v235_v1 = vrot.slane %v9148_v22, 7 }
  0xf4   :  { %v421_v59 = vsel %vm349_vm4, %v419_v54, %v420_v23  ;;  %v423_v54 = vrot.slane %v77_v21, 1 }
  0xf5   :  { %v9155_v30 = vpack.c.bf16 %v420_v23, %v421_v59 }
  0xf7   :  { %14435 = vst [vmem:[#allocation38_spill] sm:$0xff] %v9155_v30 }
  0xf9   :  { %6364 = vmatmul.mubr.msk.bf16.gmra.mxu0 %vm8260_vm3, %v9080_v31  ;;  %v236_v31 = vrot.slane %v9153_v38, 7 }
  0xfa   :  { %6558 = vmatmul.mubr.msk.bf16.gmra.mxu1 %vm8384_vm5, %v9126_v4  ;;  %1439 = vmatprep.mubr.bf16.mxu0 %v9128_v61  ;;  %v9159_v61 = vpack.c.bf16 %v234_v40, %v232_v13  ;;  %v422_v4 = vrot.slane %v76_v60, 1 }
  0xfb   :  { %6562 = vmatprep.mubr.msk.bf16.mxu1 %vm8260_vm3, %v9130_v57  ;;  %v237_v59 = vsel %vm156_vm0, %v235_v1, %v236_v31 }
  0xfc   :  { %14437 = vst [vmem:[#allocation40_spill] sm:$0xff] %v9159_v61  ;;  %v424_v21 = vsel %vm349_vm4, %v422_v4, %v423_v54 }
 0x101   :  { %v1249_v56 = vpop.f32.mrf.mxu0  ;;  %6368 = vmatmul.mubr.msk.bf16.gmra.mxu0 %vm8260_vm3, %v9104_v14  ;;  %v9180_v14 = vld [vmem:[%s14157_s0 + $0x1b0] sm:$0xff] }
 0x102   :  { %v1538_v29 = vpop.f32.mrf.mxu1  ;;  %6565 = vmatmul.mubr.msk.bf16.gmra.mxu1 %vm8384_vm5, %v9155_v30  ;;  %1447 = vmatprep.mubr.bf16.mxu0 %v9157_v44  ;;  %v425_v44 = vrot.slane %v78_v58, 1  ;;  %v426_v30 = vrot.slane %v9124_v39, 1  ;;  %v238_v55 = vrot.slane %v9180_v14, 7 }
 0x103   :  { %v9170_v23 = vadd.f32 %v1538_v29, %v1249_v56  ;;  %v1251_v60 = vpop.f32.mrf.mxu0  ;;  %6569 = vmatprep.mubr.msk.bf16.mxu1 %vm8260_vm3, %v9159_v61  ;;  %v9185_v29 = vld [vmem:[%s14157_s0 + $0x1b8] sm:$0xff] }
 0x104   :  { %v1540_v13 = vpop.f32.mrf.mxu1  ;;  %v9187_v60 = vpack.c.bf16 %v423_v54, %v424_v21  ;;  %v239_v45 = vrot.slane %v9185_v29, 7 }
 0x105   :  { %14438 = vst [vmem:[#allocation41_spill] sm:$0xff] %v9170_v23  ;;  %v1252_v40 = vpop.f32.mrf.mxu0  ;;  %v9190_v23 = vpack.c.bf16 %v9124_v39, %v78_v58  ;;  %v9194_v13 = vpack.c.bf16 %v237_v59, %v235_v1 }
 0x106   :  { %v1541_v56 = vpop.f32.mrf.mxu1  ;;  %14439 = vst [vmem:[#allocation42_spill] sm:$0xff] %v9187_v60  ;;  %v240_v21 = vsel %vm156_vm0, %v238_v55, %v239_v45 }
 0x107   :  { %14440 = vst [vmem:[#allocation43_spill] sm:$0xff] %v9190_v23  ;;  %v9192_v4 = vadd.f32 %v1541_v56, %v1252_v40  ;;  %v1254_v31 = vpop.f32.mrf.mxu0  ;;  %14442 = vst [vmem:[#allocation45_spill] sm:$0xff] %v9194_v13  ;;  %v9216_v40 = vld [vmem:[%s14157_s0 + $0x1c0] sm:$0xff] }
 0x108   :  { %v1543_v12 = vpop.f32.mrf.mxu1 }
 0x109   :  { %14441 = vst [vmem:[#allocation44_spill] sm:$0xff] %v9192_v4  ;;  %v1257_v43 = vpop.f32.mrf.mxu0  ;;  %6372 = vmatmul.mubr.msk.bf16.gmra.mxu0 %vm8260_vm3, %v9130_v57  ;;  %v427_v12 = vsel %vm349_vm4, %v425_v44, %v426_v30  ;;  %v9227_v44 = vpack.c.bf16 %v9153_v38, %v9148_v22 }
 0x10a   :  { %v1546_v54 = vpop.f32.mrf.mxu1  ;;  %6572 = vmatmul.mubr.msk.bf16.gmra.mxu1 %vm8384_vm5, %v9187_v60  ;;  %1455 = vmatprep.mubr.bf16.mxu0 %v9190_v23  ;;  %v9223_v31 = vpack.c.bf16 %v426_v30, %v427_v12  ;;  %v241_v23 = vrot.slane %v9216_v40, 7 }
 0x10b   :  { %v9206_v58 = vadd.f32 %v1546_v54, %v1257_v43  ;;  %v1259_v39 = vpop.f32.mrf.mxu0  ;;  %6576 = vmatprep.mubr.msk.bf16.mxu1 %vm8260_vm3, %v9194_v13  ;;  %v9221_v43 = vld [vmem:[%s14157_s0 + $0x1c8] sm:$0xff]  ;;  %14445 = vst [vmem:[#allocation48_spill] sm:$0xff] %v9227_v44 }
 0x10c   :  { %v1548_v1 = vpop.f32.mrf.mxu1  ;;  %14444 = vst [vmem:[#allocation47_spill] sm:$0xff] %v9223_v31  ;;  %v9231_v39 = vpack.c.bf16 %v240_v21, %v238_v55  ;;  %v242_v60 = vrot.slane %v9221_v43, 7 }
 0x10d   :  { %14443 = vst [vmem:[#allocation46_spill] sm:$0xff] %v9206_v58  ;;  %v1260_v59 = vpop.f32.mrf.mxu0  ;;  %v428_v1 = vrot.slane %v9148_v22, 1  ;;  %v429_v58 = vrot.slane %v9153_v38, 1 }
 0x10e   :  { %v1549_v56 = vpop.f32.mrf.mxu1  ;;  %14447 = vst [vmem:[#allocation50_spill] sm:$0xff] %v9231_v39  ;;  %v243_v21 = vsel %vm156_vm0, %v241_v23, %v242_v60 }
 0x10f   :  { %v9229_v54 = vadd.f32 %v1549_v56, %v1260_v59  ;;  %v1262_v45 = vpop.f32.mrf.mxu0  ;;  %v430_v38 = vsel %vm349_vm4, %v428_v1, %v429_v58  ;;  %v9254_v56 = vld [vmem:[%s14157_s0 + $0x1d0] sm:$0xff]  ;;  %v9265_v1 = vpack.c.bf16 %v9185_v29, %v9180_v14 }
 0x110   :  { %v1551_v4 = vpop.f32.mrf.mxu1  ;;  %v9259_v45 = vld [vmem:[%s14157_s0 + $0x1d8] sm:$0xff] }
 0x111   :  { %14446 = vst [vmem:[#allocation49_spill] sm:$0xff] %v9229_v54  ;;  %v1265_v30 = vpop.f32.mrf.mxu0  ;;  %6376 = vmatmul.mubr.msk.bf16.gmra.mxu0 %vm8260_vm3, %v9159_v61  ;;  %14450 = vst [vmem:[#allocation53_spill] sm:$0xff] %v9265_v1  ;;  %v432_v54 = vrot.slane %v9185_v29, 1  ;;  %v245_v61 = vrot.slane %v9259_v45, 7 }
 0x112   :  { %v1554_v12 = vpop.f32.mrf.mxu1  ;;  %6579 = vmatmul.mubr.msk.bf16.gmra.mxu1 %vm8384_vm5, %v9223_v31  ;;  %1463 = vmatprep.mubr.bf16.mxu0 %v9227_v44  ;;  %v244_v31 = vrot.slane %v9254_v56, 7 }
 0x113   :  { %v9244_v55 = vadd.f32 %v1554_v12, %v1265_v30  ;;  %v1267_v22 = vpop.f32.mrf.mxu0  ;;  %6583 = vmatprep.mubr.msk.bf16.mxu1 %vm8260_vm3, %v9231_v39  ;;  %v9261_v12 = vpack.c.bf16 %v429_v58, %v430_v38 }
 0x114   :  { %v1556_v4 = vpop.f32.mrf.mxu1 }
 0x115   :  { %14448 = vst [vmem:[#allocation51_spill] sm:$0xff] %v9244_v55  ;;  %v1268_v59 = vpop.f32.mrf.mxu0  ;;  %14449 = vst [vmem:[#allocation52_spill] sm:$0xff] %v9261_v12  ;;  %v9269_v4 = vpack.c.bf16 %v243_v21, %v241_v23  ;;  %v431_v55 = vrot.slane %v9180_v14, 1  ;;  %v246_v21 = vsel %vm156_vm0, %v244_v31, %v245_v61 }
 0x116   :  { %v1557_v30 = vpop.f32.mrf.mxu1 }
 0x117   :  { %v9267_v22 = vadd.f32 %v1557_v30, %v1268_v59  ;;  %v1270_v60 = vpop.f32.mrf.mxu0  ;;  %v433_v29 = vsel %vm349_vm4, %v431_v55, %v432_v54  ;;  %v9292_v30 = vld [vmem:[%s14157_s0 + $0x1e0] sm:$0xff]  ;;  %v9303_v55 = vpack.c.bf16 %v9221_v43, %v9216_v40 }
 0x118   :  { %v1559_v44 = vpop.f32.mrf.mxu1  ;;  %v9297_v60 = vld [vmem:[%s14157_s0 + $0x1e8] sm:$0xff] }
 0x119   :  { %14451 = vst [vmem:[#allocation54_spill] sm:$0xff] %v9267_v22  ;;  %v1273_v58 = vpop.f32.mrf.mxu0  ;;  %6380 = vmatmul.mubr.msk.bf16.gmra.mxu0 %vm8260_vm3, %v9194_v13  ;;  %14454 = vst [vmem:[#allocation57_spill] sm:$0xff] %v9303_v55  ;;  %v435_v22 = vrot.slane %v9221_v43, 1  ;;  %v248_v13 = vrot.slane %v9297_v60, 7 }
 0x11a   :  { %v1562_v38 = vpop.f32.mrf.mxu1  ;;  %6586 = vmatmul.mubr.msk.bf16.gmra.mxu1 %vm8384_vm5, %v9261_v12  ;;  %1471 = vmatprep.mubr.bf16.mxu0 %v9265_v1  ;;  %v247_v12 = vrot.slane %v9292_v30, 7 }
 0x11b   :  { %v9282_v14 = vadd.f32 %v1562_v38, %v1273_v58  ;;  %v1275_v23 = vpop.f32.mrf.mxu0  ;;  %6590 = vmatprep.mubr.msk.bf16.mxu1 %vm8260_vm3, %v9269_v4  ;;  %v9299_v38 = vpack.c.bf16 %v432_v54, %v433_v29 }
 0x11c   :  { %v1564_v44 = vpop.f32.mrf.mxu1 }
 0x11d   :  { %14452 = vst [vmem:[#allocation55_spill] sm:$0xff] %v9282_v14  ;;  %v1276_v59 = vpop.f32.mrf.mxu0  ;;  %14453 = vst [vmem:[#allocation56_spill] sm:$0xff] %v9299_v38  ;;  %v9307_v44 = vpack.c.bf16 %v246_v21, %v244_v31  ;;  %v434_v14 = vrot.slane %v9216_v40, 1  ;;  %v249_v21 = vsel %vm156_vm0, %v247_v12, %v248_v13 }
 0x11e   :  { %v1565_v58 = vpop.f32.mrf.mxu1 }
 0x11f   :  { %v9305_v23 = vadd.f32 %v1565_v58, %v1276_v59  ;;  %v1278_v61 = vpop.f32.mrf.mxu0  ;;  %v436_v31 = vsel %vm349_vm4, %v434_v14, %v435_v22  ;;  %v9330_v58 = vld [vmem:[%s14157_s0 + $0x1f0] sm:$0xff]  ;;  %v9341_v14 = vpack.c.bf16 %v9259_v45, %v9254_v56 }
 0x120   :  { %v1567_v1 = vpop.f32.mrf.mxu1  ;;  %14457 = vst [vmem:[#allocation60_spill] sm:$0xff] %v9330_v58  ;;  %v9335_v61 = vld [vmem:[%s14157_s0 + $0x1f8] sm:$0xff] }
 0x121   :  { %14455 = vst [vmem:[#allocation58_spill] sm:$0xff] %v9305_v23  ;;  %v1281_v54 = vpop.f32.mrf.mxu0  ;;  %6384 = vmatmul.mubr.msk.bf16.gmra.mxu0 %vm8260_vm3, %v9231_v39  ;;  %14458 = vst [vmem:[#allocation61_spill] sm:$0xff] %v9335_v61  ;;  %v438_v23 = vrot.slane %v9259_v45, 1  ;;  %v251_v39 = vrot.slane %v9335_v61, 7  ;;  %v9369_v61 = vpack.c.bf16 %v9297_v60, %v9292_v30 }
 0x122   :  { %v1570_v29 = vpop.f32.mrf.mxu1  ;;  %6593 = vmatmul.mubr.msk.bf16.gmra.mxu1 %vm8384_vm5, %v9299_v38  ;;  %1479 = vmatprep.mubr.bf16.mxu0 %v9303_v55  ;;  %v250_v38 = vrot.slane %v9330_v58, 7 }
 0x123   :  { %v9320_v40 = vadd.f32 %v1570_v29, %v1281_v54  ;;  %v1283_v43 = vpop.f32.mrf.mxu0  ;;  %6597 = vmatprep.mubr.msk.bf16.mxu1 %vm8260_vm3, %v9307_v44  ;;  %v9337_v29 = vpack.c.bf16 %v435_v22, %v436_v31 }
 0x124   :  { %v1572_v1 = vpop.f32.mrf.mxu1 }
 0x125   :  { %14456 = vst [vmem:[#allocation59_spill] sm:$0xff] %v9320_v40  ;;  %v1284_v59 = vpop.f32.mrf.mxu0  ;;  %v9345_v1 = vpack.c.bf16 %v249_v21, %v247_v12  ;;  %v437_v40 = vrot.slane %v9254_v56, 1  ;;  %v252_v21 = vsel %vm156_vm0, %v250_v38, %v251_v39 }
 0x126   :  { %v1573_v54 = vpop.f32.mrf.mxu1 }
 0x127   :  { %v9343_v43 = vadd.f32 %v1573_v54, %v1284_v59  ;;  %v1286_v13 = vpop.f32.mrf.mxu0  ;;  %v439_v12 = vsel %vm349_vm4, %v437_v40, %v438_v23  ;;  %v441_v40 = vrot.slane %v9297_v60, 1 }
 0x128   :  { %v1575_v55 = vpop.f32.mrf.mxu1  ;;  %v9365_v13 = vpack.c.bf16 %v438_v23, %v439_v12 }
 0x129   :  { %v1289_v22 = vpop.f32.mrf.mxu0  ;;  %6388 = vmatmul.mubr.msk.bf16.gmra.mxu0 %vm8260_vm3, %v9269_v4 }
 0x12a   :  { %v1578_v31 = vpop.f32.mrf.mxu1  ;;  %6600 = vmatmul.mubr.msk.bf16.gmra.mxu1 %vm8384_vm5, %v9337_v29  ;;  %1487 = vmatprep.mubr.bf16.mxu0 %v9341_v14 }
 0x12b   :  { %v9358_v56 = vadd.f32 %v1578_v31, %v1289_v22  ;;  %v1291_v45 = vpop.f32.mrf.mxu0  ;;  %6604 = vmatprep.mubr.msk.bf16.mxu1 %vm8260_vm3, %v9345_v1 }
 0x12c   :  { %v1580_v55 = vpop.f32.mrf.mxu1  ;;  %v9373_v45 = vpack.c.bf16 %v252_v21, %v250_v38 }
 0x12d   :  { %14459 = vst [vmem:[#allocation62_spill] sm:$0xff] %v9358_v56  ;;  %v1292_v59 = vpop.f32.mrf.mxu0  ;;  %v440_v56 = vrot.slane %v9292_v30, 1 }
 0x12e   :  { %v1581_v54 = vpop.f32.mrf.mxu1 }
 0x12f   :  { %v9371_v22 = vadd.f32 %v1581_v54, %v1292_v59  ;;  %v1294_v31 = vpop.f32.mrf.mxu0  ;;  %v442_v30 = vsel %vm349_vm4, %v440_v56, %v441_v40 }
 0x130   :  { %v1583_v55 = vpop.f32.mrf.mxu1  ;;  %v9390_v59 = vpack.c.bf16 %v441_v40, %v442_v30 }
 0x131   :  { %14460 = vst [vmem:[#allocation63_spill] sm:$0xff] %v9371_v22  ;;  %v1297_v58 = vpop.f32.mrf.mxu0  ;;  %6392 = vmatmul.mubr.msk.bf16.gmra.mxu0 %vm8260_vm3, %v9307_v44 }
 0x132   :  { %v1586_v39 = vpop.f32.mrf.mxu1  ;;  %6607 = vmatmul.mubr.msk.bf16.gmra.mxu1 %vm8384_vm5, %v9365_v13  ;;  %1495 = vmatprep.mubr.bf16.mxu0 %v9369_v61 }
 0x133   :  { %v9384_v23 = vadd.f32 %v1586_v39, %v1297_v58  ;;  %v1299_v38 = vpop.f32.mrf.mxu0  ;;  %6611 = vmatprep.mubr.msk.bf16.mxu1 %vm8260_vm3, %v9373_v45 }
 0x134   :  { %v1588_v60 = vpop.f32.mrf.mxu1 }
 0x135   :  { %v1300_v12 = vpop.f32.mrf.mxu0 }
 0x136   :  { %v1589_v21 = vpop.f32.mrf.mxu1 }
 0x137   :  { %v9392_v54 = vadd.f32 %v1589_v21, %v1300_v12  ;;  %v1302_v31 = vpop.f32.mrf.mxu0 }
 0x138   :  { %v1591_v55 = vpop.f32.mrf.mxu1  ;;  %v7948_v31 = vld [vmem:[%s14158_s1 + $0x230] sm:$0xff]  }
 0x139   :  { %v1305_v22 = vpop.f32.mrf.mxu0  ;;  %6396 = vmatmul.mubr.msk.bf16.gmra.mxu0 %vm8260_vm3, %v9345_v1 }
 0x13a   :  { %v1594_v58 = vpop.f32.mrf.mxu1  ;;  %6614 = vmatmul.mubr.msk.bf16.gmra.mxu1 %vm8384_vm5, %v9390_v59  ;;  %6617 = vmatprep.mubr.msk.bf16.mxu0 %vm8384_vm5, %v8391_v2 }
 0x13b   :  { %v9403_v56 = vadd.f32 %v1594_v58, %v1305_v22  ;;  %v1307_v40 = vpop.f32.mrf.mxu0  ;;  %2114 = vmatprep.mubr.bf16.mxu1 %v8395_v3 }
 0x13c   :  { %v1596_v39 = vpop.f32.mrf.mxu1 }
 0x13d   :  { %v1308_v38 = vpop.f32.mrf.mxu0 }
 0x13e   :  { %v1597_v30 = vpop.f32.mrf.mxu1 }
 0x13f   :  { %v9406_v60 = vadd.f32 %v1597_v30, %v1308_v38  ;;  %v1310_v12 = vpop.f32.mrf.mxu0 }
 0x140   :  { %v1599_v21 = vpop.f32.mrf.mxu1  ;;  %v7950_v12 = vld [vmem:[%s14158_s1 + $0x220] sm:$0xff]  }
 0x141   :  { %v1313_v55 = vpop.f32.mrf.mxu0  ;;  %1826 = vmatmul.mubr.bf16.vlgmr.msra.gmra.mxu0 %v8348_v50  ;;  %v7949_v50 = vld [vmem:[%s14158_s1 + $0x228] sm:$0xff]  }
 0x142   :  { %v1602_v2 = vpop.f32.mrf.mxu1  ;;  %7718 = vmatpush3.bf16.msra.mxu0 %v8970_v28  ;;  %6714 = vmatmul.mubr.msk.bf16.vlgmr.msra.gmra.mxu1 %vm8260_vm3, %v8350_v51 }
 0x143   :  { %v9416_v22 = vadd.f32 %v1602_v2, %v1313_v55  ;;  %v1315_v58 = vpop.f32.mrf.mxu0  ;;  %6620 = vmatprep.mubr.msk.bf16.mxu0 %vm8384_vm5, %v8437_v18  ;;  %2122 = vmatprep.mubr.bf16.mxu1 %v8441_v19 }
 0x144   :  { %v1604_v40 = vpop.f32.mrf.mxu1  ;;  %7719 = vmatprep.subr.bf16.mxu0 %v7948_v31 }
 0x145   :  { %v1316_v28 = vpop.f32.mrf.mxu0 }
 0x146   :  { %v1605_v39 = vpop.f32.mrf.mxu1  ;;  %7720 = vmatpush3.bf16.msra.mxu0 %v7948_v31 }
 0x147   :  { %v9425_v38 = vadd.f32 %v1605_v39, %v1316_v28  ;;  %v1318_v51 = vpop.f32.mrf.mxu0  ;;  %7721 = vmatprep.subr.bf16.mxu0 %v7949_v50 }
 0x148   :  { %v1607_v30 = vpop.f32.mrf.mxu1 }
 0x149   :  { %v1321_v21 = vpop.f32.mrf.mxu0  ;;  %1834 = vmatmul.mubr.bf16.gmra.mxu0 %v8395_v3  ;;  %v7951_v3 = vld [vmem:[%s14158_s1 + $0x218] sm:$0xff]  }
 0x14a   :  { %v1610_v55 = vpop.f32.mrf.mxu1  ;;  %6718 = vmatmul.mubr.msk.bf16.gmra.mxu1 %vm8260_vm3, %v8406_v8  ;;  %6623 = vmatprep.mubr.msk.bf16.mxu0 %vm8384_vm5, %v8483_v33 }
 0x14b   :  { %v9437_v31 = vadd.f32 %v1610_v55, %v1321_v21  ;;  %v1323_v2 = vpop.f32.mrf.mxu0  ;;  %2130 = vmatprep.mubr.bf16.mxu1 %v8487_v34  ;;  %7722 = vmatpush3.bf16.msra.mxu0 %v7949_v50 }
 0x14c   :  { %v1612_v58 = vpop.f32.mrf.mxu1  ;;  %7723 = vmatprep.subr.bf16.mxu0 %v7950_v12 }
 0x14d   :  { %v1324_v40 = vpop.f32.mrf.mxu0 }
 0x14e   :  { %v1613_v28 = vpop.f32.mrf.mxu1 }
 0x14f   :  { %v9443_v39 = vadd.f32 %v1613_v28, %v1324_v40  ;;  %v1326_v8 = vpop.f32.mrf.mxu0  ;;  %7724 = vmatpush3.bf16.msra.mxu0 %v7950_v12 }
 0x150   :  { %v1615_v51 = vpop.f32.mrf.mxu1  ;;  %7725 = vmatprep.subr.bf16.mxu0 %v7951_v3 }
 0x151   :  { %v1329_v30 = vpop.f32.mrf.mxu0  ;;  %1842 = vmatmul.mubr.bf16.gmra.mxu0 %v8441_v19 }
 0x152   :  { %v1618_v21 = vpop.f32.mrf.mxu1  ;;  %6722 = vmatmul.mubr.msk.bf16.gmra.mxu1 %vm8260_vm3, %v8443_v20  ;;  %6626 = vmatprep.mubr.msk.bf16.mxu0 %vm8384_vm5, %v8525_v46 }
 0x153   :  { %v9452_v50 = vadd.f32 %v1618_v21, %v1329_v30  ;;  %v1331_v55 = vpop.f32.mrf.mxu0  ;;  %2138 = vmatprep.mubr.bf16.mxu1 %v8529_v47  ;;  %7726 = vmatpush3.bf16.msra.mxu0 %v7951_v3 }
 0x154   :  { %v1620_v12 = vpop.f32.mrf.mxu1 }
 0x155   :  { %v1332_v2 = vpop.f32.mrf.mxu0 }
 0x156   :  { %v1621_v58 = vpop.f32.mrf.mxu1 }
 0x157   :  { %v9455_v40 = vadd.f32 %v1621_v58, %v1332_v2  ;;  %v1334_v19 = vpop.f32.mrf.mxu0 }
 0x158   :  { %v1623_v28 = vpop.f32.mrf.mxu1 }
 0x159   :  { %v1337_v8 = vpop.f32.mrf.mxu0  ;;  %1850 = vmatmul.mubr.bf16.gmra.mxu0 %v8487_v34 }
 0x15a   :  { %v1626_v20 = vpop.f32.mrf.mxu1  ;;  %6726 = vmatmul.mubr.msk.bf16.gmra.mxu1 %vm8260_vm3, %v8494_v36  ;;  %6629 = vmatprep.mubr.msk.bf16.mxu0 %vm8384_vm5, %v8571_v63 }
 0x15b   :  { %v9464_v3 = vadd.f32 %v1626_v20, %v1337_v8  ;;  %v1339_v51 = vpop.f32.mrf.mxu0  ;;  %2146 = vmatprep.mubr.bf16.mxu1 %v8575_v0  ;;  %v7952_v8 = vld [vmem:[%s14158_s1 + $0x210] sm:$0xff]  }
 0x15c   :  { %v1628_v30 = vpop.f32.mrf.mxu1  ;;  %7727 = vmatprep.subr.bf16.mxu0 %v7952_v8 }
 0x15d   :  { %v1340_v21 = vpop.f32.mrf.mxu0  ;;  %7728 = vmatpush3.bf16.msra.mxu0 %v7952_v8 }
 0x15e   :  { %v1629_v55 = vpop.f32.mrf.mxu1 }
 0x15f   :  { %v9467_v12 = vadd.f32 %v1629_v55, %v1340_v21  ;;  %v1342_v34 = vpop.f32.mrf.mxu0 }
 0x160   :  { %v1631_v2 = vpop.f32.mrf.mxu1 }
 0x161   :  { %v1345_v58 = vpop.f32.mrf.mxu0  ;;  %1858 = vmatmul.mubr.bf16.gmra.mxu0 %v8529_v47 }
 0x162   :  { %v1634_v36 = vpop.f32.mrf.mxu1  ;;  %6730 = vmatmul.mubr.msk.bf16.gmra.mxu1 %vm8260_vm3, %v8531_v48  ;;  %6632 = vmatprep.mubr.msk.bf16.mxu0 %vm8384_vm5, %v8604_v15 }
 0x163   :  { %v9476_v19 = vadd.f32 %v1634_v36, %v1345_v58  ;;  %v1347_v28 = vpop.f32.mrf.mxu0  ;;  %2154 = vmatprep.mubr.bf16.mxu1 %v8608_v16 }
 0x164   :  { %v1636_v20 = vpop.f32.mrf.mxu1 }
 0x165   :  { %v1348_v47 = vpop.f32.mrf.mxu0 }
 0x166   :  { %v1637_v51 = vpop.f32.mrf.mxu1 }
 0x167   :  { %v9482_v30 = vadd.f32 %v1637_v51, %v1348_v47  ;;  %v1350_v48 = vpop.f32.mrf.mxu0 }
 0x168   :  { %v1639_v21 = vpop.f32.mrf.mxu1 }
 0x169   :  { %v1353_v55 = vpop.f32.mrf.mxu0  ;;  %1866 = vmatmul.mubr.bf16.gmra.mxu0 %v8575_v0 }
 0x16a   :  { %v1642_v34 = vpop.f32.mrf.mxu1  ;;  %6734 = vmatmul.mubr.msk.bf16.gmra.mxu1 %vm8260_vm3, %v8577_v5  ;;  %6635 = vmatprep.mubr.msk.bf16.mxu0 %vm8384_vm5, %v8643_v32 }
 0x16b   :  { %v9491_v2 = vadd.f32 %v1642_v34, %v1353_v55  ;;  %v1355_v58 = vpop.f32.mrf.mxu0  ;;  %2162 = vmatprep.mubr.bf16.mxu1 %v8647_v35 }
 0x16c   :  { %v1644_v36 = vpop.f32.mrf.mxu1 }
 0x16d   :  { %v1356_v28 = vpop.f32.mrf.mxu0 }
 0x16e   :  { %v1645_v8 = vpop.f32.mrf.mxu1 }
 0x16f   :  { %v9494_v20 = vadd.f32 %v1645_v8, %v1356_v28  ;;  %v1358_v0 = vpop.f32.mrf.mxu0 }
 0x170   :  { %v1647_v47 = vpop.f32.mrf.mxu1 }
 0x171   :  { %v1361_v51 = vpop.f32.mrf.mxu0  ;;  %1874 = vmatmul.mubr.bf16.gmra.mxu0 %v8608_v16 }
 0x172   :  { %v1650_v5 = vpop.f32.mrf.mxu1  ;;  %6738 = vmatmul.mubr.msk.bf16.gmra.mxu1 %vm8260_vm3, %v8610_v17  ;;  %6638 = vmatprep.mubr.msk.bf16.mxu0 %vm8384_vm5, %v8670_v49 }
 0x173   :  { %v9503_v48 = vadd.f32 %v1650_v5, %v1361_v51  ;;  %v1363_v21 = vpop.f32.mrf.mxu0  ;;  %2170 = vmatprep.mubr.bf16.mxu1 %v8673_v52 }
 0x174   :  { %v1652_v55 = vpop.f32.mrf.mxu1 }
 0x175   :  { %v1364_v34 = vpop.f32.mrf.mxu0 }
 0x176   :  { %v1653_v58 = vpop.f32.mrf.mxu1 }
 0x177   :  { %v9506_v36 = vadd.f32 %v1653_v58, %v1364_v34  ;;  %v1366_v16 = vpop.f32.mrf.mxu0 }
 0x178   :  { %v1655_v28 = vpop.f32.mrf.mxu1  ;;  %v7953_v16 = vld [vmem:[%s14158_s1 + $0x208] sm:$0xff]  }
 0x179   :  { %14461 = vst [vmem:[#allocation64_spill] sm:$0xff] %v9506_v36  ;;  %v1369_v8 = vpop.f32.mrf.mxu0  ;;  %1882 = vmatmul.mubr.bf16.gmra.mxu0 %v8647_v35  ;;  %7729 = vmatprep.subr.bf16.mxu0 %v7953_v16  ;;  %v14485_v36 = vld [vmem:[#allocation14_spill] sm:$0xff] }
 0x17a   :  { %v1658_v17 = vpop.f32.mrf.mxu1  ;;  %6742 = vmatmul.mubr.msk.bf16.gmra.mxu1 %vm8260_vm3, %v8649_v37  ;;  %6641 = vmatprep.mubr.msk.bf16.mxu0 %vm8384_vm5, %v8702_v6 }
 0x17b   :  { %v9515_v0 = vadd.f32 %v1658_v17, %v1369_v8  ;;  %v1371_v47 = vpop.f32.mrf.mxu0  ;;  %2178 = vmatprep.mubr.bf16.mxu1 %v8705_v7  ;;  %7730 = vmatpush3.bf16.msra.mxu0 %v7953_v16 }
 0x17c   :  { %v1660_v51 = vpop.f32.mrf.mxu1 }
 0x17d   :  { %14462 = vst [vmem:[#allocation65_spill] sm:$0xff] %v9515_v0  ;;  %v1372_v5 = vpop.f32.mrf.mxu0 }
 0x17e   :  { %v1661_v21 = vpop.f32.mrf.mxu1 }
 0x17f   :  { %v9518_v55 = vadd.f32 %v1661_v21, %v1372_v5  ;;  %v1374_v35 = vpop.f32.mrf.mxu0 }
 0x180   :  { %v1663_v34 = vpop.f32.mrf.mxu1 }
 0x181   :  { %14463 = vst [vmem:[#allocation66_spill] sm:$0xff] %v9518_v55  ;;  %v1377_v58 = vpop.f32.mrf.mxu0  ;;  %1890 = vmatmul.mubr.bf16.gmra.mxu0 %v8673_v52 }
 0x182   :  { %v1666_v37 = vpop.f32.mrf.mxu1  ;;  %6746 = vmatmul.mubr.msk.bf16.gmra.mxu1 %vm8260_vm3, %v8675_v53  ;;  %6644 = vmatprep.mubr.msk.bf16.mxu0 %vm8384_vm5, %v8734_v24 }
 0x183   :  { %v9530_v28 = vadd.f32 %v1666_v37, %v1377_v58  ;;  %v1379_v8 = vpop.f32.mrf.mxu0  ;;  %2186 = vmatprep.mubr.bf16.mxu1 %v8736_v25 }
 0x184   :  { %v1668_v17 = vpop.f32.mrf.mxu1 }
 0x185   :  { %14464 = vst [vmem:[#allocation67_spill] sm:$0xff] %v9530_v28  ;;  %v1380_v52 = vpop.f32.mrf.mxu0 }
 0x186   :  { %v1669_v47 = vpop.f32.mrf.mxu1 }
 0x187   :  { %v9533_v51 = vadd.f32 %v1669_v47, %v1380_v52  ;;  %v1382_v53 = vpop.f32.mrf.mxu0 }
 0x188   :  { %v1671_v5 = vpop.f32.mrf.mxu1 }
 0x189   :  { %14465 = vst [vmem:[#allocation68_spill] sm:$0xff] %v9533_v51  ;;  %v1385_v21 = vpop.f32.mrf.mxu0  ;;  %1898 = vmatmul.mubr.bf16.gmra.mxu0 %v8705_v7 }
 0x18a   :  { %v1674_v35 = vpop.f32.mrf.mxu1  ;;  %6750 = vmatmul.mubr.msk.bf16.gmra.mxu1 %vm8260_vm3, %v8708_v9  ;;  %6647 = vmatprep.mubr.msk.bf16.mxu0 %vm8384_vm5, %v8766_v41 }
 0x18b   :  { %v9542_v34 = vadd.f32 %v1674_v35, %v1385_v21  ;;  %v1387_v58 = vpop.f32.mrf.mxu0  ;;  %2194 = vmatprep.mubr.bf16.mxu1 %v8769_v42 }
 0x18c   :  { %v1676_v37 = vpop.f32.mrf.mxu1 }
 0x18d   :  { %14466 = vst [vmem:[#allocation69_spill] sm:$0xff] %v9542_v34  ;;  %v1388_v16 = vpop.f32.mrf.mxu0  ;;  %v14481_v34 = vld [vmem:[#allocation11_spill] sm:$0xff] }
 0x18e   :  { %v1677_v8 = vpop.f32.mrf.mxu1 }
 0x18f   :  { %v9545_v17 = vadd.f32 %v1677_v8, %v1388_v16  ;;  %v1390_v7 = vpop.f32.mrf.mxu0 }
 0x190   :  { %v1679_v52 = vpop.f32.mrf.mxu1  ;;  %v14470_v7 = vld [vmem:[#allocation7_spill] sm:$0xff] }
 0x191   :  { %14467 = vst [vmem:[#allocation70_spill] sm:$0xff] %v9545_v17  ;;  %v1393_v47 = vpop.f32.mrf.mxu0  ;;  %1906 = vmatmul.mubr.bf16.gmra.mxu0 %v8736_v25  ;;  %v14471_v52 = vld [vmem:[#allocation9_spill] sm:$0xff] }
 0x192   :  { %v1682_v9 = vpop.f32.mrf.mxu1  ;;  %6754 = vmatmul.mubr.msk.bf16.gmra.mxu1 %vm8260_vm3, %v8738_v26  ;;  %6650 = vmatprep.mubr.msk.bf16.mxu0 %vm8384_vm5, %v8806_v10 }
 0x193   :  { %v9554_v53 = vadd.f32 %v1682_v9, %v1393_v47  ;;  %v1395_v5 = vpop.f32.mrf.mxu0  ;;  %2202 = vmatprep.mubr.bf16.mxu1 %v8809_v11 }
 0x194   :  { %v1684_v21 = vpop.f32.mrf.mxu1  ;;  %v14473_v5 = vld [vmem:[#allocation10_spill] sm:$0xff] }
 0x195   :  { %14468 = vst [vmem:[#allocation71_spill] sm:$0xff] %v9554_v53  ;;  %v1396_v35 = vpop.f32.mrf.mxu0  ;;  %v14475_v53 = vld [vmem:[#allocation8_spill] sm:$0xff] }
 0x196   :  { %v1685_v58 = vpop.f32.mrf.mxu1 }
 0x197   :  { %v9557_v37 = vadd.f32 %v1685_v58, %v1396_v35  ;;  %v1398_v25 = vpop.f32.mrf.mxu0 }
 0x198   :  { %v1687_v16 = vpop.f32.mrf.mxu1 }
 0x199   :  { %14469 = vst [vmem:[#allocation72_spill] sm:$0xff] %v9557_v37  ;;  %v1401_v8 = vpop.f32.mrf.mxu0  ;;  %1914 = vmatmul.mubr.bf16.gmra.mxu0 %v8769_v42 }
 0x19a   :  { %v1690_v26 = vpop.f32.mrf.mxu1  ;;  %6758 = vmatmul.mubr.msk.bf16.gmra.mxu1 %vm8260_vm3, %v14470_v7  ;;  %6653 = vmatprep.mubr.msk.bf16.mxu0 %vm8384_vm5, %v14471_v52 }
 0x19b   :  { %v9566_v47 = vadd.f32 %v1690_v26, %v1401_v8  ;;  %v1403_v9 = vpop.f32.mrf.mxu0  ;;  %2210 = vmatprep.mubr.bf16.mxu1 %v14473_v5  ;;  %v14476_v8 = vld [vmem:[#allocation12_spill] sm:$0xff]  ;;  %v7954_v26 = vld [vmem:[%s14158_s1 + $0x200] sm:$0xff]  }
 0x19c   :  { %v1692_v21 = vpop.f32.mrf.mxu1  ;;  %7731 = vmatprep.subr.bf16.mxu0 %v7954_v26 }
 0x19d   :  { %14472 = vst [vmem:[#allocation7_spill] sm:$0xff] %v9566_v47  ;;  %v1404_v35 = vpop.f32.mrf.mxu0  ;;  %7732 = vmatpush3.bf16.msra.mxu0 %v7954_v26  ;;  %v8031_v47 = vld [vmem:[%s14157_s0 + $0xf0] sm:$0xff] }
 0x19e   :  { %v1693_v58 = vpop.f32.mrf.mxu1 }
 0x19f   :  { %v9569_v25 = vadd.f32 %v1693_v58, %v1404_v35  ;;  %v1406_v42 = vpop.f32.mrf.mxu0  ;;  %v14478_v35 = vld [vmem:[#allocation13_spill] sm:$0xff] }
 0x1a0   :  { %v1695_v16 = vpop.f32.mrf.mxu1 }
 0x1a1   :  { %14474 = vst [vmem:[#allocation9_spill] sm:$0xff] %v9569_v25  ;;  %v1409_v37 = vpop.f32.mrf.mxu0  ;;  %1922 = vmatmul.mubr.bf16.gmra.mxu0 %v8809_v11  ;;  %v14479_v16 = vmov 0  }
 0x1a2   :  { %v1698_v7 = vpop.f32.mrf.mxu1  ;;  %6762 = vmatmul.mubr.msk.bf16.gmra.mxu1 %vm8260_vm3, %v14475_v53  ;;  %6656 = vmatprep.mubr.msk.bf16.mxu0 %vm8384_vm5, %v14476_v8 }
 0x1a3   :  { %v9581_v9 = vadd.f32 %v1698_v7, %v1409_v37  ;;  %v1411_v21 = vpop.f32.mrf.mxu0  ;;  %2218 = vmatprep.mubr.bf16.mxu1 %v14478_v35  ;;  %4487 = vmatprep.subr.bf16.mxu0 %v14479_v16  ;;  %v8032_v37 = vld [vmem:[%s14157_s0 + $0xf8] sm:$0xff] }
 0x1a4   :  { %v1700_v58 = vpop.f32.mrf.mxu1  ;;  %v589_v7 = vpack.c.bf16 %v8032_v37, %v8031_v47  ;;  %v395_v21 = vrot.slane %v8031_v47, 1 }
 0x1a5   :  { %14477 = vst [vmem:[#allocation10_spill] sm:$0xff] %v9581_v9  ;;  %v1412_v11 = vpop.f32.mrf.mxu0  ;;  %v396_v58 = vrot.slane %v8032_v37, 1 }
 0x1a6   :  { %v1701_v42 = vpop.f32.mrf.mxu1 }
 0x1a7   :  { %v9585_v53 = vadd.f32 %v1701_v42, %v1412_v11  ;;  %v1414_v25 = vpop.f32.mrf.mxu0  ;;  %v397_v47 = vsel %vm349_vm4, %v395_v21, %v396_v58 }
 0x1a8   :  { %v1703_v9 = vpop.f32.mrf.mxu1  ;;  %v14482_v25 = vld [vmem:[#allocation15_spill] sm:$0xff]  ;;  %v9603_v51 = vpack.c.bf16 %v396_v58, %v397_v47  ;;  %v14487_v58 = vmov 0.0|0.0  }
 0x1a9   :  { %14480 = vst [vmem:[#allocation8_spill] sm:$0xff] %v9585_v53  ;;  %v1417_v17 = vpop.f32.mrf.mxu0  ;;  %1930 = vmatmul.mubr.bf16.gmra.mxu0 %v14473_v5 }
 0x1aa   :  { %v1706_v26 = vpop.f32.mrf.mxu1  ;;  %6766 = vmatmul.mubr.msk.bf16.gmra.mxu1 %vm8260_vm3, %v14481_v34  ;;  %6659 = vmatprep.mubr.msk.bf16.mxu0 %vm8384_vm5, %v14482_v25 }
 0x1ab   :  { %v9600_v11 = vadd.f32 %v1706_v26, %v1417_v17  ;;  %v1419_v42 = vpop.f32.mrf.mxu0  ;;  %2226 = vmatprep.mubr.bf16.mxu1 %v589_v7 }
 0x1ac   :  { %v1708_v37 = vpop.f32.mrf.mxu1 }
 0x1ad   :  { %14483 = vst [vmem:[#allocation12_spill] sm:$0xff] %v9600_v11  ;;  %v1420_v9 = vpop.f32.mrf.mxu0  ;;  %v14504_v11 = vld [vmem:[#allocation23_spill] sm:$0xff] }
 0x1ae   :  { %v1709_v53 = vpop.f32.mrf.mxu1 }
 0x1af   :  { %v9605_v5 = vadd.f32 %v1709_v53, %v1420_v9  ;;  %v1422_v28 = vpop.f32.mrf.mxu0 }
 0x1b0   :  { %v1711_v55 = vpop.f32.mrf.mxu1 }
 0x1b1   :  { %14484 = vst [vmem:[#allocation13_spill] sm:$0xff] %v9605_v5  ;;  %v1425_v34 = vpop.f32.mrf.mxu0  ;;  %1938 = vmatmul.mubr.bf16.gmra.mxu0 %v14478_v35  ;;  %v14494_v5 = vld [vmem:[#allocation17_spill] sm:$0xff] }
 0x1b2   :  { %v1714_v0 = vpop.f32.mrf.mxu1  ;;  %6770 = vmatmul.mubr.msk.bf16.gmra.mxu1 %vm8260_vm3, %v14485_v36  ;;  %6662 = vmatprep.mubr.msk.bf16.mxu0 %vm8384_vm5, %v9603_v51  ;;  %v14489_v36 = vld [vmem:[#allocation18_spill] sm:$0xff] }
 0x1b3   :  { %v9614_v17 = vadd.f32 %v1714_v0, %v1425_v34  ;;  %v1427_v21 = vpop.f32.mrf.mxu0  ;;  %2234 = vmatprep.mubr.bf16.mxu1 %v14487_v58  ;;  %v14491_v34 = vld [vmem:[#allocation19_spill] sm:$0xff] }
 0x1b4   :  { %v1716_v53 = vpop.f32.mrf.mxu1 }
 0x1b5   :  { %14486 = vst [vmem:[#allocation11_spill] sm:$0xff] %v9614_v17  ;;  %v1428_v28 = vpop.f32.mrf.mxu0 }
 0x1b6   :  { %v1717_v55 = vpop.f32.mrf.mxu1 }
 0x1b7   :  { %v9617_v26 = vadd.f32 %v1717_v55, %v1428_v28  ;;  %v1430_v35 = vpop.f32.mrf.mxu0 }
 0x1b8   :  { %v1719_v42 = vpop.f32.mrf.mxu1 }
 0x1b9   :  { %14488 = vst [vmem:[#allocation15_spill] sm:$0xff] %v9617_v26  ;;  %v1433_v47 = vpop.f32.mrf.mxu0  ;;  %1946 = vmatmul.mubr.bf16.gmra.mxu0 %v589_v7  ;;  %v14493_v26 = vld [vmem:[#allocation16_spill] sm:$0xff] }
 0x1ba   :  { %v1722_v37 = vpop.f32.mrf.mxu1  ;;  %2235 = vmatmul.mubr.bf16.gmra.mxu1 %v14487_v58  ;;  %6665 = vmatprep.mubr.msk.bf16.mxu0 %vm8384_vm5, %v14489_v36 }
 0x1bb   :  { %v9623_v0 = vadd.f32 %v1722_v37, %v1433_v47  ;;  %v1435_v9 = vpop.f32.mrf.mxu0  ;;  %2242 = vmatprep.mubr.bf16.mxu1 %v14491_v34  ;;  %v14495_v47 = vld [vmem:[#allocation21_spill] sm:$0xff] }
 0x1bc   :  { %v1724_v21 = vpop.f32.mrf.mxu1  ;;  %v14497_v9 = vld [vmem:[#allocation22_spill] sm:$0xff] }
 0x1bd   :  { %14490 = vst [vmem:[#allocation14_spill] sm:$0xff] %v9623_v0  ;;  %v1436_v53 = vpop.f32.mrf.mxu0  ;;  %v14499_v0 = vld [vmem:[#allocation20_spill] sm:$0xff] }
 0x1be   :  { %v1725_v28 = vpop.f32.mrf.mxu1 }
 0x1bf   :  { %v9626_v55 = vadd.f32 %v1725_v28, %v1436_v53  ;;  %v1438_v35 = vpop.f32.mrf.mxu0 }
 0x1c0   :  { %v1727_v42 = vpop.f32.mrf.mxu1 }
 0x1c1   :  { %14492 = vst [vmem:[#allocation18_spill] sm:$0xff] %v9626_v55  ;;  %v1441_v7 = vpop.f32.mrf.mxu0  ;;  %1954 = vmatmul.mubr.bf16.gmra.mxu0 %v14493_v26 }
 0x1c2   :  { %v1730_v17 = vpop.f32.mrf.mxu1  ;;  %6774 = vmatmul.mubr.msk.bf16.gmra.mxu1 %vm8260_vm3, %v14494_v5  ;;  %6668 = vmatprep.mubr.msk.bf16.mxu0 %vm8384_vm5, %v14495_v47  ;;  %v14534_v47 = vld [vmem:[#allocation40_spill] sm:$0xff] }
 0x1c3   :  { %v9635_v37 = vadd.f32 %v1730_v17, %v1441_v7  ;;  %v1443_v36 = vpop.f32.mrf.mxu0  ;;  %2250 = vmatprep.mubr.bf16.mxu1 %v14497_v9  ;;  %v14500_v17 = vld [vmem:[#allocation24_spill] sm:$0xff] }
 0x1c4   :  { %v1732_v21 = vpop.f32.mrf.mxu1 }
 0x1c5   :  { %14496 = vst [vmem:[#allocation19_spill] sm:$0xff] %v9635_v37  ;;  %v1444_v53 = vpop.f32.mrf.mxu0  ;;  %v14502_v21 = vld [vmem:[#allocation25_spill] sm:$0xff] }
 0x1c6   :  { %v1733_v28 = vpop.f32.mrf.mxu1 }
 0x1c7   :  { %v9638_v35 = vadd.f32 %v1733_v28, %v1444_v53  ;;  %v1446_v26 = vpop.f32.mrf.mxu0 }
 0x1c8   :  { %v1735_v42 = vpop.f32.mrf.mxu1 }
 0x1c9   :  { %14498 = vst [vmem:[#allocation16_spill] sm:$0xff] %v9638_v35  ;;  %v1449_v55 = vpop.f32.mrf.mxu0  ;;  %1962 = vmatmul.mubr.bf16.gmra.mxu0 %v14491_v34 }
 0x1ca   :  { %v1738_v5 = vpop.f32.mrf.mxu1  ;;  %6778 = vmatmul.mubr.msk.bf16.gmra.mxu1 %vm8260_vm3, %v14499_v0  ;;  %6671 = vmatprep.mubr.msk.bf16.mxu0 %vm8384_vm5, %v14500_v17  ;;  %v14509_v17 = vld [vmem:[#allocation26_spill] sm:$0xff] }
 0x1cb   :  { %v9647_v7 = vadd.f32 %v1738_v5, %v1449_v55  ;;  %v1451_v36 = vpop.f32.mrf.mxu0  ;;  %2258 = vmatprep.mubr.bf16.mxu1 %v14502_v21  ;;  %v14505_v55 = vld [vmem:[#allocation27_spill] sm:$0xff] }
 0x1cc   :  { %v1740_v53 = vpop.f32.mrf.mxu1 }
 0x1cd   :  { %14501 = vst [vmem:[#allocation17_spill] sm:$0xff] %v9647_v7  ;;  %v1452_v28 = vpop.f32.mrf.mxu0  ;;  %v14507_v53 = vld [vmem:[#allocation28_spill] sm:$0xff] }
 0x1ce   :  { %v1741_v26 = vpop.f32.mrf.mxu1 }
 0x1cf   :  { %v9650_v42 = vadd.f32 %v1741_v26, %v1452_v28  ;;  %v1454_v34 = vpop.f32.mrf.mxu0 }
 0x1d0   :  { %v1743_v35 = vpop.f32.mrf.mxu1 }
 0x1d1   :  { %14503 = vst [vmem:[#allocation22_spill] sm:$0xff] %v9650_v42  ;;  %v1457_v37 = vpop.f32.mrf.mxu0  ;;  %1970 = vmatmul.mubr.bf16.gmra.mxu0 %v14497_v9 }
 0x1d2   :  { %v1746_v0 = vpop.f32.mrf.mxu1  ;;  %6782 = vmatmul.mubr.msk.bf16.gmra.mxu1 %vm8260_vm3, %v14504_v11  ;;  %6674 = vmatprep.mubr.msk.bf16.mxu0 %vm8384_vm5, %v14505_v55  ;;  %v14514_v55 = vld [vmem:[#allocation29_spill] sm:$0xff] }
 0x1d3   :  { %v9659_v5 = vadd.f32 %v1746_v0, %v1457_v37  ;;  %v1459_v36 = vpop.f32.mrf.mxu0  ;;  %2266 = vmatprep.mubr.bf16.mxu1 %v14507_v53  ;;  %v14510_v37 = vld [vmem:[#allocation30_spill] sm:$0xff] }
 0x1d4   :  { %v1748_v28 = vpop.f32.mrf.mxu1 }
 0x1d5   :  { %14506 = vst [vmem:[#allocation20_spill] sm:$0xff] %v9659_v5  ;;  %v1460_v26 = vpop.f32.mrf.mxu0  ;;  %v14512_v28 = vld [vmem:[#allocation31_spill] sm:$0xff] }
 0x1d6   :  { %v1749_v35 = vpop.f32.mrf.mxu1 }
 0x1d7   :  { %v9662_v34 = vadd.f32 %v1749_v35, %v1460_v26  ;;  %v1462_v9 = vpop.f32.mrf.mxu0 }
 0x1d8   :  { %v1751_v42 = vpop.f32.mrf.mxu1 }
 0x1d9   :  { %14508 = vst [vmem:[#allocation25_spill] sm:$0xff] %v9662_v34  ;;  %v1465_v7 = vpop.f32.mrf.mxu0  ;;  %1978 = vmatmul.mubr.bf16.gmra.mxu0 %v14502_v21 }
 0x1da   :  { %v1754_v11 = vpop.f32.mrf.mxu1  ;;  %6786 = vmatmul.mubr.msk.bf16.gmra.mxu1 %vm8260_vm3, %v14509_v17  ;;  %6677 = vmatprep.mubr.msk.bf16.mxu0 %vm8384_vm5, %v14510_v37  ;;  %v14519_v37 = vld [vmem:[#allocation32_spill] sm:$0xff] }
 0x1db   :  { %v9671_v0 = vadd.f32 %v1754_v11, %v1465_v7  ;;  %v1467_v36 = vpop.f32.mrf.mxu0  ;;  %2274 = vmatprep.mubr.bf16.mxu1 %v14512_v28  ;;  %v14515_v7 = vld [vmem:[#allocation33_spill] sm:$0xff] }
 0x1dc   :  { %v1756_v26 = vpop.f32.mrf.mxu1 }
 0x1dd   :  { %14511 = vst [vmem:[#allocation23_spill] sm:$0xff] %v9671_v0  ;;  %v1468_v35 = vpop.f32.mrf.mxu0  ;;  %v14517_v26 = vld [vmem:[#allocation34_spill] sm:$0xff] }
 0x1de   :  { %v1757_v42 = vpop.f32.mrf.mxu1 }
 0x1df   :  { %v9674_v9 = vadd.f32 %v1757_v42, %v1468_v35  ;;  %v1470_v21 = vpop.f32.mrf.mxu0 }
 0x1e0   :  { %v1759_v34 = vpop.f32.mrf.mxu1 }
 0x1e1   :  { %14513 = vst [vmem:[#allocation28_spill] sm:$0xff] %v9674_v9  ;;  %v1473_v5 = vpop.f32.mrf.mxu0  ;;  %1986 = vmatmul.mubr.bf16.gmra.mxu0 %v14507_v53 }
 0x1e2   :  { %v1762_v17 = vpop.f32.mrf.mxu1  ;;  %6790 = vmatmul.mubr.msk.bf16.gmra.mxu1 %vm8260_vm3, %v14514_v55  ;;  %6680 = vmatprep.mubr.msk.bf16.mxu0 %vm8384_vm5, %v14515_v7  ;;  %v14524_v7 = vld [vmem:[#allocation35_spill] sm:$0xff] }
 0x1e3   :  { %v9683_v11 = vadd.f32 %v1762_v17, %v1473_v5  ;;  %v1475_v36 = vpop.f32.mrf.mxu0  ;;  %2282 = vmatprep.mubr.bf16.mxu1 %v14517_v26  ;;  %v14520_v5 = vld [vmem:[#allocation36_spill] sm:$0xff] }
 0x1e4   :  { %v1764_v35 = vpop.f32.mrf.mxu1 }
 0x1e5   :  { %14516 = vst [vmem:[#allocation26_spill] sm:$0xff] %v9683_v11  ;;  %v1476_v42 = vpop.f32.mrf.mxu0  ;;  %v14522_v35 = vld [vmem:[#allocation37_spill] sm:$0xff] }
 0x1e6   :  { %v1765_v34 = vpop.f32.mrf.mxu1 }
 0x1e7   :  { %v9686_v21 = vadd.f32 %v1765_v34, %v1476_v42  ;;  %v1478_v53 = vpop.f32.mrf.mxu0 }
 0x1e8   :  { %v1767_v9 = vpop.f32.mrf.mxu1 }
 0x1e9   :  { %14518 = vst [vmem:[#allocation31_spill] sm:$0xff] %v9686_v21  ;;  %v1481_v0 = vpop.f32.mrf.mxu0  ;;  %1994 = vmatmul.mubr.bf16.gmra.mxu0 %v14512_v28 }
 0x1ea   :  { %v1770_v55 = vpop.f32.mrf.mxu1  ;;  %6794 = vmatmul.mubr.msk.bf16.gmra.mxu1 %vm8260_vm3, %v14519_v37  ;;  %6683 = vmatprep.mubr.msk.bf16.mxu0 %vm8384_vm5, %v14520_v5 }
 0x1eb   :  { %v9695_v17 = vadd.f32 %v1770_v55, %v1481_v0  ;;  %v1483_v36 = vpop.f32.mrf.mxu0  ;;  %2290 = vmatprep.mubr.bf16.mxu1 %v14522_v35  ;;  %v14525_v0 = vld [vmem:[#allocation38_spill] sm:$0xff] }
 0x1ec   :  { %v1772_v42 = vpop.f32.mrf.mxu1 }
 0x1ed   :  { %14521 = vst [vmem:[#allocation29_spill] sm:$0xff] %v9695_v17  ;;  %v1484_v34 = vpop.f32.mrf.mxu0  ;;  %v14527_v42 = vld [vmem:[#allocation39_spill] sm:$0xff] }
 0x1ee   :  { %v1773_v9 = vpop.f32.mrf.mxu1 }
 0x1ef   :  { %v9698_v53 = vadd.f32 %v1773_v9, %v1484_v34  ;;  %v1486_v28 = vpop.f32.mrf.mxu0 }
 0x1f0   :  { %v1775_v21 = vpop.f32.mrf.mxu1 }
 0x1f1   :  { %14523 = vst [vmem:[#allocation34_spill] sm:$0xff] %v9698_v53  ;;  %v1489_v11 = vpop.f32.mrf.mxu0  ;;  %2002 = vmatmul.mubr.bf16.gmra.mxu0 %v14517_v26 }
 0x1f2   :  { %v1778_v37 = vpop.f32.mrf.mxu1  ;;  %6798 = vmatmul.mubr.msk.bf16.gmra.mxu1 %vm8260_vm3, %v14524_v7  ;;  %6686 = vmatprep.mubr.msk.bf16.mxu0 %vm8384_vm5, %v14525_v0 }
 0x1f3   :  { %v9707_v55 = vadd.f32 %v1778_v37, %v1489_v11  ;;  %v1491_v36 = vpop.f32.mrf.mxu0  ;;  %2298 = vmatprep.mubr.bf16.mxu1 %v14527_v42  ;;  %v14529_v11 = vld [vmem:[#allocation42_spill] sm:$0xff] }
 0x1f4   :  { %v1780_v34 = vpop.f32.mrf.mxu1 }
 0x1f5   :  { %14526 = vst [vmem:[#allocation32_spill] sm:$0xff] %v9707_v55  ;;  %v1492_v9 = vpop.f32.mrf.mxu0  ;;  %v14531_v34 = vld [vmem:[#allocation43_spill] sm:$0xff] }
 0x1f6   :  { %v1781_v21 = vpop.f32.mrf.mxu1 }
 0x1f7   :  { %v9710_v28 = vadd.f32 %v1781_v21, %v1492_v9  ;;  %v1494_v26 = vpop.f32.mrf.mxu0 }
 0x1f8   :  { %v1783_v53 = vpop.f32.mrf.mxu1 }
 0x1f9   :  { %14528 = vst [vmem:[#allocation37_spill] sm:$0xff] %v9710_v28  ;;  %v1497_v17 = vpop.f32.mrf.mxu0  ;;  %2010 = vmatmul.mubr.bf16.gmra.mxu0 %v14522_v35 }
 0x1fa   :  { %v1786_v7 = vpop.f32.mrf.mxu1  ;;  %6802 = vmatmul.mubr.msk.bf16.gmra.mxu1 %vm8260_vm3, %v9130_v57  ;;  %6689 = vmatprep.mubr.msk.bf16.mxu0 %vm8384_vm5, %v14529_v11  ;;  %v14533_v57 = vld [vmem:[#allocation41_spill] sm:$0xff] }
 0x1fb   :  { %v9719_v37 = vadd.f32 %v1786_v7, %v1497_v17  ;;  %v1499_v36 = vpop.f32.mrf.mxu0  ;;  %2306 = vmatprep.mubr.bf16.mxu1 %v14531_v34  ;;  %v14535_v17 = vld [vmem:[#allocation47_spill] sm:$0xff] }
 0x1fc   :  { %v1788_v9 = vpop.f32.mrf.mxu1  ;;  %v14536_v36 = vld [vmem:[#allocation48_spill] sm:$0xff] }
 0x1fd   :  { %14530 = vst [vmem:[#allocation35_spill] sm:$0xff] %v9719_v37  ;;  %v1500_v21 = vpop.f32.mrf.mxu0 }
 0x1fe   :  { %v1789_v53 = vpop.f32.mrf.mxu1 }
 0x1ff   :  { %v9722_v26 = vadd.f32 %v1789_v53, %v1500_v21  ;;  %v1502_v35 = vpop.f32.mrf.mxu0  ;;  %v14538_v53 = vld [vmem:[#allocation44_spill] sm:$0xff] }
 0x200   :  { %v1791_v28 = vpop.f32.mrf.mxu1 }
 0x201   :  { %14532 = vst [vmem:[#allocation39_spill] sm:$0xff] %v9722_v26  ;;  %v1827_v55 = vpop.f32.mrf.mxu0  ;;  %2018 = vmatmul.mubr.bf16.gmra.mxu0 %v14527_v42 }
 0x202   :  { %v1828_v0 = vadd.f32 %v1827_v55, %v14533_v57  ;;  %v2116_v5 = vpop.f32.mrf.mxu1  ;;  %6806 = vmatmul.mubr.msk.bf16.gmra.mxu1 %vm8260_vm3, %v14534_v47  ;;  %6692 = vmatprep.mubr.msk.bf16.mxu0 %vm8384_vm5, %v14535_v17  ;;  %v14540_v47 = vld [vmem:[#allocation46_spill] sm:$0xff] }
 0x203   :  { %v1829_v7 = vpop.f32.mrf.mxu0  ;;  %2314 = vmatprep.mubr.bf16.mxu1 %v14536_v36 }
 0x204   :  { %v9733_v9 = vadd.f32 %v2116_v5, %v1828_v0  ;;  %v2118_v28 = vpop.f32.mrf.mxu1  ;;  %v14541_v7 = vld [vmem:[#allocation45_spill] sm:$0xff]  ;;  %v14542_v5 = vld [vmem:[#allocation52_spill] sm:$0xff] }
 0x205   :  { %v1830_v21 = vpop.f32.mrf.mxu0  ;;  %v14543_v28 = vld [vmem:[#allocation53_spill] sm:$0xff] }
 0x206   :  { %14537 = vst [vmem:[#allocation43_spill] sm:$0xff] %v9733_v9  ;;  %v1831_v42 = vadd.f32 %v1830_v21, %v14538_v53  ;;  %v2119_v35 = vpop.f32.mrf.mxu1 }
 0x207   :  { %v1832_v55 = vpop.f32.mrf.mxu0 }
 0x208   :  { %v9736_v57 = vadd.f32 %v2119_v35, %v1831_v42  ;;  %v2121_v26 = vpop.f32.mrf.mxu1  ;;  %v14545_v42 = vld [vmem:[#allocation49_spill] sm:$0xff] }
 0x209   :  { %v1835_v37 = vpop.f32.mrf.mxu0  ;;  %2026 = vmatmul.mubr.bf16.gmra.mxu0 %v14531_v34 }
 0x20a   :  { %14539 = vst [vmem:[#allocation41_spill] sm:$0xff] %v9736_v57  ;;  %v1836_v11 = vadd.f32 %v1835_v37, %v14540_v47  ;;  %v2124_v17 = vpop.f32.mrf.mxu1  ;;  %6810 = vmatmul.mubr.msk.bf16.gmra.mxu1 %vm8260_vm3, %v14541_v7  ;;  %6695 = vmatprep.mubr.msk.bf16.mxu0 %vm8384_vm5, %v14542_v5  ;;  %v14547_v7 = vld [vmem:[#allocation51_spill] sm:$0xff] }
 0x20b   :  { %v1837_v0 = vpop.f32.mrf.mxu0  ;;  %2322 = vmatprep.mubr.bf16.mxu1 %v14543_v28 }
 0x20c   :  { %v9747_v21 = vadd.f32 %v2124_v17, %v1836_v11  ;;  %v2126_v26 = vpop.f32.mrf.mxu1  ;;  %v14548_v0 = vld [vmem:[#allocation50_spill] sm:$0xff]  ;;  %v14549_v11 = vld [vmem:[#allocation56_spill] sm:$0xff] }
 0x20d   :  { %v1838_v53 = vpop.f32.mrf.mxu0  ;;  %v14550_v26 = vld [vmem:[#allocation57_spill] sm:$0xff] }
 0x20e   :  { %14544 = vst [vmem:[#allocation40_spill] sm:$0xff] %v9747_v21  ;;  %v1839_v34 = vadd.f32 %v1838_v53, %v14545_v42  ;;  %v2127_v35 = vpop.f32.mrf.mxu1 }
 0x20f   :  { %v1840_v37 = vpop.f32.mrf.mxu0 }
 0x210   :  { %v9750_v55 = vadd.f32 %v2127_v35, %v1839_v34  ;;  %v2129_v47 = vpop.f32.mrf.mxu1  ;;  %v14551_v35 = vld [vmem:[#allocation54_spill] sm:$0xff] }
 0x211   :  { %v1843_v57 = vpop.f32.mrf.mxu0  ;;  %2034 = vmatmul.mubr.bf16.gmra.mxu0 %v14536_v36 }
 0x212   :  { %14546 = vst [vmem:[#allocation48_spill] sm:$0xff] %v9750_v55  ;;  %v1844_v9 = vadd.f32 %v1843_v57, %v14547_v7  ;;  %v2132_v5 = vpop.f32.mrf.mxu1  ;;  %6814 = vmatmul.mubr.msk.bf16.gmra.mxu1 %vm8260_vm3, %v14548_v0  ;;  %6698 = vmatprep.mubr.msk.bf16.mxu0 %vm8384_vm5, %v14549_v11  ;;  %v14552_v0 = vld [vmem:[#allocation55_spill] sm:$0xff] }
 0x213   :  { %v1845_v17 = vpop.f32.mrf.mxu0  ;;  %2330 = vmatprep.mubr.bf16.mxu1 %v14550_v26 }
 0x214   :  { %v9761_v53 = vadd.f32 %v2132_v5, %v1844_v9  ;;  %v2134_v42 = vpop.f32.mrf.mxu1 }
 0x215   :  { %v1846_v34 = vpop.f32.mrf.mxu0 }
 0x216   :  { %v1847_v36 = vadd.f32 %v1846_v34, %v14551_v35  ;;  %v2135_v37 = vpop.f32.mrf.mxu1  ;;  %v14553_v34 = vld [vmem:[#allocation58_spill] sm:$0xff] }
 0x217   :  { %v1848_v57 = vpop.f32.mrf.mxu0 }
 0x218   :  { %v9764_v47 = vadd.f32 %v2135_v37, %v1847_v36  ;;  %v2137_v7 = vpop.f32.mrf.mxu1 }
 0x219   :  { %v1851_v55 = vpop.f32.mrf.mxu0  ;;  %2042 = vmatmul.mubr.bf16.gmra.mxu0 %v14543_v28 }
 0x21a   :  { %v1852_v21 = vadd.f32 %v1851_v55, %v14552_v0  ;;  %v2140_v11 = vpop.f32.mrf.mxu1  ;;  %6818 = vmatmul.mubr.msk.bf16.gmra.mxu1 %vm8260_vm3, %v9269_v4  ;;  %6701 = vmatprep.mubr.msk.bf16.mxu0 %vm8384_vm5, %v9337_v29  ;;  %v14554_v4 = vld [vmem:[#allocation59_spill] sm:$0xff] }
 0x21b   :  { %v1853_v9 = vpop.f32.mrf.mxu0  ;;  %2338 = vmatprep.mubr.bf16.mxu1 %v9341_v14 }
 0x21c   :  { %v9775_v5 = vadd.f32 %v2140_v11, %v1852_v21  ;;  %v2142_v17 = vpop.f32.mrf.mxu1 }
 0x21d   :  { %v1854_v42 = vpop.f32.mrf.mxu0 }
 0x21e   :  { %v1855_v28 = vadd.f32 %v1854_v42, %v14553_v34  ;;  %v2143_v35 = vpop.f32.mrf.mxu1 }
 0x21f   :  { %v1856_v55 = vpop.f32.mrf.mxu0 }
 0x220   :  { %v9778_v36 = vadd.f32 %v2143_v35, %v1855_v28  ;;  %v2145_v37 = vpop.f32.mrf.mxu1  ;;  %v14556_v28 = vld [vmem:[#allocation60_spill] sm:$0xff]  ;;  %v14557_v35 = vld [vmem:[#allocation61_spill] sm:$0xff] }
 0x221   :  { %v1859_v57 = vpop.f32.mrf.mxu0  ;;  %2050 = vmatmul.mubr.bf16.gmra.mxu0 %v14550_v26  ;;  %v637_v55 = vpack.c.bf16 %v14557_v35, %v14556_v28  ;;  %v444_v37 = vrot.slane %v14557_v35, 1 }
 0x222   :  { %v1860_v7 = vadd.f32 %v1859_v57, %v14554_v4  ;;  %v2148_v0 = vpop.f32.mrf.mxu1  ;;  %6822 = vmatmul.mubr.msk.bf16.gmra.mxu1 %vm8260_vm3, %v9307_v44  ;;  %6704 = vmatprep.mubr.msk.bf16.mxu0 %vm8384_vm5, %v9365_v13  ;;  %v443_v44 = vrot.slane %v14556_v28, 1 }
 0x223   :  { %v1861_v21 = vpop.f32.mrf.mxu0  ;;  %2346 = vmatprep.mubr.bf16.mxu1 %v9369_v61 }
 0x224   :  { %v9789_v11 = vadd.f32 %v2148_v0, %v1860_v7  ;;  %v2150_v9 = vpop.f32.mrf.mxu1  ;;  %v14559_v7 = vld [vmem:[#allocation62_spill] sm:$0xff] }
 0x225   :  { %v1862_v17 = vpop.f32.mrf.mxu0 }
 0x226   :  { %14555 = vst [vmem:[#allocation44_spill] sm:$0xff] %v9789_v11  ;;  %v1863_v26 = vadd.f32 %v1862_v17, %v9343_v43  ;;  %v2151_v42 = vpop.f32.mrf.mxu1  ;;  %v445_v17 = vsel %vm349_vm4, %v443_v44, %v444_v37 }
 0x227   :  { %v1864_v34 = vpop.f32.mrf.mxu0 }
 0x228   :  { %v9796_v57 = vadd.f32 %v2151_v42, %v1863_v26  ;;  %v2153_v4 = vpop.f32.mrf.mxu1 }
 0x229   :  { %v1867_v21 = vpop.f32.mrf.mxu0  ;;  %2058 = vmatmul.mubr.bf16.gmra.mxu0 %v9341_v14  ;;  %v14560_v14 = vld [vmem:[#allocation63_spill] sm:$0xff]  ;;  %v9810_v4 = vpack.c.bf16 %v444_v37, %v445_v17 }
 0x22a   :  { %14558 = vst [vmem:[#allocation46_spill] sm:$0xff] %v9796_v57  ;;  %v1868_v0 = vadd.f32 %v1867_v21, %v14559_v7  ;;  %v2156_v9 = vpop.f32.mrf.mxu1  ;;  %6826 = vmatmul.mubr.msk.bf16.gmra.mxu1 %vm8260_vm3, %v9345_v1  ;;  %6707 = vmatprep.mubr.msk.bf16.mxu0 %vm8384_vm5, %v9390_v59 }
 0x22b   :  { %v1869_v43 = vpop.f32.mrf.mxu0  ;;  %2354 = vmatprep.mubr.bf16.mxu1 %v637_v55 }
 0x22c   :  { %v9807_v26 = vadd.f32 %v2156_v9, %v1868_v0  ;;  %v2158_v42 = vpop.f32.mrf.mxu1 }
 0x22d   :  { %v1870_v34 = vpop.f32.mrf.mxu0 }
 0x22e   :  { %v1871_v28 = vadd.f32 %v1870_v34, %v14560_v14  ;;  %v2159_v35 = vpop.f32.mrf.mxu1 }
 0x22f   :  { %v1872_v21 = vpop.f32.mrf.mxu0 }
 0x230   :  { %v9812_v7 = vadd.f32 %v2159_v35, %v1871_v28  ;;  %v2161_v1 = vpop.f32.mrf.mxu1 }
 0x231   :  { %v1875_v57 = vpop.f32.mrf.mxu0  ;;  %2066 = vmatmul.mubr.bf16.gmra.mxu0 %v9369_v61 }
 0x232   :  { %v1876_v43 = vadd.f32 %v1875_v57, %v9384_v23  ;;  %v2164_v11 = vpop.f32.mrf.mxu1  ;;  %6830 = vmatmul.mubr.msk.bf16.gmra.mxu1 %vm8260_vm3, %v9373_v45  ;;  %6710 = vmatprep.mubr.msk.bf16.mxu0 %vm8384_vm5, %v9810_v4  ;;  %v7955_v23 = vld [vmem:[%s14159_s2 + $0x38] sm:$0xff]  }
 0x233   :  { %v1877_v44 = vpop.f32.mrf.mxu0  ;;  %2362 = vmatprep.mubr.bf16.mxu1 %v14487_v58  ;;  %4199 = vmatpush1.bf16.msra.mxu1 %v7955_v23 }
 0x234   :  { %v9823_v37 = vadd.f32 %v2164_v11, %v1876_v43  ;;  %v2166_v0 = vpop.f32.mrf.mxu1  ;;  %4200 = vmatprep.subr.bf16.mxu1 %v14479_v16 }
 0x235   :  { %v1878_v9 = vpop.f32.mrf.mxu0 }
 0x236   :  { %v1879_v61 = vadd.f32 %v1878_v9, %v9392_v54  ;;  %v2167_v17 = vpop.f32.mrf.mxu1 }
 0x237   :  { %v1880_v57 = vpop.f32.mrf.mxu0 }
 0x238   :  { %v9829_v45 = vadd.f32 %v2167_v17, %v1879_v61  ;;  %v2169_v42 = vpop.f32.mrf.mxu1 }
 0x239   :  { %v1883_v34 = vpop.f32.mrf.mxu0  ;;  %2074 = vmatmul.mubr.bf16.gmra.mxu0 %v637_v55 }
 0x23a   :  { %v1884_v11 = vadd.f32 %v1883_v34, %v9403_v56  ;;  %v2172_v14 = vpop.f32.mrf.mxu1  ;;  %2363 = vmatmul.mubr.bf16.gmra.mxu1 %v14487_v58  ;;  %7733 = vmatprep.mubr.msk.bf16.mxu0 %vm8384_vm5, %v8437_v18  ;;  %v7956_v34 = vld [vmem:[%s14159_s2 + $0x30] sm:$0xff]  }
 0x23b   :  { %v1885_v54 = vpop.f32.mrf.mxu0  ;;  %4230 = vmatprep.mubr.bf16.mxu1 %v14487_v58  ;;  %4201 = vmatpush1.bf16.msra.mxu1 %v7956_v34 }
 0x23c   :  { %v9838_v28 = vadd.f32 %v2172_v14, %v1884_v11  ;;  %v2174_v35 = vpop.f32.mrf.mxu1  ;;  %4202 = vmatprep.subr.bf16.mxu1 %v14479_v16 }
 0x23d   :  { %v1886_v21 = vpop.f32.mrf.mxu0 }
 0x23e   :  { %v1887_v55 = vadd.f32 %v1886_v21, %v9406_v60  ;;  %v2175_v1 = vpop.f32.mrf.mxu1 }
 0x23f   :  { %v1888_v43 = vpop.f32.mrf.mxu0 }
 0x240   :  { %v9841_v44 = vadd.f32 %v2175_v1, %v1887_v55  ;;  %v2177_v56 = vpop.f32.mrf.mxu1 }
 0x241   :  { %v1891_v0 = vpop.f32.mrf.mxu0  ;;  %7734 = vmatmul.mubr.msk.bf16.vlgmr.msra.gmra.mxu0 %vm8384_vm5, %v8483_v33 }
 0x242   :  { %v1892_v18 = vadd.f32 %v1891_v0, %v9416_v22  ;;  %v2180_v9 = vpop.f32.mrf.mxu1  ;;  %7737 = vmatprep.mubr.msk.bf16.mxu0 %vm8384_vm5, %v8525_v46 }
 0x243   :  { %v1893_v61 = vpop.f32.mrf.mxu0 }
 0x244   :  { %v9850_v17 = vadd.f32 %v2180_v9, %v1892_v18  ;;  %v2182_v60 = vpop.f32.mrf.mxu1 }
 0x245   :  { %v1894_v23 = vpop.f32.mrf.mxu0 }
 0x246   :  { %v1895_v57 = vadd.f32 %v1894_v23, %v9425_v38  ;;  %v2183_v42 = vpop.f32.mrf.mxu1 }
 0x247   :  { %v1896_v33 = vpop.f32.mrf.mxu0 }
 0x248   :  { %v9856_v11 = vadd.f32 %v2183_v42, %v1895_v57  ;;  %v2185_v22 = vpop.f32.mrf.mxu1  ;;  %v7957_v42 = vld [vmem:[%s14159_s2 + $0x28] sm:$0xff]  }
 0x249   :  { %v1899_v14 = vpop.f32.mrf.mxu0  ;;  %7738 = vmatmul.mubr.msk.bf16.gmra.mxu0 %vm8384_vm5, %v8571_v63  ;;  %4203 = vmatpush1.bf16.msra.mxu1 %v7957_v42 }
 0x24a   :  { %v1900_v46 = vadd.f32 %v1899_v14, %v9437_v31  ;;  %v2188_v38 = vpop.f32.mrf.mxu1  ;;  %7741 = vmatprep.mubr.msk.bf16.mxu0 %vm8384_vm5, %v8604_v15  ;;  %4204 = vmatprep.subr.bf16.mxu1 %v14479_v16 }
 0x24b   :  { %v1901_v54 = vpop.f32.mrf.mxu0 }
 0x24c   :  { %v9866_v35 = vadd.f32 %v2188_v38, %v1900_v46  ;;  %v2190_v21 = vpop.f32.mrf.mxu1 }
 0x24d   :  { %v1902_v55 = vpop.f32.mrf.mxu0 }
 0x24e   :  { %v1903_v1 = vadd.f32 %v1902_v55, %v9443_v39  ;;  %v2191_v43 = vpop.f32.mrf.mxu1 }
 0x24f   :  { %v1904_v56 = vpop.f32.mrf.mxu0 }
 0x250   :  { %v9869_v0 = vadd.f32 %v2191_v43, %v1903_v1  ;;  %v2193_v63 = vpop.f32.mrf.mxu1 }
 0x251   :  { %v1907_v18 = vpop.f32.mrf.mxu0  ;;  %7742 = vmatmul.mubr.msk.bf16.gmra.mxu0 %vm8384_vm5, %v8643_v32 }
 0x252   :  { %v1908_v31 = vadd.f32 %v1907_v18, %v9452_v50  ;;  %v2196_v15 = vpop.f32.mrf.mxu1  ;;  %7745 = vmatprep.mubr.msk.bf16.mxu0 %vm8384_vm5, %v8670_v49 }
 0x253   :  { %v1909_v9 = vpop.f32.mrf.mxu0 }
 0x254   :  { %v9878_v61 = vadd.f32 %v2196_v15, %v1908_v31  ;;  %v2198_v39 = vpop.f32.mrf.mxu1  ;;  %v7958_v9 = vld [vmem:[%s14159_s2 + $0x20] sm:$0xff]  }
 0x255   :  { %v1910_v60 = vpop.f32.mrf.mxu0  ;;  %4205 = vmatpush1.bf16.msra.mxu1 %v7958_v9 }
 0x256   :  { %v1911_v23 = vadd.f32 %v1910_v60, %v9455_v40  ;;  %v2199_v57 = vpop.f32.mrf.mxu1  ;;  %4206 = vmatprep.subr.bf16.mxu1 %v14479_v16 }
 0x257   :  { %v1912_v32 = vpop.f32.mrf.mxu0 }
 0x258   :  { %v9884_v34 = vadd.f32 %v2199_v57, %v1911_v23  ;;  %v2201_v50 = vpop.f32.mrf.mxu1 }
 0x259   :  { %v1915_v33 = vpop.f32.mrf.mxu0  ;;  %7746 = vmatmul.mubr.msk.bf16.gmra.mxu0 %vm8384_vm5, %v8702_v6 }
 0x25a   :  { %v1916_v49 = vadd.f32 %v1915_v33, %v9464_v3  ;;  %v2204_v40 = vpop.f32.mrf.mxu1  ;;  %7749 = vmatprep.mubr.msk.bf16.mxu0 %vm8384_vm5, %v8734_v24 }
 0x25b   :  { %v1917_v22 = vpop.f32.mrf.mxu0 }
 0x25c   :  { %v9894_v14 = vadd.f32 %v2204_v40, %v1916_v49  ;;  %v2206_v46 = vpop.f32.mrf.mxu1 }
 0x25d   :  { %v1918_v38 = vpop.f32.mrf.mxu0 }
 0x25e   :  { %v1919_v54 = vadd.f32 %v1918_v38, %v9467_v12  ;;  %v2207_v21 = vpop.f32.mrf.mxu1 }
 0x25f   :  { %v1920_v55 = vpop.f32.mrf.mxu0 }
 0x260   :  { %v9897_v1 = vadd.f32 %v2207_v21, %v1919_v54  ;;  %v2209_v6 = vpop.f32.mrf.mxu1  ;;  %v14561_v21 = vld [vmem:[#allocation64_spill] sm:$0xff] }
 0x261   :  { %v1923_v43 = vpop.f32.mrf.mxu0  ;;  %7750 = vmatmul.mubr.msk.bf16.gmra.mxu0 %vm8384_vm5, %v8766_v41 }
 0x262   :  { %v1924_v3 = vadd.f32 %v1923_v43, %v9476_v19  ;;  %v2212_v24 = vpop.f32.mrf.mxu1  ;;  %7753 = vmatprep.mubr.msk.bf16.mxu0 %vm8384_vm5, %v8806_v10  ;;  %v7959_v43 = vld [vmem:[%s14159_s2 + $0x18] sm:$0xff]  }
 0x263   :  { %v1925_v56 = vpop.f32.mrf.mxu0  ;;  %4207 = vmatpush1.bf16.msra.mxu1 %v7959_v43 }
 0x264   :  { %v9906_v63 = vadd.f32 %v2212_v24, %v1924_v3  ;;  %v2214_v12 = vpop.f32.mrf.mxu1  ;;  %4208 = vmatprep.subr.bf16.mxu1 %v14479_v16 }
 0x265   :  { %v1926_v18 = vpop.f32.mrf.mxu0 }
 0x266   :  { %v1927_v31 = vadd.f32 %v1926_v18, %v9482_v30  ;;  %v2215_v15 = vpop.f32.mrf.mxu1  ;;  %v14563_v18 = vld [vmem:[#allocation21_spill] sm:$0xff] }
 0x267   :  { %v1928_v41 = vpop.f32.mrf.mxu0 }
 0x268   :  { %v9912_v39 = vadd.f32 %v2215_v15, %v1927_v31  ;;  %v2217_v19 = vpop.f32.mrf.mxu1 }
 0x269   :  { %v1931_v60 = vpop.f32.mrf.mxu0  ;;  %7754 = vmatmul.mubr.msk.bf16.gmra.mxu0 %vm8384_vm5, %v14471_v52  ;;  %v14564_v19 = vld [vmem:[#allocation66_spill] sm:$0xff] }
 0x26a   :  { %v1932_v10 = vadd.f32 %v1931_v60, %v9491_v2  ;;  %v2220_v30 = vpop.f32.mrf.mxu1  ;;  %7757 = vmatprep.mubr.msk.bf16.mxu0 %vm8384_vm5, %v14476_v8 }
 0x26b   :  { %v1933_v23 = vpop.f32.mrf.mxu0 }
 0x26c   :  { %v9922_v57 = vadd.f32 %v2220_v30, %v1932_v10  ;;  %v2222_v42 = vpop.f32.mrf.mxu1 }
 0x26d   :  { %v1934_v32 = vpop.f32.mrf.mxu0 }
 0x26e   :  { %v1935_v50 = vadd.f32 %v1934_v32, %v9494_v20  ;;  %v2223_v33 = vpop.f32.mrf.mxu1 }
 0x26f   :  { %v1936_v49 = vpop.f32.mrf.mxu0 }
 0x270   :  { %v9925_v40 = vadd.f32 %v2223_v33, %v1935_v50  ;;  %v2225_v52 = vpop.f32.mrf.mxu1  ;;  %v14565_v50 = vld [vmem:[#allocation24_spill] sm:$0xff]  ;;  %v14566_v33 = vld [vmem:[#allocation67_spill] sm:$0xff] }
 0x271   :  { %v1939_v22 = vpop.f32.mrf.mxu0  ;;  %7758 = vmatmul.mubr.msk.bf16.gmra.mxu0 %vm8384_vm5, %v14482_v25 }
 0x272   :  { %v1940_v2 = vadd.f32 %v1939_v22, %v9503_v48  ;;  %v2228_v8 = vpop.f32.mrf.mxu1  ;;  %7761 = vmatprep.mubr.msk.bf16.mxu0 %vm8384_vm5, %v9603_v51  ;;  %v14562_v51 = vld [vmem:[#allocation65_spill] sm:$0xff]  ;;  %v14567_v22 = vld [vmem:[#allocation27_spill] sm:$0xff] }
 0x273   :  { %v1941_v46 = vpop.f32.mrf.mxu0 }
 0x274   :  { %v9934_v38 = vadd.f32 %v2228_v8, %v1940_v2  ;;  %v2230_v20 = vpop.f32.mrf.mxu1 }
 0x275   :  { %v1942_v54 = vpop.f32.mrf.mxu0 }
 0x276   :  { %v1943_v55 = vadd.f32 %v1942_v54, %v14561_v21  ;;  %v2231_v6 = vpop.f32.mrf.mxu1  ;;  %v14568_v54 = vld [vmem:[#allocation68_spill] sm:$0xff] }
 0x277   :  { %v1944_v25 = vpop.f32.mrf.mxu0 }
 0x278   :  { %v9940_v3 = vadd.f32 %v2231_v6, %v1943_v55  ;;  %v2233_v48 = vpop.f32.mrf.mxu1 }
 0x279   :  { %v1947_v24 = vpop.f32.mrf.mxu0  ;;  %7762 = vmatmul.mubr.bf16.gmra.mxu0 %v14487_v58  ;;  %v7960_v48 = vld [vmem:[%s14159_s2 + $0x10] sm:$0xff]  }
 0x27a   :  { %v1948_v56 = vadd.f32 %v1947_v24, %v14562_v51  ;;  %v2236_v12 = vpop.f32.mrf.mxu1  ;;  %7765 = vmatprep.mubr.msk.bf16.mxu0 %vm8384_vm5, %v14563_v18  ;;  %v14569_v51 = vld [vmem:[#allocation30_spill] sm:$0xff]  ;;  %4209 = vmatpush1.bf16.msra.mxu1 %v7960_v48 }
 0x27b   :  { %v1949_v31 = vpop.f32.mrf.mxu0  ;;  %4210 = vmatprep.subr.bf16.mxu1 %v14479_v16 }
 0x27c   :  { %v9948_v15 = vadd.f32 %v2236_v12, %v1948_v56  ;;  %v2238_v9 = vpop.f32.mrf.mxu1  ;;  %v14570_v56 = vld [vmem:[#allocation69_spill] sm:$0xff] }
 0x27d   :  { %v1950_v41 = vpop.f32.mrf.mxu0  ;;  %v14571_v31 = vld [vmem:[#allocation33_spill] sm:$0xff] }
 0x27e   :  { %v1951_v60 = vadd.f32 %v1950_v41, %v14564_v19  ;;  %v2239_v10 = vpop.f32.mrf.mxu1 }
 0x27f   :  { %v1952_v30 = vpop.f32.mrf.mxu0 }
 0x280   :  { %v9951_v23 = vadd.f32 %v2239_v10, %v1951_v60  ;;  %v2241_v42 = vpop.f32.mrf.mxu1  ;;  %v14572_v10 = vld [vmem:[#allocation70_spill] sm:$0xff] }
 0x281   :  { %v1955_v32 = vpop.f32.mrf.mxu0  ;;  %7766 = vmatmul.mubr.msk.bf16.gmra.mxu0 %vm8384_vm5, %v14565_v50 }
 0x282   :  { %v1956_v49 = vadd.f32 %v1955_v32, %v14566_v33  ;;  %v2244_v52 = vpop.f32.mrf.mxu1  ;;  %7769 = vmatprep.mubr.msk.bf16.mxu0 %vm8384_vm5, %v14567_v22  ;;  %v14574_v22 = vld [vmem:[#allocation71_spill] sm:$0xff] }
 0x283   :  { %v1957_v2 = vpop.f32.mrf.mxu0 }
 0x284   :  { %v9960_v8 = vadd.f32 %v2244_v52, %v1956_v49  ;;  %v2246_v46 = vpop.f32.mrf.mxu1  ;;  %v14573_v52 = vld [vmem:[#allocation36_spill] sm:$0xff] }
 0x285   :  { %v1958_v20 = vpop.f32.mrf.mxu0 }
 0x286   :  { %v1959_v21 = vadd.f32 %v1958_v20, %v14568_v54  ;;  %v2247_v55 = vpop.f32.mrf.mxu1  ;;  %v14575_v20 = vld [vmem:[#allocation38_spill] sm:$0xff] }
 0x287   :  { %v1960_v6 = vpop.f32.mrf.mxu0 }
 0x288   :  { %v9963_v43 = vadd.f32 %v2247_v55, %v1959_v21  ;;  %v2249_v25 = vpop.f32.mrf.mxu1 }
 0x289   :  { %v1963_v24 = vpop.f32.mrf.mxu0  ;;  %7770 = vmatmul.mubr.msk.bf16.gmra.mxu0 %vm8384_vm5, %v14569_v51  ;;  %v14576_v25 = vld [vmem:[#allocation72_spill] sm:$0xff] }
 0x28a   :  { %v1964_v12 = vadd.f32 %v1963_v24, %v14570_v56  ;;  %v2252_v18 = vpop.f32.mrf.mxu1  ;;  %7773 = vmatprep.mubr.msk.bf16.mxu0 %vm8384_vm5, %v14571_v31  ;;  %v14577_v31 = vld [vmem:[#allocation42_spill] sm:$0xff] }
 0x28b   :  { %v1965_v9 = vpop.f32.mrf.mxu0 }
 0x28c   :  { %v9976_v41 = vadd.f32 %v2252_v18, %v1964_v12  ;;  %v2254_v19 = vpop.f32.mrf.mxu1  ;;  %v14578_v9 = vld [vmem:[#allocation7_spill] sm:$0xff] }
 0x28d   :  { %v1966_v60 = vpop.f32.mrf.mxu0 }
 0x28e   :  { %v1967_v30 = vadd.f32 %v1966_v60, %v14572_v10  ;;  %v2255_v42 = vpop.f32.mrf.mxu1  ;;  %v14579_v10 = vld [vmem:[#allocation47_spill] sm:$0xff] }
 0x28f   :  { %v1968_v32 = vpop.f32.mrf.mxu0 }
 0x290   :  { %v9979_v50 = vadd.f32 %v2255_v42, %v1967_v30  ;;  %v2257_v33 = vpop.f32.mrf.mxu1  ;;  %v7961_v30 = vld [vmem:[%s14159_s2 + $0x8] sm:$0xff]  }
 0x291   :  { %v1971_v49 = vpop.f32.mrf.mxu0  ;;  %7774 = vmatmul.mubr.msk.bf16.gmra.mxu0 %vm8384_vm5, %v14573_v52  ;;  %4211 = vmatpush1.bf16.msra.mxu1 %v7961_v30  ;;  %v14580_v52 = vld [vmem:[#allocation9_spill] sm:$0xff] }
 0x292   :  { %v1972_v2 = vadd.f32 %v1971_v49, %v14574_v22  ;;  %v2260_v46 = vpop.f32.mrf.mxu1  ;;  %7777 = vmatprep.mubr.msk.bf16.mxu0 %vm8384_vm5, %v14575_v20  ;;  %4212 = vmatprep.subr.bf16.mxu1 %v14479_v16 }
 0x293   :  { %v1973_v54 = vpop.f32.mrf.mxu0 }
 0x294   :  { %v9988_v21 = vadd.f32 %v2260_v46, %v1972_v2  ;;  %v2262_v55 = vpop.f32.mrf.mxu1 }
 0x295   :  { %v1974_v6 = vpop.f32.mrf.mxu0 }
 0x296   :  { %v1975_v48 = vadd.f32 %v1974_v6, %v14576_v25  ;;  %v2263_v24 = vpop.f32.mrf.mxu1  ;;  %v14581_v6 = vld [vmem:[#allocation52_spill] sm:$0xff]  ;;  %v14582_v25 = vld [vmem:[#allocation10_spill] sm:$0xff] }
 0x297   :  { %v1976_v51 = vpop.f32.mrf.mxu0 }
 0x298   :  { %v9991_v56 = vadd.f32 %v2263_v24, %v1975_v48  ;;  %v2265_v12 = vpop.f32.mrf.mxu1  ;;  %v14583_v51 = vld [vmem:[#allocation56_spill] sm:$0xff] }
 0x299   :  { %v1979_v18 = vpop.f32.mrf.mxu0  ;;  %7778 = vmatmul.mubr.msk.bf16.gmra.mxu0 %vm8384_vm5, %v14577_v31 }
 0x29a   :  { %v1980_v19 = vadd.f32 %v1979_v18, %v14578_v9  ;;  %v2268_v60 = vpop.f32.mrf.mxu1  ;;  %7781 = vmatprep.mubr.msk.bf16.mxu0 %vm8384_vm5, %v14579_v10 }
 0x29b   :  { %v1981_v42 = vpop.f32.mrf.mxu0 }
 0x29c   :  { %v10003_v32 = vadd.f32 %v2268_v60, %v1980_v19  ;;  %v2270_v33 = vpop.f32.mrf.mxu1  ;;  %v14584_v19 = vld [vmem:[#allocation8_spill] sm:$0xff] }
 0x29d   :  { %v1982_v49 = vpop.f32.mrf.mxu0 }
 0x29e   :  { %v1983_v22 = vadd.f32 %v1982_v49, %v14580_v52  ;;  %v2271_v2 = vpop.f32.mrf.mxu1  ;;  %v14585_v52 = vld [vmem:[#allocation12_spill] sm:$0xff] }
 0x29f   :  { %v1984_v46 = vpop.f32.mrf.mxu0 }
 0x2a0   :  { %v10007_v20 = vadd.f32 %v2271_v2, %v1983_v22  ;;  %v2273_v54 = vpop.f32.mrf.mxu1  ;;  %v7962_v46 = vld [vmem:[%s14159_s2] sm:$0xff]  }
 0x2a1   :  { %v1987_v55 = vpop.f32.mrf.mxu0  ;;  %7782 = vmatmul.mubr.msk.bf16.gmra.mxu0 %vm8384_vm5, %v14581_v6  ;;  %4213 = vmatpush1.bf16.msra.mxu1 %v7962_v46 }
 0x2a2   :  { %v1988_v48 = vadd.f32 %v1987_v55, %v14582_v25  ;;  %v2276_v24 = vpop.f32.mrf.mxu1  ;;  %7785 = vmatprep.mubr.msk.bf16.mxu0 %vm8384_vm5, %v14583_v51  ;;  %4214 = vmatprep.subr.bf16.mxu1 %v14479_v16 }
 0x2a3   :  { %v1989_v12 = vpop.f32.mrf.mxu0 }
 0x2a4   :  { %v10016_v18 = vadd.f32 %v2276_v24, %v1988_v48  ;;  %v2278_v31 = vpop.f32.mrf.mxu1 }
 0x2a5   :  { %v1990_v9 = vpop.f32.mrf.mxu0 }
 0x2a6   :  { %v1991_v60 = vadd.f32 %v1990_v9, %v14584_v19  ;;  %v2279_v10 = vpop.f32.mrf.mxu1  ;;  %v14587_v9 = vld [vmem:[#allocation11_spill] sm:$0xff] }
 0x2a7   :  { %v1992_v30 = vpop.f32.mrf.mxu0 }
 0x2a8   :  { %v10019_v42 = vadd.f32 %v2279_v10, %v1991_v60  ;;  %v2281_v33 = vpop.f32.mrf.mxu1 }
 0x2a9   :  { %v1995_v49 = vpop.f32.mrf.mxu0  ;;  %7786 = vmatmul.mubr.msk.bf16.gmra.mxu0 %vm8384_vm5, %v9337_v29  ;;  %v14586_v29 = vld [vmem:[#allocation13_spill] sm:$0xff] }
 0x2aa   :  { %v1996_v22 = vadd.f32 %v1995_v49, %v14585_v52  ;;  %v2284_v2 = vpop.f32.mrf.mxu1  ;;  %7789 = vmatprep.mubr.msk.bf16.mxu0 %vm8384_vm5, %v9365_v13  ;;  %v14588_v52 = vld [vmem:[#allocation15_spill] sm:$0xff] }
 0x2ab   :  { %v1997_v54 = vpop.f32.mrf.mxu0 }
 0x2ac   :  { %v10031_v55 = vadd.f32 %v2284_v2, %v1996_v22  ;;  %v2286_v6 = vpop.f32.mrf.mxu1 }
 0x2ad   :  { %v1998_v25 = vpop.f32.mrf.mxu0 }
 0x2ae   :  { %v1999_v48 = vadd.f32 %v1998_v25, %v14586_v29  ;;  %v2287_v24 = vpop.f32.mrf.mxu1  ;;  %v14589_v25 = vld [vmem:[#allocation14_spill] sm:$0xff] }
 0x2af   :  { %v2000_v51 = vpop.f32.mrf.mxu0 }
 0x2b0   :  { %v10035_v12 = vadd.f32 %v2287_v24, %v1999_v48  ;;  %v2289_v31 = vpop.f32.mrf.mxu1 }
 0x2b1   :  { %v2003_v13 = vpop.f32.mrf.mxu0  ;;  %7790 = vmatmul.mubr.msk.bf16.gmra.mxu0 %vm8384_vm5, %v9390_v59 }
 0x2b2   :  { %v2004_v19 = vadd.f32 %v2003_v13, %v14587_v9  ;;  %v2292_v60 = vpop.f32.mrf.mxu1  ;;  %7793 = vmatprep.mubr.msk.bf16.mxu0 %vm8384_vm5, %v9810_v4  ;;  %v7963_v4 = vld [vmem:[%s14159_s2 + $0x78] sm:$0xff]   ;;  %v14590_v9 = vld [vmem:[#allocation18_spill] sm:$0xff] }
 0x2b3   :  { %v2005_v10 = vpop.f32.mrf.mxu0  ;;  %4215 = vmatpush2.bf16.msra.mxu1 %v7963_v4 }
 0x2b4   :  { %v10044_v30 = vadd.f32 %v2292_v60, %v2004_v19  ;;  %v2294_v33 = vpop.f32.mrf.mxu1  ;;  %4216 = vmatprep.subr.bf16.mxu1 %v14479_v16 }
 0x2b5   :  { %v2006_v49 = vpop.f32.mrf.mxu0 }
 0x2b6   :  { %v2007_v22 = vadd.f32 %v2006_v49, %v14588_v52  ;;  %v2295_v2 = vpop.f32.mrf.mxu1 }
 0x2b7   :  { %v2008_v46 = vpop.f32.mrf.mxu0 }
 0x2b8   :  { %v10047_v54 = vadd.f32 %v2295_v2, %v2007_v22  ;;  %v2297_v6 = vpop.f32.mrf.mxu1  ;;  %v14591_v22 = vld [vmem:[#allocation19_spill] sm:$0xff] }
 0x2b9   :  { %v2011_v59 = vpop.f32.mrf.mxu0  ;;  %7794 = vmatmul.mubr.bf16.gmra.mxu0 %v14487_v58 }
 0x2ba   :  { %v2012_v29 = vadd.f32 %v2011_v59, %v14589_v25  ;;  %v2300_v48 = vpop.f32.mrf.mxu1 }
 0x2bb   :  { %v2013_v24 = vpop.f32.mrf.mxu0 }
 0x2bc   :  { %v10054_v51 = vadd.f32 %v2300_v48, %v2012_v29  ;;  %v2302_v31 = vpop.f32.mrf.mxu1  ;;  %v14593_v48 = vld [vmem:[#allocation16_spill] sm:$0xff] }
 0x2bd   :  { %v2014_v13 = vpop.f32.mrf.mxu0 }
 0x2be   :  { %v2015_v19 = vadd.f32 %v2014_v13, %v14590_v9  ;;  %v2303_v60 = vpop.f32.mrf.mxu1 }
 0x2bf   :  { %v2016_v10 = vpop.f32.mrf.mxu0 }
 0x2c0   :  { %v10058_v33 = vadd.f32 %v2303_v60, %v2015_v19  ;;  %v2305_v49 = vpop.f32.mrf.mxu1  ;;  %v14595_v19 = vld [vmem:[#allocation17_spill] sm:$0xff] }
 0x2c1   :  { %v2019_v52 = vpop.f32.mrf.mxu0  ;;  %v7964_v49 = vld [vmem:[%s14159_s2 + $0x70] sm:$0xff]  }
 0x2c2   :  { %v2020_v2 = vadd.f32 %v2019_v52, %v14591_v22  ;;  %v2308_v46 = vpop.f32.mrf.mxu1  ;;  %4217 = vmatpush2.bf16.msra.mxu1 %v7964_v49  ;;  %v14601_v49 = vld [vmem:[#allocation25_spill] sm:$0xff] }
 0x2c3   :  { %v2021_v6 = vpop.f32.mrf.mxu0  ;;  %4218 = vmatprep.subr.bf16.mxu1 %v14479_v16 }
 0x2c4   :  { %v10061_v59 = vadd.f32 %v2308_v46, %v2020_v2  ;;  %v2310_v25 = vpop.f32.mrf.mxu1  ;;  %v14597_v6 = vld [vmem:[#allocation22_spill] sm:$0xff] }
 0x2c5   :  { %v2022_v29 = vpop.f32.mrf.mxu0 }
 0x2c6   :  { %14592 = vst [vmem:[#allocation45_spill] sm:$0xff] %v10061_v59  ;;  %v2023_v4 = vadd.f32 %v2022_v29, %v14593_v48  ;;  %v2311_v24 = vpop.f32.mrf.mxu1 }
 0x2c7   :  { %v2024_v31 = vpop.f32.mrf.mxu0 }
 0x2c8   :  { %v10064_v62 = vadd.f32 %v2311_v24, %v2023_v4  ;;  %v2313_v13 = vpop.f32.mrf.mxu1 }
 0x2c9   :  { %v2027_v9 = vpop.f32.mrf.mxu0  ;;  %v14599_v13 = vld [vmem:[#allocation20_spill] sm:$0xff] }
 0x2ca   :  { %14594 = vst [vmem:[#allocation53_spill] sm:$0xff] %v10064_v62  ;;  %v2028_v60 = vadd.f32 %v2027_v9, %v14595_v19  ;;  %v2316_v10 = vpop.f32.mrf.mxu1 }
 0x2cb   :  { %v2029_v52 = vpop.f32.mrf.mxu0 }
 0x2cc   :  { %v10070_v22 = vadd.f32 %v2316_v10, %v2028_v60  ;;  %v2318_v2 = vpop.f32.mrf.mxu1 }
 0x2cd   :  { %v2030_v46 = vpop.f32.mrf.mxu0 }
 0x2ce   :  { %14596 = vst [vmem:[#allocation49_spill] sm:$0xff] %v10070_v22  ;;  %v2031_v25 = vadd.f32 %v2030_v46, %v14597_v6  ;;  %v2319_v29 = vpop.f32.mrf.mxu1 }
 0x2cf   :  { %v2032_v48 = vpop.f32.mrf.mxu0 }
 0x2d0   :  { %v10074_v4 = vadd.f32 %v2319_v29, %v2031_v25  ;;  %v2321_v24 = vpop.f32.mrf.mxu1  ;;  %v14603_v25 = vld [vmem:[#allocation23_spill] sm:$0xff] }
 0x2d1   :  { %v2035_v31 = vpop.f32.mrf.mxu0  ;;  %v7965_v24 = vld [vmem:[%s14159_s2 + $0x68] sm:$0xff]  }
 0x2d2   :  { %14598 = vst [vmem:[#allocation51_spill] sm:$0xff] %v10074_v4  ;;  %v2036_v9 = vadd.f32 %v2035_v31, %v14599_v13  ;;  %v2324_v19 = vpop.f32.mrf.mxu1  ;;  %4219 = vmatpush2.bf16.msra.mxu1 %v7965_v24  ;;  %v14609_v24 = vld [vmem:[#allocation31_spill] sm:$0xff] }
 0x2d3   :  { %v2037_v27 = vpop.f32.mrf.mxu0  ;;  %4220 = vmatprep.subr.bf16.mxu1 %v14479_v16 }
 0x2d4   :  { %v10077_v52 = vadd.f32 %v2324_v19, %v2036_v9  ;;  %v2326_v60 = vpop.f32.mrf.mxu1 }
 0x2d5   :  { %v2038_v10 = vpop.f32.mrf.mxu0 }
 0x2d6   :  { %14600 = vst [vmem:[#allocation50_spill] sm:$0xff] %v10077_v52  ;;  %v2039_v2 = vadd.f32 %v2038_v10, %v14601_v49  ;;  %v2327_v62 = vpop.f32.mrf.mxu1 }
 0x2d7   :  { %v2040_v22 = vpop.f32.mrf.mxu0 }
 0x2d8   :  { %v10080_v59 = vadd.f32 %v2327_v62, %v2039_v2  ;;  %v2329_v46 = vpop.f32.mrf.mxu1  ;;  %v14605_v22 = vld [vmem:[#allocation28_spill] sm:$0xff] }
 0x2d9   :  { %v2043_v6 = vpop.f32.mrf.mxu0  ;;  %v14607_v46 = vld [vmem:[#allocation26_spill] sm:$0xff] }
 0x2da   :  { %14602 = vst [vmem:[#allocation57_spill] sm:$0xff] %v10080_v59  ;;  %v2044_v29 = vadd.f32 %v2043_v6, %v14603_v25  ;;  %v2332_v48 = vpop.f32.mrf.mxu1 }
 0x2db   :  { %v2045_v27 = vpop.f32.mrf.mxu0 }
 0x2dc   :  { %v10086_v31 = vadd.f32 %v2332_v48, %v2044_v29  ;;  %v2334_v13 = vpop.f32.mrf.mxu1 }
 0x2dd   :  { %v2046_v9 = vpop.f32.mrf.mxu0 }
 0x2de   :  { %14604 = vst [vmem:[#allocation54_spill] sm:$0xff] %v10086_v31  ;;  %v2047_v62 = vadd.f32 %v2046_v9, %v14605_v22  ;;  %v2335_v19 = vpop.f32.mrf.mxu1 }
 0x2df   :  { %v2048_v60 = vpop.f32.mrf.mxu0 }
 0x2e0   :  { %v10090_v10 = vadd.f32 %v2335_v19, %v2047_v62  ;;  %v2337_v49 = vpop.f32.mrf.mxu1  ;;  %v14611_v62 = vld [vmem:[#allocation29_spill] sm:$0xff] }
 0x2e1   :  { %v2051_v2 = vpop.f32.mrf.mxu0  ;;  %v7966_v49 = vld [vmem:[%s14159_s2 + $0x60] sm:$0xff]  }
 0x2e2   :  { %14606 = vst [vmem:[#allocation55_spill] sm:$0xff] %v10090_v10  ;;  %v2052_v6 = vadd.f32 %v2051_v2, %v14607_v46  ;;  %v2340_v25 = vpop.f32.mrf.mxu1  ;;  %4221 = vmatpush2.bf16.msra.mxu1 %v7966_v49  ;;  %v14615_v49 = vld [vmem:[#allocation37_spill] sm:$0xff] }
 0x2e3   :  { %v2053_v59 = vpop.f32.mrf.mxu0  ;;  %4222 = vmatprep.subr.bf16.mxu1 %v14479_v16 }
 0x2e4   :  { %v10093_v27 = vadd.f32 %v2340_v25, %v2052_v6  ;;  %v2342_v29 = vpop.f32.mrf.mxu1 }
 0x2e5   :  { %v2054_v48 = vpop.f32.mrf.mxu0 }
 0x2e6   :  { %14608 = vst [vmem:[#allocation58_spill] sm:$0xff] %v10093_v27  ;;  %v2055_v13 = vadd.f32 %v2054_v48, %v14609_v24  ;;  %v2343_v31 = vpop.f32.mrf.mxu1 }
 0x2e7   :  { %v2056_v52 = vpop.f32.mrf.mxu0 }
 0x2e8   :  { %v10096_v4 = vadd.f32 %v2343_v31, %v2055_v13  ;;  %v2345_v9 = vpop.f32.mrf.mxu1  ;;  %v14613_v52 = vld [vmem:[#allocation34_spill] sm:$0xff] }
 0x2e9   :  { %v2059_v22 = vpop.f32.mrf.mxu0  ;;  %v14614_v9 = vld [vmem:[#allocation32_spill] sm:$0xff] }
 0x2ea   :  { %14610 = vst [vmem:[#allocation59_spill] sm:$0xff] %v10096_v4  ;;  %v2060_v19 = vadd.f32 %v2059_v22, %v14611_v62  ;;  %v2348_v60 = vpop.f32.mrf.mxu1 }
 0x2eb   :  { %v2061_v59 = vpop.f32.mrf.mxu0 }
 0x2ec   :  { %v10102_v2 = vadd.f32 %v2348_v60, %v2060_v19  ;;  %v2350_v46 = vpop.f32.mrf.mxu1 }
 0x2ed   :  { %v2062_v6 = vpop.f32.mrf.mxu0 }
 0x2ee   :  { %14612 = vst [vmem:[#allocation60_spill] sm:$0xff] %v10102_v2  ;;  %v2063_v31 = vadd.f32 %v2062_v6, %v14613_v52  ;;  %v2351_v25 = vpop.f32.mrf.mxu1 }
 0x2ef   :  { %v2064_v29 = vpop.f32.mrf.mxu0 }
 0x2f0   :  { %v10106_v48 = vadd.f32 %v2351_v25, %v2063_v31  ;;  %v2353_v24 = vpop.f32.mrf.mxu1  ;;  %v14617_v31 = vld [vmem:[#allocation35_spill] sm:$0xff] }
 0x2f1   :  { %v2067_v13 = vpop.f32.mrf.mxu0  ;;  %v7967_v24 = vld [vmem:[%s14159_s2 + $0x58] sm:$0xff]  }
 0x2f2   :  { %v2068_v22 = vadd.f32 %v2067_v13, %v14614_v9  ;;  %v2356_v62 = vpop.f32.mrf.mxu1  ;;  %4223 = vmatpush2.bf16.msra.mxu1 %v7967_v24  ;;  %v14624_v24 = vld [vmem:[#allocation41_spill] sm:$0xff] }
 0x2f3   :  { %v2069_v4 = vpop.f32.mrf.mxu0  ;;  %4224 = vmatprep.subr.bf16.mxu1 %v14479_v16 }
 0x2f4   :  { %v10109_v59 = vadd.f32 %v2356_v62, %v2068_v22  ;;  %v2358_v19 = vpop.f32.mrf.mxu1 }
 0x2f5   :  { %v2070_v60 = vpop.f32.mrf.mxu0 }
 0x2f6   :  { %v2071_v46 = vadd.f32 %v2070_v60, %v14615_v49  ;;  %v2359_v2 = vpop.f32.mrf.mxu1 }
 0x2f7   :  { %v2072_v27 = vpop.f32.mrf.mxu0 }
 0x2f8   :  { %v10112_v10 = vadd.f32 %v2359_v2, %v2071_v46  ;;  %v2361_v6 = vpop.f32.mrf.mxu1  ;;  %v14619_v27 = vld [vmem:[#allocation39_spill] sm:$0xff] }
 0x2f9   :  { %v2075_v52 = vpop.f32.mrf.mxu0 }
 0x2fa   :  { %14616 = vst [vmem:[#allocation61_spill] sm:$0xff] %v10112_v10  ;;  %v2076_v25 = vadd.f32 %v2075_v52, %v14617_v31  ;;  %v2364_v29 = vpop.f32.mrf.mxu1  ;;  %v14621_v31 = vld [vmem:[#allocation43_spill] sm:$0xff] }
 0x2fb   :  { %v2077_v4 = vpop.f32.mrf.mxu0 }
 0x2fc   :  { %v10118_v13 = vadd.f32 %v2364_v29, %v2076_v25  ;;  %v2366_v9 = vpop.f32.mrf.mxu1  ;;  %v14623_v29 = vld [vmem:[#allocation40_spill] sm:$0xff] }
 0x2fd   :  { %v2078_v22 = vpop.f32.mrf.mxu0 }
 0x2fe   :  { %14618 = vst [vmem:[#allocation62_spill] sm:$0xff] %v10118_v13  ;;  %v2079_v2 = vadd.f32 %v2078_v22, %v14619_v27  ;;  %v2367_v62 = vpop.f32.mrf.mxu1  ;;  %v14626_v27 = vld [vmem:[#allocation48_spill] sm:$0xff] }
 0x2ff   :  { %v2080_v19 = vpop.f32.mrf.mxu0 }
 0x300   :  { %v10122_v60 = vadd.f32 %v2367_v62, %v2079_v2  ;;  %v2369_v49 = vpop.f32.mrf.mxu1 }
 0x301   :  { %v7735_v46 = vpop.f32.mrf.mxu0 }
 0x302   :  { %14620 = vst [vmem:[#allocation63_spill] sm:$0xff] %v10122_v60  ;;  %v10128_v4 = vadd.f32 %v7735_v46, %v14623_v29 }
 0x303   :  { %v2405_v6 = vpop.f32.mrf.mxu0 }
 0x304   :  { %v10125_v10 = vadd.f32 %v2405_v6, %v14621_v31  ;;  %v2732_v46 = vmul.f32 %v10128_v4, %v10128_v4 }
 0x305   :  { %v7736_v52 = vpop.f32.mrf.mxu0 }
 0x306   :  { %14622 = vst [vmem:[#allocation64_spill] sm:$0xff] %v10125_v10  ;;  %v2730_v22 = vmul.f32 %v10125_v10, %v10125_v10  ;;  %v10136_v2 = vadd.f32 %v7736_v52, %v14626_v27  ;;  %v7968_v52 = vld [vmem:[%s14159_s2 + $0xb8] sm:$0xff]  }
 0x307   :  { %v2408_v25 = vpop.f32.mrf.mxu0  ;;  %4488 = vmatpush1.bf16.msra.mxu0 %v7968_v52 }
 0x308   :  { %v10131_v9 = vadd.f32 %v2408_v25, %v14624_v24  ;;  %v2733_v24 = vmul.f32 %v10136_v2, %v10136_v2  ;;  %4489 = vmatprep.subr.bf16.mxu0 %v14479_v16 }
 0x309   :  { %v7739_v13 = vpop.f32.mrf.mxu0 }
 0x30a   :  { %14625 = vst [vmem:[#allocation65_spill] sm:$0xff] %v10131_v9  ;;  %v2660_v62 = vadd.f32 %v10131_v9, %v10125_v10  ;;  %v2731_v19 = vmul.f32 %v10131_v9, %v10131_v9  ;;  %v10155_v10 = vadd.f32 %v7739_v13, %v9775_v5 }
 0x30b   :  { %v2421_v49 = vpop.f32.mrf.mxu0 }
 0x30c   :  { %v2661_v6 = vadd.f32 %v2660_v62, %v10128_v4  ;;  %v2794_v31 = vadd.f32 %v2731_v19, %v2730_v22  ;;  %v10146_v25 = vadd.f32 %v2421_v49, %v9761_v53  ;;  %14628 = vst [vmem:[#allocation66_spill] sm:$0xff] %v10155_v10 }
 0x30d   :  { %v7740_v29 = vpop.f32.mrf.mxu0 }
 0x30e   :  { %14627 = vst [vmem:[#allocation21_spill] sm:$0xff] %v10146_v25  ;;  %v2795_v27 = vadd.f32 %v2794_v31, %v2732_v46  ;;  %v2662_v9 = vadd.f32 %v2661_v6, %v10136_v2  ;;  %v2734_v53 = vmul.f32 %v10146_v25, %v10146_v25  ;;  %v10165_v6 = vadd.f32 %v7740_v29, %v9778_v36 }
 0x30f   :  { %v2424_v60 = vpop.f32.mrf.mxu0  ;;  %v2736_v31 = vmul.f32 %v10155_v10, %v10155_v10 }
 0x310   :  { %v2663_v22 = vadd.f32 %v2662_v9, %v10146_v25  ;;  %v2796_v62 = vadd.f32 %v2795_v27, %v2733_v24  ;;  %v10161_v19 = vadd.f32 %v2424_v60, %v9764_v47  ;;  %v14630_v60 = vld [vmem:[#allocation44_spill] sm:$0xff]  ;;  %v2737_v36 = vmul.f32 %v10165_v6, %v10165_v6 }
 0x311   :  { %v7743_v49 = vpop.f32.mrf.mxu0 }
 0x312   :  { %14629 = vst [vmem:[#allocation24_spill] sm:$0xff] %v10161_v19  ;;  %v2797_v46 = vadd.f32 %v2796_v62, %v2734_v53  ;;  %v2664_v5 = vadd.f32 %v2663_v22, %v10161_v19  ;;  %v2735_v13 = vmul.f32 %v10161_v19, %v10161_v19  ;;  %v10180_v53 = vadd.f32 %v7743_v49, %v9807_v26 }
 0x313   :  { %v2437_v9 = vpop.f32.mrf.mxu0 }
 0x314   :  { %v2665_v52 = vadd.f32 %v2664_v5, %v10155_v10  ;;  %v2798_v47 = vadd.f32 %v2797_v46, %v2735_v13  ;;  %v10174_v24 = vadd.f32 %v2437_v9, %v14630_v60  ;;  %v14631_v13 = vld [vmem:[#allocation46_spill] sm:$0xff] }
 0x315   :  { %v7744_v27 = vpop.f32.mrf.mxu0 }
 0x316   :  { %v2799_v29 = vadd.f32 %v2798_v47, %v2736_v31  ;;  %v2666_v22 = vadd.f32 %v2665_v52, %v10165_v6  ;;  %v2738_v5 = vmul.f32 %v10174_v24, %v10174_v24  ;;  %v10189_v25 = vadd.f32 %v7744_v27, %v9812_v7 }
 0x317   :  { %v2440_v62 = vpop.f32.mrf.mxu0  ;;  %v2740_v52 = vmul.f32 %v10180_v53, %v10180_v53 }
 0x318   :  { %v2667_v19 = vadd.f32 %v2666_v22, %v10174_v24  ;;  %v2800_v46 = vadd.f32 %v2799_v29, %v2737_v36  ;;  %v10186_v9 = vadd.f32 %v2440_v62, %v14631_v13  ;;  %v2741_v7 = vmul.f32 %v10189_v25, %v10189_v25 }
 0x319   :  { %v7747_v60 = vpop.f32.mrf.mxu0 }
 0x31a   :  { %v2801_v10 = vadd.f32 %v2800_v46, %v2738_v5  ;;  %v2668_v31 = vadd.f32 %v2667_v19, %v10186_v9  ;;  %v2739_v26 = vmul.f32 %v10186_v9, %v10186_v9  ;;  %v10204_v62 = vadd.f32 %v7747_v60, %v9838_v28 }
 0x31b   :  { %v2453_v49 = vpop.f32.mrf.mxu0 }
 0x31c   :  { %v2669_v47 = vadd.f32 %v2668_v31, %v10180_v53  ;;  %v2802_v36 = vadd.f32 %v2801_v10, %v2739_v26  ;;  %v10198_v29 = vadd.f32 %v2453_v49, %v9823_v37 }
 0x31d   :  { %v7748_v22 = vpop.f32.mrf.mxu0 }
 0x31e   :  { %v2803_v27 = vadd.f32 %v2802_v36, %v2740_v52  ;;  %v2670_v19 = vadd.f32 %v2669_v47, %v10189_v25  ;;  %v2742_v13 = vmul.f32 %v10198_v29, %v10198_v29  ;;  %v10213_v49 = vadd.f32 %v7748_v22, %v9841_v44 }
 0x31f   :  { %v2456_v5 = vpop.f32.mrf.mxu0  ;;  %v2744_v47 = vmul.f32 %v10204_v62, %v10204_v62 }
 0x320   :  { %v2671_v46 = vadd.f32 %v2670_v19, %v10198_v29  ;;  %v2804_v10 = vadd.f32 %v2803_v27, %v2741_v7  ;;  %v10210_v37 = vadd.f32 %v2456_v5, %v9829_v45  ;;  %v2745_v44 = vmul.f32 %v10213_v49, %v10213_v49 }
 0x321   :  { %v7751_v31 = vpop.f32.mrf.mxu0 }
 0x322   :  { %v2805_v26 = vadd.f32 %v2804_v10, %v2742_v13  ;;  %v2672_v52 = vadd.f32 %v2671_v46, %v10210_v37  ;;  %v2743_v28 = vmul.f32 %v10210_v37, %v10210_v37  ;;  %v10228_v5 = vadd.f32 %v7751_v31, %v9866_v35  ;;  %v7969_v13 = vld [vmem:[%s14159_s2 + $0xb0] sm:$0xff]  }
 0x323   :  { %v2469_v60 = vpop.f32.mrf.mxu0  ;;  %4490 = vmatpush1.bf16.msra.mxu0 %v7969_v13 }
 0x324   :  { %v2673_v36 = vadd.f32 %v2672_v52, %v10204_v62  ;;  %v2806_v7 = vadd.f32 %v2805_v26, %v2743_v28  ;;  %v10222_v45 = vadd.f32 %v2469_v60, %v9850_v17  ;;  %4491 = vmatprep.subr.bf16.mxu0 %v14479_v16 }
 0x325   :  { %v7752_v27 = vpop.f32.mrf.mxu0 }
 0x326   :  { %v2807_v22 = vadd.f32 %v2806_v7, %v2744_v47  ;;  %v2674_v19 = vadd.f32 %v2673_v36, %v10213_v49  ;;  %v2746_v17 = vmul.f32 %v10222_v45, %v10222_v45  ;;  %v10240_v35 = vadd.f32 %v7752_v27, %v9869_v0 }
 0x327   :  { %v2472_v46 = vpop.f32.mrf.mxu0  ;;  %v2748_v7 = vmul.f32 %v10228_v5, %v10228_v5 }
 0x328   :  { %v2675_v10 = vadd.f32 %v2674_v19, %v10222_v45  ;;  %v2808_v26 = vadd.f32 %v2807_v22, %v2745_v44  ;;  %v10237_v52 = vadd.f32 %v2472_v46, %v9856_v11  ;;  %v2749_v0 = vmul.f32 %v10240_v35, %v10240_v35 }
 0x329   :  { %v7755_v28 = vpop.f32.mrf.mxu0 }
 0x32a   :  { %v2809_v60 = vadd.f32 %v2808_v26, %v2746_v17  ;;  %v2676_v31 = vadd.f32 %v2675_v10, %v10237_v52  ;;  %v2747_v47 = vmul.f32 %v10237_v52, %v10237_v52  ;;  %v10256_v13 = vadd.f32 %v7755_v28, %v9894_v14 }
 0x32b   :  { %v2485_v36 = vpop.f32.mrf.mxu0 }
 0x32c   :  { %v2677_v11 = vadd.f32 %v2676_v31, %v10228_v5  ;;  %v2810_v44 = vadd.f32 %v2809_v60, %v2747_v47  ;;  %v10250_v22 = vadd.f32 %v2485_v36, %v9878_v61 }
 0x32d   :  { %v7756_v19 = vpop.f32.mrf.mxu0 }
 0x32e   :  { %v2811_v27 = vadd.f32 %v2810_v44, %v2748_v7  ;;  %v2678_v46 = vadd.f32 %v2677_v11, %v10240_v35  ;;  %v2750_v26 = vmul.f32 %v10250_v22, %v10250_v22  ;;  %v10265_v36 = vadd.f32 %v7756_v19, %v9897_v1 }
 0x32f   :  { %v2488_v10 = vpop.f32.mrf.mxu0  ;;  %v2752_v11 = vmul.f32 %v10256_v13, %v10256_v13 }
 0x330   :  { %v2679_v17 = vadd.f32 %v2678_v46, %v10250_v22  ;;  %v2812_v60 = vadd.f32 %v2811_v27, %v2749_v0  ;;  %v10262_v61 = vadd.f32 %v2488_v10, %v9884_v34  ;;  %v2753_v1 = vmul.f32 %v10265_v36, %v10265_v36 }
 0x331   :  { %v7759_v31 = vpop.f32.mrf.mxu0 }
 0x332   :  { %v2813_v47 = vadd.f32 %v2812_v60, %v2750_v26  ;;  %v2680_v7 = vadd.f32 %v2679_v17, %v10262_v61  ;;  %v2751_v14 = vmul.f32 %v10262_v61, %v10262_v61  ;;  %v10280_v10 = vadd.f32 %v7759_v31, %v9922_v57 }
 0x333   :  { %v2501_v28 = vpop.f32.mrf.mxu0 }
 0x334   :  { %v2681_v44 = vadd.f32 %v2680_v7, %v10256_v13  ;;  %v2814_v0 = vadd.f32 %v2813_v47, %v2751_v14  ;;  %v10274_v34 = vadd.f32 %v2501_v28, %v9906_v63  ;;  %v7971_v14 = vld [vmem:[%s14159_s2 + $0xa8] sm:$0xff]  }
 0x335   :  { %v7760_v27 = vpop.f32.mrf.mxu0  ;;  %4492 = vmatpush1.bf16.msra.mxu0 %v7971_v14 }
 0x336   :  { %v2815_v19 = vadd.f32 %v2814_v0, %v2752_v11  ;;  %v2682_v46 = vadd.f32 %v2681_v44, %v10265_v36  ;;  %v2754_v60 = vmul.f32 %v10274_v34, %v10274_v34  ;;  %v10292_v11 = vadd.f32 %v7760_v27, %v9925_v40  ;;  %4493 = vmatprep.subr.bf16.mxu0 %v14479_v16  ;;  %v7972_v27 = vld [vmem:[%s14159_s2 + $0xa0] sm:$0xff]  }
 0x337   :  { %v2504_v17 = vpop.f32.mrf.mxu0 }
 0x338   :  { %v2683_v26 = vadd.f32 %v2682_v46, %v10274_v34  ;;  %v2816_v47 = vadd.f32 %v2815_v19, %v2753_v1  ;;  %v10286_v63 = vadd.f32 %v2504_v17, %v9912_v39  ;;  %v2756_v39 = vmul.f32 %v10280_v10, %v10280_v10 }
 0x339   :  { %v7763_v7 = vpop.f32.mrf.mxu0  ;;  %v2757_v46 = vmul.f32 %v10292_v11, %v10292_v11  ;;  %4494 = vmatpush1.bf16.msra.mxu0 %v7972_v27 }
 0x33a   :  { %v2817_v28 = vadd.f32 %v2816_v47, %v2754_v60  ;;  %v2684_v57 = vadd.f32 %v2683_v26, %v10286_v63  ;;  %v2755_v31 = vmul.f32 %v10286_v63, %v10286_v63  ;;  %v10311_v60 = vadd.f32 %v7763_v7, %v9948_v15  ;;  %4495 = vmatprep.subr.bf16.mxu0 %v14479_v16 }
 0x33b   :  { %v2517_v44 = vpop.f32.mrf.mxu0 }
 0x33c   :  { %v2685_v0 = vadd.f32 %v2684_v57, %v10280_v10  ;;  %v2818_v1 = vadd.f32 %v2817_v28, %v2755_v31  ;;  %v10301_v19 = vadd.f32 %v2517_v44, %v9934_v38  ;;  %v7973_v44 = vld [vmem:[%s14159_s2 + $0x98] sm:$0xff]  }
 0x33d   :  { %v7764_v40 = vpop.f32.mrf.mxu0  ;;  %4496 = vmatpush1.bf16.msra.mxu0 %v7973_v44 }
 0x33e   :  { %v2819_v17 = vadd.f32 %v2818_v1, %v2756_v39  ;;  %v2686_v26 = vadd.f32 %v2685_v0, %v10292_v11  ;;  %v2758_v14 = vmul.f32 %v10301_v19, %v10301_v19  ;;  %v10324_v7 = vadd.f32 %v7764_v40, %v9951_v23  ;;  %4497 = vmatprep.subr.bf16.mxu0 %v14479_v16  ;;  %v7974_v40 = vld [vmem:[%s14159_s2 + $0x90] sm:$0xff]  }
 0x33f   :  { %v2520_v47 = vpop.f32.mrf.mxu0 }
 0x340   :  { %v2687_v38 = vadd.f32 %v2686_v26, %v10301_v19  ;;  %v2820_v28 = vadd.f32 %v2819_v17, %v2757_v46  ;;  %v10317_v57 = vadd.f32 %v2520_v47, %v9940_v3  ;;  %v2760_v3 = vmul.f32 %v10311_v60, %v10311_v60 }
 0x341   :  { %v7767_v31 = vpop.f32.mrf.mxu0  ;;  %v2761_v26 = vmul.f32 %v10324_v7, %v10324_v7  ;;  %4498 = vmatpush1.bf16.msra.mxu0 %v7974_v40 }
 0x342   :  { %v2821_v15 = vadd.f32 %v2820_v28, %v2758_v14  ;;  %v2688_v39 = vadd.f32 %v2687_v38, %v10317_v57  ;;  %v2759_v0 = vmul.f32 %v10317_v57, %v10317_v57  ;;  %v10343_v14 = vadd.f32 %v7767_v31, %v9976_v41  ;;  %4499 = vmatprep.subr.bf16.mxu0 %v14479_v16 }
 0x343   :  { %v2533_v1 = vpop.f32.mrf.mxu0 }
 0x344   :  { %v2689_v27 = vadd.f32 %v2688_v39, %v10311_v60  ;;  %v2822_v46 = vadd.f32 %v2821_v15, %v2759_v0  ;;  %v10333_v17 = vadd.f32 %v2533_v1, %v9960_v8  ;;  %v7976_v1 = vld [vmem:[%s14159_s2 + $0x88] sm:$0xff]  }
 0x345   :  { %v7768_v23 = vpop.f32.mrf.mxu0  ;;  %4500 = vmatpush1.bf16.msra.mxu0 %v7976_v1 }
 0x346   :  { %v2823_v47 = vadd.f32 %v2822_v46, %v2760_v3  ;;  %v2690_v38 = vadd.f32 %v2689_v27, %v10324_v7  ;;  %v2762_v44 = vmul.f32 %v10333_v17, %v10333_v17  ;;  %v10356_v31 = vadd.f32 %v7768_v23, %v9979_v50  ;;  %4501 = vmatprep.subr.bf16.mxu0 %v14479_v16  ;;  %v7977_v23 = vld [vmem:[%s14159_s2 + $0x80] sm:$0xff]  }
 0x347   :  { %v2536_v28 = vpop.f32.mrf.mxu0 }
 0x348   :  { %v2691_v8 = vadd.f32 %v2690_v38, %v10333_v17  ;;  %v2824_v15 = vadd.f32 %v2823_v47, %v2761_v26  ;;  %v10349_v39 = vadd.f32 %v2536_v28, %v9963_v43  ;;  %v2764_v43 = vmul.f32 %v10343_v14, %v10343_v14 }
 0x349   :  { %v7771_v0 = vpop.f32.mrf.mxu0  ;;  %v2765_v38 = vmul.f32 %v10356_v31, %v10356_v31  ;;  %4502 = vmatpush1.bf16.msra.mxu0 %v7977_v23 }
 0x34a   :  { %v2825_v41 = vadd.f32 %v2824_v15, %v2762_v44  ;;  %v2692_v3 = vadd.f32 %v2691_v8, %v10349_v39  ;;  %v2763_v27 = vmul.f32 %v10349_v39, %v10349_v39  ;;  %v10375_v44 = vadd.f32 %v7771_v0, %v10003_v32  ;;  %4503 = vmatprep.subr.bf16.mxu0 %v14479_v16 }
 0x34b   :  { %v2549_v46 = vpop.f32.mrf.mxu0 }
 0x34c   :  { %v2693_v40 = vadd.f32 %v2692_v3, %v10343_v14  ;;  %v2826_v26 = vadd.f32 %v2825_v41, %v2763_v27  ;;  %v10365_v47 = vadd.f32 %v2549_v46, %v9988_v21  ;;  %v7978_v46 = vld [vmem:[%s14159_s2 + $0xf8] sm:$0xff]  }
 0x34d   :  { %v7772_v50 = vpop.f32.mrf.mxu0  ;;  %4504 = vmatpush2.bf16.msra.mxu0 %v7978_v46 }
 0x34e   :  { %v2827_v28 = vadd.f32 %v2826_v26, %v2764_v43  ;;  %v2694_v8 = vadd.f32 %v2693_v40, %v10356_v31  ;;  %v2766_v1 = vmul.f32 %v10365_v47, %v10365_v47  ;;  %v10388_v0 = vadd.f32 %v7772_v50, %v10007_v20  ;;  %4505 = vmatprep.subr.bf16.mxu0 %v14479_v16  ;;  %v7979_v50 = vld [vmem:[%s14159_s2 + $0xf0] sm:$0xff]  }
 0x34f   :  { %v2552_v15 = vpop.f32.mrf.mxu0 }
 0x350   :  { %v2695_v21 = vadd.f32 %v2694_v8, %v10365_v47  ;;  %v2828_v41 = vadd.f32 %v2827_v28, %v2765_v38  ;;  %v10381_v3 = vadd.f32 %v2552_v15, %v9991_v56  ;;  %v2768_v56 = vmul.f32 %v10375_v44, %v10375_v44 }
 0x351   :  { %v7775_v27 = vpop.f32.mrf.mxu0  ;;  %v2769_v8 = vmul.f32 %v10388_v0, %v10388_v0  ;;  %4506 = vmatpush2.bf16.msra.mxu0 %v7979_v50 }
 0x352   :  { %v2829_v32 = vadd.f32 %v2828_v41, %v2766_v1  ;;  %v2696_v43 = vadd.f32 %v2695_v21, %v10381_v3  ;;  %v2767_v40 = vmul.f32 %v10381_v3, %v10381_v3  ;;  %v7970_v1 = vld [vmem:[%s14159_s2 + $0x50] sm:$0xff]   ;;  %4507 = vmatprep.subr.bf16.mxu0 %v14479_v16 }
 0x353   :  { %v2565_v26 = vpop.f32.mrf.mxu0  ;;  %4225 = vmatpush2.bf16.msra.mxu1 %v7970_v1  ;;  %v7982_v1 = vld [vmem:[%s14159_s2 + $0xe0] sm:$0xff]  }
 0x354   :  { %v2697_v23 = vadd.f32 %v2696_v43, %v10375_v44  ;;  %v2830_v38 = vadd.f32 %v2829_v32, %v2767_v40  ;;  %v10397_v28 = vadd.f32 %v2565_v26, %v10016_v18  ;;  %v10410_v18 = vadd.f32 %v7775_v27, %v10031_v55  ;;  %4226 = vmatprep.subr.bf16.mxu1 %v14479_v16  ;;  %v7981_v55 = vld [vmem:[%s14159_s2 + $0xe8] sm:$0xff]  }
 0x355   :  { %v7776_v20 = vpop.f32.mrf.mxu0  ;;  %4508 = vmatpush2.bf16.msra.mxu0 %v7981_v55 }
 0x356   :  { %v2831_v15 = vadd.f32 %v2830_v38, %v2768_v56  ;;  %v2698_v21 = vadd.f32 %v2697_v23, %v10388_v0  ;;  %v2770_v32 = vmul.f32 %v10397_v28, %v10397_v28  ;;  %v10424_v56 = vadd.f32 %v7776_v20, %v10035_v12  ;;  %v7975_v38 = vld [vmem:[%s14159_s2 + $0x48] sm:$0xff]   ;;  %4509 = vmatprep.subr.bf16.mxu0 %v14479_v16 }
 0x357   :  { %v2568_v41 = vpop.f32.mrf.mxu0  ;;  %4227 = vmatpush2.bf16.msra.mxu1 %v7975_v38 }
 0x358   :  { %v2699_v46 = vadd.f32 %v2698_v21, %v10397_v28  ;;  %v2832_v43 = vadd.f32 %v2831_v15, %v2769_v8  ;;  %v10416_v40 = vadd.f32 %v2568_v41, %v10019_v42  ;;  %v2772_v8 = vmul.f32 %v10410_v18, %v10410_v18  ;;  %4228 = vmatprep.subr.bf16.mxu1 %v14479_v16 }
 0x359   :  { %v7779_v26 = vpop.f32.mrf.mxu0  ;;  %v2773_v41 = vmul.f32 %v10424_v56, %v10424_v56  ;;  %4510 = vmatpush2.bf16.msra.mxu0 %v7982_v1 }
 0x35a   :  { %v2833_v27 = vadd.f32 %v2832_v43, %v2770_v32  ;;  %v2700_v23 = vadd.f32 %v2699_v46, %v10416_v40  ;;  %v2771_v42 = vmul.f32 %v10416_v40, %v10416_v40  ;;  %v10450_v43 = vadd.f32 %v7779_v26, %v10054_v51  ;;  %4511 = vmatprep.subr.bf16.mxu0 %v14479_v16  ;;  %v7983_v51 = vld [vmem:[%s14159_s2 + $0xd8] sm:$0xff]  }
 0x35b   :  { %v2581_v50 = vpop.f32.mrf.mxu0 }
 0x35c   :  { %v2701_v15 = vadd.f32 %v2700_v23, %v10410_v18  ;;  %v2834_v21 = vadd.f32 %v2833_v27, %v2771_v42  ;;  %v10436_v12 = vadd.f32 %v2581_v50, %v10044_v30  ;;  %v7980_v30 = vld [vmem:[%s14159_s2 + $0x40] sm:$0xff]   ;;  %14632 = vst [vmem:[#allocation67_spill] sm:$0xff] %v10450_v43  ;;  %v2776_v1 = vmul.f32 %v10450_v43, %v10450_v43 }
 0x35d   :  { %v7780_v20 = vpop.f32.mrf.mxu0  ;;  %4229 = vmatpush2.bf16.msra.mxu1 %v7980_v30  ;;  %4512 = vmatpush2.bf16.msra.mxu0 %v7983_v51 }
 0x35e   :  { %v2835_v46 = vadd.f32 %v2834_v21, %v2772_v8  ;;  %v2702_v32 = vadd.f32 %v2701_v15, %v10424_v56  ;;  %v2774_v23 = vmul.f32 %v10436_v12, %v10436_v12  ;;  %4776 = vmatprep.subr.bf16.mxu1 %v14479_v16  ;;  %v10464_v8 = vadd.f32 %v7780_v20, %v10058_v33  ;;  %v7984_v20 = vld [vmem:[%s14159_s2 + $0xd0] sm:$0xff]  }
 0x35f   :  { %v2584_v55 = vpop.f32.mrf.mxu0  ;;  %4513 = vmatprep.subr.bf16.mxu0 %v14479_v16 }
 0x360   :  { %v2703_v27 = vadd.f32 %v2702_v32, %v10436_v12  ;;  %v2836_v42 = vadd.f32 %v2835_v46, %v2773_v41  ;;  %v10456_v38 = vadd.f32 %v2584_v55, %v10047_v54  ;;  %14634 = vst [vmem:[#allocation68_spill] sm:$0xff] %v10464_v8  ;;  %4231 = vmatmul.mubr.bf16.vlgmr.msra.gmra.mxu1 %v14487_v58  ;;  %v14635_v32 = vld [vmem:[#allocation45_spill] sm:$0xff] }
 0x361   :  { %v7783_v50 = vpop.f32.mrf.mxu0  ;;  %v2777_v55 = vmul.f32 %v10464_v8, %v10464_v8  ;;  %4514 = vmatpush2.bf16.msra.mxu0 %v7984_v20 }
 0x362   :  { %14633 = vst [vmem:[#allocation27_spill] sm:$0xff] %v10456_v38  ;;  %v2837_v26 = vadd.f32 %v2836_v42, %v2774_v23  ;;  %v2704_v15 = vadd.f32 %v2703_v27, %v10456_v38  ;;  %v2775_v54 = vmul.f32 %v10456_v38, %v10456_v38  ;;  %v14637_v42 = vld [vmem:[#allocation49_spill] sm:$0xff]  ;;  %4515 = vmatprep.subr.bf16.mxu0 %v14479_v16 }
 0x363   :  { %v2597_v21 = vpop.f32.mrf.mxu0  ;;  %v10484_v51 = vadd.f32 %v7783_v50, %v14637_v42 }
 0x364   :  { %v2705_v41 = vadd.f32 %v2704_v15, %v10450_v43  ;;  %v2838_v46 = vadd.f32 %v2837_v26, %v2775_v54  ;;  %v10474_v30 = vadd.f32 %v2597_v21, %v14635_v32  ;;  %v14639_v32 = vld [vmem:[#allocation53_spill] sm:$0xff] }
 0x365   :  { %v7784_v33 = vpop.f32.mrf.mxu0  ;;  %14638 = vst [vmem:[#allocation69_spill] sm:$0xff] %v10484_v51 }
 0x366   :  { %14636 = vst [vmem:[#allocation30_spill] sm:$0xff] %v10474_v30  ;;  %v2839_v27 = vadd.f32 %v2838_v46, %v2776_v1  ;;  %v2706_v23 = vadd.f32 %v2705_v41, %v10464_v8  ;;  %v2778_v54 = vmul.f32 %v10474_v30, %v10474_v30  ;;  %v7986_v1 = vld [vmem:[%s14159_s2 + $0xc8] sm:$0xff]   ;;  %v14641_v41 = vld [vmem:[#allocation51_spill] sm:$0xff] }
 0x367   :  { %v2600_v26 = vpop.f32.mrf.mxu0  ;;  %v10497_v46 = vadd.f32 %v7784_v33, %v14641_v41  ;;  %4516 = vmatpush2.bf16.msra.mxu0 %v7986_v1  ;;  %v7985_v33 = vld [vmem:[%s14159_s2 + $0x138] sm:$0xff]   ;;  %v14645_v41 = vld [vmem:[#allocation54_spill] sm:$0xff] }
 0x368   :  { %v2707_v15 = vadd.f32 %v2706_v23, %v10474_v30  ;;  %v2840_v21 = vadd.f32 %v2839_v27, %v2777_v55  ;;  %v10490_v58 = vadd.f32 %v2600_v26, %v14639_v32  ;;  %v2780_v27 = vmul.f32 %v10484_v51, %v10484_v51  ;;  %v14643_v32 = vld [vmem:[#allocation50_spill] sm:$0xff]  ;;  %4517 = vmatprep.subr.bf16.mxu0 %v14479_v16 }
 0x369   :  { %v7787_v43 = vpop.f32.mrf.mxu0  ;;  %14642 = vst [vmem:[#allocation70_spill] sm:$0xff] %v10497_v46  ;;  %4777 = vmatpush1.bf16.msra.mxu1 %v7985_v33  ;;  %v14649_v33 = vld [vmem:[#allocation55_spill] sm:$0xff] }
 0x36a   :  { %14640 = vst [vmem:[#allocation33_spill] sm:$0xff] %v10490_v58  ;;  %v2841_v50 = vadd.f32 %v2840_v21, %v2778_v54  ;;  %v2708_v20 = vadd.f32 %v2707_v15, %v10490_v58  ;;  %v2779_v23 = vmul.f32 %v10490_v58, %v10490_v58  ;;  %v2781_v54 = vmul.f32 %v10497_v46, %v10497_v46 }
 0x36b   :  { %v2613_v55 = vpop.f32.mrf.mxu0  ;;  %4778 = vmatprep.subr.bf16.mxu1 %v14479_v16 }
 0x36c   :  { %v2709_v42 = vadd.f32 %v2708_v20, %v10484_v51  ;;  %v2842_v26 = vadd.f32 %v2841_v50, %v2779_v23  ;;  %v10506_v30 = vadd.f32 %v2613_v55, %v14643_v32  ;;  %v10516_v20 = vadd.f32 %v7787_v43, %v14645_v41  ;;  %v7987_v23 = vld [vmem:[%s14159_s2 + $0xc0] sm:$0xff]  }
 0x36d   :  { %v7788_v15 = vpop.f32.mrf.mxu0  ;;  %4518 = vmatpush2.bf16.msra.mxu0 %v7987_v23 }
 0x36e   :  { %14644 = vst [vmem:[#allocation36_spill] sm:$0xff] %v10506_v30  ;;  %v2843_v21 = vadd.f32 %v2842_v26, %v2780_v27  ;;  %v2710_v1 = vadd.f32 %v2709_v42, %v10497_v46  ;;  %14646 = vst [vmem:[#allocation71_spill] sm:$0xff] %v10516_v20  ;;  %v2782_v32 = vmul.f32 %v10506_v30, %v10506_v30  ;;  %v14647_v27 = vld [vmem:[#allocation57_spill] sm:$0xff]  ;;  %5065 = vmatprep.subr.bf16.mxu0 %v14479_v16 }
 0x36f   :  { %v2616_v50 = vpop.f32.mrf.mxu0  ;;  %v10529_v41 = vadd.f32 %v7788_v15, %v14649_v33  ;;  %v14651_v33 = vld [vmem:[#allocation60_spill] sm:$0xff] }
 0x370   :  { %v2711_v55 = vadd.f32 %v2710_v1, %v10506_v30  ;;  %v2844_v51 = vadd.f32 %v2843_v21, %v2781_v54  ;;  %v10526_v26 = vadd.f32 %v2616_v50, %v14647_v27  ;;  %v2784_v54 = vmul.f32 %v10516_v20, %v10516_v20  ;;  %v14650_v27 = vld [vmem:[#allocation58_spill] sm:$0xff] }
 0x371   :  { %v7791_v42 = vpop.f32.mrf.mxu0  ;;  %v2785_v15 = vmul.f32 %v10529_v41, %v10529_v41 }
 0x372   :  { %14648 = vst [vmem:[#allocation38_spill] sm:$0xff] %v10526_v26  ;;  %v2845_v43 = vadd.f32 %v2844_v51, %v2782_v32  ;;  %v2712_v46 = vadd.f32 %v2711_v55, %v10526_v26  ;;  %v2783_v58 = vmul.f32 %v10526_v26, %v10526_v26  ;;  %v10545_v26 = vadd.f32 %v7791_v42, %v14651_v33 }
 0x373   :  { %v2629_v1 = vpop.f32.mrf.mxu0 }
 0x374   :  { %v2713_v21 = vadd.f32 %v2712_v46, %v10516_v20  ;;  %v2846_v50 = vadd.f32 %v2845_v43, %v2783_v58  ;;  %v10539_v23 = vadd.f32 %v2629_v1, %v14650_v27  ;;  %14652 = vst [vmem:[#allocation72_spill] sm:$0xff] %v10545_v26  ;;  %v14653_v43 = vld [vmem:[#allocation59_spill] sm:$0xff] }
 0x375   :  { %v7792_v51 = vpop.f32.mrf.mxu0 }
 0x376   :  { %v2847_v55 = vadd.f32 %v2846_v50, %v2784_v54  ;;  %v2714_v32 = vadd.f32 %v2713_v21, %v10529_v41  ;;  %v2786_v46 = vmul.f32 %v10539_v23, %v10539_v23  ;;  %v10554_v38 = vadd.f32 %v7792_v51, %v10106_v48  ;;  %v7988_v48 = vld [vmem:[%s14159_s2 + $0x130] sm:$0xff]  }
 0x377   :  { %v2632_v30 = vpop.f32.mrf.mxu0  ;;  %v2788_v50 = vmul.f32 %v10545_v26, %v10545_v26  ;;  %4779 = vmatpush1.bf16.msra.mxu1 %v7988_v48 }
 0x378   :  { %v2715_v8 = vadd.f32 %v2714_v32, %v10539_v23  ;;  %v2848_v58 = vadd.f32 %v2847_v55, %v2785_v15  ;;  %v10551_v1 = vadd.f32 %v2632_v30, %v14653_v43  ;;  %14655 = vst [vmem:[#allocation7_spill] sm:$0xff] %v10554_v38  ;;  %4780 = vmatprep.subr.bf16.mxu1 %v14479_v16 }
 0x379   :  { %v7795_v27 = vpop.f32.mrf.mxu0 }
 0x37a   :  { %14654 = vst [vmem:[#allocation42_spill] sm:$0xff] %v10551_v1  ;;  %v2849_v20 = vadd.f32 %v2848_v58, %v2786_v46  ;;  %v2716_v54 = vadd.f32 %v2715_v8, %v10551_v1  ;;  %v2787_v42 = vmul.f32 %v10551_v1, %v10551_v1  ;;  %v2789_v8 = vmul.f32 %v10554_v38, %v10554_v38  ;;  %v14657_v46 = vld [vmem:[#allocation62_spill] sm:$0xff]  ;;  %v14659_v1 = vld [vmem:[#allocation63_spill] sm:$0xff] }
 0x37b   :  { %v2645_v21 = vpop.f32.mrf.mxu0  ;;  %v10572_v58 = vadd.f32 %v7795_v27, %v14657_v46 }
 0x37c   :  { %v2717_v32 = vadd.f32 %v2716_v54, %v10545_v26  ;;  %v2850_v15 = vadd.f32 %v2849_v20, %v2787_v42  ;;  %v10563_v30 = vadd.f32 %v2645_v21, %v10109_v59  ;;  %v14658_v42 = vld [vmem:[#allocation61_spill] sm:$0xff] }
 0x37d   :  { %v7796_v51 = vpop.f32.mrf.mxu0  ;;  %v2792_v27 = vmul.f32 %v10572_v58, %v10572_v58 }
 0x37e   :  { %14656 = vst [vmem:[#allocation47_spill] sm:$0xff] %v10563_v30  ;;  %v2851_v55 = vadd.f32 %v2850_v15, %v2788_v50  ;;  %v2718_v33 = vadd.f32 %v2717_v32, %v10554_v38  ;;  %v2790_v20 = vmul.f32 %v10563_v30, %v10563_v30  ;;  %v10580_v50 = vadd.f32 %v7796_v51, %v14659_v1 }
 0x37f   :  { %v2648_v43 = vpop.f32.mrf.mxu0 }
 0x380   :  { %v2719_v59 = vadd.f32 %v2718_v33, %v10563_v30  ;;  %v2852_v54 = vadd.f32 %v2851_v55, %v2789_v8  ;;  %v2649_v21 = vadd.f32 %v2648_v43, %v14658_v42  ;;  %v2793_v33 = vmul.f32 %v10580_v50, %v10580_v50 }
 0x382   :  { %v2853_v26 = vadd.f32 %v2852_v54, %v2790_v20  ;;  %v2720_v32 = vadd.f32 %v2719_v59, %v2649_v21  ;;  %v2791_v15 = vmul.f32 %v2649_v21, %v2649_v21  ;;  %v7989_v59 = vld [vmem:[%s14159_s2 + $0x128] sm:$0xff]  }
 0x383   :  { %4781 = vmatpush1.bf16.msra.mxu1 %v7989_v59 }
 0x384   :  { %v2721_v48 = vadd.f32 %v2720_v32, %v10572_v58  ;;  %v2854_v46 = vadd.f32 %v2853_v26, %v2791_v15  ;;  %4782 = vmatprep.subr.bf16.mxu1 %v14479_v16 }
 0x386   :  { %v2722_v30 = vadd.f32 %v2721_v48, %v10580_v50  ;;  %v2855_v8 = vadd.f32 %v2854_v46, %v2792_v27 }
 0x388   :  { %v2723_v55 = vrot.slane %v2722_v30, 4  ;;  %v2856_v43 = vadd.f32 %v2855_v8, %v2793_v33 }
 0x38a   :  { %v2724_v20 = vadd.f32 %v2723_v55, %v2722_v30  ;;  %v2857_v54 = vrot.slane %v2856_v43, 4 }
 0x38c   :  { %v2725_v1 = vrot.slane %v2724_v20, 2  ;;  %v2858_v51 = vadd.f32 %v2857_v54, %v2856_v43  ;;  %v7990_v54 = vld [vmem:[%s14159_s2 + $0x120] sm:$0xff]  }
 0x38d   :  { %4783 = vmatpush1.bf16.msra.mxu1 %v7990_v54 }
 0x38e   :  { %v2726_v42 = vadd.f32 %v2725_v1, %v2724_v20  ;;  %v2859_v38 = vrot.slane %v2858_v51, 2  ;;  %4784 = vmatprep.subr.bf16.mxu1 %v14479_v16  ;;  %v2875_v20 = vlaneseq }
 0x390   :  { %v2727_v26 = vrot.slane %v2726_v42, 1  ;;  %v2860_v32 = vadd.f32 %v2859_v38, %v2858_v51  ;;  %v2876_v1 = vshrl.u32 %v2875_v20, 7  ;;  %v2867_v38 = vld [vmem:[%s14160_s3] sm:$0x1] }
 0x391   :  { %v14663_v20 = vld [vmem:[#allocation21_spill] sm:$0xff] }
 0x392   :  { %v2728_v15 = vadd.f32 %v2727_v26, %v2726_v42  ;;  %v2861_v48 = vrot.slane %v2860_v32, 1  ;;  %v10599_v51 = vsub.s32 0, %v2876_v1  ;;  %v7991_v26 = vld [vmem:[%s14159_s2 + $0x118] sm:$0xff]  }
 0x393   :  { %4785 = vmatpush1.bf16.msra.mxu1 %v7991_v26 }
 0x394   :  { %v2729_v27 = vmul.f32 0.001953125, %v2728_v15  ;;  %v2862_v46 = vadd.f32 %v2861_v48, %v2860_v32  ;;  %14660 = vst [vmem:[#allocation9_spill] sm:$0xff] %v10599_v51  ;;  %v2871_v32 = vld [vmem:[%s14161_s4] sm:$0x1]  ;;  %4786 = vmatprep.subr.bf16.mxu1 %v14479_v16 }
 0x396   :  { %v2863_v33 = vmul.f32 0.001953125, %v2862_v46  ;;  %v2864_v30 = vmul.f32 %v2729_v27, %v2729_v27 }
 0x398   :  { %v2865_v8 = vsub.f32 %v2863_v33, %v2864_v30  ;;  %v14661_v30 = vld [vmem:[#allocation64_spill] sm:$0xff] }
 0x39a   :  { %v2866_v55 = vmax.f32 %v2865_v8, 0.0 }
 0x39c   :  { %v2868_v43 = vadd.f32 1e-05, %v2866_v55  ;;  %v14662_v55 = vld [vmem:[#allocation65_spill] sm:$0xff] }
 0x39e   :  { %8027 = vrsqrt.f32 %v2868_v43 }
 0x3ab   :  { %v8028_v59 = vpop.eup %8027 }
 0x3ac   :  { %v2870_v42 = vmul.f32 %v8028_v59, %v2867_v38 }
 0x3ae   :  { %v2872_v15 = vmul.f32 %v2870_v42, %v2729_v27  ;;  %v10608_v48 = vrot.slane %v2870_v42, %v10599_v51  ;;  %v14665_v42 = vld [vmem:[#allocation66_spill] sm:$0xff] }
 0x3b0   :  { %v2873_v46 = vsub.f32 %v2871_v32, %v2872_v15  ;;  %v2941_v33 = vmul.f32 %v10608_v48, %v2649_v21  ;;  %v10614_v8 = vmul.f32 %v10608_v48, %v14661_v30  ;;  %v10618_v43 = vmul.f32 %v10608_v48, %v14662_v55  ;;  %v14664_v21 = vld [vmem:[#allocation24_spill] sm:$0xff]  ;;  %v14669_v55 = vld [vmem:[#allocation67_spill] sm:$0xff] }
 0x3b1   :  { %v10622_v27 = vmul.f32 %v10608_v48, %v10128_v4  ;;  %v10626_v54 = vmul.f32 %v10608_v48, %v10136_v2  ;;  %v10630_v1 = vmul.f32 %v10608_v48, %v14663_v20  ;;  %v10634_v38 = vmul.f32 %v10608_v48, %v14664_v21  ;;  %v14671_v20 = vld [vmem:[#allocation68_spill] sm:$0xff]  ;;  %v14673_v21 = vld [vmem:[#allocation30_spill] sm:$0xff] }
 0x3b2   :  { %v10637_v59 = vrot.slane %v2873_v46, %v10599_v51  ;;  %v10641_v26 = vmul.f32 %v10608_v48, %v14665_v42  ;;  %v10645_v4 = vmul.f32 %v10608_v48, %v10165_v6  ;;  %v10649_v2 = vmul.f32 %v10608_v48, %v10174_v24  ;;  %v14675_v42 = vld [vmem:[#allocation33_spill] sm:$0xff] }
 0x3b3   :  { %v10653_v32 = vmul.f32 %v10608_v48, %v10186_v9  ;;  %v10657_v15 = vmul.f32 %v10608_v48, %v10180_v53  ;;  %v10661_v46 = vmul.f32 %v10608_v48, %v10189_v25  ;;  %v10665_v6 = vmul.f32 %v10608_v48, %v10198_v29  ;;  %v14676_v51 = vld [vmem:[#allocation69_spill] sm:$0xff] }
 0x3b4   :  { %v10668_v30 = vadd.f32 %v10637_v59, %v2941_v33  ;;  %v10672_v24 = vmul.f32 %v10608_v48, %v10210_v37  ;;  %v10676_v9 = vmul.f32 %v10608_v48, %v10204_v62  ;;  %v10680_v53 = vmul.f32 %v10608_v48, %v10213_v49  ;;  %v14667_v33 = vld [vmem:[#allocation27_spill] sm:$0xff] }
 0x3b5   :  { %v10684_v25 = vmul.f32 %v10608_v48, %v10222_v45  ;;  %v10688_v29 = vmul.f32 %v10608_v48, %v10237_v52  ;;  %v10692_v37 = vmul.f32 %v10608_v48, %v10228_v5  ;;  %v10696_v62 = vmul.f32 %v10608_v48, %v10240_v35 }
 0x3b6   :  { %14666 = vst [vmem:[#allocation52_spill] sm:$0xff] %v10668_v30  ;;  %v10700_v49 = vmul.f32 %v10608_v48, %v10250_v22  ;;  %v10704_v45 = vmul.f32 %v10608_v48, %v10262_v61  ;;  %v10708_v52 = vmul.f32 %v10608_v48, %v10256_v13  ;;  %v10712_v5 = vmul.f32 %v10608_v48, %v10265_v36  ;;  %v14677_v30 = vld [vmem:[#allocation70_spill] sm:$0xff] }
 0x3b7   :  { %v10716_v35 = vmul.f32 %v10608_v48, %v10274_v34  ;;  %v10720_v22 = vmul.f32 %v10608_v48, %v10286_v63  ;;  %v10724_v61 = vmul.f32 %v10608_v48, %v10280_v10  ;;  %v10728_v13 = vmul.f32 %v10608_v48, %v10292_v11 }
 0x3b8   :  { %v10732_v36 = vmul.f32 %v10608_v48, %v10301_v19  ;;  %v10736_v34 = vmul.f32 %v10608_v48, %v10317_v57  ;;  %v10740_v63 = vmul.f32 %v10608_v48, %v10311_v60  ;;  %v10744_v10 = vmul.f32 %v10608_v48, %v10324_v7 }
 0x3b9   :  { %v10748_v11 = vmul.f32 %v10608_v48, %v10333_v17  ;;  %v10752_v19 = vmul.f32 %v10608_v48, %v10349_v39  ;;  %v10756_v57 = vmul.f32 %v10608_v48, %v10343_v14  ;;  %v10760_v60 = vmul.f32 %v10608_v48, %v10356_v31 }
 0x3ba   :  { %v10764_v7 = vmul.f32 %v10608_v48, %v10365_v47  ;;  %v10768_v17 = vmul.f32 %v10608_v48, %v10381_v3  ;;  %v10772_v39 = vmul.f32 %v10608_v48, %v10375_v44  ;;  %v10776_v14 = vmul.f32 %v10608_v48, %v10388_v0 }
 0x3bb   :  { %v10780_v31 = vmul.f32 %v10608_v48, %v10397_v28  ;;  %v10784_v47 = vmul.f32 %v10608_v48, %v10416_v40  ;;  %v10788_v3 = vmul.f32 %v10608_v48, %v10410_v18  ;;  %v10792_v44 = vmul.f32 %v10608_v48, %v10424_v56  ;;  %v7992_v56 = vld [vmem:[%s14159_s2 + $0x110] sm:$0xff]  }
 0x3bc   :  { %v10796_v0 = vmul.f32 %v10608_v48, %v10436_v12  ;;  %v10800_v28 = vmul.f32 %v10608_v48, %v14667_v33  ;;  %v10804_v40 = vmul.f32 %v10608_v48, %v14669_v55  ;;  %v10808_v18 = vmul.f32 %v10608_v48, %v14671_v20  ;;  %4787 = vmatpush1.bf16.msra.mxu1 %v7992_v56 }
 0x3bd   :  { %v10815_v12 = vmul.f32 %v10608_v48, %v14673_v21  ;;  %v10819_v33 = vmul.f32 %v10608_v48, %v14675_v42  ;;  %v10823_v55 = vmul.f32 %v10608_v48, %v14676_v51  ;;  %v10827_v20 = vmul.f32 %v10608_v48, %v14677_v30  ;;  %4788 = vmatprep.subr.bf16.mxu1 %v14479_v16 }
 0x3be   :  { %14668 = vst [vmem:[#allocation10_spill] sm:$0xff] %v10800_v28  ;;  %14670 = vst [vmem:[#allocation56_spill] sm:$0xff] %v10804_v40  ;;  %v14681_v28 = vld [vmem:[#allocation38_spill] sm:$0xff]  ;;  %v10843_v51 = vmul.f32 %v10608_v48, %v10529_v41  ;;  %v10847_v30 = vmul.f32 %v10608_v48, %v10539_v23  ;;  %v14687_v41 = vld [vmem:[#allocation47_spill] sm:$0xff]  ;;  %v10868_v23 = vmul.f32 %v10608_v48, %v10572_v58 }
 0x3bf   :  { %14672 = vst [vmem:[#allocation8_spill] sm:$0xff] %v10808_v18  ;;  %14674 = vst [vmem:[#allocation12_spill] sm:$0xff] %v10815_v12  ;;  %v14679_v18 = vld [vmem:[#allocation36_spill] sm:$0xff]  ;;  %v10835_v21 = vmul.f32 %v10608_v48, %v14681_v28  ;;  %v14683_v12 = vld [vmem:[#allocation71_spill] sm:$0xff]  ;;  %v10864_v56 = vmul.f32 %v10608_v48, %v14687_v41  ;;  %v10884_v41 = vadd.f32 %v10637_v59, %v10622_v27 }
 0x3c0   :  { %14678 = vst [vmem:[#allocation13_spill] sm:$0xff] %v10827_v20  ;;  %v10831_v40 = vmul.f32 %v10608_v48, %v14679_v18  ;;  %v10839_v42 = vmul.f32 %v10608_v48, %v14683_v12  ;;  %v14684_v20 = vld [vmem:[#allocation42_spill] sm:$0xff]  ;;  %v10888_v58 = vadd.f32 %v10637_v59, %v10626_v54  ;;  %v10908_v27 = vadd.f32 %v10637_v59, %v10649_v2 }
 0x3c1   :  { %14682 = vst [vmem:[#allocation15_spill] sm:$0xff] %v10835_v21  ;;  %v10851_v18 = vmul.f32 %v10608_v48, %v14684_v20  ;;  %v14686_v21 = vld [vmem:[#allocation7_spill] sm:$0xff]  ;;  %v10872_v20 = vmul.f32 %v10608_v48, %v10580_v50  ;;  %v10892_v50 = vadd.f32 %v10637_v59, %v10630_v1  ;;  %v10912_v54 = vadd.f32 %v10637_v59, %v10653_v32 }
 0x3c2   :  { %14680 = vst [vmem:[#allocation11_spill] sm:$0xff] %v10831_v40  ;;  %v14685_v40 = vld [vmem:[#allocation72_spill] sm:$0xff]  ;;  %v10859_v12 = vmul.f32 %v10608_v48, %v14686_v21  ;;  %v10880_v21 = vadd.f32 %v10637_v59, %v10618_v43  ;;  %v10904_v43 = vadd.f32 %v10637_v59, %v10645_v4  ;;  %v2960_v1 = vadd.f32 %v10637_v59, %v10657_v15 }
 0x3c3   :  { %v10855_v28 = vmul.f32 %v10608_v48, %v14685_v40  ;;  %v10876_v40 = vadd.f32 %v10637_v59, %v10614_v8  ;;  %v10896_v48 = vadd.f32 %v10637_v59, %v10634_v38  ;;  %v10900_v8 = vadd.f32 %v10637_v59, %v10641_v26  ;;  %14688 = vst [vmem:[#allocation14_spill] sm:$0xff] %v10912_v54 }
 0x3c4   :  { %v2961_v38 = vadd.f32 %v10637_v59, %v10661_v46  ;;  %v2962_v26 = vadd.f32 %v10637_v59, %v10665_v6  ;;  %v10922_v4 = vadd.f32 %v10637_v59, %v10672_v24  ;;  %v2964_v2 = vadd.f32 %v10637_v59, %v10676_v9 }
 0x3c5   :  { %v2965_v32 = vadd.f32 %v10637_v59, %v10680_v53  ;;  %v2966_v54 = vadd.f32 %v10637_v59, %v10684_v25  ;;  %v10932_v15 = vadd.f32 %v10637_v59, %v10688_v29  ;;  %v2968_v46 = vadd.f32 %v10637_v59, %v10692_v37 }
 0x3c6   :  { %v2969_v6 = vadd.f32 %v10637_v59, %v10696_v62  ;;  %v2970_v24 = vadd.f32 %v10637_v59, %v10700_v49  ;;  %v10942_v9 = vadd.f32 %v10637_v59, %v10704_v45  ;;  %v2972_v53 = vadd.f32 %v10637_v59, %v10708_v52 }
 0x3c7   :  { %v2973_v25 = vadd.f32 %v10637_v59, %v10712_v5  ;;  %v2974_v29 = vadd.f32 %v10637_v59, %v10716_v35  ;;  %v10952_v37 = vadd.f32 %v10637_v59, %v10720_v22  ;;  %v2976_v62 = vadd.f32 %v10637_v59, %v10724_v61 }
 0x3c8   :  { %v2977_v49 = vadd.f32 %v10637_v59, %v10728_v13  ;;  %v2978_v45 = vadd.f32 %v10637_v59, %v10732_v36  ;;  %v10962_v52 = vadd.f32 %v10637_v59, %v10736_v34  ;;  %v10966_v5 = vadd.f32 %v10637_v59, %v10740_v63 }
 0x3c9   :  { %v10970_v35 = vadd.f32 %v10637_v59, %v10744_v10  ;;  %v2982_v22 = vadd.f32 %v10637_v59, %v10748_v11  ;;  %v10976_v61 = vadd.f32 %v10637_v59, %v10752_v19  ;;  %v2984_v13 = vadd.f32 %v10637_v59, %v10756_v57 }
 0x3ca   :  { %14689 = vst [vmem:[#allocation18_spill] sm:$0xff] %v10962_v52  ;;  %14690 = vst [vmem:[#allocation19_spill] sm:$0xff] %v10966_v5  ;;  %v2985_v36 = vadd.f32 %v10637_v59, %v10760_v60  ;;  %v2986_v34 = vadd.f32 %v10637_v59, %v10764_v7  ;;  %v10986_v63 = vadd.f32 %v10637_v59, %v10768_v17  ;;  %v14698_v5 = vld [vmem:[#allocation8_spill] sm:$0xff] }
 0x3cb   :  { %14691 = vst [vmem:[#allocation16_spill] sm:$0xff] %v10970_v35  ;;  %14692 = vst [vmem:[#allocation17_spill] sm:$0xff] %v10976_v61  ;;  %v2988_v10 = vadd.f32 %v10637_v59, %v10772_v39  ;;  %v2989_v11 = vadd.f32 %v10637_v59, %v10776_v14  ;;  %v2990_v19 = vadd.f32 %v10637_v59, %v10780_v31  ;;  %v14695_v39 = vld [vmem:[#allocation10_spill] sm:$0xff]  ;;  %v14697_v14 = vld [vmem:[#allocation56_spill] sm:$0xff] }
 0x3cc   :  { %14693 = vst [vmem:[#allocation22_spill] sm:$0xff] %v10986_v63  ;;  %v10996_v57 = vadd.f32 %v10637_v59, %v10784_v47  ;;  %v2992_v60 = vadd.f32 %v10637_v59, %v10788_v3  ;;  %v2993_v7 = vadd.f32 %v10637_v59, %v10792_v44  ;;  %v2994_v17 = vadd.f32 %v10637_v59, %v10796_v0  ;;  %v7993_v3 = vld [vmem:[%s14159_s2 + $0x108] sm:$0xff]   ;;  %v14703_v61 = vld [vmem:[#allocation15_spill] sm:$0xff] }
 0x3cd   :  { %v11006_v35 = vadd.f32 %v10637_v59, %v14695_v39  ;;  %v2996_v31 = vadd.f32 %v10637_v59, %v14697_v14  ;;  %v2997_v47 = vadd.f32 %v10637_v59, %v14698_v5  ;;  %v11019_v44 = vadd.f32 %v10637_v59, %v10819_v33  ;;  %v14701_v39 = vld [vmem:[#allocation13_spill] sm:$0xff]  ;;  %4789 = vmatpush1.bf16.msra.mxu1 %v7993_v3 }
 0x3ce   :  { %14694 = vst [vmem:[#allocation20_spill] sm:$0xff] %v10996_v57  ;;  %v14699_v57 = vld [vmem:[#allocation12_spill] sm:$0xff]  ;;  %v3000_v0 = vadd.f32 %v10637_v59, %v10823_v55  ;;  %v3001_v14 = vadd.f32 %v10637_v59, %v14701_v39  ;;  %v3004_v52 = vadd.f32 %v10637_v59, %v10839_v42  ;;  %v3005_v33 = vadd.f32 %v10637_v59, %v10843_v51 }
 0x3cf   :  { %14696 = vst [vmem:[#allocation25_spill] sm:$0xff] %v11006_v35  ;;  %v2998_v63 = vadd.f32 %v10637_v59, %v14699_v57  ;;  %14700 = vst [vmem:[#allocation23_spill] sm:$0xff] %v11019_v44  ;;  %v14702_v35 = vld [vmem:[#allocation11_spill] sm:$0xff]  ;;  %v11029_v57 = vadd.f32 %v10637_v59, %v14703_v61  ;;  %v3006_v44 = vadd.f32 %v10637_v59, %v10847_v30  ;;  %4790 = vmatprep.subr.bf16.mxu1 %v14479_v16 }
 0x3d0   :  { %v3002_v5 = vadd.f32 %v10637_v59, %v14702_v35  ;;  %v11039_v55 = vadd.f32 %v10637_v59, %v10851_v18  ;;  %v3008_v35 = vadd.f32 %v10637_v59, %v10855_v28  ;;  %v3009_v61 = vadd.f32 %v10637_v59, %v10859_v12 }
 0x3d1   :  { %14704 = vst [vmem:[#allocation28_spill] sm:$0xff] %v11029_v57  ;;  %v3010_v42 = vadd.f32 %v10637_v59, %v10864_v56  ;;  %v11050_v51 = vadd.f32 %v10637_v59, %v10868_v23  ;;  %v11054_v30 = vadd.f32 %v10637_v59, %v10872_v20  ;;  %v11057_v18 = vmax.f32 %v10876_v40, 0.0 }
 0x3d2   :  { %14705 = vst [vmem:[#allocation26_spill] sm:$0xff] %v11039_v55  ;;  %v11060_v28 = vmax.f32 %v10884_v41, 0.0  ;;  %v11063_v12 = vmax.f32 %v10888_v58, 0.0  ;;  %v11066_v56 = vmax.f32 %v10892_v50, 0.0  ;;  %v11069_v3 = vmax.f32 %v10900_v8, 0.0 }
 0x3d3   :  { %14706 = vst [vmem:[#allocation31_spill] sm:$0xff] %v11050_v51  ;;  %14707 = vst [vmem:[#allocation29_spill] sm:$0xff] %v11054_v30  ;;  %v11072_v23 = vmax.f32 %v10904_v43, 0.0  ;;  %v11075_v59 = vmax.f32 %v10908_v27, 0.0  ;;  %v11077_v20 = vmax.f32 %v2960_v1, 0.0  ;;  %v11079_v40 = vmax.f32 %v2961_v38, 0.0 }
 0x3d4   :  { %v11081_v41 = vmax.f32 %v2962_v26, 0.0  ;;  %v11083_v58 = vmax.f32 %v2964_v2, 0.0  ;;  %v11085_v39 = vmax.f32 %v2965_v32, 0.0  ;;  %v11087_v50 = vmax.f32 %v2966_v54, 0.0 }
 0x3d5   :  { %v11089_v8 = vmax.f32 %v2968_v46, 0.0  ;;  %v11091_v30 = vmax.f32 %v2969_v6, 0.0  ;;  %v11093_v43 = vmax.f32 %v2970_v24, 0.0  ;;  %v11095_v27 = vmax.f32 %v2972_v53, 0.0 }
 0x3d6   :  { %v11097_v1 = vmax.f32 %v2973_v25, 0.0  ;;  %v11099_v38 = vmax.f32 %v2974_v29, 0.0  ;;  %v11101_v26 = vmax.f32 %v2976_v62, 0.0  ;;  %v11103_v2 = vmax.f32 %v2977_v49, 0.0 }
 0x3d7   :  { %v11105_v32 = vmax.f32 %v2978_v45, 0.0  ;;  %v11107_v54 = vmax.f32 %v2982_v22, 0.0  ;;  %v11109_v46 = vmax.f32 %v2984_v13, 0.0  ;;  %v11111_v6 = vmax.f32 %v2985_v36, 0.0 }
 0x3d8   :  { %v11113_v24 = vmax.f32 %v2986_v34, 0.0  ;;  %v11115_v53 = vmax.f32 %v2988_v10, 0.0  ;;  %v11117_v25 = vmax.f32 %v2989_v11, 0.0  ;;  %v11119_v29 = vmax.f32 %v2990_v19, 0.0 }
 0x3d9   :  { %v11121_v62 = vmax.f32 %v2992_v60, 0.0  ;;  %v11123_v49 = vmax.f32 %v2993_v7, 0.0  ;;  %v11125_v45 = vmax.f32 %v2994_v17, 0.0  ;;  %v11127_v22 = vmax.f32 %v2996_v31, 0.0  ;;  %v7994_v60 = vld [vmem:[%s14159_s2 + $0x100] sm:$0xff]  }
 0x3da   :  { %v11129_v13 = vmax.f32 %v2997_v47, 0.0  ;;  %v11131_v36 = vmax.f32 %v2998_v63, 0.0  ;;  %v11133_v34 = vmax.f32 %v3000_v0, 0.0  ;;  %v11135_v10 = vmax.f32 %v3001_v14, 0.0  ;;  %4791 = vmatpush1.bf16.msra.mxu1 %v7994_v60  ;;  %v7995_v14 = vld [vmem:[%s14159_s2 + $0x178] sm:$0xff]  }
 0x3db   :  { %v11137_v11 = vmax.f32 %v3002_v5, 0.0  ;;  %v11139_v19 = vmax.f32 %v3004_v52, 0.0  ;;  %v11144_v7 = vmax.f32 %v3005_v33, 0.0  ;;  %v11146_v17 = vmax.f32 %v3006_v44, 0.0  ;;  %4792 = vmatprep.subr.bf16.mxu1 %v14479_v16 }
 0x3dc   :  { %14708 = vst [vmem:[#allocation34_spill] sm:$0xff] %v11131_v36  ;;  %14709 = vst [vmem:[#allocation32_spill] sm:$0xff] %v11133_v34  ;;  %v11148_v31 = vmax.f32 %v3008_v35, 0.0  ;;  %v11150_v63 = vmax.f32 %v3009_v61, 0.0  ;;  %v11152_v47 = vmax.f32 %v3010_v42, 0.0  ;;  %v3334_v35 = vrot.slane %v11057_v18, 1 }
 0x3dd   :  { %14710 = vst [vmem:[#allocation37_spill] sm:$0xff] %v11135_v10  ;;  %14711 = vst [vmem:[#allocation35_spill] sm:$0xff] %v11137_v11  ;;  %v3337_v52 = vrot.slane %v11060_v28, 1  ;;  %v3338_v61 = vrot.slane %v11063_v12, 1  ;;  %v3015_v55 = vmax.f32 %v10880_v21, 0.0  ;;  %v11214_v57 = vpack.c.bf16 %v11063_v12, %v11060_v28  ;;  %v14725_v34 = vld [vmem:[#allocation14_spill] sm:$0xff] }
 0x3de   :  { %14712 = vst [vmem:[#allocation39_spill] sm:$0xff] %v11139_v19  ;;  %14713 = vst [vmem:[#allocation43_spill] sm:$0xff] %v11144_v7  ;;  %v3145_v0 = vrot.slane %v11060_v28, 7  ;;  %v3019_v5 = vmax.f32 %v10896_v48, 0.0  ;;  %v3148_v33 = vrot.slane %v11066_v56, 7  ;;  %v11224_v44 = vpack.c.bf16 %v11072_v23, %v11069_v3  ;;  %4793 = vmatpush2.bf16.msra.mxu1 %v7995_v14 }
 0x3df   :  { %14714 = vst [vmem:[#allocation40_spill] sm:$0xff] %v11146_v17  ;;  %14715 = vst [vmem:[#allocation41_spill] sm:$0xff] %v11214_v57  ;;  %v3339_v21 = vsel %vm349_vm4, %v3337_v52, %v3338_v61  ;;  %v3143_v51 = vrot.slane %v3015_v55, 7  ;;  %v3335_v60 = vrot.slane %v3015_v55, 1  ;;  %v11228_v42 = vpack.c.bf16 %v3015_v55, %v11057_v18  ;;  %4794 = vmatprep.subr.bf16.mxu1 %v14479_v16 }
 0x3e0   :  { %14716 = vst [vmem:[#allocation48_spill] sm:$0xff] %v11224_v44  ;;  %v14718_v28 = vrot.slane %v11063_v12, 7  ;;  %v3341_v48 = vrot.slane %v3019_v5, 1  ;;  %v11236_v19 = vpack.c.bf16 %v3019_v5, %v11066_v56  ;;  %v3149_v11 = vrot.slane %v3019_v5, 7 }
 0x3e1   :  { %14717 = vst [vmem:[#allocation44_spill] sm:$0xff] %v11228_v42  ;;  %4238 = vmatprep.mubr.bf16.mxu1 %v11228_v42  ;;  %v14721_v52 = vrot.slane %v11057_v18, 7  ;;  %v3336_v12 = vsel %vm349_vm4, %v3334_v35, %v3335_v60  ;;  %v11244_v10 = vpack.c.bf16 %v3338_v61, %v3339_v21  ;;  %v3023_v36 = vmax.f32 %v14725_v34, 0.0  ;;  %v7996_v42 = vld [vmem:[%s14159_s2 + $0x1b8] sm:$0xff]  }
 0x3e2   :  { %v3147_v17 = vsel %vm156_vm0, %v3145_v0, %v14718_v28  ;;  %14720 = vst [vmem:[#allocation45_spill] sm:$0xff] %v11236_v19  ;;  %v11249_v28 = vpack.c.bf16 %v3335_v60, %v3336_v12  ;;  %v3150_v5 = vsel %vm156_vm0, %v3148_v33, %v3149_v11  ;;  %v14727_v35 = vrot.slane %v11072_v23, 7 }
 0x3e3   :  { %v11233_v7 = vpack.c.bf16 %v3147_v17, %v3145_v0  ;;  %v3144_v55 = vsel %vm156_vm0, %v14721_v52, %v3143_v51  ;;  %14722 = vst [vmem:[#allocation49_spill] sm:$0xff] %v11244_v10  ;;  %v3151_v17 = vrot.slane %v11069_v3, 7  ;;  %v14723_v0 = vmov %v14721_v52 }
 0x3e4   :  { %v6995_v14 = vpack.c.bf16 %v3144_v55, %v14723_v0  ;;  %14724 = vst [vmem:[#allocation53_spill] sm:$0xff] %v11249_v28  ;;  %v11256_v51 = vpack.c.bf16 %v3150_v5, %v3148_v33  ;;  %v14728_v21 = vrot.slane %v11066_v56, 1  ;;  %v3154_v60 = vrot.slane %v11075_v59, 7 }
 0x3e5   :  { %14719 = vst [vmem:[#allocation46_spill] sm:$0xff] %v11233_v7  ;;  %v3153_v61 = vsel %vm156_vm0, %v3151_v17, %v14727_v35  ;;  %v3347_v11 = vrot.slane %v3023_v36, 1  ;;  %v11272_v33 = vpack.c.bf16 %v3023_v36, %v11075_v59  ;;  %v14733_v56 = vmov 0.0|0.0  }
 0x3e6   :  { %14726 = vst [vmem:[#allocation51_spill] sm:$0xff] %v11256_v51  ;;  %v3342_v18 = vsel %vm349_vm4, %v14728_v21, %v3341_v48  ;;  %6996 = vmatmul.mubr.msk.bf16.gmra.mxu1 %vm8260_vm3, %v6995_v14  ;;  %7116 = vmatprep.mubr.msk.bf16.mxu0 %vm8260_vm3, %v6995_v14  ;;  %v11269_v34 = vpack.c.bf16 %v3153_v61, %v3151_v17  ;;  %v3155_v12 = vrot.slane %v3023_v36, 7  ;;  %v14735_v5 = vrot.slane %v11072_v23, 1 }
 0x3e7   :  { %14731 = vst [vmem:[#allocation54_spill] sm:$0xff] %v11272_v33  ;;  %v11274_v55 = vpack.c.bf16 %v3341_v48, %v3342_v18  ;;  %4246 = vmatprep.mubr.bf16.mxu1 %v11214_v57  ;;  %4520 = vmatmul.mubr.bf16.vlgmr.msra.gmra.mxu0 %v14733_v56  ;;  %v11280_v0 = vpack.c.bf16 %v11079_v40, %v11077_v20  ;;  %v14736_v17 = vrot.slane %v11069_v3, 1  ;;  %v3157_v35 = vrot.slane %v11077_v20, 7 }
 0x3e8   :  { %14730 = vst [vmem:[#allocation50_spill] sm:$0xff] %v11269_v34  ;;  %7120 = vmatprep.mubr.msk.bf16.mxu0 %vm8260_vm3, %v11233_v7  ;;  %v14737_v48 = vmov %v14735_v5  ;;  %v3027_v36 = vmax.f32 %v10922_v4, 0.0  ;;  %v14739_v21 = vrot.slane %v11075_v59, 1  ;;  %v3160_v3 = vrot.slane %v11081_v41, 7  ;;  %5066 = vmatpush1.bf16.msra.mxu0 %v7996_v42 }
 0x3e9   :  { %14732 = vst [vmem:[#allocation57_spill] sm:$0xff] %v11274_v55  ;;  %14734 = vst [vmem:[#allocation55_spill] sm:$0xff] %v11280_v0  ;;  %v3345_v14 = vsel %vm349_vm4, %v14736_v17, %v14735_v5  ;;  %v3156_v5 = vsel %vm156_vm0, %v3154_v60, %v3155_v12  ;;  %v14740_v17 = vrot.slane %v11079_v40, 7  ;;  %v11308_v23 = vpack.c.bf16 %v11085_v39, %v11083_v58 }
 0x3ea   :  { %v11293_v61 = vpack.c.bf16 %v14737_v48, %v3345_v14  ;;  %v3348_v18 = vsel %vm349_vm4, %v14739_v21, %v3347_v11  ;;  %5067 = vmatprep.subr.bf16.mxu0 %v14479_v16  ;;  %v11311_v4 = vpack.c.bf16 %v3156_v5, %v3154_v60  ;;  %v3353_v14 = vrot.slane %v3027_v36, 1 }
 0x3eb   :  { %v3159_v57 = vsel %vm156_vm0, %v3157_v35, %v14740_v17  ;;  %v11304_v56 = vpack.c.bf16 %v3347_v11, %v3348_v18  ;;  %14742 = vst [vmem:[#allocation59_spill] sm:$0xff] %v11308_v23  ;;  %v11316_v42 = vpack.c.bf16 %v3027_v36, %v11081_v41  ;;  %v3161_v12 = vrot.slane %v3027_v36, 7 }
 0x3ec   :  { %14738 = vst [vmem:[#allocation58_spill] sm:$0xff] %v11293_v61  ;;  %14743 = vst [vmem:[#allocation62_spill] sm:$0xff] %v11311_v4  ;;  %v11313_v59 = vpack.c.bf16 %v3159_v57, %v3157_v35  ;;  %v14746_v48 = vrot.slane %v11079_v40, 1  ;;  %v14747_v11 = vrot.slane %v11077_v20, 1  ;;  %v3163_v18 = vrot.slane %v11083_v58, 7 }
 0x3ed   :  { %14741 = vst [vmem:[#allocation60_spill] sm:$0xff] %v11304_v56  ;;  %14745 = vst [vmem:[#allocation63_spill] sm:$0xff] %v11316_v42  ;;  %v3031_v17 = vmax.f32 %v10932_v15, 0.0  ;;  %v14750_v57 = vrot.slane %v11081_v41, 1  ;;  %v3166_v36 = vrot.slane %v11087_v50, 7  ;;  %v11335_v23 = vpack.c.bf16 %v11091_v30, %v11089_v8 }
 0x3ee   :  { %14744 = vst [vmem:[#allocation61_spill] sm:$0xff] %v11313_v59  ;;  %v3351_v21 = vsel %vm349_vm4, %v14747_v11, %v14746_v48  ;;  %v14748_v60 = vmov %v14746_v48  ;;  %v3162_v20 = vsel %vm156_vm0, %v3160_v3, %v3161_v12  ;;  %v14752_v48 = vrot.slane %v11085_v39, 7  ;;  %7000 = vmatmul.mubr.msk.bf16.gmra.mxu1 %vm8260_vm3, %v11233_v7 }
 0x3ef   :  { %v11327_v5 = vpack.c.bf16 %v14748_v60, %v3351_v21  ;;  %v3354_v35 = vsel %vm349_vm4, %v14750_v57, %v3353_v14  ;;  %14751 = vst [vmem:[#allocation65_spill] sm:$0xff] %v11335_v23  ;;  %v3359_v11 = vrot.slane %v3031_v17, 1  ;;  %v11342_v40 = vpack.c.bf16 %v3031_v17, %v11087_v50  ;;  %4254 = vmatprep.mubr.bf16.mxu1 %v11236_v19 }
 0x3f0   :  { %v3165_v15 = vsel %vm156_vm0, %v3163_v18, %v14752_v48  ;;  %v11347_v41 = vpack.c.bf16 %v3162_v20, %v3160_v3  ;;  %v11351_v60 = vpack.c.bf16 %v3353_v14, %v3354_v35  ;;  %v3167_v57 = vrot.slane %v3031_v17, 7  ;;  %7123 = vmatmul.mubr.msk.bf16.gmra.mxu0 %vm8384_vm5, %v11249_v28  ;;  %v7997_v35 = vld [vmem:[%s14159_s2 + $0x170] sm:$0xff]  }
 0x3f1   :  { %14749 = vst [vmem:[#allocation64_spill] sm:$0xff] %v11327_v5  ;;  %14753 = vst [vmem:[#allocation21_spill] sm:$0xff] %v11342_v40  ;;  %v11349_v21 = vpack.c.bf16 %v3165_v15, %v3163_v18  ;;  %v14755_v48 = vrot.slane %v11085_v39, 1  ;;  %v14756_v23 = vrot.slane %v11083_v58, 1  ;;  %v3169_v3 = vrot.slane %v11089_v8, 7  ;;  %7127 = vmatprep.mubr.msk.bf16.mxu0 %vm8260_vm3, %v11256_v51  ;;  %4795 = vmatpush2.bf16.msra.mxu1 %v7997_v35 }
 0x3f2   :  { %v3035_v18 = vmax.f32 %v10942_v9, 0.0  ;;  %v14757_v14 = vrot.slane %v11087_v50, 1  ;;  %v3168_v58 = vsel %vm156_vm0, %v3166_v36, %v3167_v57  ;;  %v3172_v9 = vrot.slane %v11093_v43, 7  ;;  %v7998_v50 = vld [vmem:[%s14159_s2 + $0x1b0] sm:$0xff]   ;;  %4796 = vmatprep.subr.bf16.mxu1 %v14479_v16 }
 0x3f3   :  { %v3357_v40 = vsel %vm349_vm4, %v14756_v23, %v14755_v48  ;;  %v14758_v23 = vmov %v14755_v48  ;;  %v11384_v48 = vpack.c.bf16 %v3168_v58, %v3166_v36  ;;  %v14761_v36 = vrot.slane %v11089_v8, 1  ;;  %5068 = vmatpush1.bf16.msra.mxu0 %v7998_v50 }
 0x3f4   :  { %v3360_v17 = vsel %vm349_vm4, %v14757_v14, %v3359_v11  ;;  %v11376_v20 = vpack.c.bf16 %v14758_v23, %v3357_v40  ;;  %v14759_v14 = vrot.slane %v11091_v30, 7  ;;  %v3365_v7 = vrot.slane %v3035_v18, 1  ;;  %5069 = vmatprep.subr.bf16.mxu0 %v14479_v16 }
 0x3f5   :  { %v11378_v15 = vpack.c.bf16 %v3359_v11, %v3360_v17  ;;  %v11390_v57 = vpack.c.bf16 %v3035_v18, %v11093_v43  ;;  %v3173_v11 = vrot.slane %v3035_v18, 7  ;;  %v11396_v40 = vpack.c.bf16 %v11097_v1, %v11095_v27 }
 0x3f6   :  { %v3171_v19 = vsel %vm156_vm0, %v3169_v3, %v14759_v14  ;;  %v14760_v17 = vrot.slane %v11091_v30, 1  ;;  %v14763_v18 = vrot.slane %v11093_v43, 1  ;;  %v3178_v50 = vrot.slane %v11099_v38, 7  ;;  %7004 = vmatmul.mubr.msk.bf16.gmra.mxu1 %vm8260_vm3, %v11256_v51 }
 0x3f7   :  { %v11392_v39 = vpack.c.bf16 %v3171_v19, %v3169_v3  ;;  %v3175_v19 = vrot.slane %v11095_v27, 7  ;;  %v3039_v3 = vmax.f32 %v10952_v37, 0.0  ;;  %v3174_v8 = vsel %vm156_vm0, %v3172_v9, %v3173_v11  ;;  %4262 = vmatprep.mubr.bf16.mxu1 %v11224_v44 }
 0x3f8   :  { %v3363_v58 = vsel %vm349_vm4, %v14761_v36, %v14760_v17  ;;  %v14762_v23 = vmov %v14760_v17  ;;  %v3366_v35 = vsel %vm349_vm4, %v14763_v18, %v3365_v7  ;;  %v11420_v30 = vpack.c.bf16 %v11103_v2, %v11101_v26  ;;  %7130 = vmatmul.mubr.msk.bf16.gmra.mxu0 %vm8384_vm5, %v11244_v10 }
 0x3f9   :  { %v11406_v14 = vpack.c.bf16 %v14762_v23, %v3363_v58  ;;  %v11415_v17 = vpack.c.bf16 %v3365_v7, %v3366_v35  ;;  %v11422_v36 = vpack.c.bf16 %v3174_v8, %v3172_v9  ;;  %v14765_v37 = vrot.slane %v11097_v1, 7  ;;  %7134 = vmatprep.mubr.msk.bf16.mxu0 %vm8260_vm3, %v11269_v34 }
 0x3fa   :  { %14764 = vst [vmem:[#allocation24_spill] sm:$0xff] %v11420_v30  ;;  %v3371_v58 = vrot.slane %v3039_v3, 1  ;;  %v11428_v23 = vpack.c.bf16 %v3039_v3, %v11099_v38  ;;  %v3179_v11 = vrot.slane %v3039_v3, 7  ;;  %v14766_v18 = vrot.slane %v11097_v1, 1 }
 0x3fb   :  { %v3177_v43 = vsel %vm156_vm0, %v3175_v19, %v14765_v37  ;;  %v14767_v9 = vrot.slane %v11095_v27, 1  ;;  %v3181_v8 = vrot.slane %v11101_v26, 7  ;;  %v14772_v44 = vrot.slane %v11103_v2, 7 }
 0x3fc   :  { %v11433_v7 = vpack.c.bf16 %v3177_v43, %v3175_v19  ;;  %v14768_v37 = vmov %v14766_v18  ;;  %v14770_v19 = vld [vmem:[#allocation18_spill] sm:$0xff]  ;;  %v14771_v43 = vrot.slane %v11099_v38, 1  ;;  %v14775_v38 = vrot.slane %v11101_v26, 1 }
 0x3fd   :  { %v3369_v35 = vsel %vm349_vm4, %v14767_v9, %v14766_v18  ;;  %v3043_v3 = vmax.f32 %v14770_v19, 0.0  ;;  %v3184_v18 = vrot.slane %v11105_v32, 7  ;;  %v3180_v9 = vsel %vm156_vm0, %v3178_v50, %v3179_v11 }
 0x3fe   :  { %v11447_v51 = vpack.c.bf16 %v14768_v37, %v3369_v35  ;;  %v3372_v27 = vsel %vm349_vm4, %v14771_v43, %v3371_v58  ;;  %v3183_v1 = vsel %vm156_vm0, %v3181_v8, %v14772_v44  ;;  %v14774_v37 = vrot.slane %v11103_v2, 1  ;;  %7008 = vmatmul.mubr.msk.bf16.gmra.mxu1 %vm8260_vm3, %v11269_v34 }
 0x3ff   :  { %v11461_v35 = vpack.c.bf16 %v3371_v58, %v3372_v27  ;;  %v11468_v43 = vpack.c.bf16 %v3180_v9, %v3178_v50  ;;  %v11470_v10 = vpack.c.bf16 %v3183_v1, %v3181_v8  ;;  %v3377_v28 = vrot.slane %v3043_v3, 1  ;;  %v14778_v27 = vld [vmem:[#allocation17_spill] sm:$0xff]  ;;  %4270 = vmatprep.mubr.bf16.mxu1 %v11272_v33  ;;  %v14792_v33 = vld [vmem:[#allocation20_spill] sm:$0xff] }
 0x400   :  { %14769 = vst [vmem:[#allocation66_spill] sm:$0xff] %v11447_v51  ;;  %v3375_v19 = vsel %vm349_vm4, %v14775_v38, %v14774_v37  ;;  %v11473_v51 = vpack.c.bf16 %v3043_v3, %v11105_v32  ;;  %v3185_v30 = vrot.slane %v3043_v3, 7  ;;  %v14777_v44 = vmov %v14774_v37  ;;  %7137 = vmatmul.mubr.msk.bf16.gmra.mxu0 %vm8384_vm5, %v11274_v55 }
 0x401   :  { %14773 = vst [vmem:[#allocation27_spill] sm:$0xff] %v11461_v35  ;;  %v11478_v58 = vpack.c.bf16 %v14777_v44, %v3375_v19  ;;  %v3047_v35 = vmax.f32 %v14778_v27, 0.0  ;;  %v14779_v26 = vrot.slane %v11105_v32, 1  ;;  %v3190_v8 = vrot.slane %v11107_v54, 7  ;;  %7141 = vmatprep.mubr.msk.bf16.mxu0 %vm8260_vm3, %v11311_v4 }
 0x402   :  { %14776 = vst [vmem:[#allocation67_spill] sm:$0xff] %v11473_v51  ;;  %v11487_v9 = vpack.c.bf16 %v11111_v6, %v11109_v46  ;;  %v3193_v1 = vrot.slane %v11109_v46, 7  ;;  %v3186_v2 = vsel %vm156_vm0, %v3184_v18, %v3185_v30  ;;  %v14783_v30 = vld [vmem:[#allocation22_spill] sm:$0xff] }
 0x403   :  { %v3378_v50 = vsel %vm349_vm4, %v14779_v26, %v3377_v28  ;;  %v3383_v37 = vrot.slane %v3047_v35, 1  ;;  %v11493_v38 = vpack.c.bf16 %v3047_v35, %v11107_v54  ;;  %v11496_v19 = vpack.c.bf16 %v3186_v2, %v3184_v18 }
 0x404   :  { %14780 = vst [vmem:[#allocation68_spill] sm:$0xff] %v11487_v9  ;;  %v11498_v44 = vpack.c.bf16 %v3377_v28, %v3378_v50  ;;  %v3191_v27 = vrot.slane %v3047_v35, 7  ;;  %v14782_v26 = vrot.slane %v11111_v6, 7  ;;  %v3051_v3 = vmax.f32 %v14783_v30, 0.0 }
 0x405   :  { %14781 = vst [vmem:[#allocation30_spill] sm:$0xff] %v11493_v38  ;;  %v14784_v9 = vrot.slane %v11107_v54, 1  ;;  %v3196_v18 = vrot.slane %v11113_v24, 7  ;;  %v3199_v2 = vrot.slane %v11115_v53, 7  ;;  %v7999_v54 = vld [vmem:[%s14159_s2 + $0x168] sm:$0xff]  }
 0x406   :  { %v3195_v11 = vsel %vm156_vm0, %v3193_v1, %v14782_v26  ;;  %v3192_v28 = vsel %vm156_vm0, %v3190_v8, %v3191_v27  ;;  %v3389_v26 = vrot.slane %v3051_v3, 1  ;;  %v11530_v30 = vpack.c.bf16 %v3051_v3, %v11113_v24  ;;  %4797 = vmatpush2.bf16.msra.mxu1 %v7999_v54 }
 0x407   :  { %v3384_v38 = vsel %vm349_vm4, %v14784_v9, %v3383_v37  ;;  %v11516_v35 = vpack.c.bf16 %v3195_v11, %v3193_v1  ;;  %v11527_v9 = vpack.c.bf16 %v3192_v28, %v3190_v8  ;;  %v3197_v11 = vrot.slane %v3051_v3, 7  ;;  %v8000_v1 = vld [vmem:[%s14159_s2 + $0x1a8] sm:$0xff]   ;;  %4798 = vmatprep.subr.bf16.mxu1 %v14479_v16  ;;  %7012 = vmatmul.mubr.msk.bf16.gmra.mxu1 %vm8260_vm3, %v11311_v4 }
 0x408   :  { %v11518_v50 = vpack.c.bf16 %v3383_v37, %v3384_v38  ;;  %14787 = vst [vmem:[#allocation70_spill] sm:$0xff] %v11530_v30  ;;  %v11537_v37 = vpack.c.bf16 %v11117_v25, %v11115_v53  ;;  %v14789_v38 = vrot.slane %v11111_v6, 1  ;;  %v14790_v27 = vrot.slane %v11109_v46, 1  ;;  %5070 = vmatpush1.bf16.msra.mxu0 %v8000_v1  ;;  %4278 = vmatprep.mubr.bf16.mxu1 %v11280_v0  ;;  %v14815_v0 = vld [vmem:[#allocation23_spill] sm:$0xff] }
 0x409   :  { %14785 = vst [vmem:[#allocation33_spill] sm:$0xff] %v11516_v35  ;;  %v14791_v28 = vrot.slane %v11117_v25, 7  ;;  %v3055_v3 = vmax.f32 %v14792_v33, 0.0  ;;  %v3198_v34 = vsel %vm156_vm0, %v3196_v18, %v3197_v11  ;;  %v14795_v30 = vrot.slane %v11113_v24, 1  ;;  %5071 = vmatprep.subr.bf16.mxu0 %v14479_v16  ;;  %7144 = vmatmul.mubr.msk.bf16.gmra.mxu0 %vm8384_vm5, %v11293_v61 }
 0x40a   :  { %14786 = vst [vmem:[#allocation69_spill] sm:$0xff] %v11518_v50  ;;  %14788 = vst [vmem:[#allocation36_spill] sm:$0xff] %v11537_v37  ;;  %v3387_v8 = vsel %vm349_vm4, %v14790_v27, %v14789_v38  ;;  %v14793_v55 = vmov %v14789_v38  ;;  %v11558_v38 = vpack.c.bf16 %v3198_v34, %v3196_v18  ;;  %v3202_v6 = vrot.slane %v11119_v29, 7  ;;  %7148 = vmatprep.mubr.msk.bf16.mxu0 %vm8260_vm3, %v11313_v59 }
 0x40b   :  { %v3201_v32 = vsel %vm156_vm0, %v3199_v2, %v14791_v28  ;;  %v11551_v50 = vpack.c.bf16 %v14793_v55, %v3387_v8  ;;  %v3390_v46 = vsel %vm349_vm4, %v14795_v30, %v3389_v26  ;;  %v3395_v27 = vrot.slane %v3055_v3, 1  ;;  %v14803_v30 = vld [vmem:[#allocation25_spill] sm:$0xff] }
 0x40c   :  { %v11553_v37 = vpack.c.bf16 %v3201_v32, %v3199_v2  ;;  %14796 = vst [vmem:[#allocation71_spill] sm:$0xff] %v11558_v38  ;;  %v11561_v28 = vpack.c.bf16 %v3055_v3, %v11119_v29  ;;  %v11563_v33 = vpack.c.bf16 %v3389_v26, %v3390_v46  ;;  %v3203_v55 = vrot.slane %v3055_v3, 7 }
 0x40d   :  { %v11570_v24 = vpack.c.bf16 %v11123_v49, %v11121_v62  ;;  %v14799_v34 = vrot.slane %v11117_v25, 1  ;;  %v14800_v32 = vrot.slane %v11115_v53, 1  ;;  %v3205_v26 = vrot.slane %v11121_v62, 7 }
 0x40e   :  { %14794 = vst [vmem:[#allocation38_spill] sm:$0xff] %v11553_v37  ;;  %14797 = vst [vmem:[#allocation42_spill] sm:$0xff] %v11561_v28  ;;  %v3059_v11 = vmax.f32 %v14803_v30, 0.0  ;;  %v14804_v1 = vrot.slane %v11119_v29, 1  ;;  %v3204_v53 = vsel %vm156_vm0, %v3202_v6, %v3203_v55  ;;  %v3208_v25 = vrot.slane %v11125_v45, 7 }
 0x40f   :  { %14798 = vst [vmem:[#allocation72_spill] sm:$0xff] %v11570_v24  ;;  %v3393_v18 = vsel %vm349_vm4, %v14800_v32, %v14799_v34  ;;  %v14801_v2 = vmov %v14799_v34  ;;  %v11595_v46 = vpack.c.bf16 %v11129_v13, %v11127_v22  ;;  %v11601_v29 = vpack.c.bf16 %v3204_v53, %v3202_v6  ;;  %7016 = vmatmul.mubr.msk.bf16.gmra.mxu1 %vm8260_vm3, %v11313_v59 }
 0x410   :  { %v11579_v54 = vpack.c.bf16 %v14801_v2, %v3393_v18  ;;  %v3396_v8 = vsel %vm349_vm4, %v14804_v1, %v3395_v27  ;;  %v14808_v34 = vrot.slane %v11123_v49, 7  ;;  %v11607_v32 = vpack.c.bf16 %v3059_v11, %v11125_v45  ;;  %4286 = vmatprep.mubr.bf16.mxu1 %v11316_v42 }
 0x411   :  { %v11590_v3 = vpack.c.bf16 %v3395_v27, %v3396_v8  ;;  %14806 = vst [vmem:[#allocation10_spill] sm:$0xff] %v11595_v46  ;;  %14807 = vst [vmem:[#allocation56_spill] sm:$0xff] %v11601_v29  ;;  %v3401_v27 = vrot.slane %v3059_v11, 1  ;;  %v3209_v2 = vrot.slane %v3059_v11, 7  ;;  %v14811_v30 = vrot.slane %v11123_v49, 1  ;;  %v14821_v49 = vld [vmem:[#allocation37_spill] sm:$0xff]  ;;  %7151 = vmatmul.mubr.msk.bf16.gmra.mxu0 %vm8384_vm5, %v11304_v56 }
 0x412   :  { %14802 = vst [vmem:[#allocation7_spill] sm:$0xff] %v11579_v54  ;;  %v3207_v55 = vsel %vm156_vm0, %v3205_v26, %v14808_v34  ;;  %14809 = vst [vmem:[#allocation8_spill] sm:$0xff] %v11607_v32  ;;  %v14812_v6 = vrot.slane %v11121_v62, 1  ;;  %v3211_v8 = vrot.slane %v11127_v22, 7  ;;  %v3063_v4 = vmax.f32 %v14815_v0, 0.0  ;;  %7155 = vmatprep.mubr.msk.bf16.mxu0 %vm8260_vm3, %v11347_v41 }
 0x413   :  { %14805 = vst [vmem:[#allocation47_spill] sm:$0xff] %v11590_v3  ;;  %v11612_v18 = vpack.c.bf16 %v3207_v55, %v3205_v26  ;;  %v14813_v53 = vmov %v14811_v30  ;;  %v14816_v61 = vrot.slane %v11125_v45, 1  ;;  %v14817_v55 = vld [vmem:[#allocation34_spill] sm:$0xff]  ;;  %v3210_v46 = vsel %vm156_vm0, %v3208_v25, %v3209_v2  ;;  %v14820_v3 = vld [vmem:[#allocation32_spill] sm:$0xff] }
 0x414   :  { %v3399_v1 = vsel %vm349_vm4, %v14812_v6, %v14811_v30  ;;  %v3214_v11 = vrot.slane %v14817_v55, 7  ;;  %v14818_v62 = vrot.slane %v11129_v13, 7  ;;  %v3407_v45 = vrot.slane %v3063_v4, 1 }
 0x415   :  { %14810 = vst [vmem:[#allocation12_spill] sm:$0xff] %v11612_v18  ;;  %v11622_v34 = vpack.c.bf16 %v14813_v53, %v3399_v1  ;;  %v3402_v26 = vsel %vm349_vm4, %v14816_v61, %v3401_v27  ;;  %v11637_v1 = vpack.c.bf16 %v14821_v49, %v14820_v3  ;;  %v11639_v53 = vpack.c.bf16 %v3210_v46, %v3208_v25 }
 0x416   :  { %v3213_v30 = vsel %vm156_vm0, %v3211_v8, %v14818_v62  ;;  %v11633_v6 = vpack.c.bf16 %v3401_v27, %v3402_v26  ;;  %v11644_v61 = vpack.c.bf16 %v3063_v4, %v14817_v55  ;;  %v14826_v2 = vrot.slane %v11129_v13, 1  ;;  %v14828_v62 = vld [vmem:[#allocation28_spill] sm:$0xff] }
 0x417   :  { %14814 = vst [vmem:[#allocation13_spill] sm:$0xff] %v11622_v34  ;;  %14822 = vst [vmem:[#allocation15_spill] sm:$0xff] %v11637_v1  ;;  %v11641_v0 = vpack.c.bf16 %v3213_v30, %v3211_v8  ;;  %v3215_v34 = vrot.slane %v3063_v4, 7  ;;  %v14827_v32 = vrot.slane %v11127_v22, 1  ;;  %v3217_v26 = vrot.slane %v14820_v3, 7  ;;  %v14832_v1 = vld [vmem:[#allocation35_spill] sm:$0xff]  ;;  %7020 = vmatmul.mubr.msk.bf16.gmra.mxu1 %vm8260_vm3, %v11347_v41 }
 0x418   :  { %14819 = vst [vmem:[#allocation11_spill] sm:$0xff] %v11633_v6  ;;  %14823 = vst [vmem:[#allocation14_spill] sm:$0xff] %v11639_v53  ;;  %v3067_v6 = vmax.f32 %v14828_v62, 0.0  ;;  %v14829_v25 = vmov %v14826_v2  ;;  %v14831_v8 = vrot.slane %v14817_v55, 1  ;;  %v3220_v4 = vrot.slane %v14832_v1, 7 }
 0x419   :  { %14824 = vst [vmem:[#allocation5_spill] sm:$0xff] %v11641_v0  ;;  %14825 = vst [vmem:[#allocation6_spill] sm:$0xff] %v11644_v61  ;;  %v3405_v27 = vsel %vm349_vm4, %v14827_v32, %v14826_v2  ;;  %v14833_v61 = vld [vmem:[#allocation39_spill] sm:$0xff]  ;;  %v3216_v22 = vsel %vm156_vm0, %v3214_v11, %v3215_v34  ;;  %v14836_v13 = vrot.slane %v14821_v49, 7  ;;  %v14841_v42 = vrot.slane %v14821_v49, 1  ;;  %7158 = vmatmul.mubr.msk.bf16.gmra.mxu0 %vm8384_vm5, %v11327_v5 }
 0x41a   :  { %v11655_v46 = vpack.c.bf16 %v14829_v25, %v3405_v27  ;;  %v3408_v30 = vsel %vm349_vm4, %v14831_v8, %v3407_v45  ;;  %v14834_v0 = vld [vmem:[#allocation43_spill] sm:$0xff]  ;;  %v3413_v2 = vrot.slane %v3067_v6, 1  ;;  %v11673_v55 = vpack.c.bf16 %v3067_v6, %v14832_v1  ;;  %v8001_v27 = vld [vmem:[%s14159_s2 + $0x160] sm:$0xff]   ;;  %7162 = vmatprep.mubr.msk.bf16.mxu0 %vm8260_vm3, %v11349_v21 }
 0x41b   :  { %v11663_v53 = vpack.c.bf16 %v14834_v0, %v14833_v61  ;;  %v3219_v32 = vsel %vm156_vm0, %v3217_v26, %v14836_v13  ;;  %v11682_v62 = vpack.c.bf16 %v3216_v22, %v3214_v11  ;;  %v11686_v25 = vpack.c.bf16 %v3407_v45, %v3408_v30  ;;  %v8002_v13 = vld [vmem:[%s14159_s2 + $0x1a0] sm:$0xff]   ;;  %v14843_v22 = vld [vmem:[#allocation26_spill] sm:$0xff]  ;;  %4799 = vmatpush2.bf16.msra.mxu1 %v8001_v27 }
 0x41c   :  { %14830 = vst [vmem:[#allocation18_spill] sm:$0xff] %v11655_v46  ;;  %14837 = vst [vmem:[#allocation22_spill] sm:$0xff] %v11673_v55  ;;  %v11684_v34 = vpack.c.bf16 %v3219_v32, %v3217_v26  ;;  %v3221_v8 = vrot.slane %v3067_v6, 7  ;;  %v14842_v59 = vrot.slane %v14820_v3, 1  ;;  %v3223_v26 = vrot.slane %v14833_v61, 7  ;;  %v14846_v3 = vld [vmem:[#allocation40_spill] sm:$0xff]  ;;  %5072 = vmatpush1.bf16.msra.mxu0 %v8002_v13  ;;  %4800 = vmatprep.subr.bf16.mxu1 %v14479_v16 }
 0x41d   :  { %14835 = vst [vmem:[#allocation17_spill] sm:$0xff] %v11663_v53  ;;  %14838 = vst [vmem:[#allocation20_spill] sm:$0xff] %v11682_v62  ;;  %v3071_v45 = vmax.f32 %v14843_v22, 0.0  ;;  %v14844_v6 = vrot.slane %v14832_v1, 1  ;;  %v14845_v56 = vmov %v14841_v42  ;;  %v3226_v55 = vrot.slane %v14846_v3, 7  ;;  %5073 = vmatprep.subr.bf16.mxu0 %v14479_v16 }
 0x41e   :  { %14839 = vst [vmem:[#allocation25_spill] sm:$0xff] %v11684_v34  ;;  %14840 = vst [vmem:[#allocation23_spill] sm:$0xff] %v11686_v25  ;;  %v3411_v11 = vsel %vm349_vm4, %v14842_v59, %v14841_v42  ;;  %v3222_v32 = vsel %vm156_vm0, %v3220_v4, %v3221_v8  ;;  %v14848_v42 = vrot.slane %v14834_v0, 7  ;;  %v14853_v13 = vrot.slane %v14833_v61, 1 }
 0x41f   :  { %v3414_v30 = vsel %vm349_vm4, %v14844_v6, %v3413_v2  ;;  %v11707_v53 = vpack.c.bf16 %v14845_v56, %v3411_v11  ;;  %v11713_v59 = vpack.c.bf16 %v3222_v32, %v3220_v4  ;;  %v3419_v27 = vrot.slane %v3071_v45, 1  ;;  %v14856_v32 = vld [vmem:[#allocation52_spill] sm:$0xff] }
 0x420   :  { %v11709_v25 = vpack.c.bf16 %v3413_v2, %v3414_v30  ;;  %v3225_v1 = vsel %vm156_vm0, %v3223_v26, %v14848_v42  ;;  %v11719_v8 = vpack.c.bf16 %v3071_v45, %v14846_v3  ;;  %v3227_v49 = vrot.slane %v3071_v45, 7 }
 0x421   :  { %14847 = vst [vmem:[#allocation34_spill] sm:$0xff] %v11713_v59  ;;  %v11722_v56 = vpack.c.bf16 %v3225_v1, %v3223_v26  ;;  %v11726_v2 = vpack.c.bf16 %v11150_v63, %v11148_v31  ;;  %v14852_v4 = vrot.slane %v14834_v0, 1  ;;  %v3229_v30 = vrot.slane %v11148_v31, 7  ;;  %7165 = vmatmul.mubr.msk.bf16.gmra.mxu0 %vm8384_vm5, %v11351_v60 }
 0x422   :  { %14849 = vst [vmem:[#allocation32_spill] sm:$0xff] %v11719_v8  ;;  %v3075_v26 = vmax.f32 %v14856_v32, 0.0  ;;  %v14857_v45 = vrot.slane %v14846_v3, 1  ;;  %v3228_v1 = vsel %vm156_vm0, %v3226_v55, %v3227_v49  ;;  %v3232_v61 = vrot.slane %v11152_v47, 7  ;;  %v14863_v32 = vld [vmem:[#allocation59_spill] sm:$0xff]  ;;  %7169 = vmatprep.mubr.msk.bf16.mxu0 %vm8260_vm3, %v11384_v48 }
 0x423   :  { %14850 = vst [vmem:[#allocation37_spill] sm:$0xff] %v11722_v56  ;;  %14851 = vst [vmem:[#allocation28_spill] sm:$0xff] %v11726_v2  ;;  %v3417_v11 = vsel %vm349_vm4, %v14853_v13, %v14852_v4  ;;  %v14854_v22 = vmov %v14852_v4  ;;  %v14858_v4 = vrot.slane %v11150_v63, 1  ;;  %v14859_v0 = vrot.slane %v11148_v31, 1  ;;  %4294 = vmatprep.mubr.bf16.mxu1 %v14863_v32 }
 0x424   :  { %v11735_v6 = vpack.c.bf16 %v14854_v22, %v3417_v11  ;;  %v3420_v42 = vsel %vm349_vm4, %v14857_v45, %v3419_v27  ;;  %v11754_v11 = vpack.c.bf16 %v3228_v1, %v3226_v55  ;;  %v14861_v3 = vrot.slane %v11150_v63, 7  ;;  %v11775_v1 = vpop.f32.mrf.mxu1  ;;  %7024 = vmatmul.mubr.msk.bf16.gmra.mxu1 %vm8260_vm3, %v11349_v21 }
 0x425   :  { %v11743_v2 = vpack.c.bf16 %v3419_v27, %v3420_v42  ;;  %v3423_v13 = vsel %vm349_vm4, %v14859_v0, %v14858_v4  ;;  %v3425_v27 = vrot.slane %v3075_v26, 1  ;;  %v11760_v22 = vpack.c.bf16 %v3075_v26, %v11152_v47  ;;  %14866 = vst [vmem:[#allocation40_spill] sm:$0xff] %v11775_v1  ;;  %v8014_v1 = vld [vmem:[%s14159_s2 + $0x1e0] sm:$0xff]  }
 0x426   :  { %14855 = vst [vmem:[#allocation35_spill] sm:$0xff] %v11735_v6  ;;  %14860 = vst [vmem:[#allocation39_spill] sm:$0xff] %v11754_v11  ;;  %v3231_v49 = vsel %vm156_vm0, %v3229_v30, %v14861_v3  ;;  %v3233_v45 = vrot.slane %v3075_v26, 7  ;;  %v14865_v55 = vmov %v14858_v4  ;;  %v14867_v4 = vrot.slane %v11152_v47, 1  ;;  %v8003_v47 = vld [vmem:[%s14159_s2 + $0x158] sm:$0xff]  }
 0x427   :  { %14862 = vst [vmem:[#allocation43_spill] sm:$0xff] %v11760_v22  ;;  %v11766_v31 = vpack.c.bf16 %v3231_v49, %v3229_v30  ;;  %v11770_v42 = vpack.c.bf16 %v14865_v55, %v3423_v13  ;;  %v4234_v30 = vpop.f32.mrf.mxu1  ;;  %v14871_v49 = vld [vmem:[#allocation21_spill] sm:$0xff]  ;;  %4801 = vmatpush2.bf16.msra.mxu1 %v8003_v47  ;;  %v8006_v55 = vld [vmem:[%s14159_s2 + $0x190] sm:$0xff]   ;;  %v8010_v47 = vld [vmem:[%s14159_s2 + $0x1f8] sm:$0xff]  }
 0x428   :  { %v3426_v0 = vsel %vm349_vm4, %v14867_v4, %v3425_v27  ;;  %v3234_v3 = vsel %vm156_vm0, %v3232_v61, %v3233_v45  ;;  %4302 = vmatprep.mubr.bf16.mxu1 %v14871_v49  ;;  %4802 = vmatprep.subr.bf16.mxu1 %v14479_v16  ;;  %v8005_v45 = vld [vmem:[%s14159_s2 + $0x150] sm:$0xff]   ;;  %v8007_v4 = vld [vmem:[%s14159_s2 + $0x148] sm:$0xff]   ;;  %v14873_v30 = vld [vmem:[#allocation24_spill] sm:$0xff] }
 0x429   :  { %14864 = vst [vmem:[#allocation26_spill] sm:$0xff] %v11766_v31  ;;  %v11781_v32 = vpack.c.bf16 %v3425_v27, %v3426_v0  ;;  %v11783_v26 = vpack.c.bf16 %v3234_v3, %v3232_v61  ;;  %v11785_v63 = vpop.f32.mrf.mxu1  ;;  %v8004_v61 = vld [vmem:[%s14159_s2 + $0x198] sm:$0xff]   ;;  %v14872_v27 = vld [vmem:[#allocation65_spill] sm:$0xff]  ;;  %7172 = vmatmul.mubr.msk.bf16.gmra.mxu0 %vm8384_vm5, %v11376_v20  ;;  %v8008_v0 = vld [vmem:[%s14159_s2 + $0x188] sm:$0xff]  }
 0x42a   :  { %14870 = vst [vmem:[#allocation74_spill] sm:$0xff] %v11785_v63  ;;  %5074 = vmatpush1.bf16.msra.mxu0 %v8004_v61  ;;  %7176 = vmatprep.mubr.msk.bf16.mxu0 %vm8260_vm3, %v11392_v39  ;;  %v8009_v3 = vld [vmem:[%s14159_s2 + $0x180] sm:$0xff]   ;;  %v14875_v61 = vld [vmem:[#allocation19_spill] sm:$0xff] }
 0x42b   :  { %14868 = vst [vmem:[#allocation52_spill] sm:$0xff] %v11781_v32  ;;  %14869 = vst [vmem:[#allocation73_spill] sm:$0xff] %v11783_v26  ;;  %v4237_v13 = vpop.f32.mrf.mxu1  ;;  %5075 = vmatprep.subr.bf16.mxu0 %v14479_v16  ;;  %4803 = vmatpush2.bf16.msra.mxu1 %v8005_v45  ;;  %v11879_v45 = vmax.f32 %v14875_v61, 0.0 }
 0x42c   :  { %7028 = vmatmul.mubr.msk.bf16.gmra.mxu1 %vm8260_vm3, %v11384_v48  ;;  %4804 = vmatprep.subr.bf16.mxu1 %v14479_v16  ;;  %v14874_v13 = vld [vmem:[#allocation66_spill] sm:$0xff] }
 0x42d   :  { %4310 = vmatprep.mubr.bf16.mxu1 %v14872_v27  ;;  %v3187_v61 = vrot.slane %v11879_v45, 7 }
 0x42e   :  { %5076 = vmatpush1.bf16.msra.mxu0 %v8006_v55  ;;  %v14876_v55 = vld [vmem:[#allocation16_spill] sm:$0xff] }
 0x42f   :  { %5077 = vmatprep.subr.bf16.mxu0 %v14479_v16  ;;  %4805 = vmatpush2.bf16.msra.mxu1 %v8007_v4  ;;  %v11882_v4 = vmax.f32 %v14876_v55, 0.0  ;;  %v8012_v55 = vld [vmem:[%s14159_s2 + $0x140] sm:$0xff]  }
 0x430   :  { %4806 = vmatprep.subr.bf16.mxu1 %v14479_v16 }
 0x431   :  { %7179 = vmatmul.mubr.msk.bf16.gmra.mxu0 %vm8384_vm5, %v11378_v15 }
 0x432   :  { %7183 = vmatprep.mubr.msk.bf16.mxu0 %vm8260_vm3, %v11422_v36  ;;  %5078 = vmatpush1.bf16.msra.mxu0 %v8008_v0  ;;  %v8011_v0 = vld [vmem:[%s14159_s2 + $0x1f0] sm:$0xff]  }
 0x433   :  { %5079 = vmatprep.subr.bf16.mxu0 %v14479_v16  ;;  %4807 = vmatpush2.bf16.msra.mxu1 %v8012_v55  ;;  %v14878_v55 = vmov 0.0|0.0  }
 0x434   :  { %7032 = vmatmul.mubr.msk.bf16.gmra.mxu1 %vm8260_vm3, %v11392_v39 }
 0x435   :  { %4318 = vmatprep.mubr.bf16.mxu1 %v11390_v57 }
 0x436   :  { %5080 = vmatpush1.bf16.msra.mxu0 %v8009_v3  ;;  %v3188_v3 = vrot.slane %v11882_v4, 7 }
 0x437   :  { %5081 = vmatprep.subr.bf16.mxu0 %v14479_v16 }
 0x438   :  { %v3189_v63 = vsel %vm156_vm0, %v3187_v61, %v3188_v3  ;;  %v8015_v3 = vld [vmem:[%s14159_s2 + $0x1d8] sm:$0xff]  }
 0x439   :  { %7186 = vmatmul.mubr.msk.bf16.gmra.mxu0 %vm8384_vm5, %v11406_v14 }
 0x43a   :  { %7190 = vmatprep.mubr.msk.bf16.mxu0 %vm8260_vm3, %v11433_v7  ;;  %5082 = vmatpush2.bf16.msra.mxu0 %v8010_v47  ;;  %v14877_v47 = vld [vmem:[#allocation27_spill] sm:$0xff] }
 0x43b   :  { %5083 = vmatprep.subr.bf16.mxu0 %v14479_v16 }
 0x43c   :  { %7036 = vmatmul.mubr.msk.bf16.gmra.mxu1 %vm8260_vm3, %v11422_v36 }
 0x43d   :  { %4326 = vmatprep.mubr.bf16.mxu1 %v11396_v40 }
 0x43e   :  { %5084 = vmatpush2.bf16.msra.mxu0 %v8011_v0  ;;  %v8013_v0 = vld [vmem:[%s14159_s2 + $0x1e8] sm:$0xff]  }
 0x43f   :  { %5085 = vmatprep.subr.bf16.mxu0 %v14479_v16 }
 0x441   :  { %7193 = vmatmul.mubr.msk.bf16.gmra.mxu0 %vm8384_vm5, %v11415_v17 }
 0x442   :  { %7197 = vmatprep.mubr.msk.bf16.mxu0 %vm8260_vm3, %v11468_v43  ;;  %5086 = vmatpush2.bf16.msra.mxu0 %v8013_v0  ;;  %v8018_v0 = vld [vmem:[%s14159_s2 + $0x1c8] sm:$0xff]  }
 0x443   :  { %5087 = vmatprep.subr.bf16.mxu0 %v14479_v16 }
 0x444   :  { %7040 = vmatmul.mubr.msk.bf16.gmra.mxu1 %vm8260_vm3, %v11433_v7 }
 0x445   :  { %4334 = vmatprep.mubr.bf16.mxu1 %v11428_v23 }
 0x446   :  { %5088 = vmatpush2.bf16.msra.mxu0 %v8014_v1  ;;  %v8016_v1 = vld [vmem:[%s14159_s2 + $0x1d0] sm:$0xff]  }
 0x447   :  { %5089 = vmatprep.subr.bf16.mxu0 %v14479_v16 }
 0x449   :  { %7200 = vmatmul.mubr.msk.bf16.gmra.mxu0 %vm8384_vm5, %v14874_v13 }
 0x44a   :  { %7204 = vmatprep.mubr.msk.bf16.mxu0 %vm8260_vm3, %v11470_v10  ;;  %5090 = vmatpush2.bf16.msra.mxu0 %v8015_v3  ;;  %v8019_v3 = vld [vmem:[%s14159_s2 + $0x1c0] sm:$0xff]  }
 0x44b   :  { %5091 = vmatprep.subr.bf16.mxu0 %v14479_v16 }
 0x44c   :  { %7044 = vmatmul.mubr.msk.bf16.gmra.mxu1 %vm8260_vm3, %v11468_v43 }
 0x44d   :  { %4342 = vmatprep.mubr.bf16.mxu1 %v14873_v30 }
 0x44e   :  { %5092 = vmatpush2.bf16.msra.mxu0 %v8016_v1  ;;  %v14880_v1 = vld [vmem:[#allocation68_spill] sm:$0xff] }
 0x44f   :  { %5093 = vmatprep.subr.bf16.mxu0 %v14479_v16 }
 0x451   :  { %7207 = vmatmul.mubr.msk.bf16.gmra.mxu0 %vm8384_vm5, %v14877_v47 }
 0x452   :  { %7211 = vmatprep.mubr.msk.bf16.mxu0 %vm8260_vm3, %v11496_v19  ;;  %5094 = vmatpush2.bf16.msra.mxu0 %v8018_v0  ;;  %v14882_v0 = vld [vmem:[#allocation69_spill] sm:$0xff] }
 0x453   :  { %5095 = vmatprep.subr.bf16.mxu0 %v14479_v16  ;;  %v14881_v16 = vld [vmem:[#allocation70_spill] sm:$0xff] }
 0x454   :  { %7048 = vmatmul.mubr.msk.bf16.gmra.mxu1 %vm8260_vm3, %v11470_v10 }
 0x455   :  { %4350 = vmatprep.mubr.bf16.mxu1 %v11473_v51  ;;  %v11915_v51 = vpack.c.bf16 %v3189_v63, %v3187_v61  ;;  %v11936_v63 = vld [vmem:[%s14159_s2 + $0x238] sm:$0xff]   ;;  %v14879_v61 = vld [vmem:[#allocation30_spill] sm:$0xff] }
 0x456   :  { %7797 = vmatprep.subr.bf16.mxu1 %v11936_v63  ;;  %5096 = vmatpush2.bf16.msra.mxu0 %v8019_v3  ;;  %v14884_v3 = vld [vmem:[#allocation8_spill] sm:$0xff] }
 0x459   :  { %7214 = vmatmul.mubr.msk.bf16.gmra.mxu0 %vm8384_vm5, %v11478_v58 }
 0x45a   :  { %7218 = vmatprep.mubr.msk.bf16.mxu0 %vm8260_vm3, %v11915_v51 }
 0x45c   :  { %7052 = vmatmul.mubr.msk.bf16.gmra.mxu1 %vm8260_vm3, %v11496_v19 }
 0x45d   :  { %4358 = vmatprep.mubr.bf16.mxu1 %v14878_v55 }
 0x461   :  { %7221 = vmatmul.mubr.msk.bf16.gmra.mxu0 %vm8384_vm5, %v11498_v44 }
 0x462   :  { %7225 = vmatprep.mubr.msk.bf16.mxu0 %vm8260_vm3, %v11527_v9 }
 0x464   :  { %4359 = vmatmul.mubr.bf16.gmra.mxu1 %v14878_v55 }
 0x465   :  { %4366 = vmatprep.mubr.bf16.mxu1 %v14879_v61 }
 0x469   :  { %4648 = vmatmul.mubr.bf16.gmra.mxu0 %v14878_v55 }
 0x46a   :  { %7229 = vmatprep.mubr.msk.bf16.mxu0 %vm8260_vm3, %v11516_v35 }
 0x46c   :  { %7056 = vmatmul.mubr.msk.bf16.gmra.mxu1 %vm8260_vm3, %v11527_v9  ;;  %v14883_v9 = vld [vmem:[#allocation36_spill] sm:$0xff] }
 0x46d   :  { %4374 = vmatprep.mubr.bf16.mxu1 %v14880_v1 }
 0x471   :  { %7232 = vmatmul.mubr.msk.bf16.gmra.mxu0 %vm8384_vm5, %v14882_v0 }
 0x472   :  { %7236 = vmatprep.mubr.msk.bf16.mxu0 %vm8260_vm3, %v11558_v38 }
 0x474   :  { %7060 = vmatmul.mubr.msk.bf16.gmra.mxu1 %vm8260_vm3, %v11516_v35 }
 0x475   :  { %4382 = vmatprep.mubr.bf16.mxu1 %v14881_v16 }
 0x479   :  { %7239 = vmatmul.mubr.msk.bf16.gmra.mxu0 %vm8384_vm5, %v11551_v50 }
 0x47a   :  { %7243 = vmatprep.mubr.msk.bf16.mxu0 %vm8260_vm3, %v11553_v37 }
 0x47c   :  { %7064 = vmatmul.mubr.msk.bf16.gmra.mxu1 %vm8260_vm3, %v11558_v38 }
 0x47d   :  { %4390 = vmatprep.mubr.bf16.mxu1 %v14883_v9 }
 0x481   :  { %7246 = vmatmul.mubr.msk.bf16.gmra.mxu0 %vm8384_vm5, %v11563_v33 }
 0x482   :  { %7250 = vmatprep.mubr.msk.bf16.mxu0 %vm8260_vm3, %v11601_v29 }
 0x484   :  { %7068 = vmatmul.mubr.msk.bf16.gmra.mxu1 %vm8260_vm3, %v11553_v37  ;;  %v14888_v37 = vld [vmem:[#allocation13_spill] sm:$0xff] }
 0x485   :  { %4398 = vmatprep.mubr.bf16.mxu1 %v11561_v28  ;;  %v14885_v28 = vld [vmem:[#allocation47_spill] sm:$0xff] }
 0x489   :  { %7253 = vmatmul.mubr.msk.bf16.gmra.mxu0 %vm8384_vm5, %v11579_v54 }
 0x48a   :  { %7257 = vmatprep.mubr.msk.bf16.mxu0 %vm8260_vm3, %v11612_v18 }
 0x48c   :  { %7072 = vmatmul.mubr.msk.bf16.gmra.mxu1 %vm8260_vm3, %v11601_v29  ;;  %v14886_v29 = vld [vmem:[#allocation14_spill] sm:$0xff] }
 0x48d   :  { %4406 = vmatprep.mubr.bf16.mxu1 %v11570_v24  ;;  %v14887_v24 = vld [vmem:[#allocation10_spill] sm:$0xff] }
 0x491   :  { %7260 = vmatmul.mubr.msk.bf16.gmra.mxu0 %vm8384_vm5, %v14885_v28  ;;  %v14891_v28 = vld [vmem:[#allocation11_spill] sm:$0xff] }
 0x492   :  { %7264 = vmatprep.mubr.msk.bf16.mxu0 %vm8260_vm3, %v14886_v29 }
 0x494   :  { %7076 = vmatmul.mubr.msk.bf16.gmra.mxu1 %vm8260_vm3, %v11612_v18  ;;  %v14889_v18 = vld [vmem:[#allocation5_spill] sm:$0xff] }
 0x495   :  { %4414 = vmatprep.mubr.bf16.mxu1 %v14884_v3  ;;  %v14890_v3 = vld [vmem:[#allocation6_spill] sm:$0xff] }
 0x499   :  { %7267 = vmatmul.mubr.msk.bf16.gmra.mxu0 %vm8384_vm5, %v14888_v37 }
 0x49a   :  { %7271 = vmatprep.mubr.msk.bf16.mxu0 %vm8260_vm3, %v14889_v18 }
 0x49c   :  { %7080 = vmatmul.mubr.msk.bf16.gmra.mxu1 %vm8260_vm3, %v14886_v29  ;;  %v14892_v29 = vld [vmem:[#allocation15_spill] sm:$0xff] }
 0x49d   :  { %4422 = vmatprep.mubr.bf16.mxu1 %v14887_v24 }
 0x4a1   :  { %7274 = vmatmul.mubr.msk.bf16.gmra.mxu0 %vm8384_vm5, %v14891_v28 }
 0x4a2   :  { %7278 = vmatprep.mubr.msk.bf16.mxu0 %vm8260_vm3, %v11682_v62 }
 0x4a4   :  { %7084 = vmatmul.mubr.msk.bf16.gmra.mxu1 %vm8260_vm3, %v14889_v18 }
 0x4a5   :  { %4430 = vmatprep.mubr.bf16.mxu1 %v14890_v3 }
 0x4a6   :  { %v4240_v24 = vpop.f32.mrf.mxu1 }
 0x4a7   :  { %v12036_v37 = vpop.f32.mrf.mxu0 }
 0x4a8   :  { %14893 = vst [vmem:[#allocation21_spill] sm:$0xff] %v12036_v37  ;;  %v4242_v3 = vpop.f32.mrf.mxu1 }
 0x4a9   :  { %7281 = vmatmul.mubr.msk.bf16.gmra.mxu0 %vm8384_vm5, %v11655_v46  ;;  %v4523_v18 = vpop.f32.mrf.mxu0  ;;  %v14896_v46 = vld [vmem:[#allocation23_spill] sm:$0xff] }
 0x4aa   :  { %7285 = vmatprep.mubr.msk.bf16.mxu0 %vm8260_vm3, %v11684_v34  ;;  %v4243_v28 = vpop.f32.mrf.mxu1 }
 0x4ab   :  { %v12044_v9 = vpop.f32.mrf.mxu0 }
 0x4ac   :  { %7088 = vmatmul.mubr.msk.bf16.gmra.mxu1 %vm8260_vm3, %v11682_v62  ;;  %14894 = vst [vmem:[#allocation65_spill] sm:$0xff] %v12044_v9  ;;  %v4245_v38 = vpop.f32.mrf.mxu1 }
 0x4ad   :  { %4438 = vmatprep.mubr.bf16.mxu1 %v14892_v29  ;;  %v4526_v54 = vpop.f32.mrf.mxu0  ;;  %v14895_v29 = vld [vmem:[#allocation22_spill] sm:$0xff] }
 0x4ae   :  { %v4248_v62 = vpop.f32.mrf.mxu1 }
 0x4b0   :  { %v4529_v37 = vpop.f32.mrf.mxu0  ;;  %v4250_v18 = vpop.f32.mrf.mxu1 }
 0x4b1   :  { %7288 = vmatmul.mubr.msk.bf16.gmra.mxu0 %vm8384_vm5, %v14896_v46  ;;  %v12053_v3 = vadd.f32 %v4529_v37, %v4240_v24  ;;  %v14897_v46 = vld [vmem:[#allocation17_spill] sm:$0xff] }
 0x4b2   :  { %7292 = vmatprep.mubr.msk.bf16.mxu0 %vm8260_vm3, %v11713_v59  ;;  %v4531_v38 = vpop.f32.mrf.mxu0  ;;  %v4251_v54 = vpop.f32.mrf.mxu1 }
 0x4b4   :  { %7092 = vmatmul.mubr.msk.bf16.gmra.mxu1 %vm8260_vm3, %v11684_v34  ;;  %v4532_v9 = vpop.f32.mrf.mxu0  ;;  %v4253_v34 = vpop.f32.mrf.mxu1 }
 0x4b5   :  { %4446 = vmatprep.mubr.bf16.mxu1 %v14895_v29  ;;  %v12058_v16 = vadd.f32 %v4532_v9, %v4243_v28 }
 0x4b6   :  { %v4534_v35 = vpop.f32.mrf.mxu0  ;;  %v4256_v29 = vpop.f32.mrf.mxu1 }
 0x4b8   :  { %v4537_v37 = vpop.f32.mrf.mxu0  ;;  %v4258_v18 = vpop.f32.mrf.mxu1 }
 0x4b9   :  { %7295 = vmatmul.mubr.msk.bf16.gmra.mxu0 %vm8384_vm5, %v11707_v53  ;;  %v12067_v24 = vadd.f32 %v4537_v37, %v4248_v62 }
 0x4ba   :  { %7299 = vmatprep.mubr.msk.bf16.mxu0 %vm8260_vm3, %v11722_v56  ;;  %v4539_v35 = vpop.f32.mrf.mxu0  ;;  %v4259_v28 = vpop.f32.mrf.mxu1 }
 0x4bc   :  { %7096 = vmatmul.mubr.msk.bf16.gmra.mxu1 %vm8260_vm3, %v11713_v59  ;;  %v4540_v34 = vpop.f32.mrf.mxu0  ;;  %v4261_v38 = vpop.f32.mrf.mxu1 }
 0x4bd   :  { %4454 = vmatprep.mubr.bf16.mxu1 %v14897_v46  ;;  %v12072_v9 = vadd.f32 %v4540_v34, %v4251_v54 }
 0x4be   :  { %v4542_v59 = vpop.f32.mrf.mxu0  ;;  %v4264_v46 = vpop.f32.mrf.mxu1 }
 0x4bf   :  { %14898 = vst [vmem:[#allocation24_spill] sm:$0xff] %v12072_v9  ;;  %v14901_v9 = vld [vmem:[#allocation28_spill] sm:$0xff] }
 0x4c0   :  { %v4545_v62 = vpop.f32.mrf.mxu0  ;;  %v4266_v18 = vpop.f32.mrf.mxu1 }
 0x4c1   :  { %7302 = vmatmul.mubr.msk.bf16.gmra.mxu0 %vm8384_vm5, %v11709_v25  ;;  %v12081_v37 = vadd.f32 %v4545_v62, %v4256_v29 }
 0x4c2   :  { %7306 = vmatprep.mubr.msk.bf16.mxu0 %vm8260_vm3, %v11754_v11  ;;  %v4547_v59 = vpop.f32.mrf.mxu0  ;;  %v4267_v54 = vpop.f32.mrf.mxu1 }
 0x4c3   :  { %14899 = vst [vmem:[#allocation66_spill] sm:$0xff] %v12081_v37  ;;  %v14902_v59 = vld [vmem:[#allocation31_spill] sm:$0xff] }
 0x4c4   :  { %7100 = vmatmul.mubr.msk.bf16.gmra.mxu1 %vm8260_vm3, %v11722_v56  ;;  %v4548_v35 = vpop.f32.mrf.mxu0  ;;  %v4269_v38 = vpop.f32.mrf.mxu1 }
 0x4c5   :  { %4462 = vmatprep.mubr.bf16.mxu1 %v11719_v8  ;;  %v12086_v34 = vadd.f32 %v4548_v35, %v4259_v28  ;;  %v12101_v35 = vmax.f32 %v14902_v59, 0.0  ;;  %v14903_v38 = vld [vmem:[#allocation29_spill] sm:$0xff] }
 0x4c6   :  { %v4550_v56 = vpop.f32.mrf.mxu0 }
 0x4c7   :  { %14900 = vst [vmem:[#allocation19_spill] sm:$0xff] %v12086_v34  ;;  %v4272_v8 = vpop.f32.mrf.mxu1 }
 0x4c9   :  { %v4553_v29 = vpop.f32.mrf.mxu0  ;;  %7309 = vmatmul.mubr.msk.bf16.gmra.mxu0 %vm8384_vm5, %v11735_v6  ;;  %v4274_v18 = vpop.f32.mrf.mxu1 }
 0x4ca   :  { %v12095_v62 = vadd.f32 %v4553_v29, %v4264_v46  ;;  %7313 = vmatprep.mubr.msk.bf16.mxu0 %vm8260_vm3, %v11766_v31 }
 0x4cb   :  { %v4555_v56 = vpop.f32.mrf.mxu0  ;;  %v4275_v28 = vpop.f32.mrf.mxu1 }
 0x4cc   :  { %7104 = vmatmul.mubr.msk.bf16.gmra.mxu1 %vm8260_vm3, %v11754_v11  ;;  %v12104_v11 = vmax.f32 %v14903_v38, 0.0  ;;  %v3235_v56 = vrot.slane %v12101_v35, 7 }
 0x4cd   :  { %4470 = vmatprep.mubr.bf16.mxu1 %v14901_v9  ;;  %v4556_v9 = vpop.f32.mrf.mxu0  ;;  %v4277_v37 = vpop.f32.mrf.mxu1 }
 0x4ce   :  { %14904 = vst [vmem:[#allocation16_spill] sm:$0xff] %v12104_v11  ;;  %v12106_v34 = vadd.f32 %v4556_v9, %v4267_v54  ;;  %v3236_v29 = vrot.slane %v12104_v11, 7 }
 0x4cf   :  { %v4558_v6 = vpop.f32.mrf.mxu0  ;;  %v4280_v46 = vpop.f32.mrf.mxu1 }
 0x4d0   :  { %14905 = vst [vmem:[#allocation27_spill] sm:$0xff] %v12106_v34  ;;  %v3237_v38 = vsel %vm156_vm0, %v3235_v56, %v3236_v29 }
 0x4d1   :  { %v4561_v18 = vpop.f32.mrf.mxu0  ;;  %7316 = vmatmul.mubr.msk.bf16.gmra.mxu0 %vm8384_vm5, %v11743_v2  ;;  %v4282_v37 = vpop.f32.mrf.mxu1 }
 0x4d2   :  { %v12117_v9 = vadd.f32 %v4561_v18, %v4272_v8  ;;  %7320 = vmatprep.mubr.msk.bf16.mxu0 %vm8260_vm3, %v11783_v26  ;;  %v12128_v8 = vpack.c.bf16 %v3237_v38, %v3235_v56  ;;  %v14908_v37 = vld [vmem:[#allocation53_spill] sm:$0xff] }
 0x4d3   :  { %v4563_v6 = vpop.f32.mrf.mxu0  ;;  %v4283_v54 = vpop.f32.mrf.mxu1 }
 0x4d4   :  { %7108 = vmatmul.mubr.msk.bf16.gmra.mxu1 %vm8260_vm3, %v11766_v31  ;;  %14907 = vst [vmem:[#allocation68_spill] sm:$0xff] %v12128_v8 }
 0x4d5   :  { %4478 = vmatprep.mubr.bf16.mxu1 %v11760_v22  ;;  %v4564_v59 = vpop.f32.mrf.mxu0  ;;  %v4285_v31 = vpop.f32.mrf.mxu1 }
 0x4d6   :  { %v12123_v22 = vadd.f32 %v4564_v59, %v4275_v28 }
 0x4d7   :  { %v4566_v11 = vpop.f32.mrf.mxu0  ;;  %v4288_v34 = vpop.f32.mrf.mxu1 }
 0x4d8   :  { %14906 = vst [vmem:[#allocation30_spill] sm:$0xff] %v12123_v22 }
 0x4d9   :  { %v4569_v18 = vpop.f32.mrf.mxu0  ;;  %7323 = vmatmul.mubr.msk.bf16.gmra.mxu0 %vm8384_vm5, %v11770_v42  ;;  %v4290_v31 = vpop.f32.mrf.mxu1 }
 0x4da   :  { %v12136_v28 = vadd.f32 %v4569_v18, %v4280_v46  ;;  %7327 = vmatprep.mubr.msk.bf16.mxu0 %vm8260_vm3, %v12128_v8  ;;  %v14912_v18 = vld [vmem:[#allocation49_spill] sm:$0xff] }
 0x4db   :  { %v4571_v11 = vpop.f32.mrf.mxu0  ;;  %v4291_v29 = vpop.f32.mrf.mxu1 }
 0x4dc   :  { %7112 = vmatmul.mubr.msk.bf16.gmra.mxu1 %vm8260_vm3, %v11783_v26  ;;  %14909 = vst [vmem:[#allocation69_spill] sm:$0xff] %v12136_v28  ;;  %v8020_v26 = vld [vmem:[%s14159_s2 + $0x230] sm:$0xff]   ;;  %v14914_v11 = vld [vmem:[#allocation41_spill] sm:$0xff] }
 0x4dd   :  { %7333 = vmatprep.mubr.msk.bf16.mxu1 %vm8384_vm5, %v14908_v37  ;;  %v4572_v56 = vpop.f32.mrf.mxu0  ;;  %v4293_v59 = vpop.f32.mrf.mxu1  ;;  %v14911_v37 = vld [vmem:[#allocation44_spill] sm:$0xff] }
 0x4de   :  { %v12141_v6 = vadd.f32 %v4572_v56, %v4283_v54  ;;  %v8021_v59 = vld [vmem:[%s14159_s2 + $0x228] sm:$0xff]  }
 0x4df   :  { %v4574_v38 = vpop.f32.mrf.mxu0 }
 0x4e0   :  { %14910 = vst [vmem:[#allocation31_spill] sm:$0xff] %v12141_v6 }
 0x4e1   :  { %v4577_v46 = vpop.f32.mrf.mxu0  ;;  %7330 = vmatmul.mubr.msk.bf16.gmra.mxu0 %vm8384_vm5, %v11781_v32  ;;  %v14925_v32 = vld [vmem:[#allocation60_spill] sm:$0xff] }
 0x4e2   :  { %v12153_v54 = vadd.f32 %v4577_v46, %v4288_v34  ;;  %5097 = vmatprep.mubr.bf16.mxu0 %v14914_v11 }
 0x4e3   :  { %v4579_v56 = vpop.f32.mrf.mxu0 }
 0x4e4   :  { %v4296_v22 = vpop.f32.mrf.mxu1  ;;  %4809 = vmatmul.mubr.bf16.vlgmr.msra.gmra.mxu1 %v14911_v37  ;;  %14913 = vst [vmem:[#allocation29_spill] sm:$0xff] %v12153_v54  ;;  %v14917_v56 = vld [vmem:[#allocation46_spill] sm:$0xff] }
 0x4e5   :  { %7336 = vmatprep.mubr.msk.bf16.mxu1 %vm8384_vm5, %v14912_v18  ;;  %7798 = vmatpush3.bf16.msra.mxu1 %v11936_v63  ;;  %v4580_v37 = vpop.f32.mrf.mxu0  ;;  %v8022_v63 = vld [vmem:[%s14159_s2 + $0x220] sm:$0xff]  }
 0x4e6   :  { %v4298_v31 = vpop.f32.mrf.mxu1  ;;  %7799 = vmatprep.subr.bf16.mxu1 %v8020_v26  ;;  %v12160_v8 = vadd.f32 %v4580_v37, %v4291_v29 }
 0x4e7   :  { %v4582_v18 = vpop.f32.mrf.mxu0  ;;  %v14916_v31 = vld [vmem:[#allocation57_spill] sm:$0xff] }
 0x4e8   :  { %v4299_v38 = vpop.f32.mrf.mxu1  ;;  %14915 = vst [vmem:[#allocation53_spill] sm:$0xff] %v12160_v8 }
 0x4e9   :  { %7800 = vmatpush3.bf16.msra.mxu1 %v8020_v26  ;;  %v4585_v46 = vpop.f32.mrf.mxu0  ;;  %7430 = vmatmul.mubr.msk.bf16.vlgmr.msra.gmra.mxu0 %vm8260_vm3, %v14917_v56  ;;  %v14921_v56 = vld [vmem:[#allocation58_spill] sm:$0xff] }
 0x4ea   :  { %v4301_v6 = vpop.f32.mrf.mxu1  ;;  %7801 = vmatprep.subr.bf16.mxu1 %v8021_v59  ;;  %v12172_v29 = vadd.f32 %v4585_v46, %v4296_v22 }
 0x4eb   :  { %v14919_v6 = vld [vmem:[#allocation45_spill] sm:$0xff]  ;;  %v4587_v18 = vpop.f32.mrf.mxu0 }
 0x4ec   :  { %v4304_v34 = vpop.f32.mrf.mxu1  ;;  %4817 = vmatmul.mubr.bf16.gmra.mxu1 %v14914_v11  ;;  %14918 = vst [vmem:[#allocation44_spill] sm:$0xff] %v12172_v29  ;;  %5105 = vmatprep.mubr.bf16.mxu0 %v14919_v6  ;;  %v8023_v11 = vld [vmem:[%s14159_s2 + $0x218] sm:$0xff]  }
 0x4ed   :  { %7339 = vmatprep.mubr.msk.bf16.mxu1 %vm8384_vm5, %v14916_v31  ;;  %7802 = vmatpush3.bf16.msra.mxu1 %v8021_v59  ;;  %v4588_v8 = vpop.f32.mrf.mxu0  ;;  %v14922_v59 = vld [vmem:[#allocation51_spill] sm:$0xff] }
 0x4ee   :  { %v4306_v26 = vpop.f32.mrf.mxu1  ;;  %7803 = vmatprep.subr.bf16.mxu1 %v8022_v63  ;;  %v12178_v54 = vadd.f32 %v4588_v8, %v4299_v38  ;;  %v14923_v38 = vld [vmem:[#allocation48_spill] sm:$0xff] }
 0x4ef   :  { %v4590_v28 = vpop.f32.mrf.mxu0 }
 0x4f0   :  { %v4307_v37 = vpop.f32.mrf.mxu1  ;;  %14920 = vst [vmem:[#allocation41_spill] sm:$0xff] %v12178_v54 }
 0x4f1   :  { %7804 = vmatpush3.bf16.msra.mxu1 %v8022_v63  ;;  %v4593_v46 = vpop.f32.mrf.mxu0  ;;  %7434 = vmatmul.mubr.msk.bf16.gmra.mxu0 %vm8260_vm3, %v14922_v59  ;;  %v14928_v59 = vld [vmem:[#allocation54_spill] sm:$0xff] }
 0x4f2   :  { %v4309_v31 = vpop.f32.mrf.mxu1  ;;  %7805 = vmatprep.subr.bf16.mxu1 %v8023_v11  ;;  %v12187_v26 = vadd.f32 %v4593_v46, %v4304_v34  ;;  %5113 = vmatprep.mubr.bf16.mxu0 %v14923_v38  ;;  %v14926_v34 = vld [vmem:[#allocation50_spill] sm:$0xff] }
 0x4f3   :  { %v4595_v28 = vpop.f32.mrf.mxu0 }
 0x4f4   :  { %v4312_v22 = vpop.f32.mrf.mxu1  ;;  %4825 = vmatmul.mubr.bf16.gmra.mxu1 %v14919_v6 }
 0x4f5   :  { %7342 = vmatprep.mubr.msk.bf16.mxu1 %vm8384_vm5, %v14921_v56  ;;  %7806 = vmatpush3.bf16.msra.mxu1 %v8023_v11  ;;  %v4596_v31 = vpop.f32.mrf.mxu0 }
 0x4f6   :  { %v4314_v8 = vpop.f32.mrf.mxu1  ;;  %v12190_v18 = vadd.f32 %v4596_v31, %v4307_v37 }
 0x4f7   :  { %v4598_v54 = vpop.f32.mrf.mxu0 }
 0x4f8   :  { %v4315_v63 = vpop.f32.mrf.mxu1  ;;  %14924 = vst [vmem:[#allocation46_spill] sm:$0xff] %v12190_v18  ;;  %v8024_v18 = vld [vmem:[%s14159_s2 + $0x210] sm:$0xff]  }
 0x4f9   :  { %v4601_v56 = vpop.f32.mrf.mxu0  ;;  %7438 = vmatmul.mubr.msk.bf16.gmra.mxu0 %vm8260_vm3, %v14926_v34  ;;  %7807 = vmatprep.subr.bf16.mxu1 %v8024_v18 }
 0x4fa   :  { %v4317_v6 = vpop.f32.mrf.mxu1  ;;  %v12199_v11 = vadd.f32 %v4601_v56, %v4312_v22  ;;  %5121 = vmatprep.mubr.bf16.mxu0 %v14928_v59  ;;  %v14930_v22 = vld [vmem:[#allocation62_spill] sm:$0xff]  ;;  %7808 = vmatpush3.bf16.msra.mxu1 %v8024_v18 }
 0x4fb   :  { %v4603_v37 = vpop.f32.mrf.mxu0 }
 0x4fc   :  { %v4320_v29 = vpop.f32.mrf.mxu1  ;;  %4833 = vmatmul.mubr.bf16.gmra.mxu1 %v14923_v38  ;;  %14927 = vst [vmem:[#allocation45_spill] sm:$0xff] %v12199_v11 }
 0x4fd   :  { %7345 = vmatprep.mubr.msk.bf16.mxu1 %vm8384_vm5, %v14925_v32  ;;  %v4604_v54 = vpop.f32.mrf.mxu0 }
 0x4fe   :  { %v4322_v46 = vpop.f32.mrf.mxu1  ;;  %v12202_v28 = vadd.f32 %v4604_v54, %v4315_v63 }
 0x4ff   :  { %v4606_v31 = vpop.f32.mrf.mxu0  ;;  %v14931_v46 = vld [vmem:[#allocation55_spill] sm:$0xff] }
 0x500   :  { %v4323_v8 = vpop.f32.mrf.mxu1  ;;  %14929 = vst [vmem:[#allocation51_spill] sm:$0xff] %v12202_v28 }
 0x501   :  { %v4609_v34 = vpop.f32.mrf.mxu0  ;;  %7442 = vmatmul.mubr.msk.bf16.gmra.mxu0 %vm8260_vm3, %v14930_v22  ;;  %v14934_v22 = vld [vmem:[#allocation63_spill] sm:$0xff] }
 0x502   :  { %v4325_v38 = vpop.f32.mrf.mxu1  ;;  %v12214_v56 = vadd.f32 %v4609_v34, %v4320_v29  ;;  %5129 = vmatprep.mubr.bf16.mxu0 %v14931_v46  ;;  %v14933_v29 = vld [vmem:[#allocation61_spill] sm:$0xff] }
 0x504   :  { %v4328_v6 = vpop.f32.mrf.mxu1  ;;  %4841 = vmatmul.mubr.bf16.gmra.mxu1 %v14928_v59  ;;  %v4611_v59 = vpop.f32.mrf.mxu0 }
 0x505   :  { %7348 = vmatprep.mubr.msk.bf16.mxu1 %vm8384_vm5, %v11327_v5 }
 0x506   :  { %v4330_v63 = vpop.f32.mrf.mxu1  ;;  %v4612_v54 = vpop.f32.mrf.mxu0 }
 0x507   :  { %v12217_v38 = vadd.f32 %v4612_v54, %v4323_v8 }
 0x508   :  { %v4331_v37 = vpop.f32.mrf.mxu1  ;;  %v4614_v28 = vpop.f32.mrf.mxu0 }
 0x509   :  { %14932 = vst [vmem:[#allocation48_spill] sm:$0xff] %v12217_v38  ;;  %7446 = vmatmul.mubr.msk.bf16.gmra.mxu0 %vm8260_vm3, %v14933_v29  ;;  %v14936_v29 = vld [vmem:[#allocation59_spill] sm:$0xff] }
 0x50a   :  { %v4333_v31 = vpop.f32.mrf.mxu1  ;;  %v4617_v5 = vpop.f32.mrf.mxu0  ;;  %5137 = vmatprep.mubr.bf16.mxu0 %v14934_v22 }
 0x50b   :  { %v12226_v34 = vadd.f32 %v4617_v5, %v4328_v6 }
 0x50c   :  { %v4336_v11 = vpop.f32.mrf.mxu1  ;;  %4849 = vmatmul.mubr.bf16.gmra.mxu1 %v14931_v46  ;;  %v4619_v8 = vpop.f32.mrf.mxu0 }
 0x50d   :  { %7351 = vmatprep.mubr.msk.bf16.mxu1 %vm8384_vm5, %v11351_v60 }
 0x50e   :  { %v4338_v18 = vpop.f32.mrf.mxu1  ;;  %v4620_v28 = vpop.f32.mrf.mxu0 }
 0x50f   :  { %v12229_v59 = vadd.f32 %v4620_v28, %v4331_v37 }
 0x510   :  { %v4339_v63 = vpop.f32.mrf.mxu1  ;;  %v4622_v54 = vpop.f32.mrf.mxu0 }
 0x511   :  { %14935 = vst [vmem:[#allocation60_spill] sm:$0xff] %v12229_v59  ;;  %7450 = vmatmul.mubr.msk.bf16.gmra.mxu0 %vm8260_vm3, %v11347_v41 }
 0x512   :  { %v4341_v46 = vpop.f32.mrf.mxu1  ;;  %v4625_v38 = vpop.f32.mrf.mxu0  ;;  %5145 = vmatprep.mubr.bf16.mxu0 %v14936_v29 }
 0x513   :  { %v12238_v5 = vadd.f32 %v4625_v38, %v4336_v11 }
 0x514   :  { %v4344_v31 = vpop.f32.mrf.mxu1  ;;  %4857 = vmatmul.mubr.bf16.gmra.mxu1 %v14934_v22  ;;  %v4627_v37 = vpop.f32.mrf.mxu0 }
 0x515   :  { %7354 = vmatprep.mubr.msk.bf16.mxu1 %vm8384_vm5, %v11376_v20 }
 0x516   :  { %v4346_v6 = vpop.f32.mrf.mxu1  ;;  %v4628_v8 = vpop.f32.mrf.mxu0 }
 0x517   :  { %v12241_v28 = vadd.f32 %v4628_v8, %v4339_v63 }
 0x518   :  { %v4347_v18 = vpop.f32.mrf.mxu1  ;;  %v4630_v46 = vpop.f32.mrf.mxu0 }
 0x519   :  { %7454 = vmatmul.mubr.msk.bf16.gmra.mxu0 %vm8260_vm3, %v11349_v21  ;;  %v8025_v21 = vld [vmem:[%s14159_s2 + $0x208] sm:$0xff]  }
 0x51a   :  { %v4349_v22 = vpop.f32.mrf.mxu1  ;;  %v4633_v59 = vpop.f32.mrf.mxu0  ;;  %5153 = vmatprep.mubr.bf16.mxu0 %v14871_v49  ;;  %7809 = vmatprep.subr.bf16.mxu1 %v8025_v21 }
 0x51b   :  { %v12250_v41 = vadd.f32 %v4633_v59, %v4344_v31  ;;  %7810 = vmatpush3.bf16.msra.mxu1 %v8025_v21 }
 0x51c   :  { %v4352_v54 = vpop.f32.mrf.mxu1  ;;  %4865 = vmatmul.mubr.bf16.gmra.mxu1 %v14936_v29  ;;  %v4635_v38 = vpop.f32.mrf.mxu0 }
 0x51d   :  { %7357 = vmatprep.mubr.msk.bf16.mxu1 %vm8384_vm5, %v11378_v15 }
 0x51e   :  { %v4354_v11 = vpop.f32.mrf.mxu1  ;;  %v4636_v6 = vpop.f32.mrf.mxu0 }
 0x51f   :  { %v12253_v37 = vadd.f32 %v4636_v6, %v4347_v18 }
 0x520   :  { %v4355_v63 = vpop.f32.mrf.mxu1  ;;  %v4638_v8 = vpop.f32.mrf.mxu0 }
 0x521   :  { %7458 = vmatmul.mubr.msk.bf16.gmra.mxu0 %vm8260_vm3, %v11384_v48 }
 0x522   :  { %v4357_v29 = vpop.f32.mrf.mxu1  ;;  %v4641_v46 = vpop.f32.mrf.mxu0  ;;  %5161 = vmatprep.mubr.bf16.mxu0 %v14872_v27 }
 0x523   :  { %v12265_v59 = vadd.f32 %v4641_v46, %v4352_v54 }
 0x524   :  { %v4360_v22 = vpop.f32.mrf.mxu1  ;;  %4873 = vmatmul.mubr.bf16.gmra.mxu1 %v14871_v49  ;;  %v4643_v18 = vpop.f32.mrf.mxu0 }
 0x525   :  { %7360 = vmatprep.mubr.msk.bf16.mxu1 %vm8384_vm5, %v11406_v14 }
 0x526   :  { %v4362_v31 = vpop.f32.mrf.mxu1  ;;  %v4644_v11 = vpop.f32.mrf.mxu0 }
 0x527   :  { %v12268_v38 = vadd.f32 %v4644_v11, %v4355_v63 }
 0x528   :  { %v4363_v49 = vpop.f32.mrf.mxu1  ;;  %v4646_v29 = vpop.f32.mrf.mxu0 }
 0x529   :  { %7462 = vmatmul.mubr.msk.bf16.gmra.mxu0 %vm8260_vm3, %v11392_v39 }
 0x52a   :  { %v4365_v6 = vpop.f32.mrf.mxu1  ;;  %v4649_v48 = vpop.f32.mrf.mxu0  ;;  %5169 = vmatprep.mubr.bf16.mxu0 %v11390_v57 }
 0x52b   :  { %v12277_v54 = vadd.f32 %v4649_v48, %v4360_v22 }
 0x52c   :  { %v4368_v8 = vpop.f32.mrf.mxu1  ;;  %4881 = vmatmul.mubr.bf16.gmra.mxu1 %v14872_v27  ;;  %v4651_v63 = vpop.f32.mrf.mxu0 }
 0x52d   :  { %7363 = vmatprep.mubr.msk.bf16.mxu1 %vm8384_vm5, %v11415_v17 }
 0x52e   :  { %v4370_v46 = vpop.f32.mrf.mxu1  ;;  %v4652_v31 = vpop.f32.mrf.mxu0 }
 0x52f   :  { %v12280_v18 = vadd.f32 %v4652_v31, %v4363_v49 }
 0x530   :  { %v4371_v21 = vpop.f32.mrf.mxu1  ;;  %v4654_v11 = vpop.f32.mrf.mxu0 }
 0x531   :  { %7466 = vmatmul.mubr.msk.bf16.gmra.mxu0 %vm8260_vm3, %v11422_v36 }
 0x532   :  { %v4373_v27 = vpop.f32.mrf.mxu1  ;;  %v4657_v29 = vpop.f32.mrf.mxu0  ;;  %5177 = vmatprep.mubr.bf16.mxu0 %v11396_v40 }
 0x533   :  { %v12289_v39 = vadd.f32 %v4657_v29, %v4368_v8 }
 0x534   :  { %v4376_v6 = vpop.f32.mrf.mxu1  ;;  %4889 = vmatmul.mubr.bf16.gmra.mxu1 %v11390_v57  ;;  %v4659_v49 = vpop.f32.mrf.mxu0 }
 0x535   :  { %7366 = vmatprep.mubr.msk.bf16.mxu1 %vm8384_vm5, %v14874_v13 }
 0x536   :  { %v4378_v22 = vpop.f32.mrf.mxu1  ;;  %v4660_v46 = vpop.f32.mrf.mxu0 }
 0x537   :  { %v12292_v63 = vadd.f32 %v4660_v46, %v4371_v21 }
 0x538   :  { %v4379_v48 = vpop.f32.mrf.mxu1  ;;  %v4662_v31 = vpop.f32.mrf.mxu0 }
 0x539   :  { %7470 = vmatmul.mubr.msk.bf16.gmra.mxu0 %vm8260_vm3, %v11433_v7  ;;  %v8026_v7 = vld [vmem:[%s14159_s2 + $0x200] sm:$0xff]  }
 0x53a   :  { %v4381_v57 = vpop.f32.mrf.mxu1  ;;  %v4665_v11 = vpop.f32.mrf.mxu0  ;;  %5185 = vmatprep.mubr.bf16.mxu0 %v11428_v23  ;;  %7811 = vmatprep.subr.bf16.mxu1 %v8026_v7 }
 0x53b   :  { %v12301_v36 = vadd.f32 %v4665_v11, %v4376_v6  ;;  %7812 = vmatpush3.bf16.msra.mxu1 %v8026_v7 }
 0x53c   :  { %v4384_v27 = vpop.f32.mrf.mxu1  ;;  %4897 = vmatmul.mubr.bf16.gmra.mxu1 %v11396_v40  ;;  %v4667_v21 = vpop.f32.mrf.mxu0 }
 0x53d   :  { %7369 = vmatprep.mubr.msk.bf16.mxu1 %vm8384_vm5, %v14877_v47  ;;  %14937 = vst [vmem:[#allocation50_spill] sm:$0xff] %v12301_v36 }
 0x53e   :  { %v4386_v8 = vpop.f32.mrf.mxu1  ;;  %v4668_v22 = vpop.f32.mrf.mxu0 }
 0x53f   :  { %v12304_v49 = vadd.f32 %v4668_v22, %v4379_v48 }
 0x540   :  { %v4387_v29 = vpop.f32.mrf.mxu1  ;;  %v4670_v46 = vpop.f32.mrf.mxu0 }
 0x541   :  { %14938 = vst [vmem:[#allocation54_spill] sm:$0xff] %v12304_v49  ;;  %7474 = vmatmul.mubr.msk.bf16.gmra.mxu0 %vm8260_vm3, %v11468_v43  ;;  %v3379_v43 = vrot.slane %v11879_v45, 1 }
 0x542   :  { %v4389_v40 = vpop.f32.mrf.mxu1  ;;  %v4673_v31 = vpop.f32.mrf.mxu0  ;;  %5193 = vmatprep.mubr.bf16.mxu0 %v14873_v30 }
 0x543   :  { %v12316_v6 = vadd.f32 %v4673_v31, %v4384_v27  ;;  %v3380_v27 = vrot.slane %v11882_v4, 1 }
 0x544   :  { %v4392_v57 = vpop.f32.mrf.mxu1  ;;  %4905 = vmatmul.mubr.bf16.gmra.mxu1 %v11428_v23  ;;  %v4675_v11 = vpop.f32.mrf.mxu0 }
 0x545   :  { %7372 = vmatprep.mubr.msk.bf16.mxu1 %vm8384_vm5, %v11478_v58  ;;  %14939 = vst [vmem:[#allocation62_spill] sm:$0xff] %v12316_v6 }
 0x546   :  { %v4394_v48 = vpop.f32.mrf.mxu1  ;;  %v4676_v8 = vpop.f32.mrf.mxu0 }
 0x547   :  { %v12319_v21 = vadd.f32 %v4676_v8, %v4387_v29  ;;  %v14942_v48 = vld [vmem:[#allocation67_spill] sm:$0xff] }
 0x548   :  { %v4395_v23 = vpop.f32.mrf.mxu1  ;;  %v4678_v40 = vpop.f32.mrf.mxu0 }
 0x549   :  { %14940 = vst [vmem:[#allocation55_spill] sm:$0xff] %v12319_v21  ;;  %7478 = vmatmul.mubr.msk.bf16.gmra.mxu0 %vm8260_vm3, %v11470_v10  ;;  %v3572_v10 = vpack.c.bf16 %v11882_v4, %v11879_v45 }
 0x54a   :  { %v4397_v22 = vpop.f32.mrf.mxu1  ;;  %v4681_v31 = vpop.f32.mrf.mxu0  ;;  %5201 = vmatprep.mubr.bf16.mxu0 %v14942_v48 }
 0x54b   :  { %v12330_v29 = vadd.f32 %v4681_v31, %v4392_v57 }
 0x54c   :  { %v4400_v46 = vpop.f32.mrf.mxu1  ;;  %4913 = vmatmul.mubr.bf16.gmra.mxu1 %v14873_v30  ;;  %v4683_v11 = vpop.f32.mrf.mxu0  ;;  %v3381_v30 = vsel %vm349_vm4, %v3379_v43, %v3380_v27 }
 0x54d   :  { %7375 = vmatprep.mubr.msk.bf16.mxu1 %vm8384_vm5, %v11498_v44  ;;  %14941 = vst [vmem:[#allocation61_spill] sm:$0xff] %v12330_v29  ;;  %v12336_v49 = vpack.c.bf16 %v3380_v27, %v3381_v30 }
 0x54e   :  { %v4402_v7 = vpop.f32.mrf.mxu1  ;;  %v4684_v22 = vpop.f32.mrf.mxu0 }
 0x54f   :  { %v12334_v40 = vadd.f32 %v4684_v22, %v4395_v23 }
 0x550   :  { %v4403_v8 = vpop.f32.mrf.mxu1  ;;  %v4686_v6 = vpop.f32.mrf.mxu0 }
 0x551   :  { %14943 = vst [vmem:[#allocation63_spill] sm:$0xff] %v12334_v40  ;;  %7482 = vmatmul.mubr.msk.bf16.gmra.mxu0 %vm8260_vm3, %v11496_v19 }
 0x552   :  { %v4405_v21 = vpop.f32.mrf.mxu1  ;;  %v4689_v57 = vpop.f32.mrf.mxu0  ;;  %5209 = vmatprep.mubr.bf16.mxu0 %v3572_v10 }
 0x553   :  { %v12347_v23 = vadd.f32 %v4689_v57, %v4400_v46 }
 0x554   :  { %v4408_v36 = vpop.f32.mrf.mxu1  ;;  %4921 = vmatmul.mubr.bf16.gmra.mxu1 %v14942_v48  ;;  %v4691_v21 = vpop.f32.mrf.mxu0 }
 0x555   :  { %7378 = vmatprep.mubr.msk.bf16.mxu1 %vm8384_vm5, %v12336_v49  ;;  %14944 = vst [vmem:[#allocation59_spill] sm:$0xff] %v12347_v23 }
 0x556   :  { %v4410_v6 = vpop.f32.mrf.mxu1  ;;  %v4692_v27 = vpop.f32.mrf.mxu0 }
 0x557   :  { %v12349_v31 = vadd.f32 %v4692_v27, %v4403_v8 }
 0x558   :  { %v4411_v43 = vpop.f32.mrf.mxu1  ;;  %v4694_v45 = vpop.f32.mrf.mxu0 }
 0x559   :  { %14945 = vst [vmem:[#allocation67_spill] sm:$0xff] %v12349_v31  ;;  %7486 = vmatmul.mubr.msk.bf16.gmra.mxu0 %vm8260_vm3, %v11915_v51  ;;  %v14979_v31 = vld [vmem:[#allocation23_spill] sm:$0xff] }
 0x55a   :  { %v4413_v7 = vpop.f32.mrf.mxu1  ;;  %v4697_v48 = vpop.f32.mrf.mxu0  ;;  %5217 = vmatprep.mubr.bf16.mxu0 %v14878_v55 }
 0x55b   :  { %v12357_v19 = vadd.f32 %v4697_v48, %v4408_v36 }
 0x55c   :  { %v4416_v4 = vpop.f32.mrf.mxu1  ;;  %4929 = vmatmul.mubr.bf16.gmra.mxu1 %v3572_v10  ;;  %v4699_v11 = vpop.f32.mrf.mxu0 }
 0x55d   :  { %7381 = vmatprep.mubr.msk.bf16.mxu1 %vm8384_vm5, %v14882_v0  ;;  %14946 = vst [vmem:[#allocation75_spill] sm:$0xff] %v12357_v19  ;;  %v14974_v19 = vld [vmem:[#allocation18_spill] sm:$0xff] }
 0x55e   :  { %v4418_v46 = vpop.f32.mrf.mxu1  ;;  %v4700_v30 = vpop.f32.mrf.mxu0 }
 0x55f   :  { %v12360_v22 = vadd.f32 %v4700_v30, %v4411_v43 }
 0x560   :  { %v4419_v8 = vpop.f32.mrf.mxu1  ;;  %v4702_v57 = vpop.f32.mrf.mxu0 }
 0x561   :  { %14947 = vst [vmem:[#allocation76_spill] sm:$0xff] %v12360_v22  ;;  %5218 = vmatmul.mubr.bf16.gmra.mxu0 %v14878_v55  ;;  %v14969_v22 = vld [vmem:[#allocation11_spill] sm:$0xff] }
 0x562   :  { %v4421_v10 = vpop.f32.mrf.mxu1  ;;  %v4705_v0 = vpop.f32.mrf.mxu0  ;;  %5225 = vmatprep.mubr.bf16.mxu0 %v14880_v1 }
 0x563   :  { %v12367_v51 = vadd.f32 %v4705_v0, %v4416_v4  ;;  %v14950_v4 = vld [vmem:[#allocation33_spill] sm:$0xff]  ;;  %v14952_v10 = vld [vmem:[#allocation70_spill] sm:$0xff] }
 0x564   :  { %v4424_v6 = vpop.f32.mrf.mxu1  ;;  %4937 = vmatmul.mubr.bf16.gmra.mxu1 %v14879_v61  ;;  %v4707_v21 = vpop.f32.mrf.mxu0 }
 0x565   :  { %7384 = vmatprep.mubr.msk.bf16.mxu1 %vm8384_vm5, %v11551_v50  ;;  %14948 = vst [vmem:[#allocation77_spill] sm:$0xff] %v12367_v51  ;;  %v14964_v51 = vld [vmem:[#allocation13_spill] sm:$0xff] }
 0x566   :  { %v4426_v36 = vpop.f32.mrf.mxu1  ;;  %v4708_v27 = vpop.f32.mrf.mxu0 }
 0x567   :  { %v12370_v7 = vadd.f32 %v4708_v27, %v4419_v8 }
 0x568   :  { %v4427_v43 = vpop.f32.mrf.mxu1  ;;  %v4710_v48 = vpop.f32.mrf.mxu0 }
 0x569   :  { %14949 = vst [vmem:[#allocation78_spill] sm:$0xff] %v12370_v7  ;;  %7490 = vmatmul.mubr.msk.bf16.gmra.mxu0 %vm8260_vm3, %v14950_v4  ;;  %v14954_v48 = vld [vmem:[#allocation7_spill] sm:$0xff] }
 0x56a   :  { %v4429_v45 = vpop.f32.mrf.mxu1  ;;  %v4713_v46 = vpop.f32.mrf.mxu0  ;;  %5233 = vmatprep.mubr.bf16.mxu0 %v14952_v10  ;;  %v14959_v7 = vld [vmem:[#allocation47_spill] sm:$0xff] }
 0x56b   :  { %v12379_v11 = vadd.f32 %v4713_v46, %v4424_v6  ;;  %v14955_v6 = vld [vmem:[#allocation71_spill] sm:$0xff] }
 0x56c   :  { %v4432_v61 = vpop.f32.mrf.mxu1  ;;  %4945 = vmatmul.mubr.bf16.gmra.mxu1 %v14880_v1  ;;  %v4715_v8 = vpop.f32.mrf.mxu0 }
 0x56d   :  { %7387 = vmatprep.mubr.msk.bf16.mxu1 %vm8384_vm5, %v11563_v33  ;;  %14951 = vst [vmem:[#allocation33_spill] sm:$0xff] %v12379_v11 }
 0x56e   :  { %v4434_v30 = vpop.f32.mrf.mxu1  ;;  %v4716_v0 = vpop.f32.mrf.mxu0 }
 0x56f   :  { %v12382_v36 = vadd.f32 %v4716_v0, %v4427_v43  ;;  %v14957_v30 = vld [vmem:[#allocation36_spill] sm:$0xff] }
 0x570   :  { %v4435_v57 = vpop.f32.mrf.mxu1  ;;  %v4718_v21 = vpop.f32.mrf.mxu0 }
 0x571   :  { %14953 = vst [vmem:[#allocation70_spill] sm:$0xff] %v12382_v36  ;;  %7494 = vmatmul.mubr.msk.bf16.gmra.mxu0 %vm8260_vm3, %v14955_v6 }
 0x572   :  { %v4437_v1 = vpop.f32.mrf.mxu1  ;;  %v4721_v45 = vpop.f32.mrf.mxu0  ;;  %5241 = vmatprep.mubr.bf16.mxu0 %v14957_v30 }
 0x573   :  { %v12391_v46 = vadd.f32 %v4721_v45, %v4432_v61  ;;  %v14960_v61 = vld [vmem:[#allocation38_spill] sm:$0xff] }
 0x574   :  { %v4440_v27 = vpop.f32.mrf.mxu1  ;;  %4953 = vmatmul.mubr.bf16.gmra.mxu1 %v14952_v10  ;;  %v4723_v43 = vpop.f32.mrf.mxu0 }
 0x575   :  { %7390 = vmatprep.mubr.msk.bf16.mxu1 %vm8384_vm5, %v14954_v48  ;;  %14956 = vst [vmem:[#allocation7_spill] sm:$0xff] %v12391_v46 }
 0x576   :  { %v4442_v4 = vpop.f32.mrf.mxu1  ;;  %v4724_v0 = vpop.f32.mrf.mxu0 }
 0x577   :  { %v12394_v1 = vadd.f32 %v4724_v0, %v4435_v57  ;;  %v14962_v4 = vld [vmem:[#allocation42_spill] sm:$0xff] }
 0x578   :  { %v4443_v8 = vpop.f32.mrf.mxu1  ;;  %v4726_v21 = vpop.f32.mrf.mxu0 }
 0x579   :  { %14958 = vst [vmem:[#allocation71_spill] sm:$0xff] %v12394_v1  ;;  %7498 = vmatmul.mubr.msk.bf16.gmra.mxu0 %vm8260_vm3, %v14960_v61 }
 0x57a   :  { %v4445_v10 = vpop.f32.mrf.mxu1  ;;  %v4729_v11 = vpop.f32.mrf.mxu0  ;;  %5249 = vmatprep.mubr.bf16.mxu0 %v14962_v4 }
 0x57b   :  { %v12403_v45 = vadd.f32 %v4729_v11, %v4440_v27  ;;  %v14965_v11 = vld [vmem:[#allocation56_spill] sm:$0xff] }
 0x57c   :  { %v4448_v36 = vpop.f32.mrf.mxu1  ;;  %4961 = vmatmul.mubr.bf16.gmra.mxu1 %v14957_v30  ;;  %v4731_v57 = vpop.f32.mrf.mxu0 }
 0x57d   :  { %7393 = vmatprep.mubr.msk.bf16.mxu1 %vm8384_vm5, %v14959_v7  ;;  %14961 = vst [vmem:[#allocation36_spill] sm:$0xff] %v12403_v45 }
 0x57e   :  { %v4450_v6 = vpop.f32.mrf.mxu1  ;;  %v4732_v0 = vpop.f32.mrf.mxu0 }
 0x57f   :  { %v12406_v10 = vadd.f32 %v4732_v0, %v4443_v8  ;;  %v14967_v6 = vld [vmem:[#allocation72_spill] sm:$0xff] }
 0x580   :  { %v4451_v43 = vpop.f32.mrf.mxu1  ;;  %v4734_v21 = vpop.f32.mrf.mxu0 }
 0x581   :  { %14963 = vst [vmem:[#allocation47_spill] sm:$0xff] %v12406_v10  ;;  %7502 = vmatmul.mubr.msk.bf16.gmra.mxu0 %vm8260_vm3, %v14965_v11 }
 0x582   :  { %v4453_v30 = vpop.f32.mrf.mxu1  ;;  %v4737_v46 = vpop.f32.mrf.mxu0  ;;  %5257 = vmatprep.mubr.bf16.mxu0 %v14967_v6 }
 0x583   :  { %v12415_v27 = vadd.f32 %v4737_v46, %v4448_v36  ;;  %v14970_v36 = vld [vmem:[#allocation12_spill] sm:$0xff] }
 0x584   :  { %v4456_v1 = vpop.f32.mrf.mxu1  ;;  %4969 = vmatmul.mubr.bf16.gmra.mxu1 %v14962_v4  ;;  %v4739_v8 = vpop.f32.mrf.mxu0 }
 0x585   :  { %7396 = vmatprep.mubr.msk.bf16.mxu1 %vm8384_vm5, %v14964_v51  ;;  %14966 = vst [vmem:[#allocation38_spill] sm:$0xff] %v12415_v27 }
 0x586   :  { %v4458_v61 = vpop.f32.mrf.mxu1  ;;  %v4740_v0 = vpop.f32.mrf.mxu0 }
 0x587   :  { %v12418_v30 = vadd.f32 %v4740_v0, %v4451_v43  ;;  %v14972_v61 = vld [vmem:[#allocation8_spill] sm:$0xff] }
 0x588   :  { %v4459_v57 = vpop.f32.mrf.mxu1  ;;  %v4742_v21 = vpop.f32.mrf.mxu0 }
 0x589   :  { %14968 = vst [vmem:[#allocation42_spill] sm:$0xff] %v12418_v30  ;;  %7506 = vmatmul.mubr.msk.bf16.gmra.mxu0 %vm8260_vm3, %v14970_v36 }
 0x58a   :  { %v4461_v4 = vpop.f32.mrf.mxu1  ;;  %v4745_v45 = vpop.f32.mrf.mxu0  ;;  %5265 = vmatprep.mubr.bf16.mxu0 %v14972_v61 }
 0x58b   :  { %v12427_v46 = vadd.f32 %v4745_v45, %v4456_v1  ;;  %v14975_v1 = vld [vmem:[#allocation14_spill] sm:$0xff] }
 0x58c   :  { %v4464_v10 = vpop.f32.mrf.mxu1  ;;  %4977 = vmatmul.mubr.bf16.gmra.mxu1 %v14967_v6  ;;  %v4747_v43 = vpop.f32.mrf.mxu0 }
 0x58d   :  { %7399 = vmatprep.mubr.msk.bf16.mxu1 %vm8384_vm5, %v14969_v22  ;;  %14971 = vst [vmem:[#allocation13_spill] sm:$0xff] %v12427_v46 }
 0x58e   :  { %v4466_v11 = vpop.f32.mrf.mxu1  ;;  %v4748_v0 = vpop.f32.mrf.mxu0 }
 0x58f   :  { %v12430_v4 = vadd.f32 %v4748_v0, %v4459_v57  ;;  %v14977_v11 = vld [vmem:[#allocation10_spill] sm:$0xff] }
 0x590   :  { %v4467_v8 = vpop.f32.mrf.mxu1  ;;  %v4750_v21 = vpop.f32.mrf.mxu0 }
 0x591   :  { %14973 = vst [vmem:[#allocation56_spill] sm:$0xff] %v12430_v4  ;;  %7510 = vmatmul.mubr.msk.bf16.gmra.mxu0 %vm8260_vm3, %v14975_v1 }
 0x592   :  { %v4469_v6 = vpop.f32.mrf.mxu1  ;;  %v4753_v27 = vpop.f32.mrf.mxu0  ;;  %5273 = vmatprep.mubr.bf16.mxu0 %v14977_v11 }
 0x593   :  { %v12439_v45 = vadd.f32 %v4753_v27, %v4464_v10  ;;  %v14980_v10 = vld [vmem:[#allocation5_spill] sm:$0xff] }
 0x594   :  { %v4472_v30 = vpop.f32.mrf.mxu1  ;;  %4985 = vmatmul.mubr.bf16.gmra.mxu1 %v14972_v61  ;;  %v4755_v57 = vpop.f32.mrf.mxu0 }
 0x595   :  { %7402 = vmatprep.mubr.msk.bf16.mxu1 %vm8384_vm5, %v14974_v19  ;;  %14976 = vst [vmem:[#allocation72_spill] sm:$0xff] %v12439_v45 }
 0x596   :  { %v4474_v36 = vpop.f32.mrf.mxu1  ;;  %v4756_v0 = vpop.f32.mrf.mxu0 }
 0x597   :  { %v12442_v6 = vadd.f32 %v4756_v0, %v4467_v8  ;;  %v14982_v36 = vld [vmem:[#allocation6_spill] sm:$0xff] }
 0x598   :  { %v4475_v43 = vpop.f32.mrf.mxu1  ;;  %v4758_v21 = vpop.f32.mrf.mxu0 }
 0x599   :  { %14978 = vst [vmem:[#allocation11_spill] sm:$0xff] %v12442_v6  ;;  %7514 = vmatmul.mubr.msk.bf16.gmra.mxu0 %vm8260_vm3, %v14980_v10  ;;  %v14984_v21 = vld [vmem:[#allocation40_spill] sm:$0xff]  ;;  %v14985_v6 = vld [vmem:[#allocation21_spill] sm:$0xff] }
 0x59a   :  { %v4477_v61 = vpop.f32.mrf.mxu1  ;;  %v4761_v46 = vpop.f32.mrf.mxu0  ;;  %5281 = vmatprep.mubr.bf16.mxu0 %v14982_v36  ;;  %v4522_v45 = vadd.f32 %v14985_v6, %v14984_v21  ;;  %v14989_v6 = vld [vmem:[#allocation74_spill] sm:$0xff] }
 0x59b   :  { %v12451_v27 = vadd.f32 %v4761_v46, %v4472_v30  ;;  %v14986_v30 = vld [vmem:[#allocation20_spill] sm:$0xff] }
 0x59c   :  { %v4480_v4 = vpop.f32.mrf.mxu1  ;;  %4993 = vmatmul.mubr.bf16.gmra.mxu1 %v14977_v11  ;;  %v4763_v8 = vpop.f32.mrf.mxu0 }
 0x59d   :  { %7405 = vmatprep.mubr.msk.bf16.mxu1 %vm8384_vm5, %v14979_v31  ;;  %14981 = vst [vmem:[#allocation12_spill] sm:$0xff] %v12451_v27 }
 0x59e   :  { %v4482_v1 = vpop.f32.mrf.mxu1  ;;  %v4764_v0 = vpop.f32.mrf.mxu0 }
 0x59f   :  { %v12454_v61 = vadd.f32 %v4764_v0, %v4475_v43  ;;  %v14988_v1 = vld [vmem:[#allocation15_spill] sm:$0xff] }
 0x5a0   :  { %v4483_v57 = vpop.f32.mrf.mxu1  ;;  %v4766_v23 = vpop.f32.mrf.mxu0 }
 0x5a1   :  { %14983 = vst [vmem:[#allocation8_spill] sm:$0xff] %v12454_v61  ;;  %7518 = vmatmul.mubr.msk.bf16.gmra.mxu0 %vm8260_vm3, %v14986_v30  ;;  %v14990_v23 = vld [vmem:[#allocation65_spill] sm:$0xff] }
 0x5a2   :  { %v4485_v11 = vpop.f32.mrf.mxu1  ;;  %v4769_v10 = vpop.f32.mrf.mxu0  ;;  %5289 = vmatprep.mubr.bf16.mxu0 %v14988_v1  ;;  %v4525_v8 = vadd.f32 %v14990_v23, %v14989_v6  ;;  %v14992_v30 = vld [vmem:[#allocation25_spill] sm:$0xff]  ;;  %v14994_v6 = vld [vmem:[#allocation22_spill] sm:$0xff] }
 0x5a3   :  { %v12465_v46 = vadd.f32 %v4769_v10, %v4480_v4 }
 0x5a4   :  { %v4810_v40 = vpop.f32.mrf.mxu1  ;;  %5001 = vmatmul.mubr.bf16.gmra.mxu1 %v14982_v36  ;;  %v4771_v0 = vpop.f32.mrf.mxu0 }
 0x5a5   :  { %v4811_v29 = vadd.f32 %v4810_v40, %v4522_v45  ;;  %7408 = vmatprep.mubr.msk.bf16.mxu1 %vm8384_vm5, %v11707_v53  ;;  %14987 = vst [vmem:[#allocation18_spill] sm:$0xff] %v12465_v46 }
 0x5a6   :  { %v4812_v43 = vpop.f32.mrf.mxu1  ;;  %v4772_v45 = vpop.f32.mrf.mxu0 }
 0x5a7   :  { %v12470_v11 = vadd.f32 %v4772_v45, %v4483_v57 }
 0x5a8   :  { %v4813_v36 = vpop.f32.mrf.mxu1  ;;  %v4774_v61 = vpop.f32.mrf.mxu0 }
 0x5a9   :  { %v4814_v40 = vadd.f32 %v4813_v36, %v4525_v8  ;;  %14991 = vst [vmem:[#allocation14_spill] sm:$0xff] %v12470_v11  ;;  %7522 = vmatmul.mubr.msk.bf16.gmra.mxu0 %vm8260_vm3, %v14992_v30  ;;  %v14999_v30 = vld [vmem:[#allocation17_spill] sm:$0xff] }
 0x5aa   :  { %v4815_v21 = vpop.f32.mrf.mxu1  ;;  %v5099_v10 = vpop.f32.mrf.mxu0  ;;  %5297 = vmatprep.mubr.bf16.mxu0 %v14994_v6 }
 0x5ab   :  { %v12480_v43 = vadd.f32 %v5099_v10, %v4811_v29  ;;  %v14996_v21 = vld [vmem:[#allocation35_spill] sm:$0xff]  ;;  %v14997_v10 = vld [vmem:[#allocation34_spill] sm:$0xff] }
 0x5ac   :  { %v4818_v27 = vpop.f32.mrf.mxu1  ;;  %5009 = vmatmul.mubr.bf16.gmra.mxu1 %v14988_v1  ;;  %v5101_v61 = vpop.f32.mrf.mxu0 }
 0x5ad   :  { %v4819_v4 = vadd.f32 %v4818_v27, %v12053_v3  ;;  %7411 = vmatprep.mubr.msk.bf16.mxu1 %vm8384_vm5, %v11709_v25  ;;  %14993 = vst [vmem:[#allocation10_spill] sm:$0xff] %v12480_v43 }
 0x5ae   :  { %v4820_v57 = vpop.f32.mrf.mxu1  ;;  %v5102_v8 = vpop.f32.mrf.mxu0 }
 0x5af   :  { %v12484_v3 = vadd.f32 %v5102_v8, %v4814_v40 }
 0x5b0   :  { %v4821_v23 = vpop.f32.mrf.mxu1  ;;  %v5104_v0 = vpop.f32.mrf.mxu0 }
 0x5b1   :  { %v4822_v1 = vadd.f32 %v4821_v23, %v12058_v16  ;;  %14995 = vst [vmem:[#allocation23_spill] sm:$0xff] %v12484_v3  ;;  %7526 = vmatmul.mubr.msk.bf16.gmra.mxu0 %vm8260_vm3, %v14997_v10  ;;  %v15000_v23 = vld [vmem:[#allocation24_spill] sm:$0xff]  ;;  %v15002_v3 = vld [vmem:[#allocation66_spill] sm:$0xff] }
 0x5b2   :  { %v4823_v27 = vpop.f32.mrf.mxu1  ;;  %v5107_v29 = vpop.f32.mrf.mxu0  ;;  %5305 = vmatprep.mubr.bf16.mxu0 %v14999_v30 }
 0x5b3   :  { %v12494_v16 = vadd.f32 %v5107_v29, %v4819_v4  ;;  %v15003_v29 = vld [vmem:[#allocation37_spill] sm:$0xff] }
 0x5b4   :  { %v4826_v36 = vpop.f32.mrf.mxu1  ;;  %5017 = vmatmul.mubr.bf16.gmra.mxu1 %v14994_v6  ;;  %v5109_v57 = vpop.f32.mrf.mxu0 }
 0x5b5   :  { %v4827_v45 = vadd.f32 %v4826_v36, %v12067_v24  ;;  %7414 = vmatprep.mubr.msk.bf16.mxu1 %vm8384_vm5, %v14996_v21  ;;  %14998 = vst [vmem:[#allocation5_spill] sm:$0xff] %v12494_v16 }
 0x5b6   :  { %v4828_v40 = vpop.f32.mrf.mxu1  ;;  %v5110_v8 = vpop.f32.mrf.mxu0 }
 0x5b7   :  { %v12498_v24 = vadd.f32 %v5110_v8, %v4822_v1  ;;  %v15005_v40 = vld [vmem:[#allocation32_spill] sm:$0xff] }
 0x5b8   :  { %v4829_v61 = vpop.f32.mrf.mxu1  ;;  %v5112_v0 = vpop.f32.mrf.mxu0 }
 0x5b9   :  { %v4830_v6 = vadd.f32 %v4829_v61, %v15000_v23  ;;  %15001 = vst [vmem:[#allocation6_spill] sm:$0xff] %v12498_v24  ;;  %7530 = vmatmul.mubr.msk.bf16.gmra.mxu0 %vm8260_vm3, %v15003_v29  ;;  %v15006_v23 = vld [vmem:[#allocation19_spill] sm:$0xff] }
 0x5ba   :  { %v4831_v27 = vpop.f32.mrf.mxu1  ;;  %v5115_v4 = vpop.f32.mrf.mxu0  ;;  %5313 = vmatprep.mubr.bf16.mxu0 %v15005_v40 }
 0x5bb   :  { %v12508_v10 = vadd.f32 %v5115_v4, %v4827_v45  ;;  %v15008_v4 = vld [vmem:[#allocation39_spill] sm:$0xff] }
 0x5bc   :  { %v4834_v36 = vpop.f32.mrf.mxu1  ;;  %5025 = vmatmul.mubr.bf16.gmra.mxu1 %v14999_v30  ;;  %v5117_v57 = vpop.f32.mrf.mxu0 }
 0x5bd   :  { %v4835_v43 = vadd.f32 %v4834_v36, %v15002_v3  ;;  %7417 = vmatprep.mubr.msk.bf16.mxu1 %vm8384_vm5, %v11743_v2  ;;  %15004 = vst [vmem:[#allocation40_spill] sm:$0xff] %v12508_v10 }
 0x5be   :  { %v4836_v1 = vpop.f32.mrf.mxu1  ;;  %v5118_v8 = vpop.f32.mrf.mxu0 }
 0x5bf   :  { %v12512_v3 = vadd.f32 %v5118_v8, %v4830_v6  ;;  %v15010_v1 = vld [vmem:[#allocation28_spill] sm:$0xff] }
 0x5c0   :  { %v4837_v61 = vpop.f32.mrf.mxu1  ;;  %v5120_v0 = vpop.f32.mrf.mxu0 }
 0x5c1   :  { %v4838_v30 = vadd.f32 %v4837_v61, %v15006_v23  ;;  %15007 = vst [vmem:[#allocation21_spill] sm:$0xff] %v12512_v3  ;;  %7534 = vmatmul.mubr.msk.bf16.gmra.mxu0 %vm8260_vm3, %v15008_v4  ;;  %v15011_v23 = vld [vmem:[#allocation27_spill] sm:$0xff]  ;;  %v15013_v4 = vld [vmem:[#allocation16_spill] sm:$0xff] }
 0x5c2   :  { %v4839_v27 = vpop.f32.mrf.mxu1  ;;  %v5123_v45 = vpop.f32.mrf.mxu0  ;;  %5321 = vmatprep.mubr.bf16.mxu0 %v15010_v1 }
 0x5c3   :  { %v12522_v29 = vadd.f32 %v5123_v45, %v4835_v43  ;;  %v3428_v43 = vrot.slane %v15013_v4, 1 }
 0x5c4   :  { %v4842_v36 = vpop.f32.mrf.mxu1  ;;  %5033 = vmatmul.mubr.bf16.gmra.mxu1 %v15005_v40  ;;  %v5125_v57 = vpop.f32.mrf.mxu0 }
 0x5c5   :  { %v4843_v24 = vadd.f32 %v4842_v36, %v12095_v62  ;;  %7420 = vmatprep.mubr.msk.bf16.mxu1 %vm8384_vm5, %v11770_v42  ;;  %15009 = vst [vmem:[#allocation20_spill] sm:$0xff] %v12522_v29  ;;  %v3427_v36 = vrot.slane %v12101_v35, 1 }
 0x5c6   :  { %v4844_v6 = vpop.f32.mrf.mxu1  ;;  %v5126_v8 = vpop.f32.mrf.mxu0 }
 0x5c7   :  { %v12526_v62 = vadd.f32 %v5126_v8, %v4838_v30  ;;  %v15014_v6 = vld [vmem:[#allocation52_spill] sm:$0xff]  ;;  %v15016_v8 = vld [vmem:[#allocation43_spill] sm:$0xff] }
 0x5c8   :  { %v4845_v61 = vpop.f32.mrf.mxu1  ;;  %v5128_v0 = vpop.f32.mrf.mxu0 }
 0x5c9   :  { %v4846_v40 = vadd.f32 %v4845_v61, %v15011_v23  ;;  %15012 = vst [vmem:[#allocation15_spill] sm:$0xff] %v12526_v62  ;;  %v15015_v61 = vld [vmem:[#allocation26_spill] sm:$0xff]  ;;  %v3429_v0 = vsel %vm349_vm4, %v3427_v36, %v3428_v43  ;;  %v15020_v36 = vld [vmem:[#allocation73_spill] sm:$0xff] }
 0x5ca   :  { %v4847_v27 = vpop.f32.mrf.mxu1  ;;  %v5131_v57 = vpop.f32.mrf.mxu0  ;;  %7538 = vmatmul.mubr.msk.bf16.gmra.mxu0 %vm8260_vm3, %v15015_v61  ;;  %v15017_v62 = vld [vmem:[#allocation30_spill] sm:$0xff]  ;;  %v12545_v11 = vpack.c.bf16 %v3428_v43, %v3429_v0  ;;  %v15022_v0 = vld [vmem:[#allocation29_spill] sm:$0xff] }
 0x5cb   :  { %v12538_v30 = vadd.f32 %v5131_v57, %v4843_v24  ;;  %5329 = vmatprep.mubr.bf16.mxu0 %v15016_v8  ;;  %v3620_v24 = vpack.c.bf16 %v15013_v4, %v12101_v35  ;;  %v15019_v57 = vld [vmem:[#allocation69_spill] sm:$0xff] }
 0x5cc   :  { %v4850_v3 = vpop.f32.mrf.mxu1  ;;  %5041 = vmatmul.mubr.bf16.gmra.mxu1 %v15010_v1  ;;  %v5133_v27 = vpop.f32.mrf.mxu0 }
 0x5cd   :  { %v4851_v45 = vadd.f32 %v4850_v3, %v12117_v9  ;;  %7423 = vmatprep.mubr.msk.bf16.mxu1 %vm8384_vm5, %v15014_v6 }
 0x5ce   :  { %v4852_v23 = vpop.f32.mrf.mxu1  ;;  %v5134_v3 = vpop.f32.mrf.mxu0 }
 0x5cf   :  { %v12543_v29 = vadd.f32 %v5134_v3, %v4846_v40  ;;  %v15021_v23 = vld [vmem:[#allocation31_spill] sm:$0xff] }
 0x5d0   :  { %v4853_v1 = vpop.f32.mrf.mxu1  ;;  %v5136_v16 = vpop.f32.mrf.mxu0 }
 0x5d1   :  { %v4854_v9 = vadd.f32 %v4853_v1, %v15017_v62  ;;  %15018 = vst [vmem:[#allocation74_spill] sm:$0xff] %v12543_v29  ;;  %v15023_v29 = vld [vmem:[#allocation68_spill] sm:$0xff] }
 0x5d2   :  { %v4855_v10 = vpop.f32.mrf.mxu1  ;;  %v5139_v62 = vpop.f32.mrf.mxu0  ;;  %7542 = vmatmul.mubr.msk.bf16.gmra.mxu0 %vm8260_vm3, %v15020_v36 }
 0x5d3   :  { %v12557_v16 = vadd.f32 %v5139_v62, %v4851_v45  ;;  %5337 = vmatprep.mubr.bf16.mxu0 %v3620_v24  ;;  %v15024_v45 = vld [vmem:[#allocation49_spill] sm:$0xff] }
 0x5d4   :  { %v4858_v46 = vpop.f32.mrf.mxu1  ;;  %5049 = vmatmul.mubr.bf16.gmra.mxu1 %v15016_v8  ;;  %v5141_v40 = vpop.f32.mrf.mxu0 }
 0x5d5   :  { %v4859_v61 = vadd.f32 %v4858_v46, %v15019_v57  ;;  %7426 = vmatprep.mubr.msk.bf16.mxu1 %vm8384_vm5, %v12545_v11  ;;  %v15025_v40 = vld [vmem:[#allocation53_spill] sm:$0xff] }
 0x5d6   :  { %v4860_v10 = vpop.f32.mrf.mxu1  ;;  %v5142_v35 = vpop.f32.mrf.mxu0 }
 0x5d7   :  { %v12560_v4 = vadd.f32 %v5142_v35, %v4854_v9 }
 0x5d8   :  { %v4861_v43 = vpop.f32.mrf.mxu1  ;;  %v5144_v27 = vpop.f32.mrf.mxu0 }
 0x5d9   :  { %v4862_v8 = vadd.f32 %v4861_v43, %v15021_v23  ;;  %v15027_v27 = vld [vmem:[#allocation44_spill] sm:$0xff] }
 0x5da   :  { %v4863_v46 = vpop.f32.mrf.mxu1  ;;  %v5147_v57 = vpop.f32.mrf.mxu0  ;;  %7546 = vmatmul.mubr.msk.bf16.gmra.mxu0 %vm8260_vm3, %v15023_v29  ;;  %v15026_v29 = vld [vmem:[#allocation57_spill] sm:$0xff] }
 0x5db   :  { %v12569_v62 = vadd.f32 %v5147_v57, %v4859_v61  ;;  %5345 = vmatprep.mubr.bf16.mxu0 %v14878_v55 }
 0x5dc   :  { %v4866_v1 = vpop.f32.mrf.mxu1  ;;  %5057 = vmatmul.mubr.bf16.gmra.mxu1 %v3620_v24  ;;  %v5149_v9 = vpop.f32.mrf.mxu0 }
 0x5dd   :  { %v4867_v3 = vadd.f32 %v4866_v1, %v15022_v0  ;;  %7813 = vmatprep.mubr.msk.bf16.mxu1 %vm8384_vm5, %v15024_v45  ;;  %v15028_v0 = vld [vmem:[#allocation58_spill] sm:$0xff]  ;;  %v15029_v9 = vld [vmem:[#allocation41_spill] sm:$0xff] }
 0x5de   :  { %v4868_v36 = vpop.f32.mrf.mxu1  ;;  %v5150_v43 = vpop.f32.mrf.mxu0 }
 0x5df   :  { %v12573_v23 = vadd.f32 %v5150_v43, %v4862_v8 }
 0x5e0   :  { %v4869_v10 = vpop.f32.mrf.mxu1  ;;  %v5152_v46 = vpop.f32.mrf.mxu0 }
 0x5e1   :  { %v4870_v24 = vadd.f32 %v4869_v10, %v15025_v40 }
 0x5e2   :  { %v4871_v35 = vpop.f32.mrf.mxu1  ;;  %v5155_v1 = vpop.f32.mrf.mxu0  ;;  %5346 = vmatmul.mubr.bf16.gmra.mxu0 %v14878_v55 }
 0x5e3   :  { %v12583_v57 = vadd.f32 %v5155_v1, %v4867_v3  ;;  %v15030_v3 = vld [vmem:[#allocation64_spill] sm:$0xff] }
 0x5e4   :  { %v4874_v52 = vpop.f32.mrf.mxu1  ;;  %7814 = vmatmul.mubr.msk.bf16.vlgmr.msra.gmra.mxu1 %vm8384_vm5, %v15026_v29  ;;  %v5157_v45 = vpop.f32.mrf.mxu0 }
 0x5e5   :  { %v4875_v61 = vadd.f32 %v4874_v52, %v15027_v27  ;;  %7817 = vmatprep.mubr.msk.bf16.mxu1 %vm8384_vm5, %v15028_v0  ;;  %v15031_v45 = vld [vmem:[#allocation46_spill] sm:$0xff] }
 0x5e6   :  { %v4876_v8 = vpop.f32.mrf.mxu1  ;;  %v5158_v40 = vpop.f32.mrf.mxu0 }
 0x5e7   :  { %v12586_v43 = vadd.f32 %v5158_v40, %v4870_v24 }
 0x5e8   :  { %v4877_v36 = vpop.f32.mrf.mxu1  ;;  %v5160_v46 = vpop.f32.mrf.mxu0 }
 0x5e9   :  { %v4878_v10 = vadd.f32 %v4877_v36, %v15029_v9 }
 0x5ea   :  { %v4879_v35 = vpop.f32.mrf.mxu1  ;;  %v5163_v27 = vpop.f32.mrf.mxu0 }
 0x5eb   :  { %v12595_v1 = vadd.f32 %v5163_v27, %v4875_v61 }
 0x5ec   :  { %v4882_v52 = vpop.f32.mrf.mxu1  ;;  %7818 = vmatmul.mubr.msk.bf16.gmra.mxu1 %vm8384_vm5, %v14925_v32  ;;  %v5165_v8 = vpop.f32.mrf.mxu0 }
 0x5ed   :  { %v4883_v29 = vadd.f32 %v4882_v52, %v12187_v26  ;;  %7821 = vmatprep.mubr.msk.bf16.mxu1 %vm8384_vm5, %v15030_v3  ;;  %v15032_v26 = vld [vmem:[#allocation45_spill] sm:$0xff]  ;;  %v15033_v8 = vld [vmem:[#allocation51_spill] sm:$0xff] }
 0x5ee   :  { %v4884_v0 = vpop.f32.mrf.mxu1  ;;  %v5166_v9 = vpop.f32.mrf.mxu0 }
 0x5ef   :  { %v12598_v40 = vadd.f32 %v5166_v9, %v4878_v10 }
 0x5f0   :  { %v4885_v24 = vpop.f32.mrf.mxu1  ;;  %v5168_v46 = vpop.f32.mrf.mxu0 }
 0x5f1   :  { %v4886_v36 = vadd.f32 %v4885_v24, %v15031_v45 }
 0x5f2   :  { %v4887_v35 = vpop.f32.mrf.mxu1  ;;  %v5171_v3 = vpop.f32.mrf.mxu0 }
 0x5f3   :  { %v12607_v61 = vadd.f32 %v5171_v3, %v4883_v29 }
 0x5f4   :  { %v4890_v32 = vpop.f32.mrf.mxu1  ;;  %7822 = vmatmul.mubr.msk.bf16.gmra.mxu1 %vm8384_vm5, %v11351_v60  ;;  %v5173_v0 = vpop.f32.mrf.mxu0 }
 0x5f5   :  { %v4891_v52 = vadd.f32 %v4890_v32, %v15032_v26  ;;  %7825 = vmatprep.mubr.msk.bf16.mxu1 %vm8384_vm5, %v11376_v20 }
 0x5f6   :  { %v4892_v27 = vpop.f32.mrf.mxu1  ;;  %v5174_v45 = vpop.f32.mrf.mxu0 }
 0x5f7   :  { %v12610_v9 = vadd.f32 %v5174_v45, %v4886_v36  ;;  %v15034_v27 = vld [vmem:[#allocation48_spill] sm:$0xff] }
 0x5f8   :  { %v4893_v10 = vpop.f32.mrf.mxu1  ;;  %v5176_v46 = vpop.f32.mrf.mxu0 }
 0x5f9   :  { %v4894_v24 = vadd.f32 %v4893_v10, %v15033_v8 }
 0x5fa   :  { %v4895_v35 = vpop.f32.mrf.mxu1  ;;  %v5179_v20 = vpop.f32.mrf.mxu0 }
 0x5fb   :  { %v12619_v29 = vadd.f32 %v5179_v20, %v4891_v52  ;;  %v15035_v20 = vld [vmem:[#allocation60_spill] sm:$0xff] }
 0x5fc   :  { %v4898_v60 = vpop.f32.mrf.mxu1  ;;  %7826 = vmatmul.mubr.msk.bf16.gmra.mxu1 %vm8384_vm5, %v11378_v15  ;;  %v5181_v3 = vpop.f32.mrf.mxu0 }
 0x5fd   :  { %v4899_v32 = vadd.f32 %v4898_v60, %v12214_v56  ;;  %7829 = vmatprep.mubr.msk.bf16.mxu1 %vm8384_vm5, %v11406_v14 }
 0x5fe   :  { %v4900_v26 = vpop.f32.mrf.mxu1  ;;  %v5182_v10 = vpop.f32.mrf.mxu0 }
 0x5ff   :  { %v12622_v8 = vadd.f32 %v5182_v10, %v4894_v24 }
 0x600   :  { %v4901_v36 = vpop.f32.mrf.mxu1  ;;  %v5184_v35 = vpop.f32.mrf.mxu0 }
 0x601   :  { %v4902_v0 = vadd.f32 %v4901_v36, %v15034_v27 }
 0x602   :  { %v4903_v45 = vpop.f32.mrf.mxu1  ;;  %v5187_v14 = vpop.f32.mrf.mxu0 }
 0x603   :  { %v12631_v52 = vadd.f32 %v5187_v14, %v4899_v32 }
 0x604   :  { %v4906_v15 = vpop.f32.mrf.mxu1  ;;  %7830 = vmatmul.mubr.msk.bf16.gmra.mxu1 %vm8384_vm5, %v11415_v17  ;;  %v5189_v60 = vpop.f32.mrf.mxu0 }
 0x605   :  { %v4907_v56 = vadd.f32 %v4906_v15, %v12226_v34  ;;  %7833 = vmatprep.mubr.msk.bf16.mxu1 %vm8384_vm5, %v14874_v13 }
 0x606   :  { %v4908_v46 = vpop.f32.mrf.mxu1  ;;  %v5190_v3 = vpop.f32.mrf.mxu0 }
 0x607   :  { %v12634_v36 = vadd.f32 %v5190_v3, %v4902_v0 }
 0x608   :  { %v4909_v24 = vpop.f32.mrf.mxu1  ;;  %v5192_v10 = vpop.f32.mrf.mxu0 }
 0x609   :  { %v4910_v26 = vadd.f32 %v4909_v24, %v15035_v20 }
 0x60a   :  { %v4911_v27 = vpop.f32.mrf.mxu1  ;;  %v5195_v13 = vpop.f32.mrf.mxu0 }
 0x60b   :  { %v12643_v32 = vadd.f32 %v5195_v13, %v4907_v56 }
 0x60c   :  { %v4914_v17 = vpop.f32.mrf.mxu1  ;;  %7834 = vmatmul.mubr.msk.bf16.gmra.mxu1 %vm8384_vm5, %v14877_v47  ;;  %v5197_v35 = vpop.f32.mrf.mxu0 }
 0x60d   :  { %v4915_v34 = vadd.f32 %v4914_v17, %v12238_v5  ;;  %7837 = vmatprep.mubr.msk.bf16.mxu1 %vm8384_vm5, %v11478_v58 }
 0x60e   :  { %v4916_v45 = vpop.f32.mrf.mxu1  ;;  %v5198_v14 = vpop.f32.mrf.mxu0 }
 0x60f   :  { %v12646_v46 = vadd.f32 %v5198_v14, %v4910_v26 }
 0x610   :  { %v4917_v0 = vpop.f32.mrf.mxu1  ;;  %v5200_v24 = vpop.f32.mrf.mxu0 }
 0x611   :  { %v4918_v15 = vadd.f32 %v4917_v0, %v12241_v28 }
 0x612   :  { %v4919_v60 = vpop.f32.mrf.mxu1  ;;  %v5203_v58 = vpop.f32.mrf.mxu0 }
 0x613   :  { %v12655_v56 = vadd.f32 %v5203_v58, %v4915_v34 }
 0x614   :  { %v4922_v47 = vpop.f32.mrf.mxu1  ;;  %7838 = vmatmul.mubr.msk.bf16.gmra.mxu1 %vm8384_vm5, %v11498_v44  ;;  %v5205_v20 = vpop.f32.mrf.mxu0 }
 0x615   :  { %v4923_v5 = vadd.f32 %v4922_v47, %v12250_v41  ;;  %7841 = vmatprep.mubr.msk.bf16.mxu1 %vm8384_vm5, %v12336_v49 }
 0x616   :  { %v4924_v28 = vpop.f32.mrf.mxu1  ;;  %v5206_v27 = vpop.f32.mrf.mxu0 }
 0x617   :  { %v12658_v10 = vadd.f32 %v5206_v27, %v4918_v15 }
 0x618   :  { %v4925_v26 = vpop.f32.mrf.mxu1  ;;  %v5208_v13 = vpop.f32.mrf.mxu0 }
 0x619   :  { %v4926_v3 = vadd.f32 %v4925_v26, %v12253_v37 }
 0x61a   :  { %v4927_v17 = vpop.f32.mrf.mxu1  ;;  %v5211_v45 = vpop.f32.mrf.mxu0 }
 0x61b   :  { %v12665_v49 = vadd.f32 %v5211_v45, %v4923_v5 }
 0x61c   :  { %v4930_v44 = vpop.f32.mrf.mxu1  ;;  %7842 = vmatmul.mubr.bf16.gmra.mxu1 %v14878_v55  ;;  %v5213_v35 = vpop.f32.mrf.mxu0 }
 0x61d   :  { %v4931_v41 = vadd.f32 %v4930_v44, %v12265_v59  ;;  %7845 = vmatprep.mubr.msk.bf16.mxu1 %vm8384_vm5, %v11551_v50 }
 0x61e   :  { %v4932_v34 = vpop.f32.mrf.mxu1  ;;  %v5214_v15 = vpop.f32.mrf.mxu0 }
 0x61f   :  { %v12668_v14 = vadd.f32 %v5214_v15, %v4926_v3 }
 0x620   :  { %v4933_v37 = vpop.f32.mrf.mxu1  ;;  %v5216_v24 = vpop.f32.mrf.mxu0 }
 0x621   :  { %v4934_v0 = vadd.f32 %v4933_v37, %v12268_v38 }
 0x622   :  { %v4935_v60 = vpop.f32.mrf.mxu1  ;;  %v5219_v50 = vpop.f32.mrf.mxu0 }
 0x623   :  { %v12677_v5 = vadd.f32 %v5219_v50, %v4931_v41 }
 0x624   :  { %v4938_v47 = vpop.f32.mrf.mxu1  ;;  %7846 = vmatmul.mubr.msk.bf16.gmra.mxu1 %vm8384_vm5, %v11563_v33  ;;  %v5221_v58 = vpop.f32.mrf.mxu0 }
 0x625   :  { %v4939_v59 = vadd.f32 %v4938_v47, %v12277_v54  ;;  %7849 = vmatprep.mubr.msk.bf16.mxu1 %vm8384_vm5, %v14954_v48 }
 0x626   :  { %v4940_v38 = vpop.f32.mrf.mxu1  ;;  %v5222_v26 = vpop.f32.mrf.mxu0 }
 0x627   :  { %v12680_v3 = vadd.f32 %v5222_v26, %v4934_v0  ;;  %v15038_v26 = vld [vmem:[#allocation62_spill] sm:$0xff] }
 0x628   :  { %v4941_v28 = vpop.f32.mrf.mxu1  ;;  %v5224_v17 = vpop.f32.mrf.mxu0 }
 0x629   :  { %v4942_v20 = vadd.f32 %v4941_v28, %v12280_v18 }
 0x62a   :  { %v4943_v27 = vpop.f32.mrf.mxu1  ;;  %v5227_v48 = vpop.f32.mrf.mxu0 }
 0x62b   :  { %v12689_v13 = vadd.f32 %v5227_v48, %v4939_v59  ;;  %v15037_v59 = vld [vmem:[#allocation54_spill] sm:$0xff] }
 0x62c   :  { %v4946_v33 = vpop.f32.mrf.mxu1  ;;  %7850 = vmatmul.mubr.msk.bf16.gmra.mxu1 %vm8384_vm5, %v14959_v7  ;;  %v5229_v44 = vpop.f32.mrf.mxu0 }
 0x62d   :  { %v4947_v54 = vadd.f32 %v4946_v33, %v12289_v39  ;;  %7853 = vmatprep.mubr.msk.bf16.mxu1 %vm8384_vm5, %v14964_v51  ;;  %v15036_v39 = vld [vmem:[#allocation50_spill] sm:$0xff] }
 0x62e   :  { %v4948_v18 = vpop.f32.mrf.mxu1  ;;  %v5230_v34 = vpop.f32.mrf.mxu0 }
 0x62f   :  { %v12692_v35 = vadd.f32 %v5230_v34, %v4942_v20  ;;  %v15039_v18 = vld [vmem:[#allocation55_spill] sm:$0xff] }
 0x630   :  { %v4949_v41 = vpop.f32.mrf.mxu1  ;;  %v5232_v0 = vpop.f32.mrf.mxu0 }
 0x631   :  { %v4950_v45 = vadd.f32 %v4949_v41, %v12292_v63  ;;  %v15040_v0 = vld [vmem:[#allocation61_spill] sm:$0xff] }
 0x632   :  { %v4951_v37 = vpop.f32.mrf.mxu1  ;;  %v5235_v51 = vpop.f32.mrf.mxu0 }
 0x633   :  { %v12701_v60 = vadd.f32 %v5235_v51, %v4947_v54 }
 0x634   :  { %v4954_v7 = vpop.f32.mrf.mxu1  ;;  %7854 = vmatmul.mubr.msk.bf16.gmra.mxu1 %vm8384_vm5, %v14969_v22  ;;  %v5237_v24 = vpop.f32.mrf.mxu0 }
 0x635   :  { %v4955_v15 = vadd.f32 %v4954_v7, %v15036_v39  ;;  %7857 = vmatprep.mubr.msk.bf16.mxu1 %vm8384_vm5, %v14974_v19  ;;  %v15041_v24 = vld [vmem:[#allocation63_spill] sm:$0xff] }
 0x636   :  { %v4956_v63 = vpop.f32.mrf.mxu1  ;;  %v5238_v38 = vpop.f32.mrf.mxu0 }
 0x637   :  { %v12704_v58 = vadd.f32 %v5238_v38, %v4950_v45 }
 0x638   :  { %v4957_v47 = vpop.f32.mrf.mxu1  ;;  %v5240_v20 = vpop.f32.mrf.mxu0 }
 0x639   :  { %v4958_v50 = vadd.f32 %v4957_v47, %v15037_v59  ;;  %v15042_v20 = vld [vmem:[#allocation59_spill] sm:$0xff] }
 0x63a   :  { %v4959_v28 = vpop.f32.mrf.mxu1  ;;  %v5243_v19 = vpop.f32.mrf.mxu0 }
 0x63b   :  { %v12713_v17 = vadd.f32 %v5243_v19, %v4955_v15 }
 0x63c   :  { %v4962_v22 = vpop.f32.mrf.mxu1  ;;  %7858 = vmatmul.mubr.msk.bf16.gmra.mxu1 %vm8384_vm5, %v14979_v31  ;;  %v5245_v54 = vpop.f32.mrf.mxu0 }
 0x63d   :  { %v4963_v27 = vadd.f32 %v4962_v22, %v15038_v26  ;;  %7861 = vmatprep.mubr.msk.bf16.mxu1 %vm8384_vm5, %v11707_v53  ;;  %v15043_v54 = vld [vmem:[#allocation67_spill] sm:$0xff] }
 0x63e   :  { %v4964_v33 = vpop.f32.mrf.mxu1  ;;  %v5246_v41 = vpop.f32.mrf.mxu0 }
 0x63f   :  { %v12716_v45 = vadd.f32 %v5246_v41, %v4958_v50 }
 0x640   :  { %v4965_v48 = vpop.f32.mrf.mxu1  ;;  %v5248_v37 = vpop.f32.mrf.mxu0 }
 0x641   :  { %v4966_v44 = vadd.f32 %v4965_v48, %v15039_v18  ;;  %v15044_v37 = vld [vmem:[#allocation75_spill] sm:$0xff] }
 0x642   :  { %v4967_v34 = vpop.f32.mrf.mxu1  ;;  %v5251_v53 = vpop.f32.mrf.mxu0 }
 0x643   :  { %v12725_v39 = vadd.f32 %v5251_v53, %v4963_v27 }
 0x644   :  { %v4970_v31 = vpop.f32.mrf.mxu1  ;;  %7862 = vmatmul.mubr.msk.bf16.gmra.mxu1 %vm8384_vm5, %v11709_v25  ;;  %v5253_v51 = vpop.f32.mrf.mxu0 }
 0x645   :  { %v4971_v7 = vadd.f32 %v4970_v31, %v15040_v0  ;;  %7865 = vmatprep.mubr.msk.bf16.mxu1 %vm8384_vm5, %v14996_v21  ;;  %v15045_v51 = vld [vmem:[#allocation76_spill] sm:$0xff] }
 0x646   :  { %v4972_v15 = vpop.f32.mrf.mxu1  ;;  %v5254_v59 = vpop.f32.mrf.mxu0 }
 0x647   :  { %v12728_v50 = vadd.f32 %v5254_v59, %v4966_v44 }
 0x648   :  { %v4973_v63 = vpop.f32.mrf.mxu1  ;;  %v5256_v28 = vpop.f32.mrf.mxu0 }
 0x649   :  { %v4974_v47 = vadd.f32 %v4973_v63, %v15041_v24  ;;  %v15046_v28 = vld [vmem:[#allocation77_spill] sm:$0xff] }
 0x64a   :  { %v4975_v38 = vpop.f32.mrf.mxu1  ;;  %v5259_v21 = vpop.f32.mrf.mxu0 }
 0x64b   :  { %v12737_v26 = vadd.f32 %v5259_v21, %v4971_v7 }
 0x64c   :  { %v4978_v25 = vpop.f32.mrf.mxu1  ;;  %7866 = vmatmul.mubr.msk.bf16.gmra.mxu1 %vm8384_vm5, %v11743_v2  ;;  %v5261_v19 = vpop.f32.mrf.mxu0 }
 0x64d   :  { %v4979_v22 = vadd.f32 %v4978_v25, %v15042_v20  ;;  %7869 = vmatprep.mubr.msk.bf16.mxu1 %vm8384_vm5, %v11770_v42 }
 0x64e   :  { %v4980_v27 = vpop.f32.mrf.mxu1  ;;  %v5262_v18 = vpop.f32.mrf.mxu0 }
 0x64f   :  { %v12740_v44 = vadd.f32 %v5262_v18, %v4974_v47  ;;  %v15047_v27 = vld [vmem:[#allocation78_spill] sm:$0xff] }
 0x650   :  { %v4981_v33 = vpop.f32.mrf.mxu1  ;;  %v5264_v34 = vpop.f32.mrf.mxu0 }
 0x651   :  { %v4982_v48 = vadd.f32 %v4981_v33, %v15043_v54  ;;  %v15048_v34 = vld [vmem:[#allocation33_spill] sm:$0xff] }
 0x652   :  { %v4983_v41 = vpop.f32.mrf.mxu1  ;;  %v5267_v42 = vpop.f32.mrf.mxu0 }
 0x653   :  { %v12749_v0 = vadd.f32 %v5267_v42, %v4979_v22 }
 0x654   :  { %v4986_v2 = vpop.f32.mrf.mxu1  ;;  %7870 = vmatmul.mubr.msk.bf16.gmra.mxu1 %vm8384_vm5, %v15014_v6  ;;  %v5269_v53 = vpop.f32.mrf.mxu0 }
 0x655   :  { %v4987_v31 = vadd.f32 %v4986_v2, %v15044_v37  ;;  %7873 = vmatprep.mubr.msk.bf16.mxu1 %vm8384_vm5, %v12545_v11  ;;  %v15049_v53 = vld [vmem:[#allocation70_spill] sm:$0xff] }
 0x656   :  { %v4988_v7 = vpop.f32.mrf.mxu1  ;;  %v5270_v24 = vpop.f32.mrf.mxu0 }
 0x657   :  { %v12752_v47 = vadd.f32 %v5270_v24, %v4982_v48 }
 0x658   :  { %v4989_v15 = vpop.f32.mrf.mxu1  ;;  %v5272_v38 = vpop.f32.mrf.mxu0 }
 0x659   :  { %v4990_v63 = vadd.f32 %v4989_v15, %v15045_v51 }
 0x65a   :  { %v4991_v59 = vpop.f32.mrf.mxu1  ;;  %v5275_v20 = vpop.f32.mrf.mxu0 }
 0x65b   :  { %v12756_v12 = vadd.f32 %v5275_v20, %v4987_v31 }
 0x65c   :  { %v4994_v6 = vpop.f32.mrf.mxu1  ;;  %7874 = vmatmul.mubr.bf16.gmra.mxu1 %v14878_v55  ;;  %v5277_v22 = vpop.f32.mrf.mxu0 }
 0x65d   :  { %v4995_v25 = vadd.f32 %v4994_v6, %v15046_v28  ;;  %v15050_v6 = vld [vmem:[#allocation7_spill] sm:$0xff] }
 0x65e   :  { %v4996_v11 = vpop.f32.mrf.mxu1  ;;  %v5278_v33 = vpop.f32.mrf.mxu0 }
 0x65f   :  { %v12759_v54 = vadd.f32 %v5278_v33, %v4990_v63 }
 0x660   :  { %v4997_v21 = vpop.f32.mrf.mxu1  ;;  %v5280_v18 = vpop.f32.mrf.mxu0 }
 0x661   :  { %v4998_v19 = vadd.f32 %v4997_v21, %v15047_v27  ;;  %v15051_v27 = vld [vmem:[#allocation71_spill] sm:$0xff] }
 0x662   :  { %v4999_v48 = vpop.f32.mrf.mxu1  ;;  %v5283_v37 = vpop.f32.mrf.mxu0 }
 0x663   :  { %v12762_v55 = vadd.f32 %v5283_v37, %v4995_v25  ;;  %v15052_v37 = vld [vmem:[#allocation36_spill] sm:$0xff] }
 0x664   :  { %v5002_v41 = vpop.f32.mrf.mxu1  ;;  %v5285_v7 = vpop.f32.mrf.mxu0 }
 0x665   :  { %v5003_v2 = vadd.f32 %v5002_v41, %v15048_v34 }
 0x666   :  { %v5004_v42 = vpop.f32.mrf.mxu1  ;;  %v5286_v51 = vpop.f32.mrf.mxu0 }
 0x667   :  { %v12765_v24 = vadd.f32 %v5286_v51, %v4998_v19 }
 0x668   :  { %v5005_v31 = vpop.f32.mrf.mxu1  ;;  %v5288_v38 = vpop.f32.mrf.mxu0 }
 0x669   :  { %v5006_v15 = vadd.f32 %v5005_v31, %v15049_v53 }
 0x66a   :  { %v5007_v59 = vpop.f32.mrf.mxu1  ;;  %v5291_v20 = vpop.f32.mrf.mxu0 }
 0x66b   :  { %v12768_v11 = vadd.f32 %v5291_v20, %v5003_v2  ;;  %v15053_v59 = vld [vmem:[#allocation47_spill] sm:$0xff] }
 0x66c   :  { %v5010_v63 = vpop.f32.mrf.mxu1  ;;  %v5293_v21 = vpop.f32.mrf.mxu0 }
 0x66d   :  { %v5011_v28 = vadd.f32 %v5010_v63, %v15050_v6  ;;  %v15055_v21 = vld [vmem:[#allocation38_spill] sm:$0xff] }
 0x66e   :  { %v5012_v22 = vpop.f32.mrf.mxu1  ;;  %v5294_v48 = vpop.f32.mrf.mxu0 }
 0x66f   :  { %v12771_v18 = vadd.f32 %v5294_v48, %v5006_v15 }
 0x670   :  { %v5013_v25 = vpop.f32.mrf.mxu1  ;;  %v5296_v34 = vpop.f32.mrf.mxu0 }
 0x671   :  { %v5014_v33 = vadd.f32 %v5013_v25, %v15051_v27 }
 0x672   :  { %v5015_v41 = vpop.f32.mrf.mxu1  ;;  %v5299_v7 = vpop.f32.mrf.mxu0 }
 0x673   :  { %v12774_v31 = vadd.f32 %v5299_v7, %v5011_v28 }
 0x674   :  { %v5018_v19 = vpop.f32.mrf.mxu1  ;;  %v5301_v51 = vpop.f32.mrf.mxu0 }
 0x675   :  { %v5019_v42 = vadd.f32 %v5018_v19, %v15052_v37  ;;  %v15057_v19 = vld [vmem:[#allocation42_spill] sm:$0xff] }
 0x676   :  { %v5020_v53 = vpop.f32.mrf.mxu1  ;;  %v5302_v63 = vpop.f32.mrf.mxu0 }
 0x677   :  { %v12777_v6 = vadd.f32 %v5302_v63, %v5014_v33 }
 0x678   :  { %v5021_v2 = vpop.f32.mrf.mxu1  ;;  %v5304_v22 = vpop.f32.mrf.mxu0 }
 0x679   :  { %v5022_v38 = vadd.f32 %v5021_v2, %v15053_v59  ;;  %15054 = vst [vmem:[#allocation65_spill] sm:$0xff] %v12777_v6  ;;  %v15059_v59 = vld [vmem:[#allocation13_spill] sm:$0xff] }
 0x67a   :  { %v5023_v20 = vpop.f32.mrf.mxu1  ;;  %v5307_v27 = vpop.f32.mrf.mxu0 }
 0x67b   :  { %v12780_v48 = vadd.f32 %v5307_v27, %v5019_v42  ;;  %v15061_v27 = vld [vmem:[#allocation56_spill] sm:$0xff] }
 0x67c   :  { %v5026_v15 = vpop.f32.mrf.mxu1  ;;  %v5309_v34 = vpop.f32.mrf.mxu0 }
 0x67d   :  { %v5027_v25 = vadd.f32 %v5026_v15, %v15055_v21  ;;  %15056 = vst [vmem:[#allocation25_spill] sm:$0xff] %v12780_v48 }
 0x67e   :  { %v5028_v41 = vpop.f32.mrf.mxu1  ;;  %v5310_v7 = vpop.f32.mrf.mxu0 }
 0x67f   :  { %v12783_v53 = vadd.f32 %v5310_v7, %v5022_v38  ;;  %v15063_v7 = vld [vmem:[#allocation72_spill] sm:$0xff] }
 0x680   :  { %v5029_v28 = vpop.f32.mrf.mxu1  ;;  %v5312_v2 = vpop.f32.mrf.mxu0 }
 0x681   :  { %v5030_v37 = vadd.f32 %v5029_v28, %v15057_v19  ;;  %15058 = vst [vmem:[#allocation22_spill] sm:$0xff] %v12783_v53 }
 0x682   :  { %v5031_v51 = vpop.f32.mrf.mxu1  ;;  %v5315_v20 = vpop.f32.mrf.mxu0 }
 0x683   :  { %v12786_v22 = vadd.f32 %v5315_v20, %v5027_v25  ;;  %v15065_v20 = vld [vmem:[#allocation11_spill] sm:$0xff] }
 0x684   :  { %v5034_v33 = vpop.f32.mrf.mxu1  ;;  %v5317_v21 = vpop.f32.mrf.mxu0 }
 0x685   :  { %v5035_v63 = vadd.f32 %v5034_v33, %v15059_v59  ;;  %15060 = vst [vmem:[#allocation35_spill] sm:$0xff] %v12786_v22 }
 0x686   :  { %v5036_v15 = vpop.f32.mrf.mxu1  ;;  %v5318_v34 = vpop.f32.mrf.mxu0 }
 0x687   :  { %v12789_v48 = vadd.f32 %v5318_v34, %v5030_v37  ;;  %v15067_v34 = vld [vmem:[#allocation12_spill] sm:$0xff] }
 0x688   :  { %v5037_v42 = vpop.f32.mrf.mxu1  ;;  %v5320_v19 = vpop.f32.mrf.mxu0 }
 0x689   :  { %v5038_v41 = vadd.f32 %v5037_v42, %v15061_v27  ;;  %15062 = vst [vmem:[#allocation34_spill] sm:$0xff] %v12789_v48 }
 0x68a   :  { %v5039_v28 = vpop.f32.mrf.mxu1  ;;  %v5323_v2 = vpop.f32.mrf.mxu0 }
 0x68b   :  { %v12792_v53 = vadd.f32 %v5323_v2, %v5035_v63  ;;  %v15069_v2 = vld [vmem:[#allocation8_spill] sm:$0xff] }
 0x68c   :  { %v5042_v38 = vpop.f32.mrf.mxu1  ;;  %v5325_v59 = vpop.f32.mrf.mxu0 }
 0x68d   :  { %v5043_v51 = vadd.f32 %v5042_v38, %v15063_v7  ;;  %15064 = vst [vmem:[#allocation17_spill] sm:$0xff] %v12792_v53 }
 0x68e   :  { %v5044_v33 = vpop.f32.mrf.mxu1  ;;  %v5326_v21 = vpop.f32.mrf.mxu0 }
 0x68f   :  { %v12795_v22 = vadd.f32 %v5326_v21, %v5038_v41  ;;  %v15071_v21 = vld [vmem:[#allocation18_spill] sm:$0xff] }
 0x690   :  { %v5045_v25 = vpop.f32.mrf.mxu1  ;;  %v5328_v27 = vpop.f32.mrf.mxu0 }
 0x691   :  { %v5046_v15 = vadd.f32 %v5045_v25, %v15065_v20  ;;  %15066 = vst [vmem:[#allocation24_spill] sm:$0xff] %v12795_v22 }
 0x692   :  { %v5047_v42 = vpop.f32.mrf.mxu1  ;;  %v5331_v19 = vpop.f32.mrf.mxu0 }
 0x693   :  { %v12798_v48 = vadd.f32 %v5331_v19, %v5043_v51  ;;  %v15073_v19 = vld [vmem:[#allocation14_spill] sm:$0xff] }
 0x694   :  { %v5050_v37 = vpop.f32.mrf.mxu1  ;;  %v5333_v7 = vpop.f32.mrf.mxu0 }
 0x695   :  { %v5051_v28 = vadd.f32 %v5050_v37, %v15067_v34  ;;  %15068 = vst [vmem:[#allocation66_spill] sm:$0xff] %v12798_v48 }
 0x696   :  { %v5052_v38 = vpop.f32.mrf.mxu1  ;;  %v5334_v59 = vpop.f32.mrf.mxu0 }
 0x697   :  { %v12801_v53 = vadd.f32 %v5334_v59, %v5046_v15 }
 0x698   :  { %v5053_v63 = vpop.f32.mrf.mxu1  ;;  %v5336_v20 = vpop.f32.mrf.mxu0 }
 0x699   :  { %v5054_v33 = vadd.f32 %v5053_v63, %v15069_v2  ;;  %15070 = vst [vmem:[#allocation37_spill] sm:$0xff] %v12801_v53 }
 0x69a   :  { %v5055_v25 = vpop.f32.mrf.mxu1  ;;  %v5339_v27 = vpop.f32.mrf.mxu0 }
 0x69b   :  { %v12804_v22 = vadd.f32 %v5339_v27, %v5051_v28 }
 0x69c   :  { %v5058_v41 = vpop.f32.mrf.mxu1  ;;  %v5341_v34 = vpop.f32.mrf.mxu0 }
 0x69d   :  { %v5059_v42 = vadd.f32 %v5058_v41, %v15071_v21  ;;  %15072 = vst [vmem:[#allocation32_spill] sm:$0xff] %v12804_v22  ;;  %v15076_v21 = vld [vmem:[#allocation10_spill] sm:$0xff]  ;;  %v15088_v22 = vld [vmem:[#allocation15_spill] sm:$0xff] }
 0x69e   :  { %v5060_v37 = vpop.f32.mrf.mxu1  ;;  %v5342_v7 = vpop.f32.mrf.mxu0 }
 0x69f   :  { %v12807_v48 = vadd.f32 %v5342_v7, %v5054_v33  ;;  %v15081_v33 = vld [vmem:[#allocation23_spill] sm:$0xff] }
 0x6a0   :  { %v5061_v51 = vpop.f32.mrf.mxu1  ;;  %v5344_v2 = vpop.f32.mrf.mxu0 }
 0x6a1   :  { %v5062_v38 = vadd.f32 %v5061_v51, %v15073_v19  ;;  %15074 = vst [vmem:[#allocation19_spill] sm:$0xff] %v12807_v48  ;;  %v15079_v51 = vld [vmem:[#allocation5_spill] sm:$0xff] }
 0x6a2   :  { %v5063_v63 = vpop.f32.mrf.mxu1  ;;  %v5347_v59 = vpop.f32.mrf.mxu0 }
 0x6a3   :  { %v12809_v25 = vadd.f32 %v5347_v59, %v5059_v42 }
 0x6a4   :  { %v7815_v15 = vpop.f32.mrf.mxu1  ;;  %v5349_v53 = vpop.f32.mrf.mxu0 }
 0x6a5   :  { %15075 = vst [vmem:[#allocation39_spill] sm:$0xff] %v12809_v25  ;;  %v12817_v19 = vadd.f32 %v7815_v15, %v15079_v51  ;;  %v15083_v53 = vld [vmem:[#allocation6_spill] sm:$0xff]  ;;  %v15084_v51 = vld [vmem:[#allocation40_spill] sm:$0xff] }
 0x6a6   :  { %v5388_v20 = vpop.f32.mrf.mxu1  ;;  %v5350_v27 = vpop.f32.mrf.mxu0 }
 0x6a7   :  { %v12812_v28 = vadd.f32 %v5388_v20, %v15076_v21  ;;  %v12814_v37 = vadd.f32 %v5350_v27, %v5062_v38  ;;  %15080 = vst [vmem:[#allocation16_spill] sm:$0xff] %v12817_v19  ;;  %v5715_v15 = vmul.f32 %v12817_v19, %v12817_v19 }
 0x6a8   :  { %v7816_v41 = vpop.f32.mrf.mxu1  ;;  %v5352_v63 = vpop.f32.mrf.mxu0 }
 0x6a9   :  { %15077 = vst [vmem:[#allocation28_spill] sm:$0xff] %v12812_v28  ;;  %15078 = vst [vmem:[#allocation27_spill] sm:$0xff] %v12814_v37  ;;  %v5713_v42 = vmul.f32 %v12812_v28, %v12812_v28  ;;  %v12825_v59 = vadd.f32 %v7816_v41, %v15083_v53  ;;  %v15085_v37 = vld [vmem:[#allocation20_spill] sm:$0xff] }
 0x6aa   :  { %v5391_v34 = vpop.f32.mrf.mxu1 }
 0x6ab   :  { %v12820_v7 = vadd.f32 %v5391_v34, %v15081_v33  ;;  %v5716_v41 = vmul.f32 %v12825_v59, %v12825_v59 }
 0x6ac   :  { %v7819_v2 = vpop.f32.mrf.mxu1 }
 0x6ad   :  { %15082 = vst [vmem:[#allocation52_spill] sm:$0xff] %v12820_v7  ;;  %v5643_v20 = vadd.f32 %v12820_v7, %v12812_v28  ;;  %v5714_v38 = vmul.f32 %v12820_v7, %v12820_v7  ;;  %v12841_v48 = vadd.f32 %v7819_v2, %v15085_v37 }
 0x6ae   :  { %v5404_v21 = vpop.f32.mrf.mxu1 }
 0x6af   :  { %v5644_v27 = vadd.f32 %v5643_v20, %v12817_v19  ;;  %v5777_v34 = vadd.f32 %v5714_v38, %v5713_v42  ;;  %v12835_v33 = vadd.f32 %v5404_v21, %v15084_v51  ;;  %15086 = vst [vmem:[#allocation26_spill] sm:$0xff] %v12841_v48  ;;  %v15087_v38 = vld [vmem:[#allocation21_spill] sm:$0xff] }
 0x6b0   :  { %v7820_v63 = vpop.f32.mrf.mxu1 }
 0x6b1   :  { %v5778_v53 = vadd.f32 %v5777_v34, %v5715_v15  ;;  %v5645_v28 = vadd.f32 %v5644_v27, %v12825_v59  ;;  %v5717_v20 = vmul.f32 %v12835_v33, %v12835_v33  ;;  %v12850_v6 = vadd.f32 %v7820_v63, %v15088_v22 }
 0x6b2   :  { %v5407_v7 = vpop.f32.mrf.mxu1 }
 0x6b3   :  { %v5646_v25 = vadd.f32 %v5645_v28, %v12835_v33  ;;  %v5779_v42 = vadd.f32 %v5778_v53, %v5716_v41  ;;  %v12847_v21 = vadd.f32 %v5407_v7, %v15087_v38  ;;  %v5719_v28 = vmul.f32 %v12841_v48, %v12841_v48 }
 0x6b4   :  { %v7823_v51 = vpop.f32.mrf.mxu1  ;;  %v5720_v22 = vmul.f32 %v12850_v6, %v12850_v6 }
 0x6b5   :  { %v5780_v19 = vadd.f32 %v5779_v42, %v5717_v20  ;;  %v5647_v15 = vadd.f32 %v5646_v25, %v12847_v21  ;;  %v5718_v37 = vmul.f32 %v12847_v21, %v12847_v21  ;;  %v12865_v53 = vadd.f32 %v7823_v51, %v12557_v16 }
 0x6b6   :  { %v5420_v2 = vpop.f32.mrf.mxu1 }
 0x6b7   :  { %v5648_v27 = vadd.f32 %v5647_v15, %v12841_v48  ;;  %v5781_v34 = vadd.f32 %v5780_v19, %v5718_v37  ;;  %v12859_v7 = vadd.f32 %v5420_v2, %v12538_v30  ;;  %v15089_v15 = vld [vmem:[#allocation74_spill] sm:$0xff] }
 0x6b8   :  { %v7824_v41 = vpop.f32.mrf.mxu1 }
 0x6b9   :  { %v5782_v63 = vadd.f32 %v5781_v34, %v5719_v28  ;;  %v5649_v25 = vadd.f32 %v5648_v27, %v12850_v6  ;;  %v5721_v38 = vmul.f32 %v12859_v7, %v12859_v7  ;;  %v12874_v48 = vadd.f32 %v7824_v41, %v12560_v4 }
 0x6ba   :  { %v5423_v20 = vpop.f32.mrf.mxu1  ;;  %v5723_v27 = vmul.f32 %v12865_v53, %v12865_v53 }
 0x6bb   :  { %v5650_v42 = vadd.f32 %v5649_v25, %v12859_v7  ;;  %v5783_v19 = vadd.f32 %v5782_v63, %v5720_v22  ;;  %v12871_v30 = vadd.f32 %v5423_v20, %v15089_v15  ;;  %v5724_v4 = vmul.f32 %v12874_v48, %v12874_v48 }
 0x6bc   :  { %v7827_v37 = vpop.f32.mrf.mxu1 }
 0x6bd   :  { %v5784_v2 = vadd.f32 %v5783_v19, %v5721_v38  ;;  %v5651_v28 = vadd.f32 %v5650_v42, %v12871_v30  ;;  %v5722_v16 = vmul.f32 %v12871_v30, %v12871_v30  ;;  %v12889_v42 = vadd.f32 %v7827_v37, %v12583_v57 }
 0x6be   :  { %v5436_v51 = vpop.f32.mrf.mxu1 }
 0x6bf   :  { %v5652_v34 = vadd.f32 %v5651_v28, %v12865_v53  ;;  %v5785_v22 = vadd.f32 %v5784_v2, %v5722_v16  ;;  %v12883_v63 = vadd.f32 %v5436_v51, %v12569_v62 }
 0x6c0   :  { %v7828_v25 = vpop.f32.mrf.mxu1 }
 0x6c1   :  { %v5786_v41 = vadd.f32 %v5785_v22, %v5723_v27  ;;  %v5653_v20 = vadd.f32 %v5652_v34, %v12874_v48  ;;  %v5725_v15 = vmul.f32 %v12883_v63, %v12883_v63  ;;  %v12898_v51 = vadd.f32 %v7828_v25, %v12586_v43 }
 0x6c2   :  { %v5439_v38 = vpop.f32.mrf.mxu1  ;;  %v5727_v34 = vmul.f32 %v12889_v42, %v12889_v42 }
 0x6c3   :  { %v5654_v19 = vadd.f32 %v5653_v20, %v12883_v63  ;;  %v5787_v2 = vadd.f32 %v5786_v41, %v5724_v4  ;;  %v12895_v62 = vadd.f32 %v5439_v38, %v12573_v23  ;;  %v5728_v43 = vmul.f32 %v12898_v51, %v12898_v51 }
 0x6c4   :  { %v7831_v28 = vpop.f32.mrf.mxu1 }
 0x6c5   :  { %v5788_v16 = vadd.f32 %v5787_v2, %v5725_v15  ;;  %v5655_v27 = vadd.f32 %v5654_v19, %v12895_v62  ;;  %v5726_v57 = vmul.f32 %v12895_v62, %v12895_v62  ;;  %v12913_v38 = vadd.f32 %v7831_v28, %v12607_v61 }
 0x6c6   :  { %v5452_v37 = vpop.f32.mrf.mxu1 }
 0x6c7   :  { %v5656_v22 = vadd.f32 %v5655_v27, %v12889_v42  ;;  %v5789_v4 = vadd.f32 %v5788_v16, %v5726_v57  ;;  %v12907_v23 = vadd.f32 %v5452_v37, %v12595_v1 }
 0x6c8   :  { %v7832_v41 = vpop.f32.mrf.mxu1 }
 0x6c9   :  { %v5790_v25 = vadd.f32 %v5789_v4, %v5727_v34  ;;  %v5657_v20 = vadd.f32 %v5656_v22, %v12898_v51  ;;  %v5729_v2 = vmul.f32 %v12907_v23, %v12907_v23  ;;  %v12922_v37 = vadd.f32 %v7832_v41, %v12610_v9 }
 0x6ca   :  { %v5455_v19 = vpop.f32.mrf.mxu1  ;;  %v5731_v22 = vmul.f32 %v12913_v38, %v12913_v38 }
 0x6cb   :  { %v5658_v15 = vadd.f32 %v5657_v20, %v12907_v23  ;;  %v5791_v16 = vadd.f32 %v5790_v25, %v5728_v43  ;;  %v12919_v1 = vadd.f32 %v5455_v19, %v12598_v40  ;;  %v5732_v9 = vmul.f32 %v12922_v37, %v12922_v37 }
 0x6cc   :  { %v7835_v27 = vpop.f32.mrf.mxu1 }
 0x6cd   :  { %v5792_v57 = vadd.f32 %v5791_v16, %v5729_v2  ;;  %v5659_v34 = vadd.f32 %v5658_v15, %v12919_v1  ;;  %v5730_v61 = vmul.f32 %v12919_v1, %v12919_v1  ;;  %v12937_v19 = vadd.f32 %v7835_v27, %v12631_v52 }
 0x6ce   :  { %v5468_v28 = vpop.f32.mrf.mxu1 }
 0x6cf   :  { %v5660_v4 = vadd.f32 %v5659_v34, %v12913_v38  ;;  %v5793_v43 = vadd.f32 %v5792_v57, %v5730_v61  ;;  %v12931_v40 = vadd.f32 %v5468_v28, %v12619_v29 }
 0x6d0   :  { %v7836_v25 = vpop.f32.mrf.mxu1 }
 0x6d1   :  { %v5794_v41 = vadd.f32 %v5793_v43, %v5731_v22  ;;  %v5661_v20 = vadd.f32 %v5660_v4, %v12922_v37  ;;  %v5733_v16 = vmul.f32 %v12931_v40, %v12931_v40  ;;  %v12946_v28 = vadd.f32 %v7836_v25, %v12634_v36 }
 0x6d2   :  { %v5471_v15 = vpop.f32.mrf.mxu1  ;;  %v5735_v4 = vmul.f32 %v12937_v19, %v12937_v19 }
 0x6d3   :  { %v5662_v2 = vadd.f32 %v5661_v20, %v12931_v40  ;;  %v5795_v57 = vadd.f32 %v5794_v41, %v5732_v9  ;;  %v12943_v29 = vadd.f32 %v5471_v15, %v12622_v8  ;;  %v5736_v36 = vmul.f32 %v12946_v28, %v12946_v28 }
 0x6d4   :  { %v7839_v34 = vpop.f32.mrf.mxu1 }
 0x6d5   :  { %v5796_v61 = vadd.f32 %v5795_v57, %v5733_v16  ;;  %v5663_v22 = vadd.f32 %v5662_v2, %v12943_v29  ;;  %v5734_v52 = vmul.f32 %v12943_v29, %v12943_v29  ;;  %v12961_v15 = vadd.f32 %v7839_v34, %v12655_v56 }
 0x6d6   :  { %v5484_v27 = vpop.f32.mrf.mxu1 }
 0x6d7   :  { %v5664_v43 = vadd.f32 %v5663_v22, %v12937_v19  ;;  %v5797_v9 = vadd.f32 %v5796_v61, %v5734_v52  ;;  %v12955_v8 = vadd.f32 %v5484_v27, %v12643_v32 }
 0x6d8   :  { %v7840_v41 = vpop.f32.mrf.mxu1 }
 0x6d9   :  { %v5798_v25 = vadd.f32 %v5797_v9, %v5735_v4  ;;  %v5665_v20 = vadd.f32 %v5664_v43, %v12946_v28  ;;  %v5737_v57 = vmul.f32 %v12955_v8, %v12955_v8  ;;  %v12970_v27 = vadd.f32 %v7840_v41, %v12658_v10 }
 0x6da   :  { %v5487_v2 = vpop.f32.mrf.mxu1  ;;  %v5739_v43 = vmul.f32 %v12961_v15, %v12961_v15 }
 0x6db   :  { %v5666_v16 = vadd.f32 %v5665_v20, %v12955_v8  ;;  %v5799_v61 = vadd.f32 %v5798_v25, %v5736_v36  ;;  %v12967_v32 = vadd.f32 %v5487_v2, %v12646_v46  ;;  %v5740_v10 = vmul.f32 %v12970_v27, %v12970_v27 }
 0x6dc   :  { %v7843_v22 = vpop.f32.mrf.mxu1 }
 0x6dd   :  { %v5800_v52 = vadd.f32 %v5799_v61, %v5737_v57  ;;  %v5667_v4 = vadd.f32 %v5666_v16, %v12967_v32  ;;  %v5738_v56 = vmul.f32 %v12967_v32, %v12967_v32  ;;  %v12985_v2 = vadd.f32 %v7843_v22, %v12677_v5 }
 0x6de   :  { %v5500_v34 = vpop.f32.mrf.mxu1 }
 0x6df   :  { %v5668_v9 = vadd.f32 %v5667_v4, %v12961_v15  ;;  %v5801_v36 = vadd.f32 %v5800_v52, %v5738_v56  ;;  %v12979_v46 = vadd.f32 %v5500_v34, %v12665_v49 }
 0x6e0   :  { %v7844_v25 = vpop.f32.mrf.mxu1 }
 0x6e1   :  { %v5802_v41 = vadd.f32 %v5801_v36, %v5739_v43  ;;  %v5669_v20 = vadd.f32 %v5668_v9, %v12970_v27  ;;  %v5741_v61 = vmul.f32 %v12979_v46, %v12979_v46  ;;  %v12994_v34 = vadd.f32 %v7844_v25, %v12680_v3 }
 0x6e2   :  { %v5503_v16 = vpop.f32.mrf.mxu1  ;;  %v5743_v9 = vmul.f32 %v12985_v2, %v12985_v2 }
 0x6e3   :  { %v5670_v57 = vadd.f32 %v5669_v20, %v12979_v46  ;;  %v5803_v52 = vadd.f32 %v5802_v41, %v5740_v10  ;;  %v12991_v49 = vadd.f32 %v5503_v16, %v12668_v14  ;;  %v5744_v3 = vmul.f32 %v12994_v34, %v12994_v34 }
 0x6e4   :  { %v7847_v4 = vpop.f32.mrf.mxu1 }
 0x6e5   :  { %v5804_v56 = vadd.f32 %v5803_v52, %v5741_v61  ;;  %v5671_v43 = vadd.f32 %v5670_v57, %v12991_v49  ;;  %v5742_v5 = vmul.f32 %v12991_v49, %v12991_v49  ;;  %v13009_v16 = vadd.f32 %v7847_v4, %v12701_v60 }
 0x6e6   :  { %v5516_v22 = vpop.f32.mrf.mxu1 }
 0x6e7   :  { %v5672_v36 = vadd.f32 %v5671_v43, %v12985_v2  ;;  %v5805_v10 = vadd.f32 %v5804_v56, %v5742_v5  ;;  %v13003_v14 = vadd.f32 %v5516_v22, %v12689_v13 }
 0x6e8   :  { %v7848_v41 = vpop.f32.mrf.mxu1 }
 0x6e9   :  { %v5806_v25 = vadd.f32 %v5805_v10, %v5743_v9  ;;  %v5673_v20 = vadd.f32 %v5672_v36, %v12994_v34  ;;  %v5745_v52 = vmul.f32 %v13003_v14, %v13003_v14  ;;  %v13018_v22 = vadd.f32 %v7848_v41, %v12704_v58 }
 0x6ea   :  { %v5519_v57 = vpop.f32.mrf.mxu1  ;;  %v5747_v36 = vmul.f32 %v13009_v16, %v13009_v16 }
 0x6eb   :  { %v5674_v61 = vadd.f32 %v5673_v20, %v13003_v14  ;;  %v5807_v56 = vadd.f32 %v5806_v25, %v5744_v3  ;;  %v13015_v13 = vadd.f32 %v5519_v57, %v12692_v35  ;;  %v5748_v58 = vmul.f32 %v13018_v22, %v13018_v22 }
 0x6ec   :  { %v7851_v43 = vpop.f32.mrf.mxu1 }
 0x6ed   :  { %v5808_v5 = vadd.f32 %v5807_v56, %v5745_v52  ;;  %v5675_v9 = vadd.f32 %v5674_v61, %v13015_v13  ;;  %v5746_v60 = vmul.f32 %v13015_v13, %v13015_v13  ;;  %v13033_v57 = vadd.f32 %v7851_v43, %v12725_v39 }
 0x6ee   :  { %v5532_v4 = vpop.f32.mrf.mxu1 }
 0x6ef   :  { %v5676_v10 = vadd.f32 %v5675_v9, %v13009_v16  ;;  %v5809_v3 = vadd.f32 %v5808_v5, %v5746_v60  ;;  %v13027_v35 = vadd.f32 %v5532_v4, %v12713_v17 }
 0x6f0   :  { %v7852_v25 = vpop.f32.mrf.mxu1 }
 0x6f1   :  { %v5810_v41 = vadd.f32 %v5809_v3, %v5747_v36  ;;  %v5677_v20 = vadd.f32 %v5676_v10, %v13018_v22  ;;  %v5749_v56 = vmul.f32 %v13027_v35, %v13027_v35  ;;  %v13042_v4 = vadd.f32 %v7852_v25, %v12728_v50 }
 0x6f2   :  { %v5535_v61 = vpop.f32.mrf.mxu1  ;;  %v5751_v10 = vmul.f32 %v13033_v57, %v13033_v57 }
 0x6f3   :  { %v5678_v52 = vadd.f32 %v5677_v20, %v13027_v35  ;;  %v5811_v5 = vadd.f32 %v5810_v41, %v5748_v58  ;;  %v13039_v17 = vadd.f32 %v5535_v61, %v12716_v45  ;;  %v5752_v50 = vmul.f32 %v13042_v4, %v13042_v4 }
 0x6f4   :  { %v7855_v9 = vpop.f32.mrf.mxu1 }
 0x6f5   :  { %v5812_v60 = vadd.f32 %v5811_v5, %v5749_v56  ;;  %v5679_v36 = vadd.f32 %v5678_v52, %v13039_v17  ;;  %v5750_v39 = vmul.f32 %v13039_v17, %v13039_v17  ;;  %v13057_v61 = vadd.f32 %v7855_v9, %v12749_v0 }
 0x6f6   :  { %v5548_v43 = vpop.f32.mrf.mxu1 }
 0x6f7   :  { %v5680_v3 = vadd.f32 %v5679_v36, %v13033_v57  ;;  %v5813_v58 = vadd.f32 %v5812_v60, %v5750_v39  ;;  %v13051_v45 = vadd.f32 %v5548_v43, %v12737_v26  ;;  %15090 = vst [vmem:[#allocation43_spill] sm:$0xff] %v13057_v61 }
 0x6f8   :  { %v7856_v41 = vpop.f32.mrf.mxu1 }
 0x6f9   :  { %v5814_v25 = vadd.f32 %v5813_v58, %v5751_v10  ;;  %v5681_v20 = vadd.f32 %v5680_v3, %v13042_v4  ;;  %v5753_v5 = vmul.f32 %v13051_v45, %v13051_v45  ;;  %v13066_v43 = vadd.f32 %v7856_v41, %v12752_v47 }
 0x6fa   :  { %v5551_v52 = vpop.f32.mrf.mxu1  ;;  %v5755_v3 = vmul.f32 %v13057_v61, %v13057_v61 }
 0x6fb   :  { %v5682_v56 = vadd.f32 %v5681_v20, %v13051_v45  ;;  %v5815_v60 = vadd.f32 %v5814_v25, %v5752_v50  ;;  %v13063_v26 = vadd.f32 %v5551_v52, %v12740_v44  ;;  %15091 = vst [vmem:[#allocation30_spill] sm:$0xff] %v13066_v43  ;;  %v5756_v47 = vmul.f32 %v13066_v43, %v13066_v43 }
 0x6fc   :  { %v7859_v36 = vpop.f32.mrf.mxu1 }
 0x6fd   :  { %v5816_v39 = vadd.f32 %v5815_v60, %v5753_v5  ;;  %v5683_v10 = vadd.f32 %v5682_v56, %v13063_v26  ;;  %v5754_v0 = vmul.f32 %v13063_v26, %v13063_v26  ;;  %v13081_v52 = vadd.f32 %v7859_v36, %v12762_v55 }
 0x6fe   :  { %v5564_v9 = vpop.f32.mrf.mxu1 }
 0x6ff   :  { %v5684_v58 = vadd.f32 %v5683_v10, %v13057_v61  ;;  %v5817_v50 = vadd.f32 %v5816_v39, %v5754_v0  ;;  %v13075_v44 = vadd.f32 %v5564_v9, %v12756_v12  ;;  %15093 = vst [vmem:[#allocation73_spill] sm:$0xff] %v13081_v52 }
 0x700   :  { %v7860_v25 = vpop.f32.mrf.mxu1 }
 0x701   :  { %15092 = vst [vmem:[#allocation69_spill] sm:$0xff] %v13075_v44  ;;  %v5818_v41 = vadd.f32 %v5817_v50, %v5755_v3  ;;  %v5685_v20 = vadd.f32 %v5684_v58, %v13066_v43  ;;  %v5757_v60 = vmul.f32 %v13075_v44, %v13075_v44  ;;  %v13090_v9 = vadd.f32 %v7860_v25, %v12765_v24 }
 0x702   :  { %v5567_v56 = vpop.f32.mrf.mxu1  ;;  %v5759_v58 = vmul.f32 %v13081_v52, %v13081_v52 }
 0x703   :  { %v5686_v5 = vadd.f32 %v5685_v20, %v13075_v44  ;;  %v5819_v39 = vadd.f32 %v5818_v41, %v5756_v47  ;;  %v13087_v12 = vadd.f32 %v5567_v56, %v12759_v54  ;;  %15095 = vst [vmem:[#allocation29_spill] sm:$0xff] %v13090_v9  ;;  %v5760_v24 = vmul.f32 %v13090_v9, %v13090_v9 }
 0x704   :  { %v7863_v10 = vpop.f32.mrf.mxu1 }
 0x705   :  { %15094 = vst [vmem:[#allocation31_spill] sm:$0xff] %v13087_v12  ;;  %v5820_v0 = vadd.f32 %v5819_v39, %v5757_v60  ;;  %v5687_v3 = vadd.f32 %v5686_v5, %v13087_v12  ;;  %v5758_v55 = vmul.f32 %v13087_v12, %v13087_v12  ;;  %v13105_v56 = vadd.f32 %v7863_v10, %v12774_v31 }
 0x706   :  { %v5580_v36 = vpop.f32.mrf.mxu1 }
 0x707   :  { %v5688_v50 = vadd.f32 %v5687_v3, %v13081_v52  ;;  %v5821_v47 = vadd.f32 %v5820_v0, %v5758_v55  ;;  %v13099_v54 = vadd.f32 %v5580_v36, %v12768_v11  ;;  %15097 = vst [vmem:[#allocation49_spill] sm:$0xff] %v13105_v56  ;;  %v15099_v36 = vld [vmem:[#allocation65_spill] sm:$0xff] }
 0x708   :  { %v7864_v41 = vpop.f32.mrf.mxu1 }
 0x709   :  { %15096 = vst [vmem:[#allocation68_spill] sm:$0xff] %v13099_v54  ;;  %v5822_v25 = vadd.f32 %v5821_v47, %v5759_v58  ;;  %v5689_v20 = vadd.f32 %v5688_v50, %v13090_v9  ;;  %v5761_v39 = vmul.f32 %v13099_v54, %v13099_v54  ;;  %v13114_v52 = vadd.f32 %v7864_v41, %v15099_v36 }
 0x70a   :  { %v5583_v5 = vpop.f32.mrf.mxu1  ;;  %v5763_v50 = vmul.f32 %v13105_v56, %v13105_v56 }
 0x70b   :  { %v5690_v60 = vadd.f32 %v5689_v20, %v13099_v54  ;;  %v5823_v0 = vadd.f32 %v5822_v25, %v5760_v24  ;;  %v13111_v11 = vadd.f32 %v5583_v5, %v12771_v18  ;;  %15100 = vst [vmem:[#allocation57_spill] sm:$0xff] %v13114_v52  ;;  %v15101_v25 = vld [vmem:[#allocation25_spill] sm:$0xff]  ;;  %v5764_v41 = vmul.f32 %v13114_v52, %v13114_v52  ;;  %v15107_v54 = vld [vmem:[#allocation34_spill] sm:$0xff] }
 0x70c   :  { %v7867_v3 = vpop.f32.mrf.mxu1 }
 0x70d   :  { %15098 = vst [vmem:[#allocation53_spill] sm:$0xff] %v13111_v11  ;;  %v5824_v55 = vadd.f32 %v5823_v0, %v5761_v39  ;;  %v5691_v58 = vadd.f32 %v5690_v60, %v13111_v11  ;;  %v5762_v31 = vmul.f32 %v13111_v11, %v13111_v11  ;;  %v15103_v39 = vld [vmem:[#allocation35_spill] sm:$0xff] }
 0x70e   :  { %v5596_v10 = vpop.f32.mrf.mxu1  ;;  %v13129_v0 = vadd.f32 %v7867_v3, %v15103_v39 }
 0x70f   :  { %v5692_v47 = vadd.f32 %v5691_v58, %v13105_v56  ;;  %v5825_v24 = vadd.f32 %v5824_v55, %v5762_v31  ;;  %v13123_v18 = vadd.f32 %v5596_v10, %v15101_v25  ;;  %v15105_v31 = vld [vmem:[#allocation22_spill] sm:$0xff] }
 0x710   :  { %v7868_v20 = vpop.f32.mrf.mxu1  ;;  %15104 = vst [vmem:[#allocation58_spill] sm:$0xff] %v13129_v0 }
 0x711   :  { %15102 = vst [vmem:[#allocation44_spill] sm:$0xff] %v13123_v18  ;;  %v5826_v5 = vadd.f32 %v5825_v24, %v5763_v50  ;;  %v5693_v60 = vadd.f32 %v5692_v47, %v13114_v52  ;;  %v5765_v58 = vmul.f32 %v13123_v18, %v13123_v18  ;;  %v13138_v9 = vadd.f32 %v7868_v20, %v15107_v54 }
 0x712   :  { %v5599_v36 = vpop.f32.mrf.mxu1  ;;  %v5767_v24 = vmul.f32 %v13129_v0, %v13129_v0 }
 0x713   :  { %v5694_v11 = vadd.f32 %v5693_v60, %v13123_v18  ;;  %v5827_v55 = vadd.f32 %v5826_v5, %v5764_v41  ;;  %v13135_v10 = vadd.f32 %v5599_v36, %v15105_v31  ;;  %15108 = vst [vmem:[#allocation64_spill] sm:$0xff] %v13138_v9  ;;  %v15109_v5 = vld [vmem:[#allocation17_spill] sm:$0xff]  ;;  %v5768_v54 = vmul.f32 %v13138_v9, %v13138_v9 }
 0x714   :  { %v7871_v25 = vpop.f32.mrf.mxu1  ;;  %v15115_v18 = vld [vmem:[#allocation37_spill] sm:$0xff] }
 0x715   :  { %15106 = vst [vmem:[#allocation41_spill] sm:$0xff] %v13135_v10  ;;  %v5828_v56 = vadd.f32 %v5827_v55, %v5765_v58  ;;  %v5695_v50 = vadd.f32 %v5694_v11, %v13135_v10  ;;  %v5766_v3 = vmul.f32 %v13135_v10, %v13135_v10  ;;  %v15111_v58 = vld [vmem:[#allocation66_spill] sm:$0xff] }
 0x716   :  { %v5612_v47 = vpop.f32.mrf.mxu1  ;;  %v13153_v55 = vadd.f32 %v7871_v25, %v15111_v58 }
 0x717   :  { %v5696_v60 = vadd.f32 %v5695_v50, %v13129_v0  ;;  %v5829_v41 = vadd.f32 %v5828_v56, %v5766_v3  ;;  %v13147_v39 = vadd.f32 %v5612_v47, %v15109_v5  ;;  %v15113_v3 = vld [vmem:[#allocation24_spill] sm:$0xff] }
 0x718   :  { %v7872_v36 = vpop.f32.mrf.mxu1  ;;  %15112 = vst [vmem:[#allocation45_spill] sm:$0xff] %v13153_v55 }
 0x719   :  { %15110 = vst [vmem:[#allocation46_spill] sm:$0xff] %v13147_v39  ;;  %v5830_v20 = vadd.f32 %v5829_v41, %v5767_v24  ;;  %v5697_v11 = vadd.f32 %v5696_v60, %v13138_v9  ;;  %v5769_v50 = vmul.f32 %v13147_v39, %v13147_v39  ;;  %v13162_v52 = vadd.f32 %v7872_v36, %v15115_v18 }
 0x71a   :  { %v5615_v31 = vpop.f32.mrf.mxu1  ;;  %v5771_v41 = vmul.f32 %v13153_v55, %v13153_v55 }
 0x71b   :  { %v5698_v10 = vadd.f32 %v5697_v11, %v13147_v39  ;;  %v5831_v56 = vadd.f32 %v5830_v20, %v5768_v54  ;;  %v13159_v47 = vadd.f32 %v5615_v31, %v15113_v3  ;;  %15116 = vst [vmem:[#allocation48_spill] sm:$0xff] %v13162_v52  ;;  %v15117_v20 = vld [vmem:[#allocation32_spill] sm:$0xff]  ;;  %v5772_v18 = vmul.f32 %v13162_v52, %v13162_v52 }
 0x71c   :  { %v7875_v5 = vpop.f32.mrf.mxu1 }
 0x71d   :  { %15114 = vst [vmem:[#allocation51_spill] sm:$0xff] %v13159_v47  ;;  %v5832_v0 = vadd.f32 %v5831_v56, %v5769_v50  ;;  %v5699_v24 = vadd.f32 %v5698_v10, %v13159_v47  ;;  %v5770_v25 = vmul.f32 %v13159_v47, %v13159_v47  ;;  %v15119_v50 = vld [vmem:[#allocation39_spill] sm:$0xff] }
 0x71e   :  { %v5628_v60 = vpop.f32.mrf.mxu1  ;;  %v13177_v56 = vadd.f32 %v7875_v5, %v15119_v50 }
 0x71f   :  { %v5700_v11 = vadd.f32 %v5699_v24, %v13153_v55  ;;  %v5833_v54 = vadd.f32 %v5832_v0, %v5770_v25  ;;  %v13171_v58 = vadd.f32 %v5628_v60, %v15117_v20  ;;  %v15121_v25 = vld [vmem:[#allocation19_spill] sm:$0xff] }
 0x720   :  { %v7876_v31 = vpop.f32.mrf.mxu1  ;;  %15120 = vst [vmem:[#allocation50_spill] sm:$0xff] %v13177_v56  ;;  %v15122_v55 = vld [vmem:[#allocation27_spill] sm:$0xff] }
 0x721   :  { %15118 = vst [vmem:[#allocation60_spill] sm:$0xff] %v13171_v58  ;;  %v5834_v36 = vadd.f32 %v5833_v54, %v5771_v41  ;;  %v5701_v10 = vadd.f32 %v5700_v11, %v13162_v52  ;;  %v5773_v24 = vmul.f32 %v13171_v58, %v13171_v58  ;;  %v13184_v39 = vadd.f32 %v7876_v31, %v15122_v55 }
 0x722   :  { %v5631_v3 = vpop.f32.mrf.mxu1  ;;  %v5775_v11 = vmul.f32 %v13177_v56, %v13177_v56 }
 0x723   :  { %v5702_v47 = vadd.f32 %v5701_v10, %v13171_v58  ;;  %v5835_v0 = vadd.f32 %v5834_v36, %v5772_v18  ;;  %v5632_v60 = vadd.f32 %v5631_v3, %v15121_v25  ;;  %v5776_v10 = vmul.f32 %v13184_v39, %v13184_v39 }
 0x725   :  { %v5836_v20 = vadd.f32 %v5835_v0, %v5773_v24  ;;  %v5703_v9 = vadd.f32 %v5702_v47, %v5632_v60  ;;  %v5774_v41 = vmul.f32 %v5632_v60, %v5632_v60 }
 0x727   :  { %v5704_v5 = vadd.f32 %v5703_v9, %v13177_v56  ;;  %v5837_v54 = vadd.f32 %v5836_v20, %v5774_v41 }
 0x729   :  { %v5705_v50 = vadd.f32 %v5704_v5, %v13184_v39  ;;  %v5838_v18 = vadd.f32 %v5837_v54, %v5775_v11  ;;  %v5850_v11 = vld [vmem:[%s14162_s5] sm:$0x1] }
 0x72b   :  { %v5706_v36 = vrot.slane %v5705_v50, 4  ;;  %v5839_v3 = vadd.f32 %v5838_v18, %v5776_v10  ;;  %v15123_v18 = vld [vmem:[#allocation9_spill] sm:$0xff] }
 0x72d   :  { %v5707_v24 = vadd.f32 %v5706_v36, %v5705_v50  ;;  %v5840_v0 = vrot.slane %v5839_v3, 4  ;;  %v5854_v50 = vld [vmem:[%s14163_s6] sm:$0x1] }
 0x72f   :  { %v5708_v55 = vrot.slane %v5707_v24, 2  ;;  %v5841_v31 = vadd.f32 %v5840_v0, %v5839_v3  ;;  %v15126_v3 = vld [vmem:[#allocation16_spill] sm:$0xff] }
 0x731   :  { %v5709_v47 = vadd.f32 %v5708_v55, %v5707_v24  ;;  %v5842_v25 = vrot.slane %v5841_v31, 2 }
 0x733   :  { %v5710_v58 = vrot.slane %v5709_v47, 1  ;;  %v5843_v52 = vadd.f32 %v5842_v25, %v5841_v31 }
 0x735   :  { %v5711_v12 = vadd.f32 %v5710_v58, %v5709_v47  ;;  %v5844_v44 = vrot.slane %v5843_v52, 1  ;;  %v15127_v47 = vld [vmem:[#allocation26_spill] sm:$0xff] }
 0x737   :  { %v5712_v9 = vmul.f32 0.001953125, %v5711_v12  ;;  %v5845_v20 = vadd.f32 %v5844_v44, %v5843_v52 }
 0x739   :  { %v5846_v41 = vmul.f32 0.001953125, %v5845_v20  ;;  %v5847_v56 = vmul.f32 %v5712_v9, %v5712_v9 }
 0x73b   :  { %v5848_v43 = vsub.f32 %v5846_v41, %v5847_v56  ;;  %v15125_v56 = vld [vmem:[#allocation52_spill] sm:$0xff] }
 0x73d   :  { %v5849_v61 = vmax.f32 %v5848_v43, 0.0  ;;  %v15124_v43 = vld [vmem:[#allocation28_spill] sm:$0xff] }
 0x73f   :  { %v5851_v5 = vadd.f32 1e-05, %v5849_v61 }
 0x741   :  { %8029 = vrsqrt.f32 %v5851_v5 }
 0x74e   :  { %v8030_v54 = vpop.eup %8029 }
 0x74f   :  { %v5853_v10 = vmul.f32 %v8030_v54, %v5850_v11 }
 0x751   :  { %v5855_v58 = vmul.f32 %v5853_v10, %v5712_v9  ;;  %v13199_v12 = vrot.slane %v5853_v10, %v15123_v18  ;;  %v15128_v10 = vld [vmem:[#allocation43_spill] sm:$0xff] }
 0x753   :  { %v5856_v44 = vsub.f32 %v5854_v50, %v5855_v58  ;;  %v5924_v52 = vmul.f32 %v13199_v12, %v5632_v60  ;;  %v13204_v61 = vmul.f32 %v13199_v12, %v15124_v43  ;;  %v13208_v36 = vmul.f32 %v13199_v12, %v15125_v56  ;;  %v15129_v50 = vld [vmem:[#allocation30_spill] sm:$0xff]  ;;  %v15130_v58 = vld [vmem:[#allocation69_spill] sm:$0xff]  ;;  %v15134_v56 = vld [vmem:[#allocation68_spill] sm:$0xff] }
 0x754   :  { %v13212_v24 = vmul.f32 %v13199_v12, %v15126_v3  ;;  %v13216_v0 = vmul.f32 %v13199_v12, %v12825_v59  ;;  %v13220_v55 = vmul.f32 %v13199_v12, %v12835_v33  ;;  %v13224_v60 = vmul.f32 %v13199_v12, %v12847_v21 }
 0x755   :  { %v13227_v31 = vrot.slane %v5856_v44, %v15123_v18  ;;  %v13231_v25 = vmul.f32 %v13199_v12, %v15127_v47  ;;  %v13235_v9 = vmul.f32 %v13199_v12, %v12850_v6  ;;  %v13239_v59 = vmul.f32 %v13199_v12, %v12859_v7  ;;  %v15131_v18 = vld [vmem:[#allocation31_spill] sm:$0xff]  ;;  %v15132_v44 = vld [vmem:[#allocation73_spill] sm:$0xff] }
 0x756   :  { %v13243_v33 = vmul.f32 %v13199_v12, %v12871_v30  ;;  %v13247_v21 = vmul.f32 %v13199_v12, %v12865_v53  ;;  %v13251_v20 = vmul.f32 %v13199_v12, %v12874_v48  ;;  %v13255_v6 = vmul.f32 %v13199_v12, %v12883_v63  ;;  %v15135_v47 = vld [vmem:[#allocation53_spill] sm:$0xff] }
 0x757   :  { %v5994_v41 = vadd.f32 %v13227_v31, %v5924_v52  ;;  %v13260_v7 = vmul.f32 %v13199_v12, %v12895_v62  ;;  %v13264_v30 = vmul.f32 %v13199_v12, %v12889_v42  ;;  %v13268_v53 = vmul.f32 %v13199_v12, %v12898_v51  ;;  %v8033_v51 = vld [vmem:[%s14157_s0 + $0x1e8] sm:$0xff]  ;;  %v15133_v52 = vld [vmem:[#allocation29_spill] sm:$0xff] }
 0x758   :  { %v13272_v48 = vmul.f32 %v13199_v12, %v12907_v23  ;;  %v13276_v63 = vmul.f32 %v13199_v12, %v12919_v1  ;;  %v13280_v62 = vmul.f32 %v13199_v12, %v12913_v38  ;;  %v13284_v42 = vmul.f32 %v13199_v12, %v12922_v37 }
 0x759   :  { %v6058_v5 = vadd.f32 %v8033_v51, %v5994_v41  ;;  %v13291_v23 = vmul.f32 %v13199_v12, %v12931_v40  ;;  %v13295_v1 = vmul.f32 %v13199_v12, %v12943_v29  ;;  %v13299_v38 = vmul.f32 %v13199_v12, %v12937_v19  ;;  %v15136_v51 = vld [vmem:[#allocation49_spill] sm:$0xff] }
 0x75a   :  { %v13303_v37 = vmul.f32 %v13199_v12, %v12946_v28  ;;  %v13307_v11 = vmul.f32 %v13199_v12, %v12955_v8  ;;  %v13311_v40 = vmul.f32 %v13199_v12, %v12967_v32  ;;  %v13315_v29 = vmul.f32 %v13199_v12, %v12961_v15 }
 0x75b   :  { %v6122_v54 = vmax.f32 %v6058_v5, 0.0  ;;  %v13319_v19 = vmul.f32 %v13199_v12, %v12970_v27  ;;  %v13323_v28 = vmul.f32 %v13199_v12, %v12979_v46  ;;  %v13327_v8 = vmul.f32 %v13199_v12, %v12991_v49 }
 0x75c   :  { %v13331_v32 = vmul.f32 %v13199_v12, %v12985_v2  ;;  %v13335_v15 = vmul.f32 %v13199_v12, %v12994_v34  ;;  %v13339_v27 = vmul.f32 %v13199_v12, %v13003_v14  ;;  %v13343_v46 = vmul.f32 %v13199_v12, %v13015_v13 }
 0x75d   :  { %6186 = vst [vmem:[#allocation2 + $0x1e8] sm:$0xff] %v6122_v54  ;;  %v13347_v49 = vmul.f32 %v13199_v12, %v13009_v16  ;;  %v13351_v2 = vmul.f32 %v13199_v12, %v13018_v22  ;;  %v13355_v34 = vmul.f32 %v13199_v12, %v13027_v35  ;;  %v13359_v14 = vmul.f32 %v13199_v12, %v13039_v17  ;;  %v15138_v54 = vld [vmem:[#allocation57_spill] sm:$0xff] }
 0x75e   :  { %v13363_v13 = vmul.f32 %v13199_v12, %v13033_v57  ;;  %v13367_v16 = vmul.f32 %v13199_v12, %v13042_v4  ;;  %v13371_v22 = vmul.f32 %v13199_v12, %v13051_v45  ;;  %v13375_v35 = vmul.f32 %v13199_v12, %v13063_v26 }
 0x75f   :  { %v13379_v17 = vmul.f32 %v13199_v12, %v15128_v10  ;;  %v13383_v57 = vmul.f32 %v13199_v12, %v15129_v50  ;;  %v13387_v4 = vmul.f32 %v13199_v12, %v15130_v58  ;;  %v13391_v45 = vmul.f32 %v13199_v12, %v15131_v18  ;;  %v15140_v50 = vld [vmem:[#allocation44_spill] sm:$0xff]  ;;  %v15142_v18 = vld [vmem:[#allocation41_spill] sm:$0xff] }
 0x760   :  { %v13395_v26 = vmul.f32 %v13199_v12, %v15132_v44  ;;  %v13399_v43 = vmul.f32 %v13199_v12, %v15133_v52  ;;  %v13403_v3 = vmul.f32 %v13199_v12, %v15134_v56  ;;  %v13407_v41 = vmul.f32 %v13199_v12, %v15135_v47  ;;  %v15144_v52 = vld [vmem:[#allocation58_spill] sm:$0xff]  ;;  %v15146_v47 = vld [vmem:[#allocation64_spill] sm:$0xff] }
 0x761   :  { %v13411_v5 = vmul.f32 %v13199_v12, %v15136_v51  ;;  %v13415_v10 = vmul.f32 %v13199_v12, %v15138_v54  ;;  %v13419_v58 = vmul.f32 %v13199_v12, %v15140_v50  ;;  %v13423_v44 = vmul.f32 %v13199_v12, %v15142_v18 }
 0x762   :  { %v13427_v56 = vmul.f32 %v13199_v12, %v15144_v52  ;;  %v13431_v51 = vmul.f32 %v13199_v12, %v15146_v47 }
 0x763   :  { %15137 = vst [vmem:[#allocation54_spill] sm:$0xff] %v13411_v5  ;;  %15139 = vst [vmem:[#allocation62_spill] sm:$0xff] %v13415_v10  ;;  %v15148_v5 = vld [vmem:[#allocation46_spill] sm:$0xff]  ;;  %v15149_v10 = vld [vmem:[#allocation51_spill] sm:$0xff] }
 0x764   :  { %15141 = vst [vmem:[#allocation55_spill] sm:$0xff] %v13419_v58  ;;  %15143 = vst [vmem:[#allocation61_spill] sm:$0xff] %v13423_v44  ;;  %v13435_v54 = vmul.f32 %v13199_v12, %v15148_v5  ;;  %v13439_v50 = vmul.f32 %v13199_v12, %v15149_v10  ;;  %v15150_v58 = vld [vmem:[#allocation45_spill] sm:$0xff]  ;;  %v15151_v44 = vld [vmem:[#allocation48_spill] sm:$0xff]  ;;  %v13459_v10 = vmul.f32 %v13199_v12, %v13184_v39 }
 0x765   :  { %15145 = vst [vmem:[#allocation63_spill] sm:$0xff] %v13427_v56  ;;  %15147 = vst [vmem:[#allocation59_spill] sm:$0xff] %v13431_v51  ;;  %v13443_v18 = vmul.f32 %v13199_v12, %v15150_v58  ;;  %v13447_v52 = vmul.f32 %v13199_v12, %v15151_v44  ;;  %v15152_v56 = vld [vmem:[#allocation60_spill] sm:$0xff]  ;;  %v15153_v51 = vld [vmem:[#allocation50_spill] sm:$0xff]  ;;  %v13463_v58 = vadd.f32 %v13227_v31, %v13204_v61 }
 0x766   :  { %v13451_v47 = vmul.f32 %v13199_v12, %v15152_v56  ;;  %v13455_v5 = vmul.f32 %v13199_v12, %v15153_v51  ;;  %v13467_v44 = vadd.f32 %v13227_v31, %v13208_v36  ;;  %v13471_v56 = vadd.f32 %v13227_v31, %v13212_v24 }
 0x767   :  { %v13475_v51 = vadd.f32 %v13227_v31, %v13216_v0  ;;  %v13479_v39 = vadd.f32 %v13227_v31, %v13220_v55  ;;  %v13483_v12 = vadd.f32 %v13227_v31, %v13224_v60  ;;  %v13487_v61 = vadd.f32 %v13227_v31, %v13231_v25 }
 0x768   :  { %v13491_v36 = vadd.f32 %v13227_v31, %v13235_v9  ;;  %v13495_v24 = vadd.f32 %v13227_v31, %v13239_v59  ;;  %v13499_v0 = vadd.f32 %v13227_v31, %v13243_v33  ;;  %v13503_v55 = vadd.f32 %v13227_v31, %v13247_v21 }
 0x769   :  { %v13507_v60 = vadd.f32 %v13227_v31, %v13251_v20  ;;  %v13511_v25 = vadd.f32 %v13227_v31, %v13255_v6  ;;  %v13515_v9 = vadd.f32 %v13227_v31, %v13260_v7  ;;  %v13519_v59 = vadd.f32 %v13227_v31, %v13264_v30 }
 0x76a   :  { %v13523_v33 = vadd.f32 %v13227_v31, %v13268_v53  ;;  %v13527_v21 = vadd.f32 %v13227_v31, %v13272_v48  ;;  %v13531_v20 = vadd.f32 %v13227_v31, %v13276_v63  ;;  %v13535_v6 = vadd.f32 %v13227_v31, %v13280_v62 }
 0x76b   :  { %v13539_v7 = vadd.f32 %v13227_v31, %v13284_v42  ;;  %v13543_v30 = vadd.f32 %v13227_v31, %v13291_v23  ;;  %v13547_v53 = vadd.f32 %v13227_v31, %v13295_v1  ;;  %v13551_v48 = vadd.f32 %v13227_v31, %v13299_v38 }
 0x76c   :  { %v13555_v63 = vadd.f32 %v13227_v31, %v13303_v37  ;;  %v13559_v62 = vadd.f32 %v13227_v31, %v13307_v11  ;;  %v13563_v42 = vadd.f32 %v13227_v31, %v13311_v40  ;;  %v13567_v23 = vadd.f32 %v13227_v31, %v13315_v29 }
 0x76d   :  { %v13571_v1 = vadd.f32 %v13227_v31, %v13319_v19  ;;  %v13575_v38 = vadd.f32 %v13227_v31, %v13323_v28  ;;  %v13579_v37 = vadd.f32 %v13227_v31, %v13327_v8  ;;  %v13583_v11 = vadd.f32 %v13227_v31, %v13331_v32 }
 0x76e   :  { %v13587_v40 = vadd.f32 %v13227_v31, %v13335_v15  ;;  %v13591_v29 = vadd.f32 %v13227_v31, %v13339_v27  ;;  %v13595_v19 = vadd.f32 %v13227_v31, %v13343_v46  ;;  %v13599_v28 = vadd.f32 %v13227_v31, %v13347_v49 }
 0x76f   :  { %v13603_v8 = vadd.f32 %v13227_v31, %v13351_v2  ;;  %v13607_v32 = vadd.f32 %v13227_v31, %v13355_v34  ;;  %v13611_v15 = vadd.f32 %v13227_v31, %v13359_v14  ;;  %v13615_v27 = vadd.f32 %v13227_v31, %v13363_v13 }
 0x770   :  { %v13619_v46 = vadd.f32 %v13227_v31, %v13367_v16  ;;  %v13623_v49 = vadd.f32 %v13227_v31, %v13371_v22  ;;  %v13627_v2 = vadd.f32 %v13227_v31, %v13375_v35  ;;  %v13631_v34 = vadd.f32 %v13227_v31, %v13379_v17 }
 0x771   :  { %v13635_v14 = vadd.f32 %v13227_v31, %v13383_v57  ;;  %v13639_v13 = vadd.f32 %v13227_v31, %v13387_v4  ;;  %v13643_v16 = vadd.f32 %v13227_v31, %v13391_v45  ;;  %v13647_v22 = vadd.f32 %v13227_v31, %v13395_v26  ;;  %v15159_v4 = vld [vmem:[#allocation54_spill] sm:$0xff] }
 0x772   :  { %v13651_v35 = vadd.f32 %v13227_v31, %v13399_v43  ;;  %v13655_v17 = vadd.f32 %v13227_v31, %v13403_v3  ;;  %v13659_v57 = vadd.f32 %v13227_v31, %v13407_v41  ;;  %v13663_v45 = vadd.f32 %v13227_v31, %v15159_v4 }
 0x773   :  { %15154 = vst [vmem:[#allocation67_spill] sm:$0xff] %v13643_v16  ;;  %15155 = vst [vmem:[#allocation75_spill] sm:$0xff] %v13647_v22  ;;  %v15160_v16 = vld [vmem:[#allocation62_spill] sm:$0xff]  ;;  %v15161_v22 = vld [vmem:[#allocation55_spill] sm:$0xff] }
 0x774   :  { %15156 = vst [vmem:[#allocation76_spill] sm:$0xff] %v13651_v35  ;;  %15157 = vst [vmem:[#allocation77_spill] sm:$0xff] %v13655_v17  ;;  %v13667_v26 = vadd.f32 %v13227_v31, %v15160_v16  ;;  %v13671_v43 = vadd.f32 %v13227_v31, %v15161_v22  ;;  %v15162_v35 = vld [vmem:[#allocation61_spill] sm:$0xff]  ;;  %v15163_v17 = vld [vmem:[#allocation63_spill] sm:$0xff]  ;;  %v13687_v16 = vadd.f32 %v13227_v31, %v13435_v54 }
 0x775   :  { %15158 = vst [vmem:[#allocation78_spill] sm:$0xff] %v13659_v57  ;;  %v13675_v3 = vadd.f32 %v13227_v31, %v15162_v35  ;;  %v13679_v41 = vadd.f32 %v13227_v31, %v15163_v17  ;;  %v15164_v57 = vld [vmem:[#allocation59_spill] sm:$0xff]  ;;  %v13691_v22 = vadd.f32 %v13227_v31, %v13439_v50  ;;  %v13695_v35 = vadd.f32 %v13227_v31, %v13443_v18  ;;  %v8034_v18 = vld [vmem:[%s14157_s0] sm:$0xff] }
 0x776   :  { %v13683_v4 = vadd.f32 %v13227_v31, %v15164_v57  ;;  %v13699_v17 = vadd.f32 %v13227_v31, %v13447_v52  ;;  %v13703_v57 = vadd.f32 %v13227_v31, %v13451_v47  ;;  %v13707_v54 = vadd.f32 %v13227_v31, %v13455_v5  ;;  %v8035_v52 = vld [vmem:[%s14157_s0 + $0x8] sm:$0xff]  ;;  %v8036_v5 = vld [vmem:[%s14157_s0 + $0x10] sm:$0xff] }
 0x777   :  { %15165 = vst [vmem:[#allocation33_spill] sm:$0xff] %v13695_v35  ;;  %v13711_v50 = vadd.f32 %v13227_v31, %v13459_v10  ;;  %v13717_v35 = vadd.f32 %v8034_v18, %v13463_v58  ;;  %v13723_v47 = vadd.f32 %v8035_v52, %v13467_v44  ;;  %v13729_v31 = vadd.f32 %v8036_v5, %v13471_v56  ;;  %v8037_v10 = vld [vmem:[%s14157_s0 + $0x18] sm:$0xff]  ;;  %v8038_v18 = vld [vmem:[%s14157_s0 + $0x20] sm:$0xff]  ;;  %v8039_v52 = vld [vmem:[%s14157_s0 + $0x28] sm:$0xff] }
 0x778   :  { %v13735_v58 = vadd.f32 %v8037_v10, %v13475_v51  ;;  %v13741_v44 = vadd.f32 %v8038_v18, %v13479_v39  ;;  %v13747_v56 = vadd.f32 %v8039_v52, %v13483_v12  ;;  %v8040_v5 = vld [vmem:[%s14157_s0 + $0x30] sm:$0xff]  ;;  %v8041_v10 = vld [vmem:[%s14157_s0 + $0x38] sm:$0xff]  ;;  %v8042_v18 = vld [vmem:[%s14157_s0 + $0x40] sm:$0xff] }
 0x779   :  { %v13753_v51 = vadd.f32 %v8040_v5, %v13487_v61  ;;  %v13759_v39 = vadd.f32 %v8041_v10, %v13491_v36  ;;  %v13765_v12 = vadd.f32 %v8042_v18, %v13495_v24  ;;  %v8043_v52 = vld [vmem:[%s14157_s0 + $0x48] sm:$0xff]  ;;  %v8044_v5 = vld [vmem:[%s14157_s0 + $0x50] sm:$0xff]  ;;  %v8045_v10 = vld [vmem:[%s14157_s0 + $0x58] sm:$0xff] }
 0x77a   :  { %v13771_v61 = vadd.f32 %v8043_v52, %v13499_v0  ;;  %v13777_v36 = vadd.f32 %v8044_v5, %v13503_v55  ;;  %v13783_v24 = vadd.f32 %v8045_v10, %v13507_v60  ;;  %v8046_v18 = vld [vmem:[%s14157_s0 + $0x60] sm:$0xff]  ;;  %v8047_v52 = vld [vmem:[%s14157_s0 + $0x68] sm:$0xff]  ;;  %v8048_v5 = vld [vmem:[%s14157_s0 + $0x70] sm:$0xff] }
 0x77b   :  { %v13789_v0 = vadd.f32 %v8046_v18, %v13511_v25  ;;  %v13795_v55 = vadd.f32 %v8047_v52, %v13515_v9  ;;  %v13801_v60 = vadd.f32 %v8048_v5, %v13519_v59  ;;  %v8049_v10 = vld [vmem:[%s14157_s0 + $0x78] sm:$0xff]  ;;  %v8050_v18 = vld [vmem:[%s14157_s0 + $0x80] sm:$0xff]  ;;  %v8051_v52 = vld [vmem:[%s14157_s0 + $0x88] sm:$0xff] }
 0x77c   :  { %v13807_v25 = vadd.f32 %v8049_v10, %v13523_v33  ;;  %v13813_v9 = vadd.f32 %v8050_v18, %v13527_v21  ;;  %v13819_v59 = vadd.f32 %v8051_v52, %v13531_v20  ;;  %v8052_v5 = vld [vmem:[%s14157_s0 + $0x90] sm:$0xff]  ;;  %v8053_v10 = vld [vmem:[%s14157_s0 + $0x98] sm:$0xff]  ;;  %v8054_v18 = vld [vmem:[%s14157_s0 + $0xa0] sm:$0xff] }
 0x77d   :  { %v13825_v33 = vadd.f32 %v8052_v5, %v13535_v6  ;;  %v13831_v21 = vadd.f32 %v8053_v10, %v13539_v7  ;;  %v13837_v20 = vadd.f32 %v8054_v18, %v13543_v30  ;;  %v8055_v52 = vld [vmem:[%s14157_s0 + $0xa8] sm:$0xff]  ;;  %v8056_v5 = vld [vmem:[%s14157_s0 + $0xb0] sm:$0xff]  ;;  %v8057_v10 = vld [vmem:[%s14157_s0 + $0xb8] sm:$0xff] }
 0x77e   :  { %v13843_v6 = vadd.f32 %v8055_v52, %v13547_v53  ;;  %v13849_v7 = vadd.f32 %v8056_v5, %v13551_v48  ;;  %v13855_v30 = vadd.f32 %v8057_v10, %v13555_v63  ;;  %v8058_v18 = vld [vmem:[%s14157_s0 + $0xc0] sm:$0xff]  ;;  %v8059_v52 = vld [vmem:[%s14157_s0 + $0xc8] sm:$0xff]  ;;  %v8060_v5 = vld [vmem:[%s14157_s0 + $0xd0] sm:$0xff] }
 0x77f   :  { %v13861_v53 = vadd.f32 %v8058_v18, %v13559_v62  ;;  %v13867_v48 = vadd.f32 %v8059_v52, %v13563_v42  ;;  %v13873_v63 = vadd.f32 %v8060_v5, %v13567_v23  ;;  %v8061_v10 = vld [vmem:[%s14157_s0 + $0xd8] sm:$0xff]  ;;  %v8062_v18 = vld [vmem:[%s14157_s0 + $0xe0] sm:$0xff]  ;;  %v8063_v52 = vld [vmem:[%s14157_s0 + $0xe8] sm:$0xff] }
 0x780   :  { %v13879_v62 = vadd.f32 %v8061_v10, %v13571_v1  ;;  %v13885_v42 = vadd.f32 %v8062_v18, %v13575_v38  ;;  %v13891_v23 = vadd.f32 %v8063_v52, %v13579_v37  ;;  %v8064_v5 = vld [vmem:[%s14157_s0 + $0xf0] sm:$0xff]  ;;  %v8065_v10 = vld [vmem:[%s14157_s0 + $0xf8] sm:$0xff]  ;;  %v8066_v18 = vld [vmem:[%s14157_s0 + $0x100] sm:$0xff] }
 0x781   :  { %v13897_v1 = vadd.f32 %v8064_v5, %v13583_v11  ;;  %v13903_v38 = vadd.f32 %v8065_v10, %v13587_v40  ;;  %v13909_v37 = vadd.f32 %v8066_v18, %v13591_v29  ;;  %v8067_v52 = vld [vmem:[%s14157_s0 + $0x108] sm:$0xff]  ;;  %v8068_v5 = vld [vmem:[%s14157_s0 + $0x110] sm:$0xff]  ;;  %v8069_v10 = vld [vmem:[%s14157_s0 + $0x118] sm:$0xff] }
 0x782   :  { %v13915_v11 = vadd.f32 %v8067_v52, %v13595_v19  ;;  %v13921_v40 = vadd.f32 %v8068_v5, %v13599_v28  ;;  %v13927_v29 = vadd.f32 %v8069_v10, %v13603_v8  ;;  %v8070_v18 = vld [vmem:[%s14157_s0 + $0x120] sm:$0xff]  ;;  %v8071_v52 = vld [vmem:[%s14157_s0 + $0x128] sm:$0xff]  ;;  %v8072_v5 = vld [vmem:[%s14157_s0 + $0x130] sm:$0xff] }
 0x783   :  { %v13933_v19 = vadd.f32 %v8070_v18, %v13607_v32  ;;  %v13939_v28 = vadd.f32 %v8071_v52, %v13611_v15  ;;  %v13945_v8 = vadd.f32 %v8072_v5, %v13615_v27  ;;  %v8073_v10 = vld [vmem:[%s14157_s0 + $0x138] sm:$0xff]  ;;  %v8074_v18 = vld [vmem:[%s14157_s0 + $0x140] sm:$0xff]  ;;  %v8075_v52 = vld [vmem:[%s14157_s0 + $0x148] sm:$0xff] }
 0x784   :  { %v13951_v32 = vadd.f32 %v8073_v10, %v13619_v46  ;;  %v13957_v15 = vadd.f32 %v8074_v18, %v13623_v49  ;;  %v13963_v27 = vadd.f32 %v8075_v52, %v13627_v2  ;;  %v8076_v5 = vld [vmem:[%s14157_s0 + $0x150] sm:$0xff]  ;;  %v8077_v10 = vld [vmem:[%s14157_s0 + $0x158] sm:$0xff]  ;;  %v8078_v18 = vld [vmem:[%s14157_s0 + $0x160] sm:$0xff] }
 0x785   :  { %v13969_v46 = vadd.f32 %v8076_v5, %v13631_v34  ;;  %v13975_v49 = vadd.f32 %v8077_v10, %v13635_v14  ;;  %v13981_v2 = vadd.f32 %v8078_v18, %v13639_v13  ;;  %v8079_v52 = vld [vmem:[%s14157_s0 + $0x168] sm:$0xff]  ;;  %v15169_v34 = vld [vmem:[#allocation67_spill] sm:$0xff]  ;;  %v15173_v13 = vld [vmem:[#allocation76_spill] sm:$0xff] }
 0x786   :  { %v13987_v5 = vadd.f32 %v8079_v52, %v15169_v34  ;;  %v15171_v14 = vld [vmem:[#allocation75_spill] sm:$0xff]  ;;  %v15174_v52 = vld [vmem:[#allocation77_spill] sm:$0xff] }
 0x787   :  { %15166 = vst [vmem:[#allocation70_spill] sm:$0xff] %v13969_v46  ;;  %15167 = vst [vmem:[#allocation7_spill] sm:$0xff] %v13975_v49  ;;  %v8080_v46 = vld [vmem:[%s14157_s0 + $0x170] sm:$0xff]  ;;  %v8081_v49 = vld [vmem:[%s14157_s0 + $0x178] sm:$0xff] }
 0x788   :  { %15168 = vst [vmem:[#allocation71_spill] sm:$0xff] %v13981_v2  ;;  %15170 = vst [vmem:[#allocation36_spill] sm:$0xff] %v13987_v5  ;;  %v13993_v10 = vadd.f32 %v8080_v46, %v15171_v14  ;;  %v13999_v18 = vadd.f32 %v8081_v49, %v15173_v13  ;;  %v8082_v2 = vld [vmem:[%s14157_s0 + $0x180] sm:$0xff]  ;;  %v8083_v5 = vld [vmem:[%s14157_s0 + $0x188] sm:$0xff] }
 0x789   :  { %v14005_v34 = vadd.f32 %v8082_v2, %v15174_v52  ;;  %v15175_v46 = vld [vmem:[#allocation78_spill] sm:$0xff]  ;;  %v8085_v13 = vld [vmem:[%s14157_s0 + $0x198] sm:$0xff]  ;;  %v8086_v52 = vld [vmem:[%s14157_s0 + $0x1a0] sm:$0xff] }
 0x78a   :  { %15172 = vst [vmem:[#allocation47_spill] sm:$0xff] %v13993_v10  ;;  %v14011_v14 = vadd.f32 %v8083_v5, %v15175_v46  ;;  %v8084_v10 = vld [vmem:[%s14157_s0 + $0x190] sm:$0xff]  ;;  %v14023_v2 = vadd.f32 %v8085_v13, %v13667_v26  ;;  %v14029_v5 = vadd.f32 %v8086_v52, %v13671_v43  ;;  %v8087_v46 = vld [vmem:[%s14157_s0 + $0x1a8] sm:$0xff]  ;;  %v8089_v13 = vld [vmem:[%s14157_s0 + $0x1b8] sm:$0xff] }
 0x78b   :  { %v14017_v49 = vadd.f32 %v8084_v10, %v13663_v45  ;;  %v14035_v45 = vadd.f32 %v8087_v46, %v13675_v3  ;;  %v8088_v10 = vld [vmem:[%s14157_s0 + $0x1b0] sm:$0xff]  ;;  %v14047_v43 = vadd.f32 %v8089_v13, %v13683_v4  ;;  %v8090_v52 = vld [vmem:[%s14157_s0 + $0x1c0] sm:$0xff]  ;;  %v8091_v46 = vld [vmem:[%s14157_s0 + $0x1c8] sm:$0xff] }
 0x78c   :  { %v14041_v26 = vadd.f32 %v8088_v10, %v13679_v41  ;;  %v14053_v3 = vadd.f32 %v8090_v52, %v13687_v16  ;;  %v14059_v41 = vadd.f32 %v8091_v46, %v13691_v22  ;;  %v8092_v10 = vld [vmem:[%s14157_s0 + $0x1d0] sm:$0xff]  ;;  %v15177_v4 = vld [vmem:[#allocation33_spill] sm:$0xff] }
 0x78d   :  { %15176 = vst [vmem:[#allocation38_spill] sm:$0xff] %v14047_v43  ;;  %v14065_v13 = vadd.f32 %v8092_v10, %v15177_v4  ;;  %v8093_v43 = vld [vmem:[%s14157_s0 + $0x1d8] sm:$0xff]  ;;  %v8094_v52 = vld [vmem:[%s14157_s0 + $0x1e0] sm:$0xff]  ;;  %v8095_v46 = vld [vmem:[%s14157_s0 + $0x1f0] sm:$0xff] }
 0x78e   :  { %v14071_v16 = vadd.f32 %v8093_v43, %v13699_v17  ;;  %v14077_v22 = vadd.f32 %v8094_v52, %v13703_v57  ;;  %v14083_v10 = vadd.f32 %v8095_v46, %v13707_v54  ;;  %v8096_v4 = vld [vmem:[%s14157_s0 + $0x1f8] sm:$0xff]  ;;  %v6061_v43 = vmax.f32 %v13717_v35, 0.0  ;;  %s8122_s0 = smov [#allocation2]  }
 0x78f   :  { %15178 = vst [vmem:[#allocation42_spill] sm:$0xff] %v14065_v13  ;;  %v14089_v17 = vadd.f32 %v8096_v4, %v13711_v50  ;;  %v6063_v57 = vmax.f32 %v13729_v31, 0.0  ;;  %v6064_v52 = vmax.f32 %v13735_v58, 0.0  ;;  %v6066_v54 = vmax.f32 %v13747_v56, 0.0  ;;  %s6194_s9 = sshll.u32 %s8122_s0, 4  ;;  %s6195_s9 = int_to_ptr.vmem [resolvable:$true] %s6194_s9 }
 0x790   :  { %15179 = vst [vmem:[#allocation13_spill] sm:$0xff] %v14071_v16  ;;  %15180 = vst [vmem:[#allocation56_spill] sm:$0xff] %v14077_v22  ;;  %v6062_v16 = vmax.f32 %v13723_v47, 0.0  ;;  %v6065_v22 = vmax.f32 %v13741_v44, 0.0  ;;  %v6067_v46 = vmax.f32 %v13753_v51, 0.0  ;;  %v6069_v13 = vmax.f32 %v13765_v12, 0.0  ;;  %p8102_p1 = scmp.lt.s32.totalorder %s6195_s9, %s6195_s9 }
 0x791   :  { %15181 = vst [vmem:[#allocation72_spill] sm:$0xff] %v14083_v10  ;;  %v6068_v10 = vmax.f32 %v13759_v39, 0.0  ;;  %6125 = vst [vmem:[#allocation2] sm:$0xff] %v6061_v43  ;;  %v6070_v50 = vmax.f32 %v13771_v61, 0.0  ;;  %v6071_v35 = vmax.f32 %v13777_v36, 0.0  ;;  %v6072_v47 = vmax.f32 %v13783_v24, 0.0 }
 0x792   :  { %v6073_v31 = vmax.f32 %v13789_v0, 0.0  ;;  %6126 = vst [vmem:[#allocation2 + $0x8] sm:$0xff] %v6062_v16  ;;  %6127 = vst [vmem:[#allocation2 + $0x10] sm:$0xff] %v6063_v57  ;;  %v6074_v58 = vmax.f32 %v13795_v55, 0.0  ;;  %v6075_v44 = vmax.f32 %v13801_v60, 0.0  ;;  %v6076_v56 = vmax.f32 %v13807_v25, 0.0 }
 0x793   :  { %6128 = vst [vmem:[#allocation2 + $0x18] sm:$0xff] %v6064_v52  ;;  %6129 = vst [vmem:[#allocation2 + $0x20] sm:$0xff] %v6065_v22  ;;  %v6077_v51 = vmax.f32 %v13813_v9, 0.0  ;;  %v6078_v39 = vmax.f32 %v13819_v59, 0.0  ;;  %v6079_v12 = vmax.f32 %v13825_v33, 0.0  ;;  %v6080_v61 = vmax.f32 %v13831_v21, 0.0 }
 0x794   :  { %6130 = vst [vmem:[#allocation2 + $0x28] sm:$0xff] %v6066_v54  ;;  %6131 = vst [vmem:[#allocation2 + $0x30] sm:$0xff] %v6067_v46  ;;  %v6081_v36 = vmax.f32 %v13837_v20, 0.0  ;;  %v6082_v24 = vmax.f32 %v13843_v6, 0.0  ;;  %v6083_v0 = vmax.f32 %v13849_v7, 0.0  ;;  %v6084_v55 = vmax.f32 %v13855_v30, 0.0 }
 0x795   :  { %6132 = vst [vmem:[#allocation2 + $0x38] sm:$0xff] %v6068_v10  ;;  %6133 = vst [vmem:[#allocation2 + $0x40] sm:$0xff] %v6069_v13  ;;  %v6085_v60 = vmax.f32 %v13861_v53, 0.0  ;;  %v6086_v25 = vmax.f32 %v13867_v48, 0.0  ;;  %v6087_v9 = vmax.f32 %v13873_v63, 0.0  ;;  %v6088_v59 = vmax.f32 %v13879_v62, 0.0 }
 0x796   :  { %6134 = vst [vmem:[#allocation2 + $0x48] sm:$0xff] %v6070_v50  ;;  %6135 = vst [vmem:[#allocation2 + $0x50] sm:$0xff] %v6071_v35  ;;  %v6089_v33 = vmax.f32 %v13885_v42, 0.0  ;;  %v6090_v21 = vmax.f32 %v13891_v23, 0.0  ;;  %v6091_v20 = vmax.f32 %v13897_v1, 0.0  ;;  %v6092_v6 = vmax.f32 %v13903_v38, 0.0 }
 0x797   :  { %6136 = vst [vmem:[#allocation2 + $0x58] sm:$0xff] %v6072_v47  ;;  %6137 = vst [vmem:[#allocation2 + $0x60] sm:$0xff] %v6073_v31  ;;  %v6093_v7 = vmax.f32 %v13909_v37, 0.0  ;;  %v6094_v30 = vmax.f32 %v13915_v11, 0.0  ;;  %v6095_v53 = vmax.f32 %v13921_v40, 0.0  ;;  %v6096_v48 = vmax.f32 %v13927_v29, 0.0 }
 0x798   :  { %6138 = vst [vmem:[#allocation2 + $0x68] sm:$0xff] %v6074_v58  ;;  %6139 = vst [vmem:[#allocation2 + $0x70] sm:$0xff] %v6075_v44  ;;  %v6097_v63 = vmax.f32 %v13933_v19, 0.0  ;;  %v6098_v62 = vmax.f32 %v13939_v28, 0.0  ;;  %v6099_v42 = vmax.f32 %v13945_v8, 0.0  ;;  %v6100_v23 = vmax.f32 %v13951_v32, 0.0 }
 0x799   :  { %6140 = vst [vmem:[#allocation2 + $0x78] sm:$0xff] %v6076_v56  ;;  %6141 = vst [vmem:[#allocation2 + $0x80] sm:$0xff] %v6077_v51  ;;  %v6101_v1 = vmax.f32 %v13957_v15, 0.0  ;;  %v6102_v38 = vmax.f32 %v13963_v27, 0.0  ;;  %v15182_v37 = vld [vmem:[#allocation70_spill] sm:$0xff]  ;;  %v15183_v40 = vld [vmem:[#allocation7_spill] sm:$0xff] }
 0x79a   :  { %6142 = vst [vmem:[#allocation2 + $0x88] sm:$0xff] %v6078_v39  ;;  %6143 = vst [vmem:[#allocation2 + $0x90] sm:$0xff] %v6079_v12  ;;  %v6103_v11 = vmax.f32 %v15182_v37, 0.0  ;;  %v6104_v29 = vmax.f32 %v15183_v40, 0.0  ;;  %v15184_v19 = vld [vmem:[#allocation71_spill] sm:$0xff]  ;;  %v15185_v28 = vld [vmem:[#allocation36_spill] sm:$0xff] }
 0x79b   :  { %6144 = vst [vmem:[#allocation2 + $0x98] sm:$0xff] %v6080_v61  ;;  %6145 = vst [vmem:[#allocation2 + $0xa0] sm:$0xff] %v6081_v36  ;;  %v6105_v13 = vmax.f32 %v15184_v19, 0.0  ;;  %v6106_v8 = vmax.f32 %v15185_v28, 0.0  ;;  %v15186_v32 = vld [vmem:[#allocation47_spill] sm:$0xff]  ;;  %v6108_v16 = vmax.f32 %v13999_v18, 0.0 }
 0x79c   :  { %6146 = vst [vmem:[#allocation2 + $0xa8] sm:$0xff] %v6082_v24  ;;  %6147 = vst [vmem:[#allocation2 + $0xb0] sm:$0xff] %v6083_v0  ;;  %v6107_v15 = vmax.f32 %v15186_v32, 0.0  ;;  %v6109_v22 = vmax.f32 %v14005_v34, 0.0  ;;  %v6110_v27 = vmax.f32 %v14011_v14, 0.0  ;;  %v6111_v10 = vmax.f32 %v14017_v49, 0.0 }
 0x79d   :  { %6148 = vst [vmem:[#allocation2 + $0xb8] sm:$0xff] %v6084_v55  ;;  %6149 = vst [vmem:[#allocation2 + $0xc0] sm:$0xff] %v6085_v60  ;;  %v6112_v4 = vmax.f32 %v14023_v2, 0.0  ;;  %v6113_v43 = vmax.f32 %v14029_v5, 0.0  ;;  %v6114_v18 = vmax.f32 %v14035_v45, 0.0  ;;  %v6115_v34 = vmax.f32 %v14041_v26, 0.0 }
 0x79e   :  { %6150 = vst [vmem:[#allocation2 + $0xc8] sm:$0xff] %v6086_v25  ;;  %6151 = vst [vmem:[#allocation2 + $0xd0] sm:$0xff] %v6087_v9  ;;  %v15187_v57 = vld [vmem:[#allocation38_spill] sm:$0xff]  ;;  %v6117_v54 = vmax.f32 %v14053_v3, 0.0  ;;  %v6118_v14 = vmax.f32 %v14059_v41, 0.0  ;;  %v15189_v5 = vld [vmem:[#allocation13_spill] sm:$0xff] }
 0x79f   :  { %6152 = vst [vmem:[#allocation2 + $0xd8] sm:$0xff] %v6088_v59  ;;  %6153 = vst [vmem:[#allocation2 + $0xe0] sm:$0xff] %v6089_v33  ;;  %v6116_v52 = vmax.f32 %v15187_v57, 0.0  ;;  %v15188_v49 = vld [vmem:[#allocation42_spill] sm:$0xff]  ;;  %v6120_v46 = vmax.f32 %v15189_v5, 0.0  ;;  %v15190_v50 = vld [vmem:[#allocation56_spill] sm:$0xff] }
 0x7a0   :  { %6154 = vst [vmem:[#allocation2 + $0xe8] sm:$0xff] %v6090_v21  ;;  %6155 = vst [vmem:[#allocation2 + $0xf0] sm:$0xff] %v6091_v20  ;;  %v6119_v2 = vmax.f32 %v15188_v49, 0.0  ;;  %v6121_v35 = vmax.f32 %v15190_v50, 0.0  ;;  %v15191_v45 = vld [vmem:[#allocation72_spill] sm:$0xff]  ;;  %v6124_v3 = vmax.f32 %v14089_v17, 0.0 }
 0x7a1   :  { %6156 = vst [vmem:[#allocation2 + $0xf8] sm:$0xff] %v6092_v6  ;;  %6157 = vst [vmem:[#allocation2 + $0x100] sm:$0xff] %v6093_v7  ;;  %v6123_v26 = vmax.f32 %v15191_v45, 0.0  ;;  %s8097_s10 = scalar_lea.vmem %s6195_s9, 8192 }
 0x7a2   :  { %6158 = vst [vmem:[#allocation2 + $0x108] sm:$0xff] %v6094_v30  ;;  %6159 = vst [vmem:[#allocation2 + $0x110] sm:$0xff] %v6095_v53  ;;  %p8098_p0 = scmp.ne.s32.totalorder %s6195_s9, %s8097_s10  ;;  %p8103_p2 = scmp.lt.s32.totalorder %s8097_s10, %s8097_s10 }
 0x7a3   :  { %6160 = vst [vmem:[#allocation2 + $0x118] sm:$0xff] %v6096_v48  ;;  %6161 = vst [vmem:[#allocation2 + $0x120] sm:$0xff] %v6097_v63 }
 0x7a4   :  { %6162 = vst [vmem:[#allocation2 + $0x128] sm:$0xff] %v6098_v62  ;;  %6163 = vst [vmem:[#allocation2 + $0x130] sm:$0xff] %v6099_v42  ;;  %p8104_p3 = por %p8103_p2, %p8102_p1 }
 0x7a5   :  { %6164 = vst [vmem:[#allocation2 + $0x138] sm:$0xff] %v6100_v23  ;;  %6165 = vst [vmem:[#allocation2 + $0x140] sm:$0xff] %v6101_v1 }
 0x7a6   :  { %6166 = vst [vmem:[#allocation2 + $0x148] sm:$0xff] %v6102_v38  ;;  %6167 = vst [vmem:[#allocation2 + $0x150] sm:$0xff] %v6103_v11  ;;  %p8105_p4 = pnand %p8104_p3, %p8098_p0 }
 0x7a7   :  { %6168 = vst [vmem:[#allocation2 + $0x158] sm:$0xff] %v6104_v29  ;;  %6169 = vst [vmem:[#allocation2 + $0x160] sm:$0xff] %v6105_v13 }
 0x7a8   :  { %6170 = vst [vmem:[#allocation2 + $0x168] sm:$0xff] %v6106_v8  ;;  %6171 = vst [vmem:[#allocation2 + $0x170] sm:$0xff] %v6107_v15 }
 0x7a9   :  { %6172 = vst [vmem:[#allocation2 + $0x178] sm:$0xff] %v6108_v16  ;;  %6173 = vst [vmem:[#allocation2 + $0x180] sm:$0xff] %v6109_v22 }
 0x7aa   :  { %6174 = vst [vmem:[#allocation2 + $0x188] sm:$0xff] %v6110_v27  ;;  %6175 = vst [vmem:[#allocation2 + $0x190] sm:$0xff] %v6111_v10 }
 0x7ab   :  { %6176 = vst [vmem:[#allocation2 + $0x198] sm:$0xff] %v6112_v4  ;;  %6177 = vst [vmem:[#allocation2 + $0x1a0] sm:$0xff] %v6113_v43 }
 0x7ac   :  { %6178 = vst [vmem:[#allocation2 + $0x1a8] sm:$0xff] %v6114_v18  ;;  %6179 = vst [vmem:[#allocation2 + $0x1b0] sm:$0xff] %v6115_v34 }
 0x7ad   :  { %6180 = vst [vmem:[#allocation2 + $0x1b8] sm:$0xff] %v6116_v52  ;;  %6181 = vst [vmem:[#allocation2 + $0x1c0] sm:$0xff] %v6117_v54 }
 0x7ae   :  { %6182 = vst [vmem:[#allocation2 + $0x1c8] sm:$0xff] %v6118_v14  ;;  %6183 = vst [vmem:[#allocation2 + $0x1d0] sm:$0xff] %v6119_v2 }
 0x7af   :  { %6184 = vst [vmem:[#allocation2 + $0x1d8] sm:$0xff] %v6120_v46  ;;  %6185 = vst [vmem:[#allocation2 + $0x1e0] sm:$0xff] %v6121_v35 }
 0x7b0   :  { %6187 = vst [vmem:[#allocation2 + $0x1f0] sm:$0xff] %v6123_v26  ;;  %6188 = vst [vmem:[#allocation2 + $0x1f8] sm:$0xff] %v6124_v3 }
 0x7b1   :  { %8108 = shalt.err (!%p8105_p4)
}
 0x7b2   :  { %s8123_s11 = smov 128   ;;  %s8124_s12 = smov 8  }
 0x7b3   :  { %6200 = dma.vmem_to_hbm [thread:$0]  %s6195_s9, 8192, %s14164_s7, [#allocation3], %s8123_s11, %s8123_s11, %s8124_s12  }
 0x7b4   :  { %8117 = dma.done.wait [#allocation3], 8192  }
 0x7b5   :  { %8118 = vsyncadd [#allocation3], 4294959104 }
 0x7b6   :  { %6204 = vsyncpa [#allocation3], 1 }

</bundles_post_ra>
